<compile_context>
chip_gen: v6e
topology: v6e:2x2x1
jax: 0.10.0
libtpu: 0.0.40
codegen_flags: <defaults>
</compile_context>

<pallas_src>
import functools

import jax
import jax.numpy as jnp
from jax.experimental import pallas as pl
from jax.experimental.pallas import tpu as pltpu


# ---------------------------------------------------------------------------
# Problem sizes (small, consistent with the module's constructor semantics):
#   num_classes=10, Prim_out_channels=8, PrimaryCaps_n_pix=16
#   -> N = Prim_out_channels * PrimaryCaps_n_pix = 128 primary capsules
#   Classifier_in_channels=8 (D_in), Classifier_out_channels=16 (D_out)
# ---------------------------------------------------------------------------
NUM_CLASSES = 10
N_CAPS = 8 * 16          # Prim_out_channels * PrimaryCaps_n_pix = 128
D_IN = 8                 # Classifier_in_channels
D_OUT = 16               # Classifier_out_channels
BATCH = 2
ROUTING_ITERS = 3


def _tree_sum(terms):
    """Pairwise (tree) add: halves the serial FMA/add chain depth."""
    while len(terms) > 1:
        nxt = [terms[i] + terms[i + 1] for i in range(0, len(terms) - 1, 2)]
        if len(terms) % 2:
            nxt.append(terms[-1])
        terms = nxt
    return terms[0]


def classifier_caps_kernel(x_ref, w_ref, out_ref, u_hat_ref, *, batch,
                           classes_per_step, d_in, routing_iterations):
    """One grid step handles `classes_per_step` classes.

    x_ref    : (B, D_in, N)                         x (lane-dense), fully resident
    w_ref    : (classes_per_step, D_in, D_out, N)   W slice (pre-transposed)
    out_ref  : (1, classes_per_step*B, D_out)       v_j, lane-major final layout
    u_hat_ref: VMEM scratch (classes_per_step*B, D_out, N)
    """
    n = x_ref.shape[-1]
    d_out = w_ref.shape[2]
    cb = classes_per_step * batch

    # ---- Phase 1: u_hat[c*B+b, e, :] = sum_d x[b, d, :] * W[c, d, e, :] ------
    # Batch-outer so each sublane broadcast of an x row is built once per (b, d)
    # and reused by every class (JAX does not CSE broadcast_in_dim).
    for b in range(batch):                                   # static unroll (B=2)
        xb = x_ref[b]                                        # (D_in, N), one vreg
        xb_bcast = [jnp.broadcast_to(xb[d:d + 1, :], (d_out, n))
                    for d in range(d_in)]                    # D_in sublane bcasts
        for c in range(classes_per_step):                    # static unroll
            terms = [xb_bcast[d] * w_ref[c, d] for d in range(d_in)]
            u_hat_ref[c * batch + b] = _tree_sum(terms)      # (D_out, N) tile

    # ---- Phase 2: dynamic routing, vectorized over all (class, batch) -------
    # b_ij is mathematically constant along D_out (its update a_ij is broadcast
    # over D_out), so it is kept as a single (CB, 1, N) tile.  All softmaxes and
    # reductions run once per iteration on wide tiles.
    def squash(s, axis):
        sq = jnp.sum(s * s, axis=axis, keepdims=True)
        # NaN-free rewrite of (sq/(1+sq)) * s / sqrt(sq); identical for sq > 0.
        return s * (jnp.sqrt(sq) / (1.0 + sq))

    inv_n = 1.0 / float(n)

    # Peeled iteration 0: b_ij == 0  =>  softmax is exactly uniform (c_ij = 1/N).
    if routing_iterations == 1:
        v2 = squash(jnp.sum(u_hat_ref[...], axis=-1) * inv_n, axis=-1)
    else:
        v3 = squash(jnp.sum(u_hat_ref[...], axis=-1, keepdims=True) * inv_n,
                    axis=1)                                        # (CB, D_out, 1)
        b_ij = jnp.zeros((cb, 1, n), jnp.float32)
        v2 = None
        for it in range(1, routing_iterations):                    # static unroll
            # agreement update from the previous iteration (sublane reduce)
            a_ij = jnp.sum(u_hat_ref[...] * v3, axis=1, keepdims=True)  # (CB,1,N)
            b_ij = b_ij + a_ij
            # softmax over the capsule axis N (exact math; op count is tiny)
            m = jnp.max(b_ij, axis=-1, keepdims=True)
            e = jnp.exp(b_ij - m)
            c_ij = e / jnp.sum(e, axis=-1, keepdims=True)               # (CB,1,N)
            if it < routing_iterations - 1:
                s3 = jnp.sum(c_ij * u_hat_ref[...], axis=-1, keepdims=True)
                v3 = squash(s3, axis=1)                            # (CB, D_out, 1)
            else:
                # Last iteration: produce v lane-major (D_out on lanes) so the
                # store below is a single dense write in the final layout.
                s2 = jnp.sum(c_ij * u_hat_ref[...], axis=-1)       # (CB, D_out)
                v2 = squash(s2, axis=-1)

    # ---- Phase 3: one lane-major store in the final (C, B, D_out) order ------
    out_ref[0, :, :] = v2


def prepare_classifier_caps_weights(W):
    """One-time weight re-layout: (C, N, D_in, D_out) -> (C, D_in, D_out, N).

    Do this at parameter init / checkpoint load and cache the result — it must
    NOT be in the per-forward hot path (it is a 640 KB cross-lane transpose).
    The N=128 capsule axis lands on lanes, so per-(class, d_in) weight tiles are
    fully packed (16, 128) vregs and the weight DMA has contiguous 512 B rows.
    """
    return jnp.transpose(W, (0, 2, 3, 1))


def classifier_caps_forward(x, WT, *, routing_iterations=ROUTING_ITERS,
                            class_splits=1):
    """x: (B, N, D_in) f32; WT: pre-transposed weights (C, D_in, D_out, N) f32.

    Returns v_j of shape (C, B, 1, 1, D_out), matching the PyTorch module.
    class_splits: keep 1 on v5e/v6e (single TensorCore — extra grid steps only
    add overhead); set 2 on v7x to shard the class axis across the two
    TensorCores (or on v5e to double-buffer the W DMA under compute).
    """
    assert routing_iterations >= 1
    B, N, Din = x.shape
    C, Dinw, Dout, Nw = WT.shape
    assert (N, Din) == (Nw, Dinw)
    assert C % class_splits == 0
    cps = C // class_splits

    # 8 KB lane-dense re-layout of x; negligible (layout plumbing only).
    xT = jnp.transpose(x, (0, 2, 1))        # (B, D_in, N)

    kernel = functools.partial(
        classifier_caps_kernel, batch=B, classes_per_step=cps, d_in=Din,
        routing_iterations=routing_iterations)

    out = pl.pallas_call(
        kernel,
        out_shape=jax.ShapeDtypeStruct((class_splits, cps * B, Dout), jnp.float32),
        grid=(class_splits,),
        in_specs=[
            pl.BlockSpec((B, Din, N), lambda g: (0, 0, 0)),             # x resident
            pl.BlockSpec((cps, Din, Dout, N), lambda g: (g, 0, 0, 0)),  # W slice
        ],
        out_specs=pl.BlockSpec((1, cps * B, Dout), lambda g: (g, 0, 0)),
        scratch_shapes=[pltpu.VMEM((cps * B, Dout, N), jnp.float32)],   # u_hat
        compiler_params=pltpu.CompilerParams(
            # Irrelevant for the default grid=(1,); with class_splits=2 on v7x it
            # lets the class axis shard across the two TensorCores.
            dimension_semantics=("parallel",),
        ),
    )(xT, WT)

    # Row-major (class_splits, cps*B, D_out) is already (C, B, D_out) linear order:
    # the reshape below is metadata-only (no transpose, no extra launch).
    return out.reshape(C, B, 1, 1, Dout)


# ---------------------------------------------------------------------------
# Pure-JAX reference mirroring the PyTorch forward exactly (for verification).
# NOTE: the module's SelfAttention branch is dead code (`if 1:` always routes).
# ---------------------------------------------------------------------------
def classifier_caps_reference(x, W, routing_iterations=ROUTING_ITERS):
    x5 = x[None, :, :, None, :]            # (1, B, N, 1, D_in)
    W5 = W[:, None, :, :, :]               # (C, 1, N, D_in, D_out)
    u_hat = jnp.matmul(x5, W5, precision=jax.lax.Precision.HIGHEST)
    b_ij = jnp.zeros_like(u_hat)
    v_j = None
    for it in range(routing_iterations):
        c_ij = jax.nn.softmax(b_ij, axis=2)
        s_j = jnp.sum(c_ij * u_hat, axis=2, keepdims=True)
        sq = jnp.sum(s_j * s_j, axis=-1, keepdims=True)
        v_j = (sq / (1.0 + sq)) * s_j / jnp.sqrt(sq)
        if it < routing_iterations - 1:
            a_ij = jnp.sum(u_hat * v_j, axis=-1, keepdims=True)
            b_ij = b_ij + a_ij
    return v_j                              # (C, B, 1, 1, D_out)


if __name__ == "__main__":
    key = jax.random.PRNGKey(0)
    kx, kw = jax.random.split(key)

    # Deterministic synthetic parameters/inputs (module's W ~ randn in __init__).
    x = jax.random.normal(kx, (BATCH, N_CAPS, D_IN), dtype=jnp.float32)
    W = jax.random.normal(kw, (NUM_CLASSES, N_CAPS, D_IN, D_OUT), dtype=jnp.float32)

    # One-time weight re-layout (this is what a real model would cache as the
    # stored parameter, keeping the transpose out of the per-call hot path).
    WT = jax.block_until_ready(prepare_classifier_caps_weights(W))

    fwd = jax.jit(functools.partial(classifier_caps_forward,
                                    routing_iterations=ROUTING_ITERS,
                                    class_splits=1))
    v_j = jax.block_until_ready(fwd(x, WT))

    v_ref = classifier_caps_reference(x, W)
    assert v_j.shape == (NUM_CLASSES, BATCH, 1, 1, D_OUT)
    # Exact math in-kernel (no approx reciprocals); remaining differences are
    # f32 reduction-order level. Genuine layout/indexing bugs give O(0.1+) errors.
    max_err = jnp.max(jnp.abs(v_j - v_ref))
    assert jnp.allclose(v_j, v_ref, atol=1e-3, rtol=1e-3), (
        f"max abs err = {max_err}"
    )

    print("KERNEL_OK")
</pallas_src>

<mosaic_0001>
module attributes {stable_mosaic.version = 11 : i64} {
  func.func @classifier_caps_kernel(%arg0: i32, %arg1: memref<2x8x128xf32, #tpu.memory_space<vmem>>, %arg2: memref<10x8x16x128xf32, #tpu.memory_space<vmem>>, %arg3: memref<1x20x16xf32, #tpu.memory_space<vmem>>, %arg4: memref<20x16x128xf32, #tpu.memory_space<vmem>>) attributes {dimension_semantics = [#tpu.dimension_semantics<parallel>], iteration_bounds = array<i64: 1>, scalar_prefetch = 0 : i64, scratch_operands = 1 : i64, tpu.core_type = #tpu.core_type<tc>, window_params = [{pipeline_mode = #tpu.pipeline_mode<synchronous>, transform_indices = @transform_0, window_bounds = array<i64: 2, 8, 128>}, {transform_indices = @transform_1, window_bounds = array<i64: 10, 8, 16, 128>}, {transform_indices = @transform_2, window_bounds = array<i64: 1, 20, 16>}]} {
    %c0 = arith.constant 0 : index
    %c0_0 = arith.constant 0 : index
    %c0_1 = arith.constant 0 : index
    %0 = vector.load %arg1[%c0, %c0_0, %c0_1] : memref<2x8x128xf32, #tpu.memory_space<vmem>>, vector<1x8x128xf32>
    %1 = vector.shape_cast %0 : vector<1x8x128xf32> to vector<8x128xf32>
    %2 = vector.extract_strided_slice %1 {offsets = [0, 0], sizes = [1, 128], strides = [1, 1]} : vector<8x128xf32> to vector<1x128xf32>
    %3 = vector.shape_cast %2 : vector<1x128xf32> to vector<1x128xf32>
    %4 = vector.broadcast %3 : vector<1x128xf32> to vector<16x128xf32>
    %5 = vector.extract_strided_slice %1 {offsets = [1, 0], sizes = [1, 128], strides = [1, 1]} : vector<8x128xf32> to vector<1x128xf32>
    %6 = vector.shape_cast %5 : vector<1x128xf32> to vector<1x128xf32>
    %7 = vector.broadcast %6 : vector<1x128xf32> to vector<16x128xf32>
    %8 = vector.extract_strided_slice %1 {offsets = [2, 0], sizes = [1, 128], strides = [1, 1]} : vector<8x128xf32> to vector<1x128xf32>
    %9 = vector.shape_cast %8 : vector<1x128xf32> to vector<1x128xf32>
    %10 = vector.broadcast %9 : vector<1x128xf32> to vector<16x128xf32>
    %11 = vector.extract_strided_slice %1 {offsets = [3, 0], sizes = [1, 128], strides = [1, 1]} : vector<8x128xf32> to vector<1x128xf32>
    %12 = vector.shape_cast %11 : vector<1x128xf32> to vector<1x128xf32>
    %13 = vector.broadcast %12 : vector<1x128xf32> to vector<16x128xf32>
    %14 = vector.extract_strided_slice %1 {offsets = [4, 0], sizes = [1, 128], strides = [1, 1]} : vector<8x128xf32> to vector<1x128xf32>
    %15 = vector.shape_cast %14 : vector<1x128xf32> to vector<1x128xf32>
    %16 = vector.broadcast %15 : vector<1x128xf32> to vector<16x128xf32>
    %17 = vector.extract_strided_slice %1 {offsets = [5, 0], sizes = [1, 128], strides = [1, 1]} : vector<8x128xf32> to vector<1x128xf32>
    %18 = vector.shape_cast %17 : vector<1x128xf32> to vector<1x128xf32>
    %19 = vector.broadcast %18 : vector<1x128xf32> to vector<16x128xf32>
    %20 = vector.extract_strided_slice %1 {offsets = [6, 0], sizes = [1, 128], strides = [1, 1]} : vector<8x128xf32> to vector<1x128xf32>
    %21 = vector.shape_cast %20 : vector<1x128xf32> to vector<1x128xf32>
    %22 = vector.broadcast %21 : vector<1x128xf32> to vector<16x128xf32>
    %23 = vector.extract_strided_slice %1 {offsets = [7, 0], sizes = [1, 128], strides = [1, 1]} : vector<8x128xf32> to vector<1x128xf32>
    %24 = vector.shape_cast %23 : vector<1x128xf32> to vector<1x128xf32>
    %25 = vector.broadcast %24 : vector<1x128xf32> to vector<16x128xf32>
    %c0_2 = arith.constant 0 : index
    %c0_3 = arith.constant 0 : index
    %c0_4 = arith.constant 0 : index
    %c0_5 = arith.constant 0 : index
    %26 = vector.load %arg2[%c0_2, %c0_3, %c0_4, %c0_5] : memref<10x8x16x128xf32, #tpu.memory_space<vmem>>, vector<1x1x16x128xf32>
    %27 = vector.shape_cast %26 : vector<1x1x16x128xf32> to vector<16x128xf32>
    %28 = arith.mulf %4, %27 : vector<16x128xf32>
    %c0_6 = arith.constant 0 : index
    %c1 = arith.constant 1 : index
    %c0_7 = arith.constant 0 : index
    %c0_8 = arith.constant 0 : index
    %29 = vector.load %arg2[%c0_6, %c1, %c0_7, %c0_8] : memref<10x8x16x128xf32, #tpu.memory_space<vmem>>, vector<1x1x16x128xf32>
    %30 = vector.shape_cast %29 : vector<1x1x16x128xf32> to vector<16x128xf32>
    %31 = arith.mulf %7, %30 : vector<16x128xf32>
    %c0_9 = arith.constant 0 : index
    %c2 = arith.constant 2 : index
    %c0_10 = arith.constant 0 : index
    %c0_11 = arith.constant 0 : index
    %32 = vector.load %arg2[%c0_9, %c2, %c0_10, %c0_11] : memref<10x8x16x128xf32, #tpu.memory_space<vmem>>, vector<1x1x16x128xf32>
    %33 = vector.shape_cast %32 : vector<1x1x16x128xf32> to vector<16x128xf32>
    %34 = arith.mulf %10, %33 : vector<16x128xf32>
    %c0_12 = arith.constant 0 : index
    %c3 = arith.constant 3 : index
    %c0_13 = arith.constant 0 : index
    %c0_14 = arith.constant 0 : index
    %35 = vector.load %arg2[%c0_12, %c3, %c0_13, %c0_14] : memref<10x8x16x128xf32, #tpu.memory_space<vmem>>, vector<1x1x16x128xf32>
    %36 = vector.shape_cast %35 : vector<1x1x16x128xf32> to vector<16x128xf32>
    %37 = arith.mulf %13, %36 : vector<16x128xf32>
    %c0_15 = arith.constant 0 : index
    %c4 = arith.constant 4 : index
    %c0_16 = arith.constant 0 : index
    %c0_17 = arith.constant 0 : index
    %38 = vector.load %arg2[%c0_15, %c4, %c0_16, %c0_17] : memref<10x8x16x128xf32, #tpu.memory_space<vmem>>, vector<1x1x16x128xf32>
    %39 = vector.shape_cast %38 : vector<1x1x16x128xf32> to vector<16x128xf32>
    %40 = arith.mulf %16, %39 : vector<16x128xf32>
    %c0_18 = arith.constant 0 : index
    %c5 = arith.constant 5 : index
    %c0_19 = arith.constant 0 : index
    %c0_20 = arith.constant 0 : index
    %41 = vector.load %arg2[%c0_18, %c5, %c0_19, %c0_20] : memref<10x8x16x128xf32, #tpu.memory_space<vmem>>, vector<1x1x16x128xf32>
    %42 = vector.shape_cast %41 : vector<1x1x16x128xf32> to vector<16x128xf32>
    %43 = arith.mulf %19, %42 : vector<16x128xf32>
    %c0_21 = arith.constant 0 : index
    %c6 = arith.constant 6 : index
    %c0_22 = arith.constant 0 : index
    %c0_23 = arith.constant 0 : index
    %44 = vector.load %arg2[%c0_21, %c6, %c0_22, %c0_23] : memref<10x8x16x128xf32, #tpu.memory_space<vmem>>, vector<1x1x16x128xf32>
    %45 = vector.shape_cast %44 : vector<1x1x16x128xf32> to vector<16x128xf32>
    %46 = arith.mulf %22, %45 : vector<16x128xf32>
    %c0_24 = arith.constant 0 : index
    %c7 = arith.constant 7 : index
    %c0_25 = arith.constant 0 : index
    %c0_26 = arith.constant 0 : index
    %47 = vector.load %arg2[%c0_24, %c7, %c0_25, %c0_26] : memref<10x8x16x128xf32, #tpu.memory_space<vmem>>, vector<1x1x16x128xf32>
    %48 = vector.shape_cast %47 : vector<1x1x16x128xf32> to vector<16x128xf32>
    %49 = arith.mulf %25, %48 : vector<16x128xf32>
    %50 = arith.addf %28, %31 : vector<16x128xf32>
    %51 = arith.addf %34, %37 : vector<16x128xf32>
    %52 = arith.addf %40, %43 : vector<16x128xf32>
    %53 = arith.addf %46, %49 : vector<16x128xf32>
    %54 = arith.addf %50, %51 : vector<16x128xf32>
    %55 = arith.addf %52, %53 : vector<16x128xf32>
    %56 = arith.addf %54, %55 : vector<16x128xf32>
    %c0_27 = arith.constant 0 : index
    %c0_28 = arith.constant 0 : index
    %c0_29 = arith.constant 0 : index
    %57 = vector.load %arg4[%c0_27, %c0_28, %c0_29] : memref<20x16x128xf32, #tpu.memory_space<vmem>>, vector<1x16x128xf32>
    %58 = vector.shape_cast %57 : vector<1x16x128xf32> to vector<16x128xf32>
    %59 = vector.shape_cast %56 : vector<16x128xf32> to vector<1x16x128xf32>
    tpu.vector_store %arg4[%c0_27, %c0_28, %c0_29], %59 {strides = array<i32>} : memref<20x16x128xf32, #tpu.memory_space<vmem>>, vector<1x16x128xf32>,
    %c1_30 = arith.constant 1 : index
    %c0_31 = arith.constant 0 : index
    %c0_32 = arith.constant 0 : index
    %c0_33 = arith.constant 0 : index
    %60 = vector.load %arg2[%c1_30, %c0_31, %c0_32, %c0_33] : memref<10x8x16x128xf32, #tpu.memory_space<vmem>>, vector<1x1x16x128xf32>
    %61 = vector.shape_cast %60 : vector<1x1x16x128xf32> to vector<16x128xf32>
    %62 = arith.mulf %4, %61 : vector<16x128xf32>
    %c1_34 = arith.constant 1 : index
    %c1_35 = arith.constant 1 : index
    %c0_36 = arith.constant 0 : index
    %c0_37 = arith.constant 0 : index
    %63 = vector.load %arg2[%c1_34, %c1_35, %c0_36, %c0_37] : memref<10x8x16x128xf32, #tpu.memory_space<vmem>>, vector<1x1x16x128xf32>
    %64 = vector.shape_cast %63 : vector<1x1x16x128xf32> to vector<16x128xf32>
    %65 = arith.mulf %7, %64 : vector<16x128xf32>
    %c1_38 = arith.constant 1 : index
    %c2_39 = arith.constant 2 : index
    %c0_40 = arith.constant 0 : index
    %c0_41 = arith.constant 0 : index
    %66 = vector.load %arg2[%c1_38, %c2_39, %c0_40, %c0_41] : memref<10x8x16x128xf32, #tpu.memory_space<vmem>>, vector<1x1x16x128xf32>
    %67 = vector.shape_cast %66 : vector<1x1x16x128xf32> to vector<16x128xf32>
    %68 = arith.mulf %10, %67 : vector<16x128xf32>
    %c1_42 = arith.constant 1 : index
    %c3_43 = arith.constant 3 : index
    %c0_44 = arith.constant 0 : index
    %c0_45 = arith.constant 0 : index
    %69 = vector.load %arg2[%c1_42, %c3_43, %c0_44, %c0_45] : memref<10x8x16x128xf32, #tpu.memory_space<vmem>>, vector<1x1x16x128xf32>
    %70 = vector.shape_cast %69 : vector<1x1x16x128xf32> to vector<16x128xf32>
    %71 = arith.mulf %13, %70 : vector<16x128xf32>
    %c1_46 = arith.constant 1 : index
    %c4_47 = arith.constant 4 : index
    %c0_48 = arith.constant 0 : index
    %c0_49 = arith.constant 0 : index
    %72 = vector.load %arg2[%c1_46, %c4_47, %c0_48, %c0_49] : memref<10x8x16x128xf32, #tpu.memory_space<vmem>>, vector<1x1x16x128xf32>
    %73 = vector.shape_cast %72 : vector<1x1x16x128xf32> to vector<16x128xf32>
    %74 = arith.mulf %16, %73 : vector<16x128xf32>
    %c1_50 = arith.constant 1 : index
    %c5_51 = arith.constant 5 : index
    %c0_52 = arith.constant 0 : index
    %c0_53 = arith.constant 0 : index
    %75 = vector.load %arg2[%c1_50, %c5_51, %c0_52, %c0_53] : memref<10x8x16x128xf32, #tpu.memory_space<vmem>>, vector<1x1x16x128xf32>
    %76 = vector.shape_cast %75 : vector<1x1x16x128xf32> to vector<16x128xf32>
    %77 = arith.mulf %19, %76 : vector<16x128xf32>
    %c1_54 = arith.constant 1 : index
    %c6_55 = arith.constant 6 : index
    %c0_56 = arith.constant 0 : index
    %c0_57 = arith.constant 0 : index
    %78 = vector.load %arg2[%c1_54, %c6_55, %c0_56, %c0_57] : memref<10x8x16x128xf32, #tpu.memory_space<vmem>>, vector<1x1x16x128xf32>
    %79 = vector.shape_cast %78 : vector<1x1x16x128xf32> to vector<16x128xf32>
    %80 = arith.mulf %22, %79 : vector<16x128xf32>
    %c1_58 = arith.constant 1 : index
    %c7_59 = arith.constant 7 : index
    %c0_60 = arith.constant 0 : index
    %c0_61 = arith.constant 0 : index
    %81 = vector.load %arg2[%c1_58, %c7_59, %c0_60, %c0_61] : memref<10x8x16x128xf32, #tpu.memory_space<vmem>>, vector<1x1x16x128xf32>
    %82 = vector.shape_cast %81 : vector<1x1x16x128xf32> to vector<16x128xf32>
    %83 = arith.mulf %25, %82 : vector<16x128xf32>
    %84 = arith.addf %62, %65 : vector<16x128xf32>
    %85 = arith.addf %68, %71 : vector<16x128xf32>
    %86 = arith.addf %74, %77 : vector<16x128xf32>
    %87 = arith.addf %80, %83 : vector<16x128xf32>
    %88 = arith.addf %84, %85 : vector<16x128xf32>
    %89 = arith.addf %86, %87 : vector<16x128xf32>
    %90 = arith.addf %88, %89 : vector<16x128xf32>
    %c2_62 = arith.constant 2 : index
    %c0_63 = arith.constant 0 : index
    %c0_64 = arith.constant 0 : index
    %91 = vector.load %arg4[%c2_62, %c0_63, %c0_64] : memref<20x16x128xf32, #tpu.memory_space<vmem>>, vector<1x16x128xf32>
    %92 = vector.shape_cast %91 : vector<1x16x128xf32> to vector<16x128xf32>
    %93 = vector.shape_cast %90 : vector<16x128xf32> to vector<1x16x128xf32>
    tpu.vector_store %arg4[%c2_62, %c0_63, %c0_64], %93 {strides = array<i32>} : memref<20x16x128xf32, #tpu.memory_space<vmem>>, vector<1x16x128xf32>,
    %c2_65 = arith.constant 2 : index
    %c0_66 = arith.constant 0 : index
    %c0_67 = arith.constant 0 : index
    %c0_68 = arith.constant 0 : index
    %94 = vector.load %arg2[%c2_65, %c0_66, %c0_67, %c0_68] : memref<10x8x16x128xf32, #tpu.memory_space<vmem>>, vector<1x1x16x128xf32>
    %95 = vector.shape_cast %94 : vector<1x1x16x128xf32> to vector<16x128xf32>
    %96 = arith.mulf %4, %95 : vector<16x128xf32>
    %c2_69 = arith.constant 2 : index
    %c1_70 = arith.constant 1 : index
    %c0_71 = arith.constant 0 : index
    %c0_72 = arith.constant 0 : index
    %97 = vector.load %arg2[%c2_69, %c1_70, %c0_71, %c0_72] : memref<10x8x16x128xf32, #tpu.memory_space<vmem>>, vector<1x1x16x128xf32>
    %98 = vector.shape_cast %97 : vector<1x1x16x128xf32> to vector<16x128xf32>
    %99 = arith.mulf %7, %98 : vector<16x128xf32>
    %c2_73 = arith.constant 2 : index
    %c2_74 = arith.constant 2 : index
    %c0_75 = arith.constant 0 : index
    %c0_76 = arith.constant 0 : index
    %100 = vector.load %arg2[%c2_73, %c2_74, %c0_75, %c0_76] : memref<10x8x16x128xf32, #tpu.memory_space<vmem>>, vector<1x1x16x128xf32>
    %101 = vector.shape_cast %100 : vector<1x1x16x128xf32> to vector<16x128xf32>
    %102 = arith.mulf %10, %101 : vector<16x128xf32>
    %c2_77 = arith.constant 2 : index
    %c3_78 = arith.constant 3 : index
    %c0_79 = arith.constant 0 : index
    %c0_80 = arith.constant 0 : index
    %103 = vector.load %arg2[%c2_77, %c3_78, %c0_79, %c0_80] : memref<10x8x16x128xf32, #tpu.memory_space<vmem>>, vector<1x1x16x128xf32>
    %104 = vector.shape_cast %103 : vector<1x1x16x128xf32> to vector<16x128xf32>
    %105 = arith.mulf %13, %104 : vector<16x128xf32>
    %c2_81 = arith.constant 2 : index
    %c4_82 = arith.constant 4 : index
    %c0_83 = arith.constant 0 : index
    %c0_84 = arith.constant 0 : index
    %106 = vector.load %arg2[%c2_81, %c4_82, %c0_83, %c0_84] : memref<10x8x16x128xf32, #tpu.memory_space<vmem>>, vector<1x1x16x128xf32>
    %107 = vector.shape_cast %106 : vector<1x1x16x128xf32> to vector<16x128xf32>
    %108 = arith.mulf %16, %107 : vector<16x128xf32>
    %c2_85 = arith.constant 2 : index
    %c5_86 = arith.constant 5 : index
    %c0_87 = arith.constant 0 : index
    %c0_88 = arith.constant 0 : index
    %109 = vector.load %arg2[%c2_85, %c5_86, %c0_87, %c0_88] : memref<10x8x16x128xf32, #tpu.memory_space<vmem>>, vector<1x1x16x128xf32>
    %110 = vector.shape_cast %109 : vector<1x1x16x128xf32> to vector<16x128xf32>
    %111 = arith.mulf %19, %110 : vector<16x128xf32>
    %c2_89 = arith.constant 2 : index
    %c6_90 = arith.constant 6 : index
    %c0_91 = arith.constant 0 : index
    %c0_92 = arith.constant 0 : index
    %112 = vector.load %arg2[%c2_89, %c6_90, %c0_91, %c0_92] : memref<10x8x16x128xf32, #tpu.memory_space<vmem>>, vector<1x1x16x128xf32>
    %113 = vector.shape_cast %112 : vector<1x1x16x128xf32> to vector<16x128xf32>
    %114 = arith.mulf %22, %113 : vector<16x128xf32>
    %c2_93 = arith.constant 2 : index
    %c7_94 = arith.constant 7 : index
    %c0_95 = arith.constant 0 : index
    %c0_96 = arith.constant 0 : index
    %115 = vector.load %arg2[%c2_93, %c7_94, %c0_95, %c0_96] : memref<10x8x16x128xf32, #tpu.memory_space<vmem>>, vector<1x1x16x128xf32>
    %116 = vector.shape_cast %115 : vector<1x1x16x128xf32> to vector<16x128xf32>
    %117 = arith.mulf %25, %116 : vector<16x128xf32>
    %118 = arith.addf %96, %99 : vector<16x128xf32>
    %119 = arith.addf %102, %105 : vector<16x128xf32>
    %120 = arith.addf %108, %111 : vector<16x128xf32>
    %121 = arith.addf %114, %117 : vector<16x128xf32>
    %122 = arith.addf %118, %119 : vector<16x128xf32>
    %123 = arith.addf %120, %121 : vector<16x128xf32>
    %124 = arith.addf %122, %123 : vector<16x128xf32>
    %c4_97 = arith.constant 4 : index
    %c0_98 = arith.constant 0 : index
    %c0_99 = arith.constant 0 : index
    %125 = vector.load %arg4[%c4_97, %c0_98, %c0_99] : memref<20x16x128xf32, #tpu.memory_space<vmem>>, vector<1x16x128xf32>
    %126 = vector.shape_cast %125 : vector<1x16x128xf32> to vector<16x128xf32>
    %127 = vector.shape_cast %124 : vector<16x128xf32> to vector<1x16x128xf32>
    tpu.vector_store %arg4[%c4_97, %c0_98, %c0_99], %127 {strides = array<i32>} : memref<20x16x128xf32, #tpu.memory_space<vmem>>, vector<1x16x128xf32>,
    %c3_100 = arith.constant 3 : index
    %c0_101 = arith.constant 0 : index
    %c0_102 = arith.constant 0 : index
    %c0_103 = arith.constant 0 : index
    %128 = vector.load %arg2[%c3_100, %c0_101, %c0_102, %c0_103] : memref<10x8x16x128xf32, #tpu.memory_space<vmem>>, vector<1x1x16x128xf32>
    %129 = vector.shape_cast %128 : vector<1x1x16x128xf32> to vector<16x128xf32>
    %130 = arith.mulf %4, %129 : vector<16x128xf32>
    %c3_104 = arith.constant 3 : index
    %c1_105 = arith.constant 1 : index
    %c0_106 = arith.constant 0 : index
    %c0_107 = arith.constant 0 : index
    %131 = vector.load %arg2[%c3_104, %c1_105, %c0_106, %c0_107] : memref<10x8x16x128xf32, #tpu.memory_space<vmem>>, vector<1x1x16x128xf32>
    %132 = vector.shape_cast %131 : vector<1x1x16x128xf32> to vector<16x128xf32>
    %133 = arith.mulf %7, %132 : vector<16x128xf32>
    %c3_108 = arith.constant 3 : index
    %c2_109 = arith.constant 2 : index
    %c0_110 = arith.constant 0 : index
    %c0_111 = arith.constant 0 : index
    %134 = vector.load %arg2[%c3_108, %c2_109, %c0_110, %c0_111] : memref<10x8x16x128xf32, #tpu.memory_space<vmem>>, vector<1x1x16x128xf32>
    %135 = vector.shape_cast %134 : vector<1x1x16x128xf32> to vector<16x128xf32>
    %136 = arith.mulf %10, %135 : vector<16x128xf32>
    %c3_112 = arith.constant 3 : index
    %c3_113 = arith.constant 3 : index
    %c0_114 = arith.constant 0 : index
    %c0_115 = arith.constant 0 : index
    %137 = vector.load %arg2[%c3_112, %c3_113, %c0_114, %c0_115] : memref<10x8x16x128xf32, #tpu.memory_space<vmem>>, vector<1x1x16x128xf32>
    %138 = vector.shape_cast %137 : vector<1x1x16x128xf32> to vector<16x128xf32>
    %139 = arith.mulf %13, %138 : vector<16x128xf32>
    %c3_116 = arith.constant 3 : index
    %c4_117 = arith.constant 4 : index
    %c0_118 = arith.constant 0 : index
    %c0_119 = arith.constant 0 : index
    %140 = vector.load %arg2[%c3_116, %c4_117, %c0_118, %c0_119] : memref<10x8x16x128xf32, #tpu.memory_space<vmem>>, vector<1x1x16x128xf32>
    %141 = vector.shape_cast %140 : vector<1x1x16x128xf32> to vector<16x128xf32>
    %142 = arith.mulf %16, %141 : vector<16x128xf32>
    %c3_120 = arith.constant 3 : index
    %c5_121 = arith.constant 5 : index
    %c0_122 = arith.constant 0 : index
    %c0_123 = arith.constant 0 : index
    %143 = vector.load %arg2[%c3_120, %c5_121, %c0_122, %c0_123] : memref<10x8x16x128xf32, #tpu.memory_space<vmem>>, vector<1x1x16x128xf32>
    %144 = vector.shape_cast %143 : vector<1x1x16x128xf32> to vector<16x128xf32>
    %145 = arith.mulf %19, %144 : vector<16x128xf32>
    %c3_124 = arith.constant 3 : index
    %c6_125 = arith.constant 6 : index
    %c0_126 = arith.constant 0 : index
    %c0_127 = arith.constant 0 : index
    %146 = vector.load %arg2[%c3_124, %c6_125, %c0_126, %c0_127] : memref<10x8x16x128xf32, #tpu.memory_space<vmem>>, vector<1x1x16x128xf32>
    %147 = vector.shape_cast %146 : vector<1x1x16x128xf32> to vector<16x128xf32>
    %148 = arith.mulf %22, %147 : vector<16x128xf32>
    %c3_128 = arith.constant 3 : index
    %c7_129 = arith.constant 7 : index
    %c0_130 = arith.constant 0 : index
    %c0_131 = arith.constant 0 : index
    %149 = vector.load %arg2[%c3_128, %c7_129, %c0_130, %c0_131] : memref<10x8x16x128xf32, #tpu.memory_space<vmem>>, vector<1x1x16x128xf32>
    %150 = vector.shape_cast %149 : vector<1x1x16x128xf32> to vector<16x128xf32>
    %151 = arith.mulf %25, %150 : vector<16x128xf32>
    %152 = arith.addf %130, %133 : vector<16x128xf32>
    %153 = arith.addf %136, %139 : vector<16x128xf32>
    %154 = arith.addf %142, %145 : vector<16x128xf32>
    %155 = arith.addf %148, %151 : vector<16x128xf32>
    %156 = arith.addf %152, %153 : vector<16x128xf32>
    %157 = arith.addf %154, %155 : vector<16x128xf32>
    %158 = arith.addf %156, %157 : vector<16x128xf32>
    %c6_132 = arith.constant 6 : index
    %c0_133 = arith.constant 0 : index
    %c0_134 = arith.constant 0 : index
    %159 = vector.load %arg4[%c6_132, %c0_133, %c0_134] : memref<20x16x128xf32, #tpu.memory_space<vmem>>, vector<1x16x128xf32>
    %160 = vector.shape_cast %159 : vector<1x16x128xf32> to vector<16x128xf32>
    %161 = vector.shape_cast %158 : vector<16x128xf32> to vector<1x16x128xf32>
    tpu.vector_store %arg4[%c6_132, %c0_133, %c0_134], %161 {strides = array<i32>} : memref<20x16x128xf32, #tpu.memory_space<vmem>>, vector<1x16x128xf32>,
    %c4_135 = arith.constant 4 : index
    %c0_136 = arith.constant 0 : index
    %c0_137 = arith.constant 0 : index
    %c0_138 = arith.constant 0 : index
    %162 = vector.load %arg2[%c4_135, %c0_136, %c0_137, %c0_138] : memref<10x8x16x128xf32, #tpu.memory_space<vmem>>, vector<1x1x16x128xf32>
    %163 = vector.shape_cast %162 : vector<1x1x16x128xf32> to vector<16x128xf32>
    %164 = arith.mulf %4, %163 : vector<16x128xf32>
    %c4_139 = arith.constant 4 : index
    %c1_140 = arith.constant 1 : index
    %c0_141 = arith.constant 0 : index
    %c0_142 = arith.constant 0 : index
    %165 = vector.load %arg2[%c4_139, %c1_140, %c0_141, %c0_142] : memref<10x8x16x128xf32, #tpu.memory_space<vmem>>, vector<1x1x16x128xf32>
    %166 = vector.shape_cast %165 : vector<1x1x16x128xf32> to vector<16x128xf32>
    %167 = arith.mulf %7, %166 : vector<16x128xf32>
    %c4_143 = arith.constant 4 : index
    %c2_144 = arith.constant 2 : index
    %c0_145 = arith.constant 0 : index
    %c0_146 = arith.constant 0 : index
    %168 = vector.load %arg2[%c4_143, %c2_144, %c0_145, %c0_146] : memref<10x8x16x128xf32, #tpu.memory_space<vmem>>, vector<1x1x16x128xf32>
    %169 = vector.shape_cast %168 : vector<1x1x16x128xf32> to vector<16x128xf32>
    %170 = arith.mulf %10, %169 : vector<16x128xf32>
    %c4_147 = arith.constant 4 : index
    %c3_148 = arith.constant 3 : index
    %c0_149 = arith.constant 0 : index
    %c0_150 = arith.constant 0 : index
    %171 = vector.load %arg2[%c4_147, %c3_148, %c0_149, %c0_150] : memref<10x8x16x128xf32, #tpu.memory_space<vmem>>, vector<1x1x16x128xf32>
    %172 = vector.shape_cast %171 : vector<1x1x16x128xf32> to vector<16x128xf32>
    %173 = arith.mulf %13, %172 : vector<16x128xf32>
    %c4_151 = arith.constant 4 : index
    %c4_152 = arith.constant 4 : index
    %c0_153 = arith.constant 0 : index
    %c0_154 = arith.constant 0 : index
    %174 = vector.load %arg2[%c4_151, %c4_152, %c0_153, %c0_154] : memref<10x8x16x128xf32, #tpu.memory_space<vmem>>, vector<1x1x16x128xf32>
    %175 = vector.shape_cast %174 : vector<1x1x16x128xf32> to vector<16x128xf32>
    %176 = arith.mulf %16, %175 : vector<16x128xf32>
    %c4_155 = arith.constant 4 : index
    %c5_156 = arith.constant 5 : index
    %c0_157 = arith.constant 0 : index
    %c0_158 = arith.constant 0 : index
    %177 = vector.load %arg2[%c4_155, %c5_156, %c0_157, %c0_158] : memref<10x8x16x128xf32, #tpu.memory_space<vmem>>, vector<1x1x16x128xf32>
    %178 = vector.shape_cast %177 : vector<1x1x16x128xf32> to vector<16x128xf32>
    %179 = arith.mulf %19, %178 : vector<16x128xf32>
    %c4_159 = arith.constant 4 : index
    %c6_160 = arith.constant 6 : index
    %c0_161 = arith.constant 0 : index
    %c0_162 = arith.constant 0 : index
    %180 = vector.load %arg2[%c4_159, %c6_160, %c0_161, %c0_162] : memref<10x8x16x128xf32, #tpu.memory_space<vmem>>, vector<1x1x16x128xf32>
    %181 = vector.shape_cast %180 : vector<1x1x16x128xf32> to vector<16x128xf32>
    %182 = arith.mulf %22, %181 : vector<16x128xf32>
    %c4_163 = arith.constant 4 : index
    %c7_164 = arith.constant 7 : index
    %c0_165 = arith.constant 0 : index
    %c0_166 = arith.constant 0 : index
    %183 = vector.load %arg2[%c4_163, %c7_164, %c0_165, %c0_166] : memref<10x8x16x128xf32, #tpu.memory_space<vmem>>, vector<1x1x16x128xf32>
    %184 = vector.shape_cast %183 : vector<1x1x16x128xf32> to vector<16x128xf32>
    %185 = arith.mulf %25, %184 : vector<16x128xf32>
    %186 = arith.addf %164, %167 : vector<16x128xf32>
    %187 = arith.addf %170, %173 : vector<16x128xf32>
    %188 = arith.addf %176, %179 : vector<16x128xf32>
    %189 = arith.addf %182, %185 : vector<16x128xf32>
    %190 = arith.addf %186, %187 : vector<16x128xf32>
    %191 = arith.addf %188, %189 : vector<16x128xf32>
    %192 = arith.addf %190, %191 : vector<16x128xf32>
    %c8 = arith.constant 8 : index
    %c0_167 = arith.constant 0 : index
    %c0_168 = arith.constant 0 : index
    %193 = vector.load %arg4[%c8, %c0_167, %c0_168] : memref<20x16x128xf32, #tpu.memory_space<vmem>>, vector<1x16x128xf32>
    %194 = vector.shape_cast %193 : vector<1x16x128xf32> to vector<16x128xf32>
    %195 = vector.shape_cast %192 : vector<16x128xf32> to vector<1x16x128xf32>
    tpu.vector_store %arg4[%c8, %c0_167, %c0_168], %195 {strides = array<i32>} : memref<20x16x128xf32, #tpu.memory_space<vmem>>, vector<1x16x128xf32>,
    %c5_169 = arith.constant 5 : index
    %c0_170 = arith.constant 0 : index
    %c0_171 = arith.constant 0 : index
    %c0_172 = arith.constant 0 : index
    %196 = vector.load %arg2[%c5_169, %c0_170, %c0_171, %c0_172] : memref<10x8x16x128xf32, #tpu.memory_space<vmem>>, vector<1x1x16x128xf32>
    %197 = vector.shape_cast %196 : vector<1x1x16x128xf32> to vector<16x128xf32>
    %198 = arith.mulf %4, %197 : vector<16x128xf32>
    %c5_173 = arith.constant 5 : index
    %c1_174 = arith.constant 1 : index
    %c0_175 = arith.constant 0 : index
    %c0_176 = arith.constant 0 : index
    %199 = vector.load %arg2[%c5_173, %c1_174, %c0_175, %c0_176] : memref<10x8x16x128xf32, #tpu.memory_space<vmem>>, vector<1x1x16x128xf32>
    %200 = vector.shape_cast %199 : vector<1x1x16x128xf32> to vector<16x128xf32>
    %201 = arith.mulf %7, %200 : vector<16x128xf32>
    %c5_177 = arith.constant 5 : index
    %c2_178 = arith.constant 2 : index
    %c0_179 = arith.constant 0 : index
    %c0_180 = arith.constant 0 : index
    %202 = vector.load %arg2[%c5_177, %c2_178, %c0_179, %c0_180] : memref<10x8x16x128xf32, #tpu.memory_space<vmem>>, vector<1x1x16x128xf32>
    %203 = vector.shape_cast %202 : vector<1x1x16x128xf32> to vector<16x128xf32>
    %204 = arith.mulf %10, %203 : vector<16x128xf32>
    %c5_181 = arith.constant 5 : index
    %c3_182 = arith.constant 3 : index
    %c0_183 = arith.constant 0 : index
    %c0_184 = arith.constant 0 : index
    %205 = vector.load %arg2[%c5_181, %c3_182, %c0_183, %c0_184] : memref<10x8x16x128xf32, #tpu.memory_space<vmem>>, vector<1x1x16x128xf32>
    %206 = vector.shape_cast %205 : vector<1x1x16x128xf32> to vector<16x128xf32>
    %207 = arith.mulf %13, %206 : vector<16x128xf32>
    %c5_185 = arith.constant 5 : index
    %c4_186 = arith.constant 4 : index
    %c0_187 = arith.constant 0 : index
    %c0_188 = arith.constant 0 : index
    %208 = vector.load %arg2[%c5_185, %c4_186, %c0_187, %c0_188] : memref<10x8x16x128xf32, #tpu.memory_space<vmem>>, vector<1x1x16x128xf32>
    %209 = vector.shape_cast %208 : vector<1x1x16x128xf32> to vector<16x128xf32>
    %210 = arith.mulf %16, %209 : vector<16x128xf32>
    %c5_189 = arith.constant 5 : index
    %c5_190 = arith.constant 5 : index
    %c0_191 = arith.constant 0 : index
    %c0_192 = arith.constant 0 : index
    %211 = vector.load %arg2[%c5_189, %c5_190, %c0_191, %c0_192] : memref<10x8x16x128xf32, #tpu.memory_space<vmem>>, vector<1x1x16x128xf32>
    %212 = vector.shape_cast %211 : vector<1x1x16x128xf32> to vector<16x128xf32>
    %213 = arith.mulf %19, %212 : vector<16x128xf32>
    %c5_193 = arith.constant 5 : index
    %c6_194 = arith.constant 6 : index
    %c0_195 = arith.constant 0 : index
    %c0_196 = arith.constant 0 : index
    %214 = vector.load %arg2[%c5_193, %c6_194, %c0_195, %c0_196] : memref<10x8x16x128xf32, #tpu.memory_space<vmem>>, vector<1x1x16x128xf32>
    %215 = vector.shape_cast %214 : vector<1x1x16x128xf32> to vector<16x128xf32>
    %216 = arith.mulf %22, %215 : vector<16x128xf32>
    %c5_197 = arith.constant 5 : index
    %c7_198 = arith.constant 7 : index
    %c0_199 = arith.constant 0 : index
    %c0_200 = arith.constant 0 : index
    %217 = vector.load %arg2[%c5_197, %c7_198, %c0_199, %c0_200] : memref<10x8x16x128xf32, #tpu.memory_space<vmem>>, vector<1x1x16x128xf32>
    %218 = vector.shape_cast %217 : vector<1x1x16x128xf32> to vector<16x128xf32>
    %219 = arith.mulf %25, %218 : vector<16x128xf32>
    %220 = arith.addf %198, %201 : vector<16x128xf32>
    %221 = arith.addf %204, %207 : vector<16x128xf32>
    %222 = arith.addf %210, %213 : vector<16x128xf32>
    %223 = arith.addf %216, %219 : vector<16x128xf32>
    %224 = arith.addf %220, %221 : vector<16x128xf32>
    %225 = arith.addf %222, %223 : vector<16x128xf32>
    %226 = arith.addf %224, %225 : vector<16x128xf32>
    %c10 = arith.constant 10 : index
    %c0_201 = arith.constant 0 : index
    %c0_202 = arith.constant 0 : index
    %227 = vector.load %arg4[%c10, %c0_201, %c0_202] : memref<20x16x128xf32, #tpu.memory_space<vmem>>, vector<1x16x128xf32>
    %228 = vector.shape_cast %227 : vector<1x16x128xf32> to vector<16x128xf32>
    %229 = vector.shape_cast %226 : vector<16x128xf32> to vector<1x16x128xf32>
    tpu.vector_store %arg4[%c10, %c0_201, %c0_202], %229 {strides = array<i32>} : memref<20x16x128xf32, #tpu.memory_space<vmem>>, vector<1x16x128xf32>,
    %c6_203 = arith.constant 6 : index
    %c0_204 = arith.constant 0 : index
    %c0_205 = arith.constant 0 : index
    %c0_206 = arith.constant 0 : index
    %230 = vector.load %arg2[%c6_203, %c0_204, %c0_205, %c0_206] : memref<10x8x16x128xf32, #tpu.memory_space<vmem>>, vector<1x1x16x128xf32>
    %231 = vector.shape_cast %230 : vector<1x1x16x128xf32> to vector<16x128xf32>
    %232 = arith.mulf %4, %231 : vector<16x128xf32>
    %c6_207 = arith.constant 6 : index
    %c1_208 = arith.constant 1 : index
    %c0_209 = arith.constant 0 : index
    %c0_210 = arith.constant 0 : index
    %233 = vector.load %arg2[%c6_207, %c1_208, %c0_209, %c0_210] : memref<10x8x16x128xf32, #tpu.memory_space<vmem>>, vector<1x1x16x128xf32>
    %234 = vector.shape_cast %233 : vector<1x1x16x128xf32> to vector<16x128xf32>
    %235 = arith.mulf %7, %234 : vector<16x128xf32>
    %c6_211 = arith.constant 6 : index
    %c2_212 = arith.constant 2 : index
    %c0_213 = arith.constant 0 : index
    %c0_214 = arith.constant 0 : index
    %236 = vector.load %arg2[%c6_211, %c2_212, %c0_213, %c0_214] : memref<10x8x16x128xf32, #tpu.memory_space<vmem>>, vector<1x1x16x128xf32>
    %237 = vector.shape_cast %236 : vector<1x1x16x128xf32> to vector<16x128xf32>
    %238 = arith.mulf %10, %237 : vector<16x128xf32>
    %c6_215 = arith.constant 6 : index
    %c3_216 = arith.constant 3 : index
    %c0_217 = arith.constant 0 : index
    %c0_218 = arith.constant 0 : index
    %239 = vector.load %arg2[%c6_215, %c3_216, %c0_217, %c0_218] : memref<10x8x16x128xf32, #tpu.memory_space<vmem>>, vector<1x1x16x128xf32>
    %240 = vector.shape_cast %239 : vector<1x1x16x128xf32> to vector<16x128xf32>
    %241 = arith.mulf %13, %240 : vector<16x128xf32>
    %c6_219 = arith.constant 6 : index
    %c4_220 = arith.constant 4 : index
    %c0_221 = arith.constant 0 : index
    %c0_222 = arith.constant 0 : index
    %242 = vector.load %arg2[%c6_219, %c4_220, %c0_221, %c0_222] : memref<10x8x16x128xf32, #tpu.memory_space<vmem>>, vector<1x1x16x128xf32>
    %243 = vector.shape_cast %242 : vector<1x1x16x128xf32> to vector<16x128xf32>
    %244 = arith.mulf %16, %243 : vector<16x128xf32>
    %c6_223 = arith.constant 6 : index
    %c5_224 = arith.constant 5 : index
    %c0_225 = arith.constant 0 : index
    %c0_226 = arith.constant 0 : index
    %245 = vector.load %arg2[%c6_223, %c5_224, %c0_225, %c0_226] : memref<10x8x16x128xf32, #tpu.memory_space<vmem>>, vector<1x1x16x128xf32>
    %246 = vector.shape_cast %245 : vector<1x1x16x128xf32> to vector<16x128xf32>
    %247 = arith.mulf %19, %246 : vector<16x128xf32>
    %c6_227 = arith.constant 6 : index
    %c6_228 = arith.constant 6 : index
    %c0_229 = arith.constant 0 : index
    %c0_230 = arith.constant 0 : index
    %248 = vector.load %arg2[%c6_227, %c6_228, %c0_229, %c0_230] : memref<10x8x16x128xf32, #tpu.memory_space<vmem>>, vector<1x1x16x128xf32>
    %249 = vector.shape_cast %248 : vector<1x1x16x128xf32> to vector<16x128xf32>
    %250 = arith.mulf %22, %249 : vector<16x128xf32>
    %c6_231 = arith.constant 6 : index
    %c7_232 = arith.constant 7 : index
    %c0_233 = arith.constant 0 : index
    %c0_234 = arith.constant 0 : index
    %251 = vector.load %arg2[%c6_231, %c7_232, %c0_233, %c0_234] : memref<10x8x16x128xf32, #tpu.memory_space<vmem>>, vector<1x1x16x128xf32>
    %252 = vector.shape_cast %251 : vector<1x1x16x128xf32> to vector<16x128xf32>
    %253 = arith.mulf %25, %252 : vector<16x128xf32>
    %254 = arith.addf %232, %235 : vector<16x128xf32>
    %255 = arith.addf %238, %241 : vector<16x128xf32>
    %256 = arith.addf %244, %247 : vector<16x128xf32>
    %257 = arith.addf %250, %253 : vector<16x128xf32>
    %258 = arith.addf %254, %255 : vector<16x128xf32>
    %259 = arith.addf %256, %257 : vector<16x128xf32>
    %260 = arith.addf %258, %259 : vector<16x128xf32>
    %c12 = arith.constant 12 : index
    %c0_235 = arith.constant 0 : index
    %c0_236 = arith.constant 0 : index
    %261 = vector.load %arg4[%c12, %c0_235, %c0_236] : memref<20x16x128xf32, #tpu.memory_space<vmem>>, vector<1x16x128xf32>
    %262 = vector.shape_cast %261 : vector<1x16x128xf32> to vector<16x128xf32>
    %263 = vector.shape_cast %260 : vector<16x128xf32> to vector<1x16x128xf32>
    tpu.vector_store %arg4[%c12, %c0_235, %c0_236], %263 {strides = array<i32>} : memref<20x16x128xf32, #tpu.memory_space<vmem>>, vector<1x16x128xf32>,
    %c7_237 = arith.constant 7 : index
    %c0_238 = arith.constant 0 : index
    %c0_239 = arith.constant 0 : index
    %c0_240 = arith.constant 0 : index
    %264 = vector.load %arg2[%c7_237, %c0_238, %c0_239, %c0_240] : memref<10x8x16x128xf32, #tpu.memory_space<vmem>>, vector<1x1x16x128xf32>
    %265 = vector.shape_cast %264 : vector<1x1x16x128xf32> to vector<16x128xf32>
    %266 = arith.mulf %4, %265 : vector<16x128xf32>
    %c7_241 = arith.constant 7 : index
    %c1_242 = arith.constant 1 : index
    %c0_243 = arith.constant 0 : index
    %c0_244 = arith.constant 0 : index
    %267 = vector.load %arg2[%c7_241, %c1_242, %c0_243, %c0_244] : memref<10x8x16x128xf32, #tpu.memory_space<vmem>>, vector<1x1x16x128xf32>
    %268 = vector.shape_cast %267 : vector<1x1x16x128xf32> to vector<16x128xf32>
    %269 = arith.mulf %7, %268 : vector<16x128xf32>
    %c7_245 = arith.constant 7 : index
    %c2_246 = arith.constant 2 : index
    %c0_247 = arith.constant 0 : index
    %c0_248 = arith.constant 0 : index
    %270 = vector.load %arg2[%c7_245, %c2_246, %c0_247, %c0_248] : memref<10x8x16x128xf32, #tpu.memory_space<vmem>>, vector<1x1x16x128xf32>
    %271 = vector.shape_cast %270 : vector<1x1x16x128xf32> to vector<16x128xf32>
    %272 = arith.mulf %10, %271 : vector<16x128xf32>
    %c7_249 = arith.constant 7 : index
    %c3_250 = arith.constant 3 : index
    %c0_251 = arith.constant 0 : index
    %c0_252 = arith.constant 0 : index
    %273 = vector.load %arg2[%c7_249, %c3_250, %c0_251, %c0_252] : memref<10x8x16x128xf32, #tpu.memory_space<vmem>>, vector<1x1x16x128xf32>
    %274 = vector.shape_cast %273 : vector<1x1x16x128xf32> to vector<16x128xf32>
    %275 = arith.mulf %13, %274 : vector<16x128xf32>
    %c7_253 = arith.constant 7 : index
    %c4_254 = arith.constant 4 : index
    %c0_255 = arith.constant 0 : index
    %c0_256 = arith.constant 0 : index
    %276 = vector.load %arg2[%c7_253, %c4_254, %c0_255, %c0_256] : memref<10x8x16x128xf32, #tpu.memory_space<vmem>>, vector<1x1x16x128xf32>
    %277 = vector.shape_cast %276 : vector<1x1x16x128xf32> to vector<16x128xf32>
    %278 = arith.mulf %16, %277 : vector<16x128xf32>
    %c7_257 = arith.constant 7 : index
    %c5_258 = arith.constant 5 : index
    %c0_259 = arith.constant 0 : index
    %c0_260 = arith.constant 0 : index
    %279 = vector.load %arg2[%c7_257, %c5_258, %c0_259, %c0_260] : memref<10x8x16x128xf32, #tpu.memory_space<vmem>>, vector<1x1x16x128xf32>
    %280 = vector.shape_cast %279 : vector<1x1x16x128xf32> to vector<16x128xf32>
    %281 = arith.mulf %19, %280 : vector<16x128xf32>
    %c7_261 = arith.constant 7 : index
    %c6_262 = arith.constant 6 : index
    %c0_263 = arith.constant 0 : index
    %c0_264 = arith.constant 0 : index
    %282 = vector.load %arg2[%c7_261, %c6_262, %c0_263, %c0_264] : memref<10x8x16x128xf32, #tpu.memory_space<vmem>>, vector<1x1x16x128xf32>
    %283 = vector.shape_cast %282 : vector<1x1x16x128xf32> to vector<16x128xf32>
    %284 = arith.mulf %22, %283 : vector<16x128xf32>
    %c7_265 = arith.constant 7 : index
    %c7_266 = arith.constant 7 : index
    %c0_267 = arith.constant 0 : index
    %c0_268 = arith.constant 0 : index
    %285 = vector.load %arg2[%c7_265, %c7_266, %c0_267, %c0_268] : memref<10x8x16x128xf32, #tpu.memory_space<vmem>>, vector<1x1x16x128xf32>
    %286 = vector.shape_cast %285 : vector<1x1x16x128xf32> to vector<16x128xf32>
    %287 = arith.mulf %25, %286 : vector<16x128xf32>
    %288 = arith.addf %266, %269 : vector<16x128xf32>
    %289 = arith.addf %272, %275 : vector<16x128xf32>
    %290 = arith.addf %278, %281 : vector<16x128xf32>
    %291 = arith.addf %284, %287 : vector<16x128xf32>
    %292 = arith.addf %288, %289 : vector<16x128xf32>
    %293 = arith.addf %290, %291 : vector<16x128xf32>
    %294 = arith.addf %292, %293 : vector<16x128xf32>
    %c14 = arith.constant 14 : index
    %c0_269 = arith.constant 0 : index
    %c0_270 = arith.constant 0 : index
    %295 = vector.load %arg4[%c14, %c0_269, %c0_270] : memref<20x16x128xf32, #tpu.memory_space<vmem>>, vector<1x16x128xf32>
    %296 = vector.shape_cast %295 : vector<1x16x128xf32> to vector<16x128xf32>
    %297 = vector.shape_cast %294 : vector<16x128xf32> to vector<1x16x128xf32>
    tpu.vector_store %arg4[%c14, %c0_269, %c0_270], %297 {strides = array<i32>} : memref<20x16x128xf32, #tpu.memory_space<vmem>>, vector<1x16x128xf32>,
    %c8_271 = arith.constant 8 : index
    %c0_272 = arith.constant 0 : index
    %c0_273 = arith.constant 0 : index
    %c0_274 = arith.constant 0 : index
    %298 = vector.load %arg2[%c8_271, %c0_272, %c0_273, %c0_274] : memref<10x8x16x128xf32, #tpu.memory_space<vmem>>, vector<1x1x16x128xf32>
    %299 = vector.shape_cast %298 : vector<1x1x16x128xf32> to vector<16x128xf32>
    %300 = arith.mulf %4, %299 : vector<16x128xf32>
    %c8_275 = arith.constant 8 : index
    %c1_276 = arith.constant 1 : index
    %c0_277 = arith.constant 0 : index
    %c0_278 = arith.constant 0 : index
    %301 = vector.load %arg2[%c8_275, %c1_276, %c0_277, %c0_278] : memref<10x8x16x128xf32, #tpu.memory_space<vmem>>, vector<1x1x16x128xf32>
    %302 = vector.shape_cast %301 : vector<1x1x16x128xf32> to vector<16x128xf32>
    %303 = arith.mulf %7, %302 : vector<16x128xf32>
    %c8_279 = arith.constant 8 : index
    %c2_280 = arith.constant 2 : index
    %c0_281 = arith.constant 0 : index
    %c0_282 = arith.constant 0 : index
    %304 = vector.load %arg2[%c8_279, %c2_280, %c0_281, %c0_282] : memref<10x8x16x128xf32, #tpu.memory_space<vmem>>, vector<1x1x16x128xf32>
    %305 = vector.shape_cast %304 : vector<1x1x16x128xf32> to vector<16x128xf32>
    %306 = arith.mulf %10, %305 : vector<16x128xf32>
    %c8_283 = arith.constant 8 : index
    %c3_284 = arith.constant 3 : index
    %c0_285 = arith.constant 0 : index
    %c0_286 = arith.constant 0 : index
    %307 = vector.load %arg2[%c8_283, %c3_284, %c0_285, %c0_286] : memref<10x8x16x128xf32, #tpu.memory_space<vmem>>, vector<1x1x16x128xf32>
    %308 = vector.shape_cast %307 : vector<1x1x16x128xf32> to vector<16x128xf32>
    %309 = arith.mulf %13, %308 : vector<16x128xf32>
    %c8_287 = arith.constant 8 : index
    %c4_288 = arith.constant 4 : index
    %c0_289 = arith.constant 0 : index
    %c0_290 = arith.constant 0 : index
    %310 = vector.load %arg2[%c8_287, %c4_288, %c0_289, %c0_290] : memref<10x8x16x128xf32, #tpu.memory_space<vmem>>, vector<1x1x16x128xf32>
    %311 = vector.shape_cast %310 : vector<1x1x16x128xf32> to vector<16x128xf32>
    %312 = arith.mulf %16, %311 : vector<16x128xf32>
    %c8_291 = arith.constant 8 : index
    %c5_292 = arith.constant 5 : index
    %c0_293 = arith.constant 0 : index
    %c0_294 = arith.constant 0 : index
    %313 = vector.load %arg2[%c8_291, %c5_292, %c0_293, %c0_294] : memref<10x8x16x128xf32, #tpu.memory_space<vmem>>, vector<1x1x16x128xf32>
    %314 = vector.shape_cast %313 : vector<1x1x16x128xf32> to vector<16x128xf32>
    %315 = arith.mulf %19, %314 : vector<16x128xf32>
    %c8_295 = arith.constant 8 : index
    %c6_296 = arith.constant 6 : index
    %c0_297 = arith.constant 0 : index
    %c0_298 = arith.constant 0 : index
    %316 = vector.load %arg2[%c8_295, %c6_296, %c0_297, %c0_298] : memref<10x8x16x128xf32, #tpu.memory_space<vmem>>, vector<1x1x16x128xf32>
    %317 = vector.shape_cast %316 : vector<1x1x16x128xf32> to vector<16x128xf32>
    %318 = arith.mulf %22, %317 : vector<16x128xf32>
    %c8_299 = arith.constant 8 : index
    %c7_300 = arith.constant 7 : index
    %c0_301 = arith.constant 0 : index
    %c0_302 = arith.constant 0 : index
    %319 = vector.load %arg2[%c8_299, %c7_300, %c0_301, %c0_302] : memref<10x8x16x128xf32, #tpu.memory_space<vmem>>, vector<1x1x16x128xf32>
    %320 = vector.shape_cast %319 : vector<1x1x16x128xf32> to vector<16x128xf32>
    %321 = arith.mulf %25, %320 : vector<16x128xf32>
    %322 = arith.addf %300, %303 : vector<16x128xf32>
    %323 = arith.addf %306, %309 : vector<16x128xf32>
    %324 = arith.addf %312, %315 : vector<16x128xf32>
    %325 = arith.addf %318, %321 : vector<16x128xf32>
    %326 = arith.addf %322, %323 : vector<16x128xf32>
    %327 = arith.addf %324, %325 : vector<16x128xf32>
    %328 = arith.addf %326, %327 : vector<16x128xf32>
    %c16 = arith.constant 16 : index
    %c0_303 = arith.constant 0 : index
    %c0_304 = arith.constant 0 : index
    %329 = vector.load %arg4[%c16, %c0_303, %c0_304] : memref<20x16x128xf32, #tpu.memory_space<vmem>>, vector<1x16x128xf32>
    %330 = vector.shape_cast %329 : vector<1x16x128xf32> to vector<16x128xf32>
    %331 = vector.shape_cast %328 : vector<16x128xf32> to vector<1x16x128xf32>
    tpu.vector_store %arg4[%c16, %c0_303, %c0_304], %331 {strides = array<i32>} : memref<20x16x128xf32, #tpu.memory_space<vmem>>, vector<1x16x128xf32>,
    %c9 = arith.constant 9 : index
    %c0_305 = arith.constant 0 : index
    %c0_306 = arith.constant 0 : index
    %c0_307 = arith.constant 0 : index
    %332 = vector.load %arg2[%c9, %c0_305, %c0_306, %c0_307] : memref<10x8x16x128xf32, #tpu.memory_space<vmem>>, vector<1x1x16x128xf32>
    %333 = vector.shape_cast %332 : vector<1x1x16x128xf32> to vector<16x128xf32>
    %334 = arith.mulf %4, %333 : vector<16x128xf32>
    %c9_308 = arith.constant 9 : index
    %c1_309 = arith.constant 1 : index
    %c0_310 = arith.constant 0 : index
    %c0_311 = arith.constant 0 : index
    %335 = vector.load %arg2[%c9_308, %c1_309, %c0_310, %c0_311] : memref<10x8x16x128xf32, #tpu.memory_space<vmem>>, vector<1x1x16x128xf32>
    %336 = vector.shape_cast %335 : vector<1x1x16x128xf32> to vector<16x128xf32>
    %337 = arith.mulf %7, %336 : vector<16x128xf32>
    %c9_312 = arith.constant 9 : index
    %c2_313 = arith.constant 2 : index
    %c0_314 = arith.constant 0 : index
    %c0_315 = arith.constant 0 : index
    %338 = vector.load %arg2[%c9_312, %c2_313, %c0_314, %c0_315] : memref<10x8x16x128xf32, #tpu.memory_space<vmem>>, vector<1x1x16x128xf32>
    %339 = vector.shape_cast %338 : vector<1x1x16x128xf32> to vector<16x128xf32>
    %340 = arith.mulf %10, %339 : vector<16x128xf32>
    %c9_316 = arith.constant 9 : index
    %c3_317 = arith.constant 3 : index
    %c0_318 = arith.constant 0 : index
    %c0_319 = arith.constant 0 : index
    %341 = vector.load %arg2[%c9_316, %c3_317, %c0_318, %c0_319] : memref<10x8x16x128xf32, #tpu.memory_space<vmem>>, vector<1x1x16x128xf32>
    %342 = vector.shape_cast %341 : vector<1x1x16x128xf32> to vector<16x128xf32>
    %343 = arith.mulf %13, %342 : vector<16x128xf32>
    %c9_320 = arith.constant 9 : index
    %c4_321 = arith.constant 4 : index
    %c0_322 = arith.constant 0 : index
    %c0_323 = arith.constant 0 : index
    %344 = vector.load %arg2[%c9_320, %c4_321, %c0_322, %c0_323] : memref<10x8x16x128xf32, #tpu.memory_space<vmem>>, vector<1x1x16x128xf32>
    %345 = vector.shape_cast %344 : vector<1x1x16x128xf32> to vector<16x128xf32>
    %346 = arith.mulf %16, %345 : vector<16x128xf32>
    %c9_324 = arith.constant 9 : index
    %c5_325 = arith.constant 5 : index
    %c0_326 = arith.constant 0 : index
    %c0_327 = arith.constant 0 : index
    %347 = vector.load %arg2[%c9_324, %c5_325, %c0_326, %c0_327] : memref<10x8x16x128xf32, #tpu.memory_space<vmem>>, vector<1x1x16x128xf32>
    %348 = vector.shape_cast %347 : vector<1x1x16x128xf32> to vector<16x128xf32>
    %349 = arith.mulf %19, %348 : vector<16x128xf32>
    %c9_328 = arith.constant 9 : index
    %c6_329 = arith.constant 6 : index
    %c0_330 = arith.constant 0 : index
    %c0_331 = arith.constant 0 : index
    %350 = vector.load %arg2[%c9_328, %c6_329, %c0_330, %c0_331] : memref<10x8x16x128xf32, #tpu.memory_space<vmem>>, vector<1x1x16x128xf32>
    %351 = vector.shape_cast %350 : vector<1x1x16x128xf32> to vector<16x128xf32>
    %352 = arith.mulf %22, %351 : vector<16x128xf32>
    %c9_332 = arith.constant 9 : index
    %c7_333 = arith.constant 7 : index
    %c0_334 = arith.constant 0 : index
    %c0_335 = arith.constant 0 : index
    %353 = vector.load %arg2[%c9_332, %c7_333, %c0_334, %c0_335] : memref<10x8x16x128xf32, #tpu.memory_space<vmem>>, vector<1x1x16x128xf32>
    %354 = vector.shape_cast %353 : vector<1x1x16x128xf32> to vector<16x128xf32>
    %355 = arith.mulf %25, %354 : vector<16x128xf32>
    %356 = arith.addf %334, %337 : vector<16x128xf32>
    %357 = arith.addf %340, %343 : vector<16x128xf32>
    %358 = arith.addf %346, %349 : vector<16x128xf32>
    %359 = arith.addf %352, %355 : vector<16x128xf32>
    %360 = arith.addf %356, %357 : vector<16x128xf32>
    %361 = arith.addf %358, %359 : vector<16x128xf32>
    %362 = arith.addf %360, %361 : vector<16x128xf32>
    %c18 = arith.constant 18 : index
    %c0_336 = arith.constant 0 : index
    %c0_337 = arith.constant 0 : index
    %363 = vector.load %arg4[%c18, %c0_336, %c0_337] : memref<20x16x128xf32, #tpu.memory_space<vmem>>, vector<1x16x128xf32>
    %364 = vector.shape_cast %363 : vector<1x16x128xf32> to vector<16x128xf32>
    %365 = vector.shape_cast %362 : vector<16x128xf32> to vector<1x16x128xf32>
    tpu.vector_store %arg4[%c18, %c0_336, %c0_337], %365 {strides = array<i32>} : memref<20x16x128xf32, #tpu.memory_space<vmem>>, vector<1x16x128xf32>,
    %c1_338 = arith.constant 1 : index
    %c0_339 = arith.constant 0 : index
    %c0_340 = arith.constant 0 : index
    %366 = vector.load %arg1[%c1_338, %c0_339, %c0_340] : memref<2x8x128xf32, #tpu.memory_space<vmem>>, vector<1x8x128xf32>
    %367 = vector.shape_cast %366 : vector<1x8x128xf32> to vector<8x128xf32>
    %368 = vector.extract_strided_slice %367 {offsets = [0, 0], sizes = [1, 128], strides = [1, 1]} : vector<8x128xf32> to vector<1x128xf32>
    %369 = vector.shape_cast %368 : vector<1x128xf32> to vector<1x128xf32>
    %370 = vector.broadcast %369 : vector<1x128xf32> to vector<16x128xf32>
    %371 = vector.extract_strided_slice %367 {offsets = [1, 0], sizes = [1, 128], strides = [1, 1]} : vector<8x128xf32> to vector<1x128xf32>
    %372 = vector.shape_cast %371 : vector<1x128xf32> to vector<1x128xf32>
    %373 = vector.broadcast %372 : vector<1x128xf32> to vector<16x128xf32>
    %374 = vector.extract_strided_slice %367 {offsets = [2, 0], sizes = [1, 128], strides = [1, 1]} : vector<8x128xf32> to vector<1x128xf32>
    %375 = vector.shape_cast %374 : vector<1x128xf32> to vector<1x128xf32>
    %376 = vector.broadcast %375 : vector<1x128xf32> to vector<16x128xf32>
    %377 = vector.extract_strided_slice %367 {offsets = [3, 0], sizes = [1, 128], strides = [1, 1]} : vector<8x128xf32> to vector<1x128xf32>
    %378 = vector.shape_cast %377 : vector<1x128xf32> to vector<1x128xf32>
    %379 = vector.broadcast %378 : vector<1x128xf32> to vector<16x128xf32>
    %380 = vector.extract_strided_slice %367 {offsets = [4, 0], sizes = [1, 128], strides = [1, 1]} : vector<8x128xf32> to vector<1x128xf32>
    %381 = vector.shape_cast %380 : vector<1x128xf32> to vector<1x128xf32>
    %382 = vector.broadcast %381 : vector<1x128xf32> to vector<16x128xf32>
    %383 = vector.extract_strided_slice %367 {offsets = [5, 0], sizes = [1, 128], strides = [1, 1]} : vector<8x128xf32> to vector<1x128xf32>
    %384 = vector.shape_cast %383 : vector<1x128xf32> to vector<1x128xf32>
    %385 = vector.broadcast %384 : vector<1x128xf32> to vector<16x128xf32>
    %386 = vector.extract_strided_slice %367 {offsets = [6, 0], sizes = [1, 128], strides = [1, 1]} : vector<8x128xf32> to vector<1x128xf32>
    %387 = vector.shape_cast %386 : vector<1x128xf32> to vector<1x128xf32>
    %388 = vector.broadcast %387 : vector<1x128xf32> to vector<16x128xf32>
    %389 = vector.extract_strided_slice %367 {offsets = [7, 0], sizes = [1, 128], strides = [1, 1]} : vector<8x128xf32> to vector<1x128xf32>
    %390 = vector.shape_cast %389 : vector<1x128xf32> to vector<1x128xf32>
    %391 = vector.broadcast %390 : vector<1x128xf32> to vector<16x128xf32>
    %c0_341 = arith.constant 0 : index
    %c0_342 = arith.constant 0 : index
    %c0_343 = arith.constant 0 : index
    %c0_344 = arith.constant 0 : index
    %392 = vector.load %arg2[%c0_341, %c0_342, %c0_343, %c0_344] : memref<10x8x16x128xf32, #tpu.memory_space<vmem>>, vector<1x1x16x128xf32>
    %393 = vector.shape_cast %392 : vector<1x1x16x128xf32> to vector<16x128xf32>
    %394 = arith.mulf %370, %393 : vector<16x128xf32>
    %c0_345 = arith.constant 0 : index
    %c1_346 = arith.constant 1 : index
    %c0_347 = arith.constant 0 : index
    %c0_348 = arith.constant 0 : index
    %395 = vector.load %arg2[%c0_345, %c1_346, %c0_347, %c0_348] : memref<10x8x16x128xf32, #tpu.memory_space<vmem>>, vector<1x1x16x128xf32>
    %396 = vector.shape_cast %395 : vector<1x1x16x128xf32> to vector<16x128xf32>
    %397 = arith.mulf %373, %396 : vector<16x128xf32>
    %c0_349 = arith.constant 0 : index
    %c2_350 = arith.constant 2 : index
    %c0_351 = arith.constant 0 : index
    %c0_352 = arith.constant 0 : index
    %398 = vector.load %arg2[%c0_349, %c2_350, %c0_351, %c0_352] : memref<10x8x16x128xf32, #tpu.memory_space<vmem>>, vector<1x1x16x128xf32>
    %399 = vector.shape_cast %398 : vector<1x1x16x128xf32> to vector<16x128xf32>
    %400 = arith.mulf %376, %399 : vector<16x128xf32>
    %c0_353 = arith.constant 0 : index
    %c3_354 = arith.constant 3 : index
    %c0_355 = arith.constant 0 : index
    %c0_356 = arith.constant 0 : index
    %401 = vector.load %arg2[%c0_353, %c3_354, %c0_355, %c0_356] : memref<10x8x16x128xf32, #tpu.memory_space<vmem>>, vector<1x1x16x128xf32>
    %402 = vector.shape_cast %401 : vector<1x1x16x128xf32> to vector<16x128xf32>
    %403 = arith.mulf %379, %402 : vector<16x128xf32>
    %c0_357 = arith.constant 0 : index
    %c4_358 = arith.constant 4 : index
    %c0_359 = arith.constant 0 : index
    %c0_360 = arith.constant 0 : index
    %404 = vector.load %arg2[%c0_357, %c4_358, %c0_359, %c0_360] : memref<10x8x16x128xf32, #tpu.memory_space<vmem>>, vector<1x1x16x128xf32>
    %405 = vector.shape_cast %404 : vector<1x1x16x128xf32> to vector<16x128xf32>
    %406 = arith.mulf %382, %405 : vector<16x128xf32>
    %c0_361 = arith.constant 0 : index
    %c5_362 = arith.constant 5 : index
    %c0_363 = arith.constant 0 : index
    %c0_364 = arith.constant 0 : index
    %407 = vector.load %arg2[%c0_361, %c5_362, %c0_363, %c0_364] : memref<10x8x16x128xf32, #tpu.memory_space<vmem>>, vector<1x1x16x128xf32>
    %408 = vector.shape_cast %407 : vector<1x1x16x128xf32> to vector<16x128xf32>
    %409 = arith.mulf %385, %408 : vector<16x128xf32>
    %c0_365 = arith.constant 0 : index
    %c6_366 = arith.constant 6 : index
    %c0_367 = arith.constant 0 : index
    %c0_368 = arith.constant 0 : index
    %410 = vector.load %arg2[%c0_365, %c6_366, %c0_367, %c0_368] : memref<10x8x16x128xf32, #tpu.memory_space<vmem>>, vector<1x1x16x128xf32>
    %411 = vector.shape_cast %410 : vector<1x1x16x128xf32> to vector<16x128xf32>
    %412 = arith.mulf %388, %411 : vector<16x128xf32>
    %c0_369 = arith.constant 0 : index
    %c7_370 = arith.constant 7 : index
    %c0_371 = arith.constant 0 : index
    %c0_372 = arith.constant 0 : index
    %413 = vector.load %arg2[%c0_369, %c7_370, %c0_371, %c0_372] : memref<10x8x16x128xf32, #tpu.memory_space<vmem>>, vector<1x1x16x128xf32>
    %414 = vector.shape_cast %413 : vector<1x1x16x128xf32> to vector<16x128xf32>
    %415 = arith.mulf %391, %414 : vector<16x128xf32>
    %416 = arith.addf %394, %397 : vector<16x128xf32>
    %417 = arith.addf %400, %403 : vector<16x128xf32>
    %418 = arith.addf %406, %409 : vector<16x128xf32>
    %419 = arith.addf %412, %415 : vector<16x128xf32>
    %420 = arith.addf %416, %417 : vector<16x128xf32>
    %421 = arith.addf %418, %419 : vector<16x128xf32>
    %422 = arith.addf %420, %421 : vector<16x128xf32>
    %c1_373 = arith.constant 1 : index
    %c0_374 = arith.constant 0 : index
    %c0_375 = arith.constant 0 : index
    %423 = vector.load %arg4[%c1_373, %c0_374, %c0_375] : memref<20x16x128xf32, #tpu.memory_space<vmem>>, vector<1x16x128xf32>
    %424 = vector.shape_cast %423 : vector<1x16x128xf32> to vector<16x128xf32>
    %425 = vector.shape_cast %422 : vector<16x128xf32> to vector<1x16x128xf32>
    tpu.vector_store %arg4[%c1_373, %c0_374, %c0_375], %425 {strides = array<i32>} : memref<20x16x128xf32, #tpu.memory_space<vmem>>, vector<1x16x128xf32>,
    %c1_376 = arith.constant 1 : index
    %c0_377 = arith.constant 0 : index
    %c0_378 = arith.constant 0 : index
    %c0_379 = arith.constant 0 : index
    %426 = vector.load %arg2[%c1_376, %c0_377, %c0_378, %c0_379] : memref<10x8x16x128xf32, #tpu.memory_space<vmem>>, vector<1x1x16x128xf32>
    %427 = vector.shape_cast %426 : vector<1x1x16x128xf32> to vector<16x128xf32>
    %428 = arith.mulf %370, %427 : vector<16x128xf32>
    %c1_380 = arith.constant 1 : index
    %c1_381 = arith.constant 1 : index
    %c0_382 = arith.constant 0 : index
    %c0_383 = arith.constant 0 : index
    %429 = vector.load %arg2[%c1_380, %c1_381, %c0_382, %c0_383] : memref<10x8x16x128xf32, #tpu.memory_space<vmem>>, vector<1x1x16x128xf32>
    %430 = vector.shape_cast %429 : vector<1x1x16x128xf32> to vector<16x128xf32>
    %431 = arith.mulf %373, %430 : vector<16x128xf32>
    %c1_384 = arith.constant 1 : index
    %c2_385 = arith.constant 2 : index
    %c0_386 = arith.constant 0 : index
    %c0_387 = arith.constant 0 : index
    %432 = vector.load %arg2[%c1_384, %c2_385, %c0_386, %c0_387] : memref<10x8x16x128xf32, #tpu.memory_space<vmem>>, vector<1x1x16x128xf32>
    %433 = vector.shape_cast %432 : vector<1x1x16x128xf32> to vector<16x128xf32>
    %434 = arith.mulf %376, %433 : vector<16x128xf32>
    %c1_388 = arith.constant 1 : index
    %c3_389 = arith.constant 3 : index
    %c0_390 = arith.constant 0 : index
    %c0_391 = arith.constant 0 : index
    %435 = vector.load %arg2[%c1_388, %c3_389, %c0_390, %c0_391] : memref<10x8x16x128xf32, #tpu.memory_space<vmem>>, vector<1x1x16x128xf32>
    %436 = vector.shape_cast %435 : vector<1x1x16x128xf32> to vector<16x128xf32>
    %437 = arith.mulf %379, %436 : vector<16x128xf32>
    %c1_392 = arith.constant 1 : index
    %c4_393 = arith.constant 4 : index
    %c0_394 = arith.constant 0 : index
    %c0_395 = arith.constant 0 : index
    %438 = vector.load %arg2[%c1_392, %c4_393, %c0_394, %c0_395] : memref<10x8x16x128xf32, #tpu.memory_space<vmem>>, vector<1x1x16x128xf32>
    %439 = vector.shape_cast %438 : vector<1x1x16x128xf32> to vector<16x128xf32>
    %440 = arith.mulf %382, %439 : vector<16x128xf32>
    %c1_396 = arith.constant 1 : index
    %c5_397 = arith.constant 5 : index
    %c0_398 = arith.constant 0 : index
    %c0_399 = arith.constant 0 : index
    %441 = vector.load %arg2[%c1_396, %c5_397, %c0_398, %c0_399] : memref<10x8x16x128xf32, #tpu.memory_space<vmem>>, vector<1x1x16x128xf32>
    %442 = vector.shape_cast %441 : vector<1x1x16x128xf32> to vector<16x128xf32>
    %443 = arith.mulf %385, %442 : vector<16x128xf32>
    %c1_400 = arith.constant 1 : index
    %c6_401 = arith.constant 6 : index
    %c0_402 = arith.constant 0 : index
    %c0_403 = arith.constant 0 : index
    %444 = vector.load %arg2[%c1_400, %c6_401, %c0_402, %c0_403] : memref<10x8x16x128xf32, #tpu.memory_space<vmem>>, vector<1x1x16x128xf32>
    %445 = vector.shape_cast %444 : vector<1x1x16x128xf32> to vector<16x128xf32>
    %446 = arith.mulf %388, %445 : vector<16x128xf32>
    %c1_404 = arith.constant 1 : index
    %c7_405 = arith.constant 7 : index
    %c0_406 = arith.constant 0 : index
    %c0_407 = arith.constant 0 : index
    %447 = vector.load %arg2[%c1_404, %c7_405, %c0_406, %c0_407] : memref<10x8x16x128xf32, #tpu.memory_space<vmem>>, vector<1x1x16x128xf32>
    %448 = vector.shape_cast %447 : vector<1x1x16x128xf32> to vector<16x128xf32>
    %449 = arith.mulf %391, %448 : vector<16x128xf32>
    %450 = arith.addf %428, %431 : vector<16x128xf32>
    %451 = arith.addf %434, %437 : vector<16x128xf32>
    %452 = arith.addf %440, %443 : vector<16x128xf32>
    %453 = arith.addf %446, %449 : vector<16x128xf32>
    %454 = arith.addf %450, %451 : vector<16x128xf32>
    %455 = arith.addf %452, %453 : vector<16x128xf32>
    %456 = arith.addf %454, %455 : vector<16x128xf32>
    %c3_408 = arith.constant 3 : index
    %c0_409 = arith.constant 0 : index
    %c0_410 = arith.constant 0 : index
    %457 = vector.load %arg4[%c3_408, %c0_409, %c0_410] : memref<20x16x128xf32, #tpu.memory_space<vmem>>, vector<1x16x128xf32>
    %458 = vector.shape_cast %457 : vector<1x16x128xf32> to vector<16x128xf32>
    %459 = vector.shape_cast %456 : vector<16x128xf32> to vector<1x16x128xf32>
    tpu.vector_store %arg4[%c3_408, %c0_409, %c0_410], %459 {strides = array<i32>} : memref<20x16x128xf32, #tpu.memory_space<vmem>>, vector<1x16x128xf32>,
    %c2_411 = arith.constant 2 : index
    %c0_412 = arith.constant 0 : index
    %c0_413 = arith.constant 0 : index
    %c0_414 = arith.constant 0 : index
    %460 = vector.load %arg2[%c2_411, %c0_412, %c0_413, %c0_414] : memref<10x8x16x128xf32, #tpu.memory_space<vmem>>, vector<1x1x16x128xf32>
    %461 = vector.shape_cast %460 : vector<1x1x16x128xf32> to vector<16x128xf32>
    %462 = arith.mulf %370, %461 : vector<16x128xf32>
    %c2_415 = arith.constant 2 : index
    %c1_416 = arith.constant 1 : index
    %c0_417 = arith.constant 0 : index
    %c0_418 = arith.constant 0 : index
    %463 = vector.load %arg2[%c2_415, %c1_416, %c0_417, %c0_418] : memref<10x8x16x128xf32, #tpu.memory_space<vmem>>, vector<1x1x16x128xf32>
    %464 = vector.shape_cast %463 : vector<1x1x16x128xf32> to vector<16x128xf32>
    %465 = arith.mulf %373, %464 : vector<16x128xf32>
    %c2_419 = arith.constant 2 : index
    %c2_420 = arith.constant 2 : index
    %c0_421 = arith.constant 0 : index
    %c0_422 = arith.constant 0 : index
    %466 = vector.load %arg2[%c2_419, %c2_420, %c0_421, %c0_422] : memref<10x8x16x128xf32, #tpu.memory_space<vmem>>, vector<1x1x16x128xf32>
    %467 = vector.shape_cast %466 : vector<1x1x16x128xf32> to vector<16x128xf32>
    %468 = arith.mulf %376, %467 : vector<16x128xf32>
    %c2_423 = arith.constant 2 : index
    %c3_424 = arith.constant 3 : index
    %c0_425 = arith.constant 0 : index
    %c0_426 = arith.constant 0 : index
    %469 = vector.load %arg2[%c2_423, %c3_424, %c0_425, %c0_426] : memref<10x8x16x128xf32, #tpu.memory_space<vmem>>, vector<1x1x16x128xf32>
    %470 = vector.shape_cast %469 : vector<1x1x16x128xf32> to vector<16x128xf32>
    %471 = arith.mulf %379, %470 : vector<16x128xf32>
    %c2_427 = arith.constant 2 : index
    %c4_428 = arith.constant 4 : index
    %c0_429 = arith.constant 0 : index
    %c0_430 = arith.constant 0 : index
    %472 = vector.load %arg2[%c2_427, %c4_428, %c0_429, %c0_430] : memref<10x8x16x128xf32, #tpu.memory_space<vmem>>, vector<1x1x16x128xf32>
    %473 = vector.shape_cast %472 : vector<1x1x16x128xf32> to vector<16x128xf32>
    %474 = arith.mulf %382, %473 : vector<16x128xf32>
    %c2_431 = arith.constant 2 : index
    %c5_432 = arith.constant 5 : index
    %c0_433 = arith.constant 0 : index
    %c0_434 = arith.constant 0 : index
    %475 = vector.load %arg2[%c2_431, %c5_432, %c0_433, %c0_434] : memref<10x8x16x128xf32, #tpu.memory_space<vmem>>, vector<1x1x16x128xf32>
    %476 = vector.shape_cast %475 : vector<1x1x16x128xf32> to vector<16x128xf32>
    %477 = arith.mulf %385, %476 : vector<16x128xf32>
    %c2_435 = arith.constant 2 : index
    %c6_436 = arith.constant 6 : index
    %c0_437 = arith.constant 0 : index
    %c0_438 = arith.constant 0 : index
    %478 = vector.load %arg2[%c2_435, %c6_436, %c0_437, %c0_438] : memref<10x8x16x128xf32, #tpu.memory_space<vmem>>, vector<1x1x16x128xf32>
    %479 = vector.shape_cast %478 : vector<1x1x16x128xf32> to vector<16x128xf32>
    %480 = arith.mulf %388, %479 : vector<16x128xf32>
    %c2_439 = arith.constant 2 : index
    %c7_440 = arith.constant 7 : index
    %c0_441 = arith.constant 0 : index
    %c0_442 = arith.constant 0 : index
    %481 = vector.load %arg2[%c2_439, %c7_440, %c0_441, %c0_442] : memref<10x8x16x128xf32, #tpu.memory_space<vmem>>, vector<1x1x16x128xf32>
    %482 = vector.shape_cast %481 : vector<1x1x16x128xf32> to vector<16x128xf32>
    %483 = arith.mulf %391, %482 : vector<16x128xf32>
    %484 = arith.addf %462, %465 : vector<16x128xf32>
    %485 = arith.addf %468, %471 : vector<16x128xf32>
    %486 = arith.addf %474, %477 : vector<16x128xf32>
    %487 = arith.addf %480, %483 : vector<16x128xf32>
    %488 = arith.addf %484, %485 : vector<16x128xf32>
    %489 = arith.addf %486, %487 : vector<16x128xf32>
    %490 = arith.addf %488, %489 : vector<16x128xf32>
    %c5_443 = arith.constant 5 : index
    %c0_444 = arith.constant 0 : index
    %c0_445 = arith.constant 0 : index
    %491 = vector.load %arg4[%c5_443, %c0_444, %c0_445] : memref<20x16x128xf32, #tpu.memory_space<vmem>>, vector<1x16x128xf32>
    %492 = vector.shape_cast %491 : vector<1x16x128xf32> to vector<16x128xf32>
    %493 = vector.shape_cast %490 : vector<16x128xf32> to vector<1x16x128xf32>
    tpu.vector_store %arg4[%c5_443, %c0_444, %c0_445], %493 {strides = array<i32>} : memref<20x16x128xf32, #tpu.memory_space<vmem>>, vector<1x16x128xf32>,
    %c3_446 = arith.constant 3 : index
    %c0_447 = arith.constant 0 : index
    %c0_448 = arith.constant 0 : index
    %c0_449 = arith.constant 0 : index
    %494 = vector.load %arg2[%c3_446, %c0_447, %c0_448, %c0_449] : memref<10x8x16x128xf32, #tpu.memory_space<vmem>>, vector<1x1x16x128xf32>
    %495 = vector.shape_cast %494 : vector<1x1x16x128xf32> to vector<16x128xf32>
    %496 = arith.mulf %370, %495 : vector<16x128xf32>
    %c3_450 = arith.constant 3 : index
    %c1_451 = arith.constant 1 : index
    %c0_452 = arith.constant 0 : index
    %c0_453 = arith.constant 0 : index
    %497 = vector.load %arg2[%c3_450, %c1_451, %c0_452, %c0_453] : memref<10x8x16x128xf32, #tpu.memory_space<vmem>>, vector<1x1x16x128xf32>
    %498 = vector.shape_cast %497 : vector<1x1x16x128xf32> to vector<16x128xf32>
    %499 = arith.mulf %373, %498 : vector<16x128xf32>
    %c3_454 = arith.constant 3 : index
    %c2_455 = arith.constant 2 : index
    %c0_456 = arith.constant 0 : index
    %c0_457 = arith.constant 0 : index
    %500 = vector.load %arg2[%c3_454, %c2_455, %c0_456, %c0_457] : memref<10x8x16x128xf32, #tpu.memory_space<vmem>>, vector<1x1x16x128xf32>
    %501 = vector.shape_cast %500 : vector<1x1x16x128xf32> to vector<16x128xf32>
    %502 = arith.mulf %376, %501 : vector<16x128xf32>
    %c3_458 = arith.constant 3 : index
    %c3_459 = arith.constant 3 : index
    %c0_460 = arith.constant 0 : index
    %c0_461 = arith.constant 0 : index
    %503 = vector.load %arg2[%c3_458, %c3_459, %c0_460, %c0_461] : memref<10x8x16x128xf32, #tpu.memory_space<vmem>>, vector<1x1x16x128xf32>
    %504 = vector.shape_cast %503 : vector<1x1x16x128xf32> to vector<16x128xf32>
    %505 = arith.mulf %379, %504 : vector<16x128xf32>
    %c3_462 = arith.constant 3 : index
    %c4_463 = arith.constant 4 : index
    %c0_464 = arith.constant 0 : index
    %c0_465 = arith.constant 0 : index
    %506 = vector.load %arg2[%c3_462, %c4_463, %c0_464, %c0_465] : memref<10x8x16x128xf32, #tpu.memory_space<vmem>>, vector<1x1x16x128xf32>
    %507 = vector.shape_cast %506 : vector<1x1x16x128xf32> to vector<16x128xf32>
    %508 = arith.mulf %382, %507 : vector<16x128xf32>
    %c3_466 = arith.constant 3 : index
    %c5_467 = arith.constant 5 : index
    %c0_468 = arith.constant 0 : index
    %c0_469 = arith.constant 0 : index
    %509 = vector.load %arg2[%c3_466, %c5_467, %c0_468, %c0_469] : memref<10x8x16x128xf32, #tpu.memory_space<vmem>>, vector<1x1x16x128xf32>
    %510 = vector.shape_cast %509 : vector<1x1x16x128xf32> to vector<16x128xf32>
    %511 = arith.mulf %385, %510 : vector<16x128xf32>
    %c3_470 = arith.constant 3 : index
    %c6_471 = arith.constant 6 : index
    %c0_472 = arith.constant 0 : index
    %c0_473 = arith.constant 0 : index
    %512 = vector.load %arg2[%c3_470, %c6_471, %c0_472, %c0_473] : memref<10x8x16x128xf32, #tpu.memory_space<vmem>>, vector<1x1x16x128xf32>
    %513 = vector.shape_cast %512 : vector<1x1x16x128xf32> to vector<16x128xf32>
    %514 = arith.mulf %388, %513 : vector<16x128xf32>
    %c3_474 = arith.constant 3 : index
    %c7_475 = arith.constant 7 : index
    %c0_476 = arith.constant 0 : index
    %c0_477 = arith.constant 0 : index
    %515 = vector.load %arg2[%c3_474, %c7_475, %c0_476, %c0_477] : memref<10x8x16x128xf32, #tpu.memory_space<vmem>>, vector<1x1x16x128xf32>
    %516 = vector.shape_cast %515 : vector<1x1x16x128xf32> to vector<16x128xf32>
    %517 = arith.mulf %391, %516 : vector<16x128xf32>
    %518 = arith.addf %496, %499 : vector<16x128xf32>
    %519 = arith.addf %502, %505 : vector<16x128xf32>
    %520 = arith.addf %508, %511 : vector<16x128xf32>
    %521 = arith.addf %514, %517 : vector<16x128xf32>
    %522 = arith.addf %518, %519 : vector<16x128xf32>
    %523 = arith.addf %520, %521 : vector<16x128xf32>
    %524 = arith.addf %522, %523 : vector<16x128xf32>
    %c7_478 = arith.constant 7 : index
    %c0_479 = arith.constant 0 : index
    %c0_480 = arith.constant 0 : index
    %525 = vector.load %arg4[%c7_478, %c0_479, %c0_480] : memref<20x16x128xf32, #tpu.memory_space<vmem>>, vector<1x16x128xf32>
    %526 = vector.shape_cast %525 : vector<1x16x128xf32> to vector<16x128xf32>
    %527 = vector.shape_cast %524 : vector<16x128xf32> to vector<1x16x128xf32>
    tpu.vector_store %arg4[%c7_478, %c0_479, %c0_480], %527 {strides = array<i32>} : memref<20x16x128xf32, #tpu.memory_space<vmem>>, vector<1x16x128xf32>,
    %c4_481 = arith.constant 4 : index
    %c0_482 = arith.constant 0 : index
    %c0_483 = arith.constant 0 : index
    %c0_484 = arith.constant 0 : index
    %528 = vector.load %arg2[%c4_481, %c0_482, %c0_483, %c0_484] : memref<10x8x16x128xf32, #tpu.memory_space<vmem>>, vector<1x1x16x128xf32>
    %529 = vector.shape_cast %528 : vector<1x1x16x128xf32> to vector<16x128xf32>
    %530 = arith.mulf %370, %529 : vector<16x128xf32>
    %c4_485 = arith.constant 4 : index
    %c1_486 = arith.constant 1 : index
    %c0_487 = arith.constant 0 : index
    %c0_488 = arith.constant 0 : index
    %531 = vector.load %arg2[%c4_485, %c1_486, %c0_487, %c0_488] : memref<10x8x16x128xf32, #tpu.memory_space<vmem>>, vector<1x1x16x128xf32>
    %532 = vector.shape_cast %531 : vector<1x1x16x128xf32> to vector<16x128xf32>
    %533 = arith.mulf %373, %532 : vector<16x128xf32>
    %c4_489 = arith.constant 4 : index
    %c2_490 = arith.constant 2 : index
    %c0_491 = arith.constant 0 : index
    %c0_492 = arith.constant 0 : index
    %534 = vector.load %arg2[%c4_489, %c2_490, %c0_491, %c0_492] : memref<10x8x16x128xf32, #tpu.memory_space<vmem>>, vector<1x1x16x128xf32>
    %535 = vector.shape_cast %534 : vector<1x1x16x128xf32> to vector<16x128xf32>
    %536 = arith.mulf %376, %535 : vector<16x128xf32>
    %c4_493 = arith.constant 4 : index
    %c3_494 = arith.constant 3 : index
    %c0_495 = arith.constant 0 : index
    %c0_496 = arith.constant 0 : index
    %537 = vector.load %arg2[%c4_493, %c3_494, %c0_495, %c0_496] : memref<10x8x16x128xf32, #tpu.memory_space<vmem>>, vector<1x1x16x128xf32>
    %538 = vector.shape_cast %537 : vector<1x1x16x128xf32> to vector<16x128xf32>
    %539 = arith.mulf %379, %538 : vector<16x128xf32>
    %c4_497 = arith.constant 4 : index
    %c4_498 = arith.constant 4 : index
    %c0_499 = arith.constant 0 : index
    %c0_500 = arith.constant 0 : index
    %540 = vector.load %arg2[%c4_497, %c4_498, %c0_499, %c0_500] : memref<10x8x16x128xf32, #tpu.memory_space<vmem>>, vector<1x1x16x128xf32>
    %541 = vector.shape_cast %540 : vector<1x1x16x128xf32> to vector<16x128xf32>
    %542 = arith.mulf %382, %541 : vector<16x128xf32>
    %c4_501 = arith.constant 4 : index
    %c5_502 = arith.constant 5 : index
    %c0_503 = arith.constant 0 : index
    %c0_504 = arith.constant 0 : index
    %543 = vector.load %arg2[%c4_501, %c5_502, %c0_503, %c0_504] : memref<10x8x16x128xf32, #tpu.memory_space<vmem>>, vector<1x1x16x128xf32>
    %544 = vector.shape_cast %543 : vector<1x1x16x128xf32> to vector<16x128xf32>
    %545 = arith.mulf %385, %544 : vector<16x128xf32>
    %c4_505 = arith.constant 4 : index
    %c6_506 = arith.constant 6 : index
    %c0_507 = arith.constant 0 : index
    %c0_508 = arith.constant 0 : index
    %546 = vector.load %arg2[%c4_505, %c6_506, %c0_507, %c0_508] : memref<10x8x16x128xf32, #tpu.memory_space<vmem>>, vector<1x1x16x128xf32>
    %547 = vector.shape_cast %546 : vector<1x1x16x128xf32> to vector<16x128xf32>
    %548 = arith.mulf %388, %547 : vector<16x128xf32>
    %c4_509 = arith.constant 4 : index
    %c7_510 = arith.constant 7 : index
    %c0_511 = arith.constant 0 : index
    %c0_512 = arith.constant 0 : index
    %549 = vector.load %arg2[%c4_509, %c7_510, %c0_511, %c0_512] : memref<10x8x16x128xf32, #tpu.memory_space<vmem>>, vector<1x1x16x128xf32>
    %550 = vector.shape_cast %549 : vector<1x1x16x128xf32> to vector<16x128xf32>
    %551 = arith.mulf %391, %550 : vector<16x128xf32>
    %552 = arith.addf %530, %533 : vector<16x128xf32>
    %553 = arith.addf %536, %539 : vector<16x128xf32>
    %554 = arith.addf %542, %545 : vector<16x128xf32>
    %555 = arith.addf %548, %551 : vector<16x128xf32>
    %556 = arith.addf %552, %553 : vector<16x128xf32>
    %557 = arith.addf %554, %555 : vector<16x128xf32>
    %558 = arith.addf %556, %557 : vector<16x128xf32>
    %c9_513 = arith.constant 9 : index
    %c0_514 = arith.constant 0 : index
    %c0_515 = arith.constant 0 : index
    %559 = vector.load %arg4[%c9_513, %c0_514, %c0_515] : memref<20x16x128xf32, #tpu.memory_space<vmem>>, vector<1x16x128xf32>
    %560 = vector.shape_cast %559 : vector<1x16x128xf32> to vector<16x128xf32>
    %561 = vector.shape_cast %558 : vector<16x128xf32> to vector<1x16x128xf32>
    tpu.vector_store %arg4[%c9_513, %c0_514, %c0_515], %561 {strides = array<i32>} : memref<20x16x128xf32, #tpu.memory_space<vmem>>, vector<1x16x128xf32>,
    %c5_516 = arith.constant 5 : index
    %c0_517 = arith.constant 0 : index
    %c0_518 = arith.constant 0 : index
    %c0_519 = arith.constant 0 : index
    %562 = vector.load %arg2[%c5_516, %c0_517, %c0_518, %c0_519] : memref<10x8x16x128xf32, #tpu.memory_space<vmem>>, vector<1x1x16x128xf32>
    %563 = vector.shape_cast %562 : vector<1x1x16x128xf32> to vector<16x128xf32>
    %564 = arith.mulf %370, %563 : vector<16x128xf32>
    %c5_520 = arith.constant 5 : index
    %c1_521 = arith.constant 1 : index
    %c0_522 = arith.constant 0 : index
    %c0_523 = arith.constant 0 : index
    %565 = vector.load %arg2[%c5_520, %c1_521, %c0_522, %c0_523] : memref<10x8x16x128xf32, #tpu.memory_space<vmem>>, vector<1x1x16x128xf32>
    %566 = vector.shape_cast %565 : vector<1x1x16x128xf32> to vector<16x128xf32>
    %567 = arith.mulf %373, %566 : vector<16x128xf32>
    %c5_524 = arith.constant 5 : index
    %c2_525 = arith.constant 2 : index
    %c0_526 = arith.constant 0 : index
    %c0_527 = arith.constant 0 : index
    %568 = vector.load %arg2[%c5_524, %c2_525, %c0_526, %c0_527] : memref<10x8x16x128xf32, #tpu.memory_space<vmem>>, vector<1x1x16x128xf32>
    %569 = vector.shape_cast %568 : vector<1x1x16x128xf32> to vector<16x128xf32>
    %570 = arith.mulf %376, %569 : vector<16x128xf32>
    %c5_528 = arith.constant 5 : index
    %c3_529 = arith.constant 3 : index
    %c0_530 = arith.constant 0 : index
    %c0_531 = arith.constant 0 : index
    %571 = vector.load %arg2[%c5_528, %c3_529, %c0_530, %c0_531] : memref<10x8x16x128xf32, #tpu.memory_space<vmem>>, vector<1x1x16x128xf32>
    %572 = vector.shape_cast %571 : vector<1x1x16x128xf32> to vector<16x128xf32>
    %573 = arith.mulf %379, %572 : vector<16x128xf32>
    %c5_532 = arith.constant 5 : index
    %c4_533 = arith.constant 4 : index
    %c0_534 = arith.constant 0 : index
    %c0_535 = arith.constant 0 : index
    %574 = vector.load %arg2[%c5_532, %c4_533, %c0_534, %c0_535] : memref<10x8x16x128xf32, #tpu.memory_space<vmem>>, vector<1x1x16x128xf32>
    %575 = vector.shape_cast %574 : vector<1x1x16x128xf32> to vector<16x128xf32>
    %576 = arith.mulf %382, %575 : vector<16x128xf32>
    %c5_536 = arith.constant 5 : index
    %c5_537 = arith.constant 5 : index
    %c0_538 = arith.constant 0 : index
    %c0_539 = arith.constant 0 : index
    %577 = vector.load %arg2[%c5_536, %c5_537, %c0_538, %c0_539] : memref<10x8x16x128xf32, #tpu.memory_space<vmem>>, vector<1x1x16x128xf32>
    %578 = vector.shape_cast %577 : vector<1x1x16x128xf32> to vector<16x128xf32>
    %579 = arith.mulf %385, %578 : vector<16x128xf32>
    %c5_540 = arith.constant 5 : index
    %c6_541 = arith.constant 6 : index
    %c0_542 = arith.constant 0 : index
    %c0_543 = arith.constant 0 : index
    %580 = vector.load %arg2[%c5_540, %c6_541, %c0_542, %c0_543] : memref<10x8x16x128xf32, #tpu.memory_space<vmem>>, vector<1x1x16x128xf32>
    %581 = vector.shape_cast %580 : vector<1x1x16x128xf32> to vector<16x128xf32>
    %582 = arith.mulf %388, %581 : vector<16x128xf32>
    %c5_544 = arith.constant 5 : index
    %c7_545 = arith.constant 7 : index
    %c0_546 = arith.constant 0 : index
    %c0_547 = arith.constant 0 : index
    %583 = vector.load %arg2[%c5_544, %c7_545, %c0_546, %c0_547] : memref<10x8x16x128xf32, #tpu.memory_space<vmem>>, vector<1x1x16x128xf32>
    %584 = vector.shape_cast %583 : vector<1x1x16x128xf32> to vector<16x128xf32>
    %585 = arith.mulf %391, %584 : vector<16x128xf32>
    %586 = arith.addf %564, %567 : vector<16x128xf32>
    %587 = arith.addf %570, %573 : vector<16x128xf32>
    %588 = arith.addf %576, %579 : vector<16x128xf32>
    %589 = arith.addf %582, %585 : vector<16x128xf32>
    %590 = arith.addf %586, %587 : vector<16x128xf32>
    %591 = arith.addf %588, %589 : vector<16x128xf32>
    %592 = arith.addf %590, %591 : vector<16x128xf32>
    %c11 = arith.constant 11 : index
    %c0_548 = arith.constant 0 : index
    %c0_549 = arith.constant 0 : index
    %593 = vector.load %arg4[%c11, %c0_548, %c0_549] : memref<20x16x128xf32, #tpu.memory_space<vmem>>, vector<1x16x128xf32>
    %594 = vector.shape_cast %593 : vector<1x16x128xf32> to vector<16x128xf32>
    %595 = vector.shape_cast %592 : vector<16x128xf32> to vector<1x16x128xf32>
    tpu.vector_store %arg4[%c11, %c0_548, %c0_549], %595 {strides = array<i32>} : memref<20x16x128xf32, #tpu.memory_space<vmem>>, vector<1x16x128xf32>,
    %c6_550 = arith.constant 6 : index
    %c0_551 = arith.constant 0 : index
    %c0_552 = arith.constant 0 : index
    %c0_553 = arith.constant 0 : index
    %596 = vector.load %arg2[%c6_550, %c0_551, %c0_552, %c0_553] : memref<10x8x16x128xf32, #tpu.memory_space<vmem>>, vector<1x1x16x128xf32>
    %597 = vector.shape_cast %596 : vector<1x1x16x128xf32> to vector<16x128xf32>
    %598 = arith.mulf %370, %597 : vector<16x128xf32>
    %c6_554 = arith.constant 6 : index
    %c1_555 = arith.constant 1 : index
    %c0_556 = arith.constant 0 : index
    %c0_557 = arith.constant 0 : index
    %599 = vector.load %arg2[%c6_554, %c1_555, %c0_556, %c0_557] : memref<10x8x16x128xf32, #tpu.memory_space<vmem>>, vector<1x1x16x128xf32>
    %600 = vector.shape_cast %599 : vector<1x1x16x128xf32> to vector<16x128xf32>
    %601 = arith.mulf %373, %600 : vector<16x128xf32>
    %c6_558 = arith.constant 6 : index
    %c2_559 = arith.constant 2 : index
    %c0_560 = arith.constant 0 : index
    %c0_561 = arith.constant 0 : index
    %602 = vector.load %arg2[%c6_558, %c2_559, %c0_560, %c0_561] : memref<10x8x16x128xf32, #tpu.memory_space<vmem>>, vector<1x1x16x128xf32>
    %603 = vector.shape_cast %602 : vector<1x1x16x128xf32> to vector<16x128xf32>
    %604 = arith.mulf %376, %603 : vector<16x128xf32>
    %c6_562 = arith.constant 6 : index
    %c3_563 = arith.constant 3 : index
    %c0_564 = arith.constant 0 : index
    %c0_565 = arith.constant 0 : index
    %605 = vector.load %arg2[%c6_562, %c3_563, %c0_564, %c0_565] : memref<10x8x16x128xf32, #tpu.memory_space<vmem>>, vector<1x1x16x128xf32>
    %606 = vector.shape_cast %605 : vector<1x1x16x128xf32> to vector<16x128xf32>
    %607 = arith.mulf %379, %606 : vector<16x128xf32>
    %c6_566 = arith.constant 6 : index
    %c4_567 = arith.constant 4 : index
    %c0_568 = arith.constant 0 : index
    %c0_569 = arith.constant 0 : index
    %608 = vector.load %arg2[%c6_566, %c4_567, %c0_568, %c0_569] : memref<10x8x16x128xf32, #tpu.memory_space<vmem>>, vector<1x1x16x128xf32>
    %609 = vector.shape_cast %608 : vector<1x1x16x128xf32> to vector<16x128xf32>
    %610 = arith.mulf %382, %609 : vector<16x128xf32>
    %c6_570 = arith.constant 6 : index
    %c5_571 = arith.constant 5 : index
    %c0_572 = arith.constant 0 : index
    %c0_573 = arith.constant 0 : index
    %611 = vector.load %arg2[%c6_570, %c5_571, %c0_572, %c0_573] : memref<10x8x16x128xf32, #tpu.memory_space<vmem>>, vector<1x1x16x128xf32>
    %612 = vector.shape_cast %611 : vector<1x1x16x128xf32> to vector<16x128xf32>
    %613 = arith.mulf %385, %612 : vector<16x128xf32>
    %c6_574 = arith.constant 6 : index
    %c6_575 = arith.constant 6 : index
    %c0_576 = arith.constant 0 : index
    %c0_577 = arith.constant 0 : index
    %614 = vector.load %arg2[%c6_574, %c6_575, %c0_576, %c0_577] : memref<10x8x16x128xf32, #tpu.memory_space<vmem>>, vector<1x1x16x128xf32>
    %615 = vector.shape_cast %614 : vector<1x1x16x128xf32> to vector<16x128xf32>
    %616 = arith.mulf %388, %615 : vector<16x128xf32>
    %c6_578 = arith.constant 6 : index
    %c7_579 = arith.constant 7 : index
    %c0_580 = arith.constant 0 : index
    %c0_581 = arith.constant 0 : index
    %617 = vector.load %arg2[%c6_578, %c7_579, %c0_580, %c0_581] : memref<10x8x16x128xf32, #tpu.memory_space<vmem>>, vector<1x1x16x128xf32>
    %618 = vector.shape_cast %617 : vector<1x1x16x128xf32> to vector<16x128xf32>
    %619 = arith.mulf %391, %618 : vector<16x128xf32>
    %620 = arith.addf %598, %601 : vector<16x128xf32>
    %621 = arith.addf %604, %607 : vector<16x128xf32>
    %622 = arith.addf %610, %613 : vector<16x128xf32>
    %623 = arith.addf %616, %619 : vector<16x128xf32>
    %624 = arith.addf %620, %621 : vector<16x128xf32>
    %625 = arith.addf %622, %623 : vector<16x128xf32>
    %626 = arith.addf %624, %625 : vector<16x128xf32>
    %c13 = arith.constant 13 : index
    %c0_582 = arith.constant 0 : index
    %c0_583 = arith.constant 0 : index
    %627 = vector.load %arg4[%c13, %c0_582, %c0_583] : memref<20x16x128xf32, #tpu.memory_space<vmem>>, vector<1x16x128xf32>
    %628 = vector.shape_cast %627 : vector<1x16x128xf32> to vector<16x128xf32>
    %629 = vector.shape_cast %626 : vector<16x128xf32> to vector<1x16x128xf32>
    tpu.vector_store %arg4[%c13, %c0_582, %c0_583], %629 {strides = array<i32>} : memref<20x16x128xf32, #tpu.memory_space<vmem>>, vector<1x16x128xf32>,
    %c7_584 = arith.constant 7 : index
    %c0_585 = arith.constant 0 : index
    %c0_586 = arith.constant 0 : index
    %c0_587 = arith.constant 0 : index
    %630 = vector.load %arg2[%c7_584, %c0_585, %c0_586, %c0_587] : memref<10x8x16x128xf32, #tpu.memory_space<vmem>>, vector<1x1x16x128xf32>
    %631 = vector.shape_cast %630 : vector<1x1x16x128xf32> to vector<16x128xf32>
    %632 = arith.mulf %370, %631 : vector<16x128xf32>
    %c7_588 = arith.constant 7 : index
    %c1_589 = arith.constant 1 : index
    %c0_590 = arith.constant 0 : index
    %c0_591 = arith.constant 0 : index
    %633 = vector.load %arg2[%c7_588, %c1_589, %c0_590, %c0_591] : memref<10x8x16x128xf32, #tpu.memory_space<vmem>>, vector<1x1x16x128xf32>
    %634 = vector.shape_cast %633 : vector<1x1x16x128xf32> to vector<16x128xf32>
    %635 = arith.mulf %373, %634 : vector<16x128xf32>
    %c7_592 = arith.constant 7 : index
    %c2_593 = arith.constant 2 : index
    %c0_594 = arith.constant 0 : index
    %c0_595 = arith.constant 0 : index
    %636 = vector.load %arg2[%c7_592, %c2_593, %c0_594, %c0_595] : memref<10x8x16x128xf32, #tpu.memory_space<vmem>>, vector<1x1x16x128xf32>
    %637 = vector.shape_cast %636 : vector<1x1x16x128xf32> to vector<16x128xf32>
    %638 = arith.mulf %376, %637 : vector<16x128xf32>
    %c7_596 = arith.constant 7 : index
    %c3_597 = arith.constant 3 : index
    %c0_598 = arith.constant 0 : index
    %c0_599 = arith.constant 0 : index
    %639 = vector.load %arg2[%c7_596, %c3_597, %c0_598, %c0_599] : memref<10x8x16x128xf32, #tpu.memory_space<vmem>>, vector<1x1x16x128xf32>
    %640 = vector.shape_cast %639 : vector<1x1x16x128xf32> to vector<16x128xf32>
    %641 = arith.mulf %379, %640 : vector<16x128xf32>
    %c7_600 = arith.constant 7 : index
    %c4_601 = arith.constant 4 : index
    %c0_602 = arith.constant 0 : index
    %c0_603 = arith.constant 0 : index
    %642 = vector.load %arg2[%c7_600, %c4_601, %c0_602, %c0_603] : memref<10x8x16x128xf32, #tpu.memory_space<vmem>>, vector<1x1x16x128xf32>
    %643 = vector.shape_cast %642 : vector<1x1x16x128xf32> to vector<16x128xf32>
    %644 = arith.mulf %382, %643 : vector<16x128xf32>
    %c7_604 = arith.constant 7 : index
    %c5_605 = arith.constant 5 : index
    %c0_606 = arith.constant 0 : index
    %c0_607 = arith.constant 0 : index
    %645 = vector.load %arg2[%c7_604, %c5_605, %c0_606, %c0_607] : memref<10x8x16x128xf32, #tpu.memory_space<vmem>>, vector<1x1x16x128xf32>
    %646 = vector.shape_cast %645 : vector<1x1x16x128xf32> to vector<16x128xf32>
    %647 = arith.mulf %385, %646 : vector<16x128xf32>
    %c7_608 = arith.constant 7 : index
    %c6_609 = arith.constant 6 : index
    %c0_610 = arith.constant 0 : index
    %c0_611 = arith.constant 0 : index
    %648 = vector.load %arg2[%c7_608, %c6_609, %c0_610, %c0_611] : memref<10x8x16x128xf32, #tpu.memory_space<vmem>>, vector<1x1x16x128xf32>
    %649 = vector.shape_cast %648 : vector<1x1x16x128xf32> to vector<16x128xf32>
    %650 = arith.mulf %388, %649 : vector<16x128xf32>
    %c7_612 = arith.constant 7 : index
    %c7_613 = arith.constant 7 : index
    %c0_614 = arith.constant 0 : index
    %c0_615 = arith.constant 0 : index
    %651 = vector.load %arg2[%c7_612, %c7_613, %c0_614, %c0_615] : memref<10x8x16x128xf32, #tpu.memory_space<vmem>>, vector<1x1x16x128xf32>
    %652 = vector.shape_cast %651 : vector<1x1x16x128xf32> to vector<16x128xf32>
    %653 = arith.mulf %391, %652 : vector<16x128xf32>
    %654 = arith.addf %632, %635 : vector<16x128xf32>
    %655 = arith.addf %638, %641 : vector<16x128xf32>
    %656 = arith.addf %644, %647 : vector<16x128xf32>
    %657 = arith.addf %650, %653 : vector<16x128xf32>
    %658 = arith.addf %654, %655 : vector<16x128xf32>
    %659 = arith.addf %656, %657 : vector<16x128xf32>
    %660 = arith.addf %658, %659 : vector<16x128xf32>
    %c15 = arith.constant 15 : index
    %c0_616 = arith.constant 0 : index
    %c0_617 = arith.constant 0 : index
    %661 = vector.load %arg4[%c15, %c0_616, %c0_617] : memref<20x16x128xf32, #tpu.memory_space<vmem>>, vector<1x16x128xf32>
    %662 = vector.shape_cast %661 : vector<1x16x128xf32> to vector<16x128xf32>
    %663 = vector.shape_cast %660 : vector<16x128xf32> to vector<1x16x128xf32>
    tpu.vector_store %arg4[%c15, %c0_616, %c0_617], %663 {strides = array<i32>} : memref<20x16x128xf32, #tpu.memory_space<vmem>>, vector<1x16x128xf32>,
    %c8_618 = arith.constant 8 : index
    %c0_619 = arith.constant 0 : index
    %c0_620 = arith.constant 0 : index
    %c0_621 = arith.constant 0 : index
    %664 = vector.load %arg2[%c8_618, %c0_619, %c0_620, %c0_621] : memref<10x8x16x128xf32, #tpu.memory_space<vmem>>, vector<1x1x16x128xf32>
    %665 = vector.shape_cast %664 : vector<1x1x16x128xf32> to vector<16x128xf32>
    %666 = arith.mulf %370, %665 : vector<16x128xf32>
    %c8_622 = arith.constant 8 : index
    %c1_623 = arith.constant 1 : index
    %c0_624 = arith.constant 0 : index
    %c0_625 = arith.constant 0 : index
    %667 = vector.load %arg2[%c8_622, %c1_623, %c0_624, %c0_625] : memref<10x8x16x128xf32, #tpu.memory_space<vmem>>, vector<1x1x16x128xf32>
    %668 = vector.shape_cast %667 : vector<1x1x16x128xf32> to vector<16x128xf32>
    %669 = arith.mulf %373, %668 : vector<16x128xf32>
    %c8_626 = arith.constant 8 : index
    %c2_627 = arith.constant 2 : index
    %c0_628 = arith.constant 0 : index
    %c0_629 = arith.constant 0 : index
    %670 = vector.load %arg2[%c8_626, %c2_627, %c0_628, %c0_629] : memref<10x8x16x128xf32, #tpu.memory_space<vmem>>, vector<1x1x16x128xf32>
    %671 = vector.shape_cast %670 : vector<1x1x16x128xf32> to vector<16x128xf32>
    %672 = arith.mulf %376, %671 : vector<16x128xf32>
    %c8_630 = arith.constant 8 : index
    %c3_631 = arith.constant 3 : index
    %c0_632 = arith.constant 0 : index
    %c0_633 = arith.constant 0 : index
    %673 = vector.load %arg2[%c8_630, %c3_631, %c0_632, %c0_633] : memref<10x8x16x128xf32, #tpu.memory_space<vmem>>, vector<1x1x16x128xf32>
    %674 = vector.shape_cast %673 : vector<1x1x16x128xf32> to vector<16x128xf32>
    %675 = arith.mulf %379, %674 : vector<16x128xf32>
    %c8_634 = arith.constant 8 : index
    %c4_635 = arith.constant 4 : index
    %c0_636 = arith.constant 0 : index
    %c0_637 = arith.constant 0 : index
    %676 = vector.load %arg2[%c8_634, %c4_635, %c0_636, %c0_637] : memref<10x8x16x128xf32, #tpu.memory_space<vmem>>, vector<1x1x16x128xf32>
    %677 = vector.shape_cast %676 : vector<1x1x16x128xf32> to vector<16x128xf32>
    %678 = arith.mulf %382, %677 : vector<16x128xf32>
    %c8_638 = arith.constant 8 : index
    %c5_639 = arith.constant 5 : index
    %c0_640 = arith.constant 0 : index
    %c0_641 = arith.constant 0 : index
    %679 = vector.load %arg2[%c8_638, %c5_639, %c0_640, %c0_641] : memref<10x8x16x128xf32, #tpu.memory_space<vmem>>, vector<1x1x16x128xf32>
    %680 = vector.shape_cast %679 : vector<1x1x16x128xf32> to vector<16x128xf32>
    %681 = arith.mulf %385, %680 : vector<16x128xf32>
    %c8_642 = arith.constant 8 : index
    %c6_643 = arith.constant 6 : index
    %c0_644 = arith.constant 0 : index
    %c0_645 = arith.constant 0 : index
    %682 = vector.load %arg2[%c8_642, %c6_643, %c0_644, %c0_645] : memref<10x8x16x128xf32, #tpu.memory_space<vmem>>, vector<1x1x16x128xf32>
    %683 = vector.shape_cast %682 : vector<1x1x16x128xf32> to vector<16x128xf32>
    %684 = arith.mulf %388, %683 : vector<16x128xf32>
    %c8_646 = arith.constant 8 : index
    %c7_647 = arith.constant 7 : index
    %c0_648 = arith.constant 0 : index
    %c0_649 = arith.constant 0 : index
    %685 = vector.load %arg2[%c8_646, %c7_647, %c0_648, %c0_649] : memref<10x8x16x128xf32, #tpu.memory_space<vmem>>, vector<1x1x16x128xf32>
    %686 = vector.shape_cast %685 : vector<1x1x16x128xf32> to vector<16x128xf32>
    %687 = arith.mulf %391, %686 : vector<16x128xf32>
    %688 = arith.addf %666, %669 : vector<16x128xf32>
    %689 = arith.addf %672, %675 : vector<16x128xf32>
    %690 = arith.addf %678, %681 : vector<16x128xf32>
    %691 = arith.addf %684, %687 : vector<16x128xf32>
    %692 = arith.addf %688, %689 : vector<16x128xf32>
    %693 = arith.addf %690, %691 : vector<16x128xf32>
    %694 = arith.addf %692, %693 : vector<16x128xf32>
    %c17 = arith.constant 17 : index
    %c0_650 = arith.constant 0 : index
    %c0_651 = arith.constant 0 : index
    %695 = vector.load %arg4[%c17, %c0_650, %c0_651] : memref<20x16x128xf32, #tpu.memory_space<vmem>>, vector<1x16x128xf32>
    %696 = vector.shape_cast %695 : vector<1x16x128xf32> to vector<16x128xf32>
    %697 = vector.shape_cast %694 : vector<16x128xf32> to vector<1x16x128xf32>
    tpu.vector_store %arg4[%c17, %c0_650, %c0_651], %697 {strides = array<i32>} : memref<20x16x128xf32, #tpu.memory_space<vmem>>, vector<1x16x128xf32>,
    %c9_652 = arith.constant 9 : index
    %c0_653 = arith.constant 0 : index
    %c0_654 = arith.constant 0 : index
    %c0_655 = arith.constant 0 : index
    %698 = vector.load %arg2[%c9_652, %c0_653, %c0_654, %c0_655] : memref<10x8x16x128xf32, #tpu.memory_space<vmem>>, vector<1x1x16x128xf32>
    %699 = vector.shape_cast %698 : vector<1x1x16x128xf32> to vector<16x128xf32>
    %700 = arith.mulf %370, %699 : vector<16x128xf32>
    %c9_656 = arith.constant 9 : index
    %c1_657 = arith.constant 1 : index
    %c0_658 = arith.constant 0 : index
    %c0_659 = arith.constant 0 : index
    %701 = vector.load %arg2[%c9_656, %c1_657, %c0_658, %c0_659] : memref<10x8x16x128xf32, #tpu.memory_space<vmem>>, vector<1x1x16x128xf32>
    %702 = vector.shape_cast %701 : vector<1x1x16x128xf32> to vector<16x128xf32>
    %703 = arith.mulf %373, %702 : vector<16x128xf32>
    %c9_660 = arith.constant 9 : index
    %c2_661 = arith.constant 2 : index
    %c0_662 = arith.constant 0 : index
    %c0_663 = arith.constant 0 : index
    %704 = vector.load %arg2[%c9_660, %c2_661, %c0_662, %c0_663] : memref<10x8x16x128xf32, #tpu.memory_space<vmem>>, vector<1x1x16x128xf32>
    %705 = vector.shape_cast %704 : vector<1x1x16x128xf32> to vector<16x128xf32>
    %706 = arith.mulf %376, %705 : vector<16x128xf32>
    %c9_664 = arith.constant 9 : index
    %c3_665 = arith.constant 3 : index
    %c0_666 = arith.constant 0 : index
    %c0_667 = arith.constant 0 : index
    %707 = vector.load %arg2[%c9_664, %c3_665, %c0_666, %c0_667] : memref<10x8x16x128xf32, #tpu.memory_space<vmem>>, vector<1x1x16x128xf32>
    %708 = vector.shape_cast %707 : vector<1x1x16x128xf32> to vector<16x128xf32>
    %709 = arith.mulf %379, %708 : vector<16x128xf32>
    %c9_668 = arith.constant 9 : index
    %c4_669 = arith.constant 4 : index
    %c0_670 = arith.constant 0 : index
    %c0_671 = arith.constant 0 : index
    %710 = vector.load %arg2[%c9_668, %c4_669, %c0_670, %c0_671] : memref<10x8x16x128xf32, #tpu.memory_space<vmem>>, vector<1x1x16x128xf32>
    %711 = vector.shape_cast %710 : vector<1x1x16x128xf32> to vector<16x128xf32>
    %712 = arith.mulf %382, %711 : vector<16x128xf32>
    %c9_672 = arith.constant 9 : index
    %c5_673 = arith.constant 5 : index
    %c0_674 = arith.constant 0 : index
    %c0_675 = arith.constant 0 : index
    %713 = vector.load %arg2[%c9_672, %c5_673, %c0_674, %c0_675] : memref<10x8x16x128xf32, #tpu.memory_space<vmem>>, vector<1x1x16x128xf32>
    %714 = vector.shape_cast %713 : vector<1x1x16x128xf32> to vector<16x128xf32>
    %715 = arith.mulf %385, %714 : vector<16x128xf32>
    %c9_676 = arith.constant 9 : index
    %c6_677 = arith.constant 6 : index
    %c0_678 = arith.constant 0 : index
    %c0_679 = arith.constant 0 : index
    %716 = vector.load %arg2[%c9_676, %c6_677, %c0_678, %c0_679] : memref<10x8x16x128xf32, #tpu.memory_space<vmem>>, vector<1x1x16x128xf32>
    %717 = vector.shape_cast %716 : vector<1x1x16x128xf32> to vector<16x128xf32>
    %718 = arith.mulf %388, %717 : vector<16x128xf32>
    %c9_680 = arith.constant 9 : index
    %c7_681 = arith.constant 7 : index
    %c0_682 = arith.constant 0 : index
    %c0_683 = arith.constant 0 : index
    %719 = vector.load %arg2[%c9_680, %c7_681, %c0_682, %c0_683] : memref<10x8x16x128xf32, #tpu.memory_space<vmem>>, vector<1x1x16x128xf32>
    %720 = vector.shape_cast %719 : vector<1x1x16x128xf32> to vector<16x128xf32>
    %721 = arith.mulf %391, %720 : vector<16x128xf32>
    %722 = arith.addf %700, %703 : vector<16x128xf32>
    %723 = arith.addf %706, %709 : vector<16x128xf32>
    %724 = arith.addf %712, %715 : vector<16x128xf32>
    %725 = arith.addf %718, %721 : vector<16x128xf32>
    %726 = arith.addf %722, %723 : vector<16x128xf32>
    %727 = arith.addf %724, %725 : vector<16x128xf32>
    %728 = arith.addf %726, %727 : vector<16x128xf32>
    %c19 = arith.constant 19 : index
    %c0_684 = arith.constant 0 : index
    %c0_685 = arith.constant 0 : index
    %729 = vector.load %arg4[%c19, %c0_684, %c0_685] : memref<20x16x128xf32, #tpu.memory_space<vmem>>, vector<1x16x128xf32>
    %730 = vector.shape_cast %729 : vector<1x16x128xf32> to vector<16x128xf32>
    %731 = vector.shape_cast %728 : vector<16x128xf32> to vector<1x16x128xf32>
    tpu.vector_store %arg4[%c19, %c0_684, %c0_685], %731 {strides = array<i32>} : memref<20x16x128xf32, #tpu.memory_space<vmem>>, vector<1x16x128xf32>,
    %c0_686 = arith.constant 0 : index
    %c0_687 = arith.constant 0 : index
    %c0_688 = arith.constant 0 : index
    %732 = vector.load %arg4[%c0_686, %c0_687, %c0_688] : memref<20x16x128xf32, #tpu.memory_space<vmem>>, vector<20x16x128xf32>
    %cst = arith.constant dense<0.000000e+00> : vector<20x16xf32>
    %733 = vector.multi_reduction <add>, %732, %cst [2] : vector<20x16x128xf32> to vector<20x16xf32>
    %734 = vector.shape_cast %733 : vector<20x16xf32> to vector<20x16x1xf32>
    %cst_689 = arith.constant 7.812500e-03 : f32
    %735 = vector.broadcast %cst_689 : f32 to vector<20x16x1xf32>
    %736 = arith.mulf %734, %735 : vector<20x16x1xf32>
    %737 = arith.mulf %736, %736 : vector<20x16x1xf32>
    %cst_690 = arith.constant dense<0.000000e+00> : vector<20x1xf32>
    %738 = vector.multi_reduction <add>, %737, %cst_690 [1] : vector<20x16x1xf32> to vector<20x1xf32>
    %739 = vector.shape_cast %738 : vector<20x1xf32> to vector<20x1x1xf32>
    %740 = math.sqrt %739 : vector<20x1x1xf32>
    %cst_691 = arith.constant 1.000000e+00 : f32
    %741 = vector.broadcast %cst_691 : f32 to vector<20x1x1xf32>
    %742 = arith.addf %741, %739 : vector<20x1x1xf32>
    %743 = arith.divf %740, %742 : vector<20x1x1xf32>
    %744 = vector.broadcast %743 : vector<20x1x1xf32> to vector<20x16x1xf32>
    %745 = arith.mulf %736, %744 : vector<20x16x1xf32>
    %cst_692 = arith.constant 0.000000e+00 : f32
    %746 = vector.broadcast %cst_692 : f32 to vector<20x1x128xf32>
    %c0_693 = arith.constant 0 : index
    %c0_694 = arith.constant 0 : index
    %c0_695 = arith.constant 0 : index
    %747 = vector.load %arg4[%c0_693, %c0_694, %c0_695] : memref<20x16x128xf32, #tpu.memory_space<vmem>>, vector<20x16x128xf32>
    %748 = vector.broadcast %745 : vector<20x16x1xf32> to vector<20x16x128xf32>
    %749 = arith.mulf %747, %748 : vector<20x16x128xf32>
    %cst_696 = arith.constant dense<0.000000e+00> : vector<20x128xf32>
    %750 = vector.multi_reduction <add>, %749, %cst_696 [1] : vector<20x16x128xf32> to vector<20x128xf32>
    %751 = vector.shape_cast %750 : vector<20x128xf32> to vector<20x1x128xf32>
    %752 = arith.addf %746, %751 : vector<20x1x128xf32>
    %cst_697 = arith.constant dense<0xFF800000> : vector<20x1xf32>
    %753 = vector.multi_reduction <maximumf>, %752, %cst_697 [2] : vector<20x1x128xf32> to vector<20x1xf32>
    %754 = vector.shape_cast %753 : vector<20x1xf32> to vector<20x1x1xf32>
    %755 = vector.broadcast %754 : vector<20x1x1xf32> to vector<20x1x128xf32>
    %756 = arith.subf %752, %755 : vector<20x1x128xf32>
    %757 = math.exp %756 : vector<20x1x128xf32>
    %cst_698 = arith.constant dense<0.000000e+00> : vector<20x1xf32>
    %758 = vector.multi_reduction <add>, %757, %cst_698 [2] : vector<20x1x128xf32> to vector<20x1xf32>
    %759 = vector.shape_cast %758 : vector<20x1xf32> to vector<20x1x1xf32>
    %760 = vector.broadcast %759 : vector<20x1x1xf32> to vector<20x1x128xf32>
    %761 = arith.divf %757, %760 : vector<20x1x128xf32>
    %c0_699 = arith.constant 0 : index
    %c0_700 = arith.constant 0 : index
    %c0_701 = arith.constant 0 : index
    %762 = vector.load %arg4[%c0_699, %c0_700, %c0_701] : memref<20x16x128xf32, #tpu.memory_space<vmem>>, vector<20x16x128xf32>
    %763 = vector.broadcast %761 : vector<20x1x128xf32> to vector<20x16x128xf32>
    %764 = arith.mulf %763, %762 : vector<20x16x128xf32>
    %cst_702 = arith.constant dense<0.000000e+00> : vector<20x16xf32>
    %765 = vector.multi_reduction <add>, %764, %cst_702 [2] : vector<20x16x128xf32> to vector<20x16xf32>
    %766 = vector.shape_cast %765 : vector<20x16xf32> to vector<20x16x1xf32>
    %767 = arith.mulf %766, %766 : vector<20x16x1xf32>
    %cst_703 = arith.constant dense<0.000000e+00> : vector<20x1xf32>
    %768 = vector.multi_reduction <add>, %767, %cst_703 [1] : vector<20x16x1xf32> to vector<20x1xf32>
    %769 = vector.shape_cast %768 : vector<20x1xf32> to vector<20x1x1xf32>
    %770 = math.sqrt %769 : vector<20x1x1xf32>
    %cst_704 = arith.constant 1.000000e+00 : f32
    %771 = vector.broadcast %cst_704 : f32 to vector<20x1x1xf32>
    %772 = arith.addf %771, %769 : vector<20x1x1xf32>
    %773 = arith.divf %770, %772 : vector<20x1x1xf32>
    %774 = vector.broadcast %773 : vector<20x1x1xf32> to vector<20x16x1xf32>
    %775 = arith.mulf %766, %774 : vector<20x16x1xf32>
    %c0_705 = arith.constant 0 : index
    %c0_706 = arith.constant 0 : index
    %c0_707 = arith.constant 0 : index
    %776 = vector.load %arg4[%c0_705, %c0_706, %c0_707] : memref<20x16x128xf32, #tpu.memory_space<vmem>>, vector<20x16x128xf32>
    %777 = vector.broadcast %775 : vector<20x16x1xf32> to vector<20x16x128xf32>
    %778 = arith.mulf %776, %777 : vector<20x16x128xf32>
    %cst_708 = arith.constant dense<0.000000e+00> : vector<20x128xf32>
    %779 = vector.multi_reduction <add>, %778, %cst_708 [1] : vector<20x16x128xf32> to vector<20x128xf32>
    %780 = vector.shape_cast %779 : vector<20x128xf32> to vector<20x1x128xf32>
    %781 = arith.addf %752, %780 : vector<20x1x128xf32>
    %cst_709 = arith.constant dense<0xFF800000> : vector<20x1xf32>
    %782 = vector.multi_reduction <maximumf>, %781, %cst_709 [2] : vector<20x1x128xf32> to vector<20x1xf32>
    %783 = vector.shape_cast %782 : vector<20x1xf32> to vector<20x1x1xf32>
    %784 = vector.broadcast %783 : vector<20x1x1xf32> to vector<20x1x128xf32>
    %785 = arith.subf %781, %784 : vector<20x1x128xf32>
    %786 = math.exp %785 : vector<20x1x128xf32>
    %cst_710 = arith.constant dense<0.000000e+00> : vector<20x1xf32>
    %787 = vector.multi_reduction <add>, %786, %cst_710 [2] : vector<20x1x128xf32> to vector<20x1xf32>
    %788 = vector.shape_cast %787 : vector<20x1xf32> to vector<20x1x1xf32>
    %789 = vector.broadcast %788 : vector<20x1x1xf32> to vector<20x1x128xf32>
    %790 = arith.divf %786, %789 : vector<20x1x128xf32>
    %c0_711 = arith.constant 0 : index
    %c0_712 = arith.constant 0 : index
    %c0_713 = arith.constant 0 : index
    %791 = vector.load %arg4[%c0_711, %c0_712, %c0_713] : memref<20x16x128xf32, #tpu.memory_space<vmem>>, vector<20x16x128xf32>
    %792 = vector.broadcast %790 : vector<20x1x128xf32> to vector<20x16x128xf32>
    %793 = arith.mulf %792, %791 : vector<20x16x128xf32>
    %cst_714 = arith.constant dense<0.000000e+00> : vector<20x16xf32>
    %794 = vector.multi_reduction <add>, %793, %cst_714 [2] : vector<20x16x128xf32> to vector<20x16xf32>
    %795 = arith.mulf %794, %794 : vector<20x16xf32>
    %cst_715 = arith.constant dense<0.000000e+00> : vector<20xf32>
    %796 = vector.multi_reduction <add>, %795, %cst_715 [1] : vector<20x16xf32> to vector<20xf32>
    %797 = vector.shape_cast %796 : vector<20xf32> to vector<20x1xf32>
    %798 = math.sqrt %797 : vector<20x1xf32>
    %cst_716 = arith.constant 1.000000e+00 : f32
    %799 = vector.broadcast %cst_716 : f32 to vector<20x1xf32>
    %800 = arith.addf %799, %797 : vector<20x1xf32>
    %801 = arith.divf %798, %800 : vector<20x1xf32>
    %802 = vector.broadcast %801 : vector<20x1xf32> to vector<20x16xf32>
    %803 = arith.mulf %794, %802 : vector<20x16xf32>
    %c0_717 = arith.constant 0 : index
    %c0_718 = arith.constant 0 : index
    %c0_719 = arith.constant 0 : index
    %804 = vector.load %arg3[%c0_717, %c0_718, %c0_719] : memref<1x20x16xf32, #tpu.memory_space<vmem>>, vector<1x20x16xf32>
    %805 = vector.shape_cast %804 : vector<1x20x16xf32> to vector<20x16xf32>
    %806 = vector.shape_cast %803 : vector<20x16xf32> to vector<1x20x16xf32>
    tpu.vector_store %arg3[%c0_717, %c0_718, %c0_719], %806 {strides = array<i32>} : memref<1x20x16xf32, #tpu.memory_space<vmem>>, vector<1x20x16xf32>,
    return
  }
  func.func @transform_0(%arg0: i32) -> (i32, i32, i32) {
    %c0_i32 = arith.constant 0 : i32
    %c0_i32_0 = arith.constant 0 : i32
    %c0_i32_1 = arith.constant 0 : i32
    %c0_i32_2 = arith.constant 0 : i32
    return %c0_i32, %c0_i32_0, %c0_i32_1 : i32, i32, i32
  }
  func.func @transform_1(%arg0: i32) -> (i32, i32, i32, i32) {
    %c0_i32 = arith.constant 0 : i32
    %c0_i32_0 = arith.constant 0 : i32
    %c0_i32_1 = arith.constant 0 : i32
    %c0_i32_2 = arith.constant 0 : i32
    return %arg0, %c0_i32, %c0_i32_0, %c0_i32_1 : i32, i32, i32, i32
  }
  func.func @transform_2(%arg0: i32) -> (i32, i32, i32) {
    %c0_i32 = arith.constant 0 : i32
    %c0_i32_0 = arith.constant 0 : i32
    %c0_i32_1 = arith.constant 0 : i32
    return %arg0, %c0_i32, %c0_i32_0 : i32, i32, i32
  }
}

</mosaic_0001>

<bundles_post_ra>
// kernel: classifier_caps_forward.1
= control target key start
LH: loop header
LB: loop body
LE: loop exit
PB: predicated region body
PF: predicated region fallthrough
CT: control target
= control target key end

     0   :  { %7 = vsyncpa [#allocation4], 0  ;;  %s7088_s0 = inlined_call_operand.hbm [shape: f32[2,8,128], index: 0, kind: input, shape index: {}]   ;;  %s7089_s1 = inlined_call_operand.hbm [shape: f32[10,8,16,128], index: 1, kind: input, shape index: {}]   ;;  %s7090_s2 = inlined_call_operand.vmem [shape: f32[1,20,16], index: 2, kind: output, shape index: {}]  }
   0x1   :  { %8 = vsyncpa [#allocation6], 0  ;;  %s4391_s9 = smov [#allocation3]  }
   0x2   :  { %s14_s10 = sshll.u32 %s4391_s9, 4  ;;  %s15_s10 = int_to_ptr.vmem [resolvable:$true] %s14_s10 }
   0x3   :  { %s4355_s11 = scalar_lea.vmem %s15_s10, 256  ;;  %p4360_p1 = scmp.lt.s32.totalorder %s15_s10, %s15_s10 }
   0x4   :  { %p4356_p0 = scmp.ne.s32.totalorder %s15_s10, %s4355_s11  ;;  %p4361_p2 = scmp.lt.s32.totalorder %s4355_s11, %s4355_s11 }
   0x6   :  { %p4362_p3 = por %p4361_p2, %p4360_p1 }
   0x8   :  { %p4363_p4 = pnand %p4362_p3, %p4356_p0 }
   0xa   :  { %4366 = shalt.err (!%p4363_p4)
}
   0xb   :  { %s4392_s12 = smov 128   ;;  %s4393_s13 = smov 8  }
   0xc   :  { %20 = dma.hbm_to_vmem [thread:$0]  %s7088_s0, 256, %s15_s10, [#allocation4], %s4392_s12, %s4392_s12, %s4393_s13  }
   0xd   :  { %s4394_s16 = smov [#allocation5]  }
   0xe   :  { %s26_s17 = sshll.u32 %s4394_s16, 4  ;;  %s27_s17 = int_to_ptr.vmem [resolvable:$true] %s26_s17 }
   0xf   :  { %s4375_s18 = scalar_lea.vmem %s27_s17, 20480  ;;  %p4380_p6 = scmp.lt.s32.totalorder %s27_s17, %s27_s17 }
  0x10   :  { %p4376_p5 = scmp.ne.s32.totalorder %s27_s17, %s4375_s18  ;;  %p4381_p7 = scmp.lt.s32.totalorder %s4375_s18, %s4375_s18 }
  0x12   :  { %p4382_p8 = por %p4381_p7, %p4380_p6 }
  0x14   :  { %p4383_p9 = pnand %p4382_p8, %p4376_p5 }
  0x16   :  { %4386 = shalt.err (!%p4383_p9)
}
  0x17   :  { %32 = dma.hbm_to_vmem [thread:$0]  %s7089_s1, 20480, %s27_s17, [#allocation6], %s4392_s12, %s4392_s12, %s4393_s13  }
  0x18   :  { %4387 = dma.done.wait [#allocation4], 256  }
  0x19   :  { %4388 = vsyncadd [#allocation4], 4294967040 }
  0x1a   :  { %4389 = dma.done.wait [#allocation6], 20480  }
  0x1b   :  { %4390 = vsyncadd [#allocation6], 4294946816  ;;  %v40_v0 = vlaneseq  ;;  %v641_v12 = vld [vmem:[#allocation3 + $0x8] sm:$0xff]  ;;  %v674_v13 = vld [vmem:[#allocation5] sm:$0xff] }
  0x1c   :  { %v678_v14 = vld [vmem:[#allocation5 + $0x10] sm:$0xff]  ;;  %v682_v20 = vld [vmem:[#allocation5 + $0x20] sm:$0xff]  ;;  %v675_v55 = vld [vmem:[#allocation5 + $0x8] sm:$0xff] }
  0x1d   :  { %v41_v1 = vshrl.u32 %v40_v0, 7  ;;  %v3245_v2 = vand.u32 127, %v40_v0  ;;  %v686_v21 = vld [vmem:[#allocation5 + $0x30] sm:$0xff]  ;;  %v690_v22 = vld [vmem:[#allocation5 + $0x40] sm:$0xff]  ;;  %v679_v56 = vld [vmem:[#allocation5 + $0x18] sm:$0xff] }
  0x1e   :  { %v694_v27 = vld [vmem:[#allocation5 + $0x50] sm:$0xff]  ;;  %v698_v28 = vld [vmem:[#allocation5 + $0x60] sm:$0xff]  ;;  %v683_v61 = vld [vmem:[#allocation5 + $0x28] sm:$0xff] }
  0x1f   :  { %v4417_v3 = vsub.s32 0, %v41_v1  ;;  %v4419_v4 = vsub.s32 1, %v41_v1  ;;  %v4421_v5 = vsub.s32 2, %v41_v1  ;;  %v4423_v6 = vsub.s32 3, %v41_v1  ;;  %v702_v29 = vld [vmem:[#allocation5 + $0x70] sm:$0xff]  ;;  %v687_v62 = vld [vmem:[#allocation5 + $0x38] sm:$0xff] }
  0x20   :  { %v4425_v7 = vsub.s32 4, %v41_v1  ;;  %v4427_v8 = vsub.s32 5, %v41_v1  ;;  %v4429_v9 = vsub.s32 6, %v41_v1  ;;  %v4431_v10 = vsub.s32 7, %v41_v1  ;;  %v39_v34 = vld [vmem:[#allocation3] sm:$0xff] }
  0x21   :  { %7247 = vst [vmem:[#allocation9_spill] sm:$0xff] %v4417_v3  ;;  %7248 = vst [vmem:[#allocation10_spill] sm:$0xff] %v4419_v4  ;;  %v4433_v11 = vsub.s32 %v3245_v2, %v41_v1  ;;  %v3250_v15 = vadd.s32 4294967288, %v3245_v2  ;;  %v4436_v16 = vrot.slane %v641_v12, %v4417_v3  ;;  %v4439_v17 = vrot.slane %v641_v12, %v4419_v4 }
  0x22   :  { %7249 = vst [vmem:[#allocation11_spill] sm:$0xff] %v4421_v5  ;;  %7250 = vst [vmem:[#allocation12_spill] sm:$0xff] %v4423_v6  ;;  %v4442_v18 = vrot.slane %v641_v12, %v4421_v5  ;;  %v4445_v19 = vrot.slane %v641_v12, %v4423_v6  ;;  %v4448_v23 = vrot.slane %v641_v12, %v4425_v7 }
  0x23   :  { %7251 = vst [vmem:[#allocation13_spill] sm:$0xff] %v4425_v7  ;;  %7252 = vst [vmem:[#allocation14_spill] sm:$0xff] %v4427_v8  ;;  %v4451_v24 = vrot.slane %v641_v12, %v4427_v8  ;;  %v4454_v25 = vrot.slane %v641_v12, %v4429_v9  ;;  %v4457_v26 = vrot.slane %v641_v12, %v4431_v10  ;;  %v691_v12 = vld [vmem:[#allocation5 + $0x48] sm:$0xff] }
  0x24   :  { %7253 = vst [vmem:[#allocation15_spill] sm:$0xff] %v4429_v9  ;;  %7254 = vst [vmem:[#allocation16_spill] sm:$0xff] %v4431_v10  ;;  %v676_v30 = vmul.f32 %v674_v13, %v4436_v16  ;;  %v680_v31 = vmul.f32 %v678_v14, %v4439_v17  ;;  %v684_v32 = vmul.f32 %v682_v20, %v4442_v18 }
  0x25   :  { %7255 = vst [vmem:[#allocation17_spill] sm:$0xff] %v4433_v11  ;;  %v688_v33 = vmul.f32 %v686_v21, %v4445_v19  ;;  %v692_v35 = vmul.f32 %v690_v22, %v4448_v23  ;;  %v696_v36 = vmul.f32 %v694_v27, %v4451_v24  ;;  %v700_v37 = vmul.f32 %v698_v28, %v4454_v25 }
  0x26   :  { %v704_v38 = vmul.f32 %v702_v29, %v4457_v26  ;;  %v706_v39 = vadd.f32 %v680_v31, %v676_v30  ;;  %v4467_v41 = vsub.s32 %v3250_v15, %v41_v1  ;;  %v4470_v42 = vrot.slane %v39_v34, %v4417_v3  ;;  %v699_v15 = vld [vmem:[#allocation5 + $0x68] sm:$0xff] }
  0x27   :  { %v708_v40 = vadd.f32 %v688_v33, %v684_v32  ;;  %v710_v43 = vadd.f32 %v696_v36, %v692_v35  ;;  %v4473_v45 = vrot.slane %v39_v34, %v4419_v4  ;;  %v4476_v46 = vrot.slane %v39_v34, %v4421_v5  ;;  %v4649_v5 = vld [vmem:[#allocation5 + $0x2e8] sm:$0xff] }
  0x28   :  { %7256 = vst [vmem:[#allocation18_spill] sm:$0xff] %v4467_v41  ;;  %v712_v44 = vadd.f32 %v704_v38, %v700_v37  ;;  %v4479_v48 = vrot.slane %v39_v34, %v4423_v6  ;;  %v4482_v49 = vrot.slane %v39_v34, %v4425_v7  ;;  %v4485_v50 = vrot.slane %v39_v34, %v4427_v8  ;;  %v4647_v8 = vld [vmem:[#allocation5 + $0x2d8] sm:$0xff] }
  0x29   :  { %v714_v47 = vadd.f32 %v708_v40, %v706_v39  ;;  %v4488_v52 = vrot.slane %v39_v34, %v4429_v9  ;;  %v4491_v53 = vrot.slane %v39_v34, %v4431_v10  ;;  %v74_v54 = vmul.f32 %v674_v13, %v4470_v42  ;;  %v695_v13 = vld [vmem:[#allocation5 + $0x58] sm:$0xff]  ;;  %7269 = vst [vmem:[#allocation31_spill] sm:$0xff] %v4647_v8 }
  0x2a   :  { %7257 = vst [vmem:[#allocation19_spill] sm:$0xff] %v4479_v48  ;;  %7258 = vst [vmem:[#allocation20_spill] sm:$0xff] %v4482_v49  ;;  %v716_v51 = vadd.f32 %v712_v44, %v710_v43  ;;  %v79_v57 = vmul.f32 %v678_v14, %v4473_v45  ;;  %v84_v58 = vmul.f32 %v682_v20, %v4476_v46 }
  0x2b   :  { %7259 = vst [vmem:[#allocation21_spill] sm:$0xff] %v4485_v50  ;;  %7260 = vst [vmem:[#allocation22_spill] sm:$0xff] %v4488_v52  ;;  %v89_v59 = vmul.f32 %v686_v21, %v4479_v48  ;;  %v94_v60 = vmul.f32 %v690_v22, %v4482_v49  ;;  %v99_v0 = vmul.f32 %v694_v27, %v4485_v50  ;;  %v703_v22 = vld [vmem:[#allocation5 + $0x78] sm:$0xff] }
  0x2c   :  { %v4498_v63 = vadd.f32 %v716_v51, %v714_v47  ;;  %v104_v1 = vmul.f32 %v698_v28, %v4488_v52  ;;  %v109_v2 = vmul.f32 %v702_v29, %v4491_v53  ;;  %v111_v14 = vadd.f32 %v79_v57, %v74_v54  ;;  %v300_v51 = vld [vmem:[#allocation5 + $0x208] sm:$0xff]  ;;  %7270 = vst [vmem:[#allocation32_spill] sm:$0xff] %v4649_v5 }
  0x2d   :  { %v113_v30 = vadd.f32 %v89_v59, %v84_v58  ;;  %v677_v20 = vmul.f32 %v675_v55, %v4436_v16  ;;  %v681_v21 = vmul.f32 %v679_v56, %v4439_v17  ;;  %v115_v31 = vadd.f32 %v99_v0, %v94_v60  ;;  %v305_v60 = vld [vmem:[#allocation5 + $0x218] sm:$0xff]  ;;  %v310_v0 = vld [vmem:[#allocation5 + $0x228] sm:$0xff] }
  0x2e   :  { %7261 = vst [vmem:[#allocation23_spill] sm:$0xff] %v4498_v63  ;;  %1208 = vadd.xlane.f32.xlu1 %v4498_v63  ;;  %v117_v32 = vadd.f32 %v109_v2, %v104_v1  ;;  %v685_v27 = vmul.f32 %v683_v61, %v4442_v18  ;;  %v689_v28 = vmul.f32 %v687_v62, %v4445_v19 }
  0x2f   :  { %v119_v33 = vadd.f32 %v113_v30, %v111_v14  ;;  %v693_v29 = vmul.f32 %v691_v12, %v4448_v23  ;;  %v697_v34 = vmul.f32 %v695_v13, %v4451_v24  ;;  %v701_v35 = vmul.f32 %v699_v15, %v4454_v25  ;;  %v320_v30 = vld [vmem:[#allocation5 + $0x248] sm:$0xff] }
  0x30   :  { %v121_v36 = vadd.f32 %v117_v32, %v115_v31  ;;  %v705_v37 = vmul.f32 %v703_v22, %v4457_v26  ;;  %v707_v38 = vadd.f32 %v681_v21, %v677_v20  ;;  %v709_v39 = vadd.f32 %v689_v28, %v685_v27  ;;  %v330_v32 = vld [vmem:[#allocation5 + $0x268] sm:$0xff]  ;;  %v335_v27 = vld [vmem:[#allocation5 + $0x278] sm:$0xff] }
  0x31   :  { %v711_v40 = vadd.f32 %v697_v34, %v693_v29  ;;  %v75_v43 = vmul.f32 %v675_v55, %v4470_v42  ;;  %v80_v44 = vmul.f32 %v679_v56, %v4473_v45  ;;  %v85_v47 = vmul.f32 %v683_v61, %v4476_v46  ;;  %v315_v56 = vld [vmem:[#allocation5 + $0x238] sm:$0xff] }
  0x32   :  { %v4515_v54 = vadd.f32 %v121_v36, %v119_v33  ;;  %v713_v57 = vadd.f32 %v705_v37, %v701_v35  ;;  %v715_v58 = vadd.f32 %v709_v39, %v707_v38  ;;  %v90_v59 = vmul.f32 %v687_v62, %v4479_v48  ;;  %v325_v62 = vld [vmem:[#allocation5 + $0x258] sm:$0xff]  ;;  %v299_v33 = vld [vmem:[#allocation5 + $0x200] sm:$0xff] }
  0x33   :  { %v95_v1 = vmul.f32 %v691_v12, %v4482_v49  ;;  %v100_v2 = vmul.f32 %v695_v13, %v4485_v50  ;;  %v105_v14 = vmul.f32 %v699_v15, %v4488_v52  ;;  %v110_v55 = vmul.f32 %v703_v22, %v4491_v53  ;;  %v304_v22 = vld [vmem:[#allocation5 + $0x210] sm:$0xff]  ;;  %v309_v37 = vld [vmem:[#allocation5 + $0x220] sm:$0xff] }
  0x34   :  { %7262 = vst [vmem:[#allocation24_spill] sm:$0xff] %v4515_v54  ;;  %1204 = vadd.xlane.f32.xlu0 %v4515_v54  ;;  %v717_v61 = vadd.f32 %v713_v57, %v711_v40  ;;  %v112_v20 = vadd.f32 %v80_v44, %v75_v43  ;;  %v114_v21 = vadd.f32 %v90_v59, %v85_v47  ;;  %v314_v44 = vld [vmem:[#allocation5 + $0x230] sm:$0xff]  ;;  %v319_v47 = vld [vmem:[#allocation5 + $0x240] sm:$0xff] }
  0x35   :  { %v302_v31 = vmul.f32 %v300_v51, %v4470_v42  ;;  %v116_v28 = vadd.f32 %v100_v2, %v95_v1  ;;  %v118_v12 = vadd.f32 %v110_v55, %v105_v14  ;;  %v307_v13 = vmul.f32 %v305_v60, %v4473_v45  ;;  %v324_v57 = vld [vmem:[#allocation5 + $0x250] sm:$0xff]  ;;  %v329_v14 = vld [vmem:[#allocation5 + $0x260] sm:$0xff] }
  0x36   :  { %v312_v15 = vmul.f32 %v310_v0, %v4476_v46  ;;  %v4526_v29 = vadd.f32 %v717_v61, %v715_v58  ;;  %v120_v34 = vadd.f32 %v114_v21, %v112_v20  ;;  %v317_v35 = vmul.f32 %v315_v56, %v4479_v48  ;;  %v334_v55 = vld [vmem:[#allocation5 + $0x270] sm:$0xff]  ;;  %v4684_v54 = vld [vmem:[#allocation5 + $0x2e0] sm:$0xff] }
  0x37   :  { %v322_v36 = vmul.f32 %v320_v30, %v4482_v49  ;;  %v122_v38 = vadd.f32 %v118_v12, %v116_v28  ;;  %v327_v39 = vmul.f32 %v325_v62, %v4485_v50  ;;  %v332_v40 = vmul.f32 %v330_v32, %v4488_v52 }
  0x38   :  { %7263 = vst [vmem:[#allocation25_spill] sm:$0xff] %v4526_v29  ;;  %v337_v43 = vmul.f32 %v335_v27, %v4491_v53  ;;  %1210 = vadd.xlane.f32.xlu1 %v4526_v29  ;;  %v339_v58 = vadd.f32 %v307_v13, %v302_v31  ;;  %v341_v59 = vadd.f32 %v317_v35, %v312_v15  ;;  %v4686_v29 = vld [vmem:[#allocation5 + $0x2f0] sm:$0xff] }
  0x39   :  { %v301_v1 = vmul.f32 %v299_v33, %v4470_v42  ;;  %v306_v2 = vmul.f32 %v304_v22, %v4473_v45  ;;  %v4536_v61 = vadd.f32 %v122_v38, %v120_v34  ;;  %v343_v20 = vadd.f32 %v327_v39, %v322_v36 }
  0x3a   :  { %v345_v21 = vadd.f32 %v337_v43, %v332_v40  ;;  %v311_v28 = vmul.f32 %v309_v37, %v4476_v46  ;;  %v347_v12 = vadd.f32 %v341_v59, %v339_v58  ;;  %v316_v7 = vmul.f32 %v314_v44, %v4479_v48 }
  0x3b   :  { %7264 = vst [vmem:[#allocation26_spill] sm:$0xff] %v4536_v61  ;;  %v321_v6 = vmul.f32 %v319_v47, %v4482_v49  ;;  %v326_v31 = vmul.f32 %v324_v57, %v4485_v50  ;;  %1206 = vadd.xlane.f32.xlu0 %v4536_v61  ;;  %v331_v15 = vmul.f32 %v329_v14, %v4488_v52  ;;  %v4682_v61 = vld [vmem:[#allocation5 + $0x2d0] sm:$0xff] }
  0x3c   :  { %v349_v13 = vadd.f32 %v345_v21, %v343_v20  ;;  %v336_v35 = vmul.f32 %v334_v55, %v4491_v53  ;;  %v338_v34 = vadd.f32 %v306_v2, %v301_v1  ;;  %v340_v38 = vadd.f32 %v316_v7, %v311_v28 }
  0x3d   :  { %v342_v36 = vadd.f32 %v326_v31, %v321_v6  ;;  %v873_v39 = vmul.f32 %v4436_v16, %v300_v51  ;;  %v877_v40 = vmul.f32 %v4439_v17, %v305_v60  ;;  %v881_v59 = vmul.f32 %v4442_v18, %v310_v0 }
  0x3e   :  { %v4547_v43 = vadd.f32 %v349_v13, %v347_v12  ;;  %v344_v58 = vadd.f32 %v336_v35, %v331_v15  ;;  %v885_v10 = vmul.f32 %v4445_v19, %v315_v56  ;;  %v346_v9 = vadd.f32 %v340_v38, %v338_v34  ;;  %v4559_v12 = vld [vmem:[#allocation5 + $0x88] sm:$0xff]  ;;  %v4564_v13 = vld [vmem:[#allocation5 + $0x98] sm:$0xff] }
  0x3f   :  { %v889_v20 = vmul.f32 %v4448_v23, %v320_v30  ;;  %v893_v21 = vmul.f32 %v4451_v24, %v325_v62  ;;  %v897_v1 = vmul.f32 %v4454_v25, %v330_v32  ;;  %v901_v7 = vmul.f32 %v4457_v26, %v335_v27  ;;  %v4566_v27 = vld [vmem:[#allocation5 + $0xa8] sm:$0xff]  ;;  %v4572_v15 = vld [vmem:[#allocation5 + $0xb8] sm:$0xff] }
  0x40   :  { %7265 = vst [vmem:[#allocation27_spill] sm:$0xff] %v4547_v43  ;;  %1238 = vadd.xlane.f32.xlu1 %v4547_v43  ;;  %v348_v6 = vadd.f32 %v344_v58, %v342_v36  ;;  %v903_v51 = vadd.f32 %v877_v40, %v873_v39  ;;  %v905_v60 = vadd.f32 %v885_v10, %v881_v59  ;;  %v4579_v36 = vld [vmem:[#allocation5 + $0xd8] sm:$0xff]  ;;  %v4589_v58 = vld [vmem:[#allocation5 + $0x80] sm:$0xff]  ;;  %v4591_v59 = vld [vmem:[#allocation5 + $0x90] sm:$0xff] }
  0x41   :  { %v907_v2 = vadd.f32 %v893_v21, %v889_v20  ;;  %v872_v28 = vmul.f32 %v4436_v16, %v299_v33  ;;  %v876_v0 = vmul.f32 %v4439_v17, %v304_v22  ;;  %v880_v56 = vmul.f32 %v4442_v18, %v309_v37 }
  0x42   :  { %v4561_v30 = vadd.f32 %v348_v6, %v346_v9  ;;  %v909_v62 = vadd.f32 %v901_v7, %v897_v1  ;;  %v911_v32 = vadd.f32 %v905_v60, %v903_v51  ;;  %v884_v31 = vmul.f32 %v4445_v19, %v314_v44  ;;  %v4574_v9 = vld [vmem:[#allocation5 + $0xc8] sm:$0xff]  ;;  %v4599_v7 = vld [vmem:[#allocation5 + $0xa0] sm:$0xff] }
  0x43   :  { %v888_v10 = vmul.f32 %v4448_v23, %v319_v47  ;;  %v892_v33 = vmul.f32 %v4451_v24, %v324_v57  ;;  %v896_v22 = vmul.f32 %v4454_v25, %v329_v14  ;;  %v900_v37 = vmul.f32 %v4457_v26, %v334_v55  ;;  %v4581_v47 = vld [vmem:[#allocation5 + $0xe8] sm:$0xff]  ;;  %v4583_v57 = vld [vmem:[#allocation5 + $0xf8] sm:$0xff] }
  0x44   :  { %7266 = vst [vmem:[#allocation28_spill] sm:$0xff] %v4561_v30  ;;  %1236 = vadd.xlane.f32.xlu0 %v4561_v30  ;;  %v913_v35 = vadd.f32 %v909_v62, %v907_v2  ;;  %v902_v44 = vadd.f32 %v876_v0, %v872_v28  ;;  %v904_v34 = vadd.f32 %v884_v31, %v880_v56  ;;  %v4607_v0 = vld [vmem:[#allocation5 + $0xb0] sm:$0xff]  ;;  %v4609_v56 = vld [vmem:[#allocation5 + $0xc0] sm:$0xff] }
  0x45   :  { %v131_v38 = vmul.f32 %v4559_v12, %v4470_v42  ;;  %v906_v14 = vadd.f32 %v892_v33, %v888_v10  ;;  %v908_v55 = vadd.f32 %v900_v37, %v896_v22  ;;  %v136_v39 = vmul.f32 %v4564_v13, %v4473_v45  ;;  %v4611_v62 = vld [vmem:[#allocation5 + $0xd0] sm:$0xff]  ;;  %v4618_v22 = vld [vmem:[#allocation5 + $0xe0] sm:$0xff] }
  0x46   :  { %v141_v40 = vmul.f32 %v4566_v27, %v4476_v46  ;;  %v4593_v20 = vadd.f32 %v913_v35, %v911_v32  ;;  %v910_v21 = vadd.f32 %v904_v34, %v902_v44  ;;  %v146_v1 = vmul.f32 %v4572_v15, %v4479_v48  ;;  %v4620_v37 = vld [vmem:[#allocation5 + $0xf0] sm:$0xff] }
  0x47   :  { %v151_v6 = vmul.f32 %v4574_v9, %v4482_v49  ;;  %v912_v51 = vadd.f32 %v908_v55, %v906_v14  ;;  %v156_v60 = vmul.f32 %v4579_v36, %v4485_v50  ;;  %v161_v2 = vmul.f32 %v4581_v47, %v4488_v52  ;;  %v4626_v55 = vld [vmem:[#allocation5 + $0x288] sm:$0xff] }
  0x48   :  { %7267 = vst [vmem:[#allocation29_spill] sm:$0xff] %v4593_v20  ;;  %v166_v28 = vmul.f32 %v4583_v57, %v4491_v53  ;;  %1242 = vadd.xlane.f32.xlu1 %v4593_v20  ;;  %v168_v32 = vadd.f32 %v136_v39, %v131_v38  ;;  %v170_v31 = vadd.f32 %v146_v1, %v141_v40  ;;  %v4628_v38 = vld [vmem:[#allocation5 + $0x298] sm:$0xff] }
  0x49   :  { %v130_v10 = vmul.f32 %v4589_v58, %v4470_v42  ;;  %v135_v33 = vmul.f32 %v4591_v59, %v4473_v45  ;;  %v4622_v35 = vadd.f32 %v912_v51, %v910_v21  ;;  %v172_v44 = vadd.f32 %v156_v60, %v151_v6  ;;  %v4636_v51 = vld [vmem:[#allocation5 + $0x2a8] sm:$0xff]  ;;  %v4638_v6 = vld [vmem:[#allocation5 + $0x2b8] sm:$0xff] }
  0x4a   :  { %v174_v34 = vadd.f32 %v166_v28, %v161_v2  ;;  %v140_v14 = vmul.f32 %v4599_v7, %v4476_v46  ;;  %v176_v39 = vadd.f32 %v170_v31, %v168_v32  ;;  %v145_v40 = vmul.f32 %v4607_v0, %v4479_v48  ;;  %v4645_v31 = vld [vmem:[#allocation5 + $0x2c8] sm:$0xff] }
  0x4b   :  { %7268 = vst [vmem:[#allocation30_spill] sm:$0xff] %v4622_v35  ;;  %v150_v1 = vmul.f32 %v4609_v56, %v4482_v49  ;;  %v155_v21 = vmul.f32 %v4611_v62, %v4485_v50  ;;  %1240 = vadd.xlane.f32.xlu0 %v4622_v35  ;;  %v160_v2 = vmul.f32 %v4618_v22, %v4488_v52  ;;  %v4663_v35 = vld [vmem:[#allocation5 + $0x280] sm:$0xff] }
  0x4c   :  { %v178_v60 = vadd.f32 %v174_v34, %v172_v44  ;;  %v165_v28 = vmul.f32 %v4620_v37, %v4491_v53  ;;  %v167_v32 = vadd.f32 %v135_v33, %v130_v10  ;;  %v169_v4 = vadd.f32 %v145_v40, %v140_v14  ;;  %v4655_v34 = vld [vmem:[#allocation5 + $0x2f8] sm:$0xff]  ;;  %v4665_v14 = vld [vmem:[#allocation5 + $0x290] sm:$0xff]  ;;  %v4667_v40 = vld [vmem:[#allocation5 + $0x2a0] sm:$0xff] }
  0x4d   :  { %v171_v3 = vadd.f32 %v155_v21, %v150_v1  ;;  %v359_v11 = vmul.f32 %v4626_v55, %v4470_v42  ;;  %v364_v44 = vmul.f32 %v4628_v38, %v4473_v45  ;;  %v369_v10 = vmul.f32 %v4636_v51, %v4476_v46 }
  0x4e   :  { %v4657_v41 = vadd.f32 %v178_v60, %v176_v39  ;;  %v173_v20 = vadd.f32 %v165_v28, %v160_v2  ;;  %v374_v33 = vmul.f32 %v4638_v6, %v4479_v48  ;;  %v175_v1 = vadd.f32 %v169_v4, %v167_v32  ;;  %v4675_v2 = vld [vmem:[#allocation5 + $0x2b0] sm:$0xff]  ;;  %v4677_v28 = vld [vmem:[#allocation5 + $0x2c0] sm:$0xff] }
  0x4f   :  { %v379_v21 = vmul.f32 %v4645_v31, %v4482_v49  ;;  %v384_v39 = vmul.f32 %v4647_v8, %v4485_v50  ;;  %v389_v60 = vmul.f32 %v4649_v5, %v4488_v52  ;;  %v394_v30 = vmul.f32 %v4655_v34, %v4491_v53 }
  0x50   :  { %7271 = vst [vmem:[#allocation33_spill] sm:$0xff] %v4657_v41  ;;  %1214 = vadd.xlane.f32.xlu1 %v4657_v41  ;;  %v177_v43 = vadd.f32 %v173_v20, %v171_v3  ;;  %v396_v4 = vadd.f32 %v364_v44, %v359_v11  ;;  %v398_v32 = vadd.f32 %v374_v33, %v369_v10 }
  0x51   :  { %v400_v63 = vadd.f32 %v384_v39, %v379_v21  ;;  %v358_v5 = vmul.f32 %v4663_v35, %v4470_v42  ;;  %v363_v8 = vmul.f32 %v4665_v14, %v4473_v45  ;;  %v368_v3 = vmul.f32 %v4667_v40, %v4476_v46 }
  0x52   :  { %v4694_v20 = vadd.f32 %v177_v43, %v175_v1  ;;  %v402_v11 = vadd.f32 %v394_v30, %v389_v60  ;;  %v404_v44 = vadd.f32 %v398_v32, %v396_v4  ;;  %v373_v10 = vmul.f32 %v4675_v2, %v4479_v48 }
  0x53   :  { %v378_v33 = vmul.f32 %v4677_v28, %v4482_v49  ;;  %v383_v21 = vmul.f32 %v4682_v61, %v4485_v50  ;;  %v388_v39 = vmul.f32 %v4684_v54, %v4488_v52  ;;  %v393_v41 = vmul.f32 %v4686_v29, %v4491_v53 }
  0x54   :  { %7272 = vst [vmem:[#allocation34_spill] sm:$0xff] %v4694_v20  ;;  %1212 = vadd.xlane.f32.xlu0 %v4694_v20  ;;  %v406_v43 = vadd.f32 %v402_v11, %v400_v63  ;;  %v395_v30 = vadd.f32 %v363_v8, %v358_v5  ;;  %v397_v1 = vadd.f32 %v373_v10, %v368_v3 }
  0x55   :  { %v726_v60 = vmul.f32 %v4436_v16, %v4559_v12  ;;  %v399_v4 = vadd.f32 %v383_v21, %v378_v33  ;;  %v401_v32 = vadd.f32 %v393_v41, %v388_v39  ;;  %v730_v49 = vmul.f32 %v4439_v17, %v4564_v13 }
  0x56   :  { %v734_v50 = vmul.f32 %v4442_v18, %v4566_v27  ;;  %v4713_v52 = vadd.f32 %v406_v43, %v404_v44  ;;  %v403_v48 = vadd.f32 %v397_v1, %v395_v30  ;;  %v738_v20 = vmul.f32 %v4445_v19, %v4572_v15  ;;  %v7276_v43 = vld [vmem:[#allocation31_spill] sm:$0xff] }
  0x57   :  { %v742_v5 = vmul.f32 %v4448_v23, %v4574_v9  ;;  %v405_v8 = vadd.f32 %v401_v32, %v399_v4  ;;  %v746_v63 = vmul.f32 %v4451_v24, %v4579_v36  ;;  %v750_v41 = vmul.f32 %v4454_v25, %v4581_v47 }
  0x58   :  { %7273 = vst [vmem:[#allocation35_spill] sm:$0xff] %v4713_v52  ;;  %v754_v12 = vmul.f32 %v4457_v26, %v4583_v57  ;;  %1246 = vadd.xlane.f32.xlu1 %v4713_v52  ;;  %v756_v13 = vadd.f32 %v730_v49, %v726_v60  ;;  %v758_v27 = vadd.f32 %v738_v20, %v734_v50  ;;  %v4902_v52 = vld [vmem:[#allocation5 + $0x370] sm:$0xff] }
  0x59   :  { %v725_v15 = vmul.f32 %v4436_v16, %v4589_v58  ;;  %v729_v9 = vmul.f32 %v4439_v17, %v4591_v59  ;;  %v4730_v3 = vadd.f32 %v405_v8, %v403_v48  ;;  %v760_v11 = vadd.f32 %v746_v63, %v742_v5  ;;  %v4770_v8 = vld [vmem:[#allocation5 + $0x108] sm:$0xff] }
  0x5a   :  { %v762_v36 = vadd.f32 %v754_v12, %v750_v41  ;;  %v733_v47 = vmul.f32 %v4442_v18, %v4599_v7  ;;  %v764_v44 = vadd.f32 %v758_v27, %v756_v13  ;;  %v737_v57 = vmul.f32 %v4445_v19, %v4607_v0  ;;  %v4776_v13 = vld [vmem:[#allocation5 + $0x118] sm:$0xff]  ;;  %v4778_v27 = vld [vmem:[#allocation5 + $0x128] sm:$0xff] }
  0x5b   :  { %7274 = vst [vmem:[#allocation36_spill] sm:$0xff] %v4730_v3  ;;  %v741_v49 = vmul.f32 %v4448_v23, %v4609_v56  ;;  %v745_v50 = vmul.f32 %v4451_v24, %v4611_v62  ;;  %1244 = vadd.xlane.f32.xlu0 %v4730_v3  ;;  %v749_v48 = vmul.f32 %v4454_v25, %v4618_v22 }
  0x5c   :  { %v766_v58 = vadd.f32 %v762_v36, %v760_v11  ;;  %v753_v59 = vmul.f32 %v4457_v26, %v4620_v37  ;;  %v755_v7 = vadd.f32 %v729_v9, %v725_v15  ;;  %v757_v20 = vadd.f32 %v737_v57, %v733_v47  ;;  %v4788_v9 = vld [vmem:[#allocation5 + $0x138] sm:$0xff]  ;;  %v4790_v11 = vld [vmem:[#allocation5 + $0x148] sm:$0xff] }
  0x5d   :  { %v759_v10 = vadd.f32 %v745_v50, %v741_v49  ;;  %v922_v0 = vmul.f32 %v4436_v16, %v4626_v55  ;;  %v926_v56 = vmul.f32 %v4439_v17, %v4628_v38  ;;  %v930_v21 = vmul.f32 %v4442_v18, %v4636_v51  ;;  %v7277_v55 = vld [vmem:[#allocation32_spill] sm:$0xff] }
  0x5e   :  { %v4749_v33 = vadd.f32 %v766_v58, %v764_v44  ;;  %v761_v62 = vadd.f32 %v753_v59, %v749_v48  ;;  %v934_v22 = vmul.f32 %v4445_v19, %v4638_v6  ;;  %v763_v39 = vadd.f32 %v757_v20, %v755_v7  ;;  %v4795_v44 = vld [vmem:[#allocation5 + $0x158] sm:$0xff]  ;;  %v4805_v58 = vld [vmem:[#allocation5 + $0x100] sm:$0xff]  ;;  %v4807_v48 = vld [vmem:[#allocation5 + $0x110] sm:$0xff] }
  0x5f   :  { %v938_v37 = vmul.f32 %v4448_v23, %v4645_v31  ;;  %v942_v30 = vmul.f32 %v4451_v24, %v7276_v43  ;;  %v946_v1 = vmul.f32 %v4454_v25, %v7277_v55  ;;  %v950_v60 = vmul.f32 %v4457_v26, %v4655_v34  ;;  %v7280_v20 = vld [vmem:[#allocation19_spill] sm:$0xff] }
  0x60   :  { %7275 = vst [vmem:[#allocation37_spill] sm:$0xff] %v4749_v33  ;;  %1218 = vadd.xlane.f32.xlu1 %v4749_v33  ;;  %v765_v38 = vadd.f32 %v761_v62, %v759_v10  ;;  %v952_v51 = vadd.f32 %v926_v56, %v922_v0  ;;  %v954_v4 = vadd.f32 %v934_v22, %v930_v21  ;;  %v7281_v0 = vld [vmem:[#allocation20_spill] sm:$0xff]  ;;  %v4815_v62 = vld [vmem:[#allocation5 + $0x120] sm:$0xff]  ;;  %v4823_v55 = vld [vmem:[#allocation5 + $0x130] sm:$0xff] }
  0x61   :  { %v956_v32 = vadd.f32 %v942_v30, %v938_v37  ;;  %v921_v6 = vmul.f32 %v4436_v16, %v4663_v35  ;;  %v925_v31 = vmul.f32 %v4439_v17, %v4665_v14  ;;  %v929_v5 = vmul.f32 %v4442_v18, %v4667_v40  ;;  %v7282_v22 = vld [vmem:[#allocation21_spill] sm:$0xff]  ;;  %v7283_v37 = vld [vmem:[#allocation22_spill] sm:$0xff]  ;;  %v4898_v33 = vld [vmem:[#allocation5 + $0x350] sm:$0xff] }
  0x62   :  { %v4772_v63 = vadd.f32 %v765_v38, %v763_v39  ;;  %v958_v41 = vadd.f32 %v950_v60, %v946_v1  ;;  %v960_v12 = vadd.f32 %v954_v4, %v952_v51  ;;  %v933_v34 = vmul.f32 %v4445_v19, %v4675_v2  ;;  %v4825_v1 = vld [vmem:[#allocation5 + $0x140] sm:$0xff]  ;;  %v4827_v38 = vld [vmem:[#allocation5 + $0x150] sm:$0xff] }
  0x63   :  { %v937_v35 = vmul.f32 %v4448_v23, %v4677_v28  ;;  %v941_v14 = vmul.f32 %v4451_v24, %v4682_v61  ;;  %v945_v40 = vmul.f32 %v4454_v25, %v4684_v54  ;;  %v949_v15 = vmul.f32 %v4457_v26, %v4686_v29  ;;  %v4797_v61 = vld [vmem:[#allocation5 + $0x168] sm:$0xff]  ;;  %v4799_v54 = vld [vmem:[#allocation5 + $0x178] sm:$0xff] }
  0x64   :  { %7278 = vst [vmem:[#allocation31_spill] sm:$0xff] %v4772_v63  ;;  %1216 = vadd.xlane.f32.xlu0 %v4772_v63  ;;  %v962_v2 = vadd.f32 %v958_v41, %v956_v32  ;;  %v951_v36 = vadd.f32 %v925_v31, %v921_v6  ;;  %v953_v47 = vadd.f32 %v933_v34, %v929_v5  ;;  %v4834_v6 = vld [vmem:[#allocation5 + $0x160] sm:$0xff]  ;;  %v4836_v31 = vld [vmem:[#allocation5 + $0x170] sm:$0xff] }
  0x65   :  { %v188_v28 = vmul.f32 %v4770_v8, %v4470_v42  ;;  %v955_v57 = vadd.f32 %v941_v14, %v937_v35  ;;  %v957_v29 = vadd.f32 %v949_v15, %v945_v40  ;;  %v193_v49 = vmul.f32 %v4776_v13, %v4473_v45  ;;  %v4842_v35 = vld [vmem:[#allocation5 + $0x308] sm:$0xff]  ;;  %v4844_v14 = vld [vmem:[#allocation5 + $0x318] sm:$0xff]  ;;  %v4900_v63 = vld [vmem:[#allocation5 + $0x360] sm:$0xff] }
  0x66   :  { %v198_v50 = vmul.f32 %v4778_v27, %v4476_v46  ;;  %v4809_v59 = vadd.f32 %v962_v2, %v960_v12  ;;  %v959_v7 = vadd.f32 %v953_v47, %v951_v36  ;;  %v203_v10 = vmul.f32 %v4788_v9, %v7280_v20  ;;  %v4852_v47 = vld [vmem:[#allocation5 + $0x328] sm:$0xff] }
  0x67   :  { %v208_v56 = vmul.f32 %v4790_v11, %v7281_v0  ;;  %v961_v21 = vadd.f32 %v957_v29, %v955_v57  ;;  %v213_v39 = vmul.f32 %v4795_v44, %v7282_v22  ;;  %v218_v43 = vmul.f32 %v4797_v61, %v7283_v37 }
  0x68   :  { %7279 = vst [vmem:[#allocation32_spill] sm:$0xff] %v4809_v59  ;;  %v223_v30 = vmul.f32 %v4799_v54, %v4491_v53  ;;  %1250 = vadd.xlane.f32.xlu1 %v4809_v59  ;;  %v225_v60 = vadd.f32 %v193_v49, %v188_v28  ;;  %v227_v51 = vadd.f32 %v203_v10, %v198_v50  ;;  %v4854_v28 = vld [vmem:[#allocation5 + $0x338] sm:$0xff] }
  0x69   :  { %v187_v4 = vmul.f32 %v4805_v58, %v4470_v42  ;;  %v192_v32 = vmul.f32 %v4807_v48, %v4473_v45  ;;  %v4838_v5 = vadd.f32 %v961_v21, %v959_v7  ;;  %v229_v41 = vadd.f32 %v213_v39, %v208_v56  ;;  %v4861_v7 = vld [vmem:[#allocation5 + $0x348] sm:$0xff]  ;;  %v4863_v10 = vld [vmem:[#allocation5 + $0x358] sm:$0xff] }
  0x6a   :  { %v231_v12 = vadd.f32 %v223_v30, %v218_v43  ;;  %v197_v34 = vmul.f32 %v4815_v62, %v4476_v46  ;;  %v233_v40 = vadd.f32 %v227_v51, %v225_v60  ;;  %v202_v15 = vmul.f32 %v4823_v55, %v7280_v20  ;;  %7285 = vst [vmem:[#allocation39_spill] sm:$0xff] %v4863_v10  ;;  %v4865_v56 = vld [vmem:[#allocation5 + $0x368] sm:$0xff]  ;;  %v4871_v60 = vld [vmem:[#allocation5 + $0x378] sm:$0xff] }
  0x6b   :  { %7284 = vst [vmem:[#allocation38_spill] sm:$0xff] %v4838_v5  ;;  %v207_v2 = vmul.f32 %v4825_v1, %v7281_v0  ;;  %v212_v36 = vmul.f32 %v4827_v38, %v7282_v22  ;;  %1248 = vadd.xlane.f32.xlu0 %v4838_v5  ;;  %v217_v29 = vmul.f32 %v4834_v6, %v7283_v37  ;;  %7286 = vst [vmem:[#allocation40_spill] sm:$0xff] %v4865_v56 }
  0x6c   :  { %v235_v57 = vadd.f32 %v231_v12, %v229_v41  ;;  %v222_v49 = vmul.f32 %v4836_v31, %v4491_v53  ;;  %v224_v50 = vadd.f32 %v192_v32, %v187_v4  ;;  %v226_v21 = vadd.f32 %v202_v15, %v197_v34  ;;  %v4879_v12 = vld [vmem:[#allocation5 + $0x300] sm:$0xff]  ;;  %v4881_v34 = vld [vmem:[#allocation5 + $0x310] sm:$0xff] }
  0x6d   :  { %v228_v39 = vadd.f32 %v212_v36, %v207_v2  ;;  %v416_v43 = vmul.f32 %v4842_v35, %v4470_v42  ;;  %v421_v30 = vmul.f32 %v4844_v14, %v4473_v45  ;;  %v426_v4 = vmul.f32 %v4852_v47, %v4476_v46  ;;  %v4883_v15 = vld [vmem:[#allocation5 + $0x320] sm:$0xff] }
  0x6e   :  { %v4873_v51 = vadd.f32 %v235_v57, %v233_v40  ;;  %v230_v41 = vadd.f32 %v222_v49, %v217_v29  ;;  %v431_v32 = vmul.f32 %v4854_v28, %v7280_v20  ;;  %v232_v2 = vadd.f32 %v226_v21, %v224_v50  ;;  %v4891_v29 = vld [vmem:[#allocation5 + $0x330] sm:$0xff]  ;;  %v4893_v49 = vld [vmem:[#allocation5 + $0x340] sm:$0xff] }
  0x6f   :  { %v436_v36 = vmul.f32 %v4861_v7, %v7281_v0  ;;  %v441_v40 = vmul.f32 %v4863_v10, %v7282_v22  ;;  %v446_v57 = vmul.f32 %v4865_v56, %v7283_v37  ;;  %v451_v5 = vmul.f32 %v4871_v60, %v4491_v53 }
  0x70   :  { %7287 = vst [vmem:[#allocation41_spill] sm:$0xff] %v4873_v51  ;;  %1222 = vadd.xlane.f32.xlu1 %v4873_v51  ;;  %v234_v59 = vadd.f32 %v230_v41, %v228_v39  ;;  %v453_v50 = vadd.f32 %v421_v30, %v416_v43  ;;  %v455_v21 = vadd.f32 %v431_v32, %v426_v4 }
  0x71   :  { %v457_v3 = vadd.f32 %v441_v40, %v436_v36  ;;  %v415_v56 = vmul.f32 %v4879_v12, %v4470_v42  ;;  %v420_v10 = vmul.f32 %v4881_v34, %v4473_v45  ;;  %v425_v39 = vmul.f32 %v4883_v15, %v4476_v46 }
  0x72   :  { %v4910_v41 = vadd.f32 %v234_v59, %v232_v2  ;;  %v459_v43 = vadd.f32 %v451_v5, %v446_v57  ;;  %v461_v30 = vadd.f32 %v455_v21, %v453_v50  ;;  %v430_v4 = vmul.f32 %v4891_v29, %v7280_v20 }
  0x73   :  { %v435_v32 = vmul.f32 %v4893_v49, %v7281_v0  ;;  %v440_v36 = vmul.f32 %v4898_v33, %v7282_v22  ;;  %v445_v40 = vmul.f32 %v4900_v63, %v7283_v37  ;;  %v450_v51 = vmul.f32 %v4902_v52, %v4491_v53 }
  0x74   :  { %7288 = vst [vmem:[#allocation42_spill] sm:$0xff] %v4910_v41  ;;  %1220 = vadd.xlane.f32.xlu0 %v4910_v41  ;;  %v463_v59 = vadd.f32 %v459_v43, %v457_v3  ;;  %v452_v5 = vadd.f32 %v420_v10, %v415_v56  ;;  %v454_v2 = vadd.f32 %v430_v4, %v425_v39 }
  0x75   :  { %v775_v57 = vmul.f32 %v4436_v16, %v4770_v8  ;;  %v456_v50 = vadd.f32 %v440_v36, %v435_v32  ;;  %v458_v21 = vadd.f32 %v450_v51, %v445_v40  ;;  %v779_v0 = vmul.f32 %v4439_v17, %v4776_v13 }
  0x76   :  { %v783_v22 = vmul.f32 %v4442_v18, %v4778_v27  ;;  %v4929_v37 = vadd.f32 %v463_v59, %v461_v30  ;;  %v460_v20 = vadd.f32 %v454_v2, %v452_v5  ;;  %v787_v41 = vmul.f32 %v4445_v19, %v4788_v9  ;;  %v7292_v59 = vld [vmem:[#allocation39_spill] sm:$0xff] }
  0x77   :  { %v791_v3 = vmul.f32 %v4448_v23, %v4790_v11  ;;  %v462_v10 = vadd.f32 %v458_v21, %v456_v50  ;;  %v795_v8 = vmul.f32 %v4451_v24, %v4795_v44  ;;  %v799_v56 = vmul.f32 %v4454_v25, %v4797_v61 }
  0x78   :  { %7289 = vst [vmem:[#allocation43_spill] sm:$0xff] %v4929_v37  ;;  %v803_v13 = vmul.f32 %v4457_v26, %v4799_v54  ;;  %1254 = vadd.xlane.f32.xlu1 %v4929_v37  ;;  %v805_v27 = vadd.f32 %v779_v0, %v775_v57  ;;  %v807_v51 = vadd.f32 %v787_v41, %v783_v22  ;;  %v5118_v37 = vld [vmem:[#allocation5 + $0x3f0] sm:$0xff] }
  0x79   :  { %v774_v9 = vmul.f32 %v4436_v16, %v4805_v58  ;;  %v778_v11 = vmul.f32 %v4439_v17, %v4807_v48  ;;  %v4946_v39 = vadd.f32 %v462_v10, %v460_v20  ;;  %v809_v43 = vadd.f32 %v795_v8, %v791_v3  ;;  %v4986_v10 = vld [vmem:[#allocation5 + $0x188] sm:$0xff] }
  0x7a   :  { %v811_v44 = vadd.f32 %v803_v13, %v799_v56  ;;  %v782_v61 = vmul.f32 %v4442_v18, %v4815_v62  ;;  %v813_v30 = vadd.f32 %v807_v51, %v805_v27  ;;  %v786_v54 = vmul.f32 %v4445_v19, %v4823_v55  ;;  %v4992_v27 = vld [vmem:[#allocation5 + $0x198] sm:$0xff]  ;;  %v4994_v51 = vld [vmem:[#allocation5 + $0x1a8] sm:$0xff] }
  0x7b   :  { %7290 = vst [vmem:[#allocation44_spill] sm:$0xff] %v4946_v39  ;;  %v790_v0 = vmul.f32 %v4448_v23, %v4825_v1  ;;  %v794_v58 = vmul.f32 %v4451_v24, %v4827_v38  ;;  %1252 = vadd.xlane.f32.xlu0 %v4946_v39  ;;  %v798_v20 = vmul.f32 %v4454_v25, %v4834_v6 }
  0x7c   :  { %v815_v48 = vadd.f32 %v811_v44, %v809_v43  ;;  %v802_v22 = vmul.f32 %v4457_v26, %v4836_v31  ;;  %v804_v62 = vadd.f32 %v778_v11, %v774_v9  ;;  %v806_v41 = vadd.f32 %v786_v54, %v782_v61  ;;  %v5004_v11 = vld [vmem:[#allocation5 + $0x1b8] sm:$0xff]  ;;  %v5006_v43 = vld [vmem:[#allocation5 + $0x1c8] sm:$0xff] }
  0x7d   :  { %v808_v4 = vadd.f32 %v794_v58, %v790_v0  ;;  %v971_v55 = vmul.f32 %v4436_v16, %v4842_v35  ;;  %v975_v1 = vmul.f32 %v4439_v17, %v4844_v14  ;;  %v979_v36 = vmul.f32 %v4442_v18, %v4852_v47  ;;  %v7293_v35 = vld [vmem:[#allocation40_spill] sm:$0xff] }
  0x7e   :  { %v4965_v32 = vadd.f32 %v815_v48, %v813_v30  ;;  %v810_v38 = vadd.f32 %v802_v22, %v798_v20  ;;  %v983_v6 = vmul.f32 %v4445_v19, %v4854_v28  ;;  %v812_v40 = vadd.f32 %v806_v41, %v804_v62  ;;  %v5011_v30 = vld [vmem:[#allocation5 + $0x1d8] sm:$0xff]  ;;  %v5021_v48 = vld [vmem:[#allocation5 + $0x180] sm:$0xff]  ;;  %v5023_v20 = vld [vmem:[#allocation5 + $0x190] sm:$0xff] }
  0x7f   :  { %v987_v31 = vmul.f32 %v4448_v23, %v4861_v7  ;;  %v991_v5 = vmul.f32 %v4451_v24, %v7292_v59  ;;  %v995_v2 = vmul.f32 %v4454_v25, %v7293_v35  ;;  %v999_v57 = vmul.f32 %v4457_v26, %v4871_v60  ;;  %v7296_v41 = vld [vmem:[#allocation19_spill] sm:$0xff] }
  0x80   :  { %7291 = vst [vmem:[#allocation45_spill] sm:$0xff] %v4965_v32  ;;  %1226 = vadd.xlane.f32.xlu1 %v4965_v32  ;;  %v814_v14 = vadd.f32 %v810_v38, %v808_v4  ;;  %v1001_v47 = vadd.f32 %v975_v1, %v971_v55  ;;  %v1003_v50 = vadd.f32 %v983_v6, %v979_v36  ;;  %v7297_v55 = vld [vmem:[#allocation20_spill] sm:$0xff]  ;;  %v5031_v38 = vld [vmem:[#allocation5 + $0x1a0] sm:$0xff]  ;;  %v5039_v35 = vld [vmem:[#allocation5 + $0x1b0] sm:$0xff] }
  0x81   :  { %v1005_v21 = vadd.f32 %v991_v5, %v987_v31  ;;  %v970_v28 = vmul.f32 %v4436_v16, %v4879_v12  ;;  %v974_v7 = vmul.f32 %v4439_v17, %v4881_v34  ;;  %v978_v3 = vmul.f32 %v4442_v18, %v4883_v15  ;;  %v7298_v6 = vld [vmem:[#allocation21_spill] sm:$0xff]  ;;  %v7299_v31 = vld [vmem:[#allocation22_spill] sm:$0xff]  ;;  %v5114_v32 = vld [vmem:[#allocation5 + $0x3d0] sm:$0xff] }
  0x82   :  { %v4988_v8 = vadd.f32 %v814_v14, %v812_v40  ;;  %v1007_v56 = vadd.f32 %v999_v57, %v995_v2  ;;  %v1009_v13 = vadd.f32 %v1003_v50, %v1001_v47  ;;  %v982_v60 = vmul.f32 %v4445_v19, %v4891_v29  ;;  %v5041_v2 = vld [vmem:[#allocation5 + $0x1c0] sm:$0xff]  ;;  %v5043_v14 = vld [vmem:[#allocation5 + $0x1d0] sm:$0xff] }
  0x83   :  { %v986_v12 = vmul.f32 %v4448_v23, %v4893_v49  ;;  %v990_v34 = vmul.f32 %v4451_v24, %v4898_v33  ;;  %v994_v15 = vmul.f32 %v4454_v25, %v4900_v63  ;;  %v998_v9 = vmul.f32 %v4457_v26, %v4902_v52  ;;  %v5013_v33 = vld [vmem:[#allocation5 + $0x1e8] sm:$0xff]  ;;  %v5015_v63 = vld [vmem:[#allocation5 + $0x1f8] sm:$0xff] }
  0x84   :  { %7294 = vst [vmem:[#allocation39_spill] sm:$0xff] %v4988_v8  ;;  %1224 = vadd.xlane.f32.xlu0 %v4988_v8  ;;  %v1011_v29 = vadd.f32 %v1007_v56, %v1005_v21  ;;  %v1000_v44 = vadd.f32 %v974_v7, %v970_v28  ;;  %v1002_v61 = vadd.f32 %v982_v60, %v978_v3  ;;  %v5050_v28 = vld [vmem:[#allocation5 + $0x1e0] sm:$0xff]  ;;  %v5052_v7 = vld [vmem:[#allocation5 + $0x1f0] sm:$0xff] }
  0x85   :  { %v245_v49 = vmul.f32 %v4986_v10, %v4470_v42  ;;  %v1004_v54 = vadd.f32 %v990_v34, %v986_v12  ;;  %v1006_v52 = vadd.f32 %v998_v9, %v994_v15  ;;  %v250_v0 = vmul.f32 %v4992_v27, %v4473_v45  ;;  %v5058_v12 = vld [vmem:[#allocation5 + $0x388] sm:$0xff]  ;;  %v5060_v34 = vld [vmem:[#allocation5 + $0x398] sm:$0xff]  ;;  %v5116_v8 = vld [vmem:[#allocation5 + $0x3e0] sm:$0xff] }
  0x86   :  { %v255_v58 = vmul.f32 %v4994_v51, %v4476_v46  ;;  %v5025_v22 = vadd.f32 %v1011_v29, %v1009_v13  ;;  %v1008_v62 = vadd.f32 %v1002_v61, %v1000_v44  ;;  %v260_v4 = vmul.f32 %v5004_v11, %v7296_v41  ;;  %v5068_v61 = vld [vmem:[#allocation5 + $0x3a8] sm:$0xff] }
  0x87   :  { %v265_v1 = vmul.f32 %v5006_v43, %v7297_v55  ;;  %v1010_v36 = vadd.f32 %v1006_v52, %v1004_v54  ;;  %v270_v40 = vmul.f32 %v5011_v30, %v7298_v6  ;;  %v275_v59 = vmul.f32 %v5013_v33, %v7299_v31 }
  0x88   :  { %7295 = vst [vmem:[#allocation40_spill] sm:$0xff] %v5025_v22  ;;  %v280_v5 = vmul.f32 %v5015_v63, %v4491_v53  ;;  %1258 = vadd.xlane.f32.xlu1 %v5025_v22  ;;  %v282_v57 = vadd.f32 %v250_v0, %v245_v49  ;;  %v284_v47 = vadd.f32 %v260_v4, %v255_v58  ;;  %v5070_v49 = vld [vmem:[#allocation5 + $0x3b8] sm:$0xff] }
  0x89   :  { %v244_v50 = vmul.f32 %v5021_v48, %v4470_v42  ;;  %v249_v21 = vmul.f32 %v5023_v20, %v4473_v45  ;;  %v5054_v3 = vadd.f32 %v1010_v36, %v1008_v62  ;;  %v286_v56 = vadd.f32 %v270_v40, %v265_v1  ;;  %v5077_v62 = vld [vmem:[#allocation5 + $0x3c8] sm:$0xff]  ;;  %v5079_v4 = vld [vmem:[#allocation5 + $0x3d8] sm:$0xff] }
  0x8a   :  { %v288_v13 = vadd.f32 %v280_v5, %v275_v59  ;;  %v254_v60 = vmul.f32 %v5031_v38, %v4476_v46  ;;  %v290_v15 = vadd.f32 %v284_v47, %v282_v57  ;;  %v259_v9 = vmul.f32 %v5039_v35, %v7296_v41  ;;  %7301 = vst [vmem:[#allocation47_spill] sm:$0xff] %v5079_v4  ;;  %v5081_v1 = vld [vmem:[#allocation5 + $0x3e8] sm:$0xff]  ;;  %v5087_v57 = vld [vmem:[#allocation5 + $0x3f8] sm:$0xff] }
  0x8b   :  { %7300 = vst [vmem:[#allocation46_spill] sm:$0xff] %v5054_v3  ;;  %v264_v29 = vmul.f32 %v5041_v2, %v7297_v55  ;;  %v269_v44 = vmul.f32 %v5043_v14, %v7298_v6  ;;  %1256 = vadd.xlane.f32.xlu0 %v5054_v3  ;;  %v274_v52 = vmul.f32 %v5050_v28, %v7299_v31  ;;  %7302 = vst [vmem:[#allocation48_spill] sm:$0xff] %v5081_v1 }
  0x8c   :  { %v292_v54 = vadd.f32 %v288_v13, %v286_v56  ;;  %v279_v0 = vmul.f32 %v5052_v7, %v4491_v53  ;;  %v281_v58 = vadd.f32 %v249_v21, %v244_v50  ;;  %v283_v36 = vadd.f32 %v259_v9, %v254_v60  ;;  %v5095_v13 = vld [vmem:[#allocation5 + $0x380] sm:$0xff]  ;;  %v5097_v60 = vld [vmem:[#allocation5 + $0x390] sm:$0xff] }
  0x8d   :  { %v285_v40 = vadd.f32 %v269_v44, %v264_v29  ;;  %v473_v59 = vmul.f32 %v5058_v12, %v4470_v42  ;;  %v478_v5 = vmul.f32 %v5060_v34, %v4473_v45  ;;  %v483_v50 = vmul.f32 %v5068_v61, %v4476_v46  ;;  %v5099_v9 = vld [vmem:[#allocation5 + $0x3a0] sm:$0xff] }
  0x8e   :  { %v5089_v47 = vadd.f32 %v292_v54, %v290_v15  ;;  %v287_v56 = vadd.f32 %v279_v0, %v274_v52  ;;  %v488_v21 = vmul.f32 %v5070_v49, %v7296_v41  ;;  %v289_v29 = vadd.f32 %v283_v36, %v281_v58  ;;  %v5107_v52 = vld [vmem:[#allocation5 + $0x3b0] sm:$0xff]  ;;  %v5109_v0 = vld [vmem:[#allocation5 + $0x3c0] sm:$0xff] }
  0x8f   :  { %v493_v44 = vmul.f32 %v5077_v62, %v7297_v55  ;;  %v498_v15 = vmul.f32 %v5079_v4, %v7298_v6  ;;  %v503_v54 = vmul.f32 %v5081_v1, %v7299_v31  ;;  %v508_v3 = vmul.f32 %v5087_v57, %v4491_v53 }
  0x90   :  { %7303 = vst [vmem:[#allocation49_spill] sm:$0xff] %v5089_v47  ;;  %1230 = vadd.xlane.f32.xlu1 %v5089_v47  ;;  %v291_v22 = vadd.f32 %v287_v56, %v285_v40  ;;  %v510_v58 = vadd.f32 %v478_v5, %v473_v59  ;;  %v512_v36 = vadd.f32 %v488_v21, %v483_v50 }
  0x91   :  { %v514_v39 = vadd.f32 %v498_v15, %v493_v44  ;;  %v472_v1 = vmul.f32 %v5095_v13, %v4470_v42  ;;  %v477_v4 = vmul.f32 %v5097_v60, %v4473_v45  ;;  %v482_v40 = vmul.f32 %v5099_v9, %v4476_v46 }
  0x92   :  { %v5126_v56 = vadd.f32 %v291_v22, %v289_v29  ;;  %v516_v59 = vadd.f32 %v508_v3, %v503_v54  ;;  %v518_v5 = vadd.f32 %v512_v36, %v510_v58  ;;  %v487_v50 = vmul.f32 %v5107_v52, %v7296_v41 }
  0x93   :  { %v492_v21 = vmul.f32 %v5109_v0, %v7297_v55  ;;  %v497_v44 = vmul.f32 %v5114_v32, %v7298_v6  ;;  %v502_v15 = vmul.f32 %v5116_v8, %v7299_v31  ;;  %v507_v47 = vmul.f32 %v5118_v37, %v4491_v53 }
  0x94   :  { %7304 = vst [vmem:[#allocation50_spill] sm:$0xff] %v5126_v56  ;;  %1228 = vadd.xlane.f32.xlu0 %v5126_v56  ;;  %v520_v22 = vadd.f32 %v516_v59, %v514_v39  ;;  %v509_v3 = vadd.f32 %v477_v4, %v472_v1  ;;  %v511_v29 = vadd.f32 %v487_v50, %v482_v40 }
  0x95   :  { %v824_v54 = vmul.f32 %v4436_v16, %v4986_v10  ;;  %v513_v58 = vadd.f32 %v497_v44, %v492_v21  ;;  %v515_v36 = vadd.f32 %v507_v47, %v502_v15  ;;  %v828_v55 = vmul.f32 %v4439_v17, %v4992_v27 }
  0x96   :  { %v832_v6 = vmul.f32 %v4442_v18, %v4994_v51  ;;  %v5145_v31 = vadd.f32 %v520_v22, %v518_v5  ;;  %v517_v41 = vadd.f32 %v511_v29, %v509_v3  ;;  %v836_v56 = vmul.f32 %v4445_v19, %v5004_v11  ;;  %v7307_v22 = vld [vmem:[#allocation47_spill] sm:$0xff] }
  0x97   :  { %v840_v39 = vmul.f32 %v4448_v23, %v5006_v43  ;;  %v519_v4 = vadd.f32 %v515_v36, %v513_v58  ;;  %v844_v10 = vmul.f32 %v4451_v24, %v5011_v30  ;;  %v848_v1 = vmul.f32 %v4454_v25, %v5013_v33 }
  0x98   :  { %7305 = vst [vmem:[#allocation51_spill] sm:$0xff] %v5145_v31  ;;  %v852_v27 = vmul.f32 %v4457_v26, %v5015_v63  ;;  %1262 = vadd.xlane.f32.xlu1 %v5145_v31  ;;  %v854_v51 = vadd.f32 %v828_v55, %v824_v54  ;;  %v856_v47 = vadd.f32 %v836_v56, %v832_v6 }
  0x99   :  { %v823_v11 = vmul.f32 %v4436_v16, %v5021_v48  ;;  %v827_v43 = vmul.f32 %v4439_v17, %v5023_v20  ;;  %v5162_v40 = vadd.f32 %v519_v4, %v517_v41  ;;  %v858_v59 = vadd.f32 %v844_v10, %v840_v39  ;;  %v528_v4 = vld [vmem:[#allocation5 + $0x408] sm:$0xff] }
  0x9a   :  { %v860_v30 = vadd.f32 %v852_v27, %v848_v1  ;;  %v831_v33 = vmul.f32 %v4442_v18, %v5031_v38  ;;  %v862_v5 = vadd.f32 %v856_v47, %v854_v51  ;;  %v835_v63 = vmul.f32 %v4445_v19, %v5039_v35  ;;  %v533_v51 = vld [vmem:[#allocation5 + $0x418] sm:$0xff]  ;;  %v538_v47 = vld [vmem:[#allocation5 + $0x428] sm:$0xff] }
  0x9b   :  { %7306 = vst [vmem:[#allocation52_spill] sm:$0xff] %v5162_v40  ;;  %v839_v55 = vmul.f32 %v4448_v23, %v5041_v2  ;;  %v843_v48 = vmul.f32 %v4451_v24, %v5043_v14  ;;  %1260 = vadd.xlane.f32.xlu0 %v5162_v40  ;;  %v847_v41 = vmul.f32 %v4454_v25, %v5050_v28 }
  0x9c   :  { %v864_v20 = vadd.f32 %v860_v30, %v858_v59  ;;  %v851_v6 = vmul.f32 %v4457_v26, %v5052_v7  ;;  %v853_v38 = vadd.f32 %v827_v43, %v823_v11  ;;  %v855_v56 = vadd.f32 %v835_v63, %v831_v33  ;;  %v543_v43 = vld [vmem:[#allocation5 + $0x438] sm:$0xff]  ;;  %v548_v59 = vld [vmem:[#allocation5 + $0x448] sm:$0xff] }
  0x9d   :  { %v857_v50 = vadd.f32 %v843_v48, %v839_v55  ;;  %v1020_v35 = vmul.f32 %v4436_v16, %v5058_v12  ;;  %v1024_v2 = vmul.f32 %v4439_v17, %v5060_v34  ;;  %v1028_v44 = vmul.f32 %v4442_v18, %v5068_v61  ;;  %v7308_v12 = vld [vmem:[#allocation48_spill] sm:$0xff] }
  0x9e   :  { %v5181_v21 = vadd.f32 %v864_v20, %v862_v5  ;;  %v859_v14 = vadd.f32 %v851_v6, %v847_v41  ;;  %v1032_v28 = vmul.f32 %v4445_v19, %v5070_v49  ;;  %v861_v15 = vadd.f32 %v855_v56, %v853_v38  ;;  %v553_v63 = vld [vmem:[#allocation5 + $0x458] sm:$0xff]  ;;  %v527_v41 = vld [vmem:[#allocation5 + $0x400] sm:$0xff]  ;;  %v7311_v56 = vld [vmem:[#allocation19_spill] sm:$0xff] }
  0x9f   :  { %v1036_v7 = vmul.f32 %v4448_v23, %v5077_v62  ;;  %v1040_v3 = vmul.f32 %v4451_v24, %v7307_v22  ;;  %v1044_v29 = vmul.f32 %v4454_v25, %v7308_v12  ;;  %v1048_v54 = vmul.f32 %v4457_v26, %v5087_v57  ;;  %v563_v55 = vld [vmem:[#allocation5 + $0x478] sm:$0xff]  ;;  %v542_v12 = vld [vmem:[#allocation5 + $0x430] sm:$0xff] }
  0xa0   :  { %1234 = vadd.xlane.f32.xlu1 %v5181_v21  ;;  %v863_v34 = vadd.f32 %v859_v14, %v857_v50  ;;  %v1050_v61 = vadd.f32 %v1024_v2, %v1020_v35  ;;  %v1052_v58 = vadd.f32 %v1032_v28, %v1028_v44  ;;  %v1019_v49 = vmul.f32 %v4436_v16, %v5095_v13  ;;  %v7312_v35 = vld [vmem:[#allocation20_spill] sm:$0xff]  ;;  %v537_v14 = vld [vmem:[#allocation5 + $0x420] sm:$0xff] }
  0xa1   :  { %v1054_v36 = vadd.f32 %v1040_v3, %v1036_v7  ;;  %v1023_v62 = vmul.f32 %v4439_v17, %v5097_v60  ;;  %v1027_v39 = vmul.f32 %v4442_v18, %v5099_v9  ;;  %v1056_v1 = vadd.f32 %v1048_v54, %v1044_v29  ;;  %v7313_v28 = vld [vmem:[#allocation21_spill] sm:$0xff]  ;;  %v7314_v7 = vld [vmem:[#allocation22_spill] sm:$0xff] }
  0xa2   :  { %v5202_v10 = vadd.f32 %v863_v34, %v861_v15  ;;  %v1058_v27 = vadd.f32 %v1052_v58, %v1050_v61  ;;  %v1031_v57 = vmul.f32 %v4445_v19, %v5107_v52  ;;  %v1035_v11 = vmul.f32 %v4448_v23, %v5109_v0  ;;  %v558_v0 = vld [vmem:[#allocation5 + $0x468] sm:$0xff]  ;;  %v547_v29 = vld [vmem:[#allocation5 + $0x440] sm:$0xff]  ;;  %v552_v34 = vld [vmem:[#allocation5 + $0x450] sm:$0xff] }
  0xa3   :  { %v1039_v13 = vmul.f32 %v4451_v24, %v5114_v32  ;;  %v1043_v60 = vmul.f32 %v4454_v25, %v5116_v8  ;;  %v1047_v9 = vmul.f32 %v4457_v26, %v5118_v37  ;;  %v1060_v30 = vadd.f32 %v1056_v1, %v1054_v36  ;;  %v532_v37 = vld [vmem:[#allocation5 + $0x410] sm:$0xff] }
  0xa4   :  { %7309 = vst [vmem:[#allocation47_spill] sm:$0xff] %v5202_v10  ;;  %1232 = vadd.xlane.f32.xlu0 %v5202_v10  ;;  %v1049_v52 = vadd.f32 %v1023_v62, %v1019_v49  ;;  %v1051_v33 = vadd.f32 %v1031_v57, %v1027_v39  ;;  %v530_v5 = vmul.f32 %v528_v4, %v4470_v42  ;;  %v557_v49 = vld [vmem:[#allocation5 + $0x460] sm:$0xff]  ;;  %v562_v62 = vld [vmem:[#allocation5 + $0x470] sm:$0xff] }
  0xa5   :  { %v1053_v48 = vadd.f32 %v1039_v13, %v1035_v11  ;;  %v1055_v32 = vadd.f32 %v1047_v9, %v1043_v60  ;;  %v535_v20 = vmul.f32 %v533_v51, %v4473_v45  ;;  %v540_v8 = vmul.f32 %v538_v47, %v4476_v46 }
  0xa6   :  { %v5218_v6 = vadd.f32 %v1060_v30, %v1058_v27  ;;  %v1057_v38 = vadd.f32 %v1051_v33, %v1049_v52  ;;  %v545_v50 = vmul.f32 %v543_v43, %v7311_v56  ;;  %v550_v2 = vmul.f32 %v548_v59, %v7312_v35 }
  0xa7   :  { %v1059_v44 = vadd.f32 %v1055_v32, %v1053_v48  ;;  %v555_v15 = vmul.f32 %v553_v63, %v7313_v28  ;;  %v560_v22 = vmul.f32 %v558_v0, %v7314_v7  ;;  %v565_v3 = vmul.f32 %v563_v55, %v4491_v53 }
  0xa8   :  { %7310 = vst [vmem:[#allocation48_spill] sm:$0xff] %v5218_v6  ;;  %1266 = vadd.xlane.f32.xlu1 %v5218_v6  ;;  %v567_v54 = vadd.f32 %v535_v20, %v530_v5  ;;  %v569_v61 = vadd.f32 %v545_v50, %v540_v8  ;;  %v529_v58 = vmul.f32 %v527_v41, %v4470_v42 }
  0xa9   :  { %v534_v36 = vmul.f32 %v532_v37, %v4473_v45  ;;  %v5228_v39 = vadd.f32 %v1059_v44, %v1057_v38  ;;  %v571_v1 = vadd.f32 %v555_v15, %v550_v2  ;;  %v573_v27 = vadd.f32 %v565_v3, %v560_v22 }
  0xaa   :  { %v539_v57 = vmul.f32 %v537_v14, %v4476_v46  ;;  %v575_v11 = vadd.f32 %v569_v61, %v567_v54  ;;  %v544_v13 = vmul.f32 %v542_v12, %v7311_v56  ;;  %v549_v60 = vmul.f32 %v547_v29, %v7312_v35 }
  0xab   :  { %7315 = vst [vmem:[#allocation19_spill] sm:$0xff] %v5228_v39  ;;  %v554_v9 = vmul.f32 %v552_v34, %v7313_v28  ;;  %1264 = vadd.xlane.f32.xlu0 %v5228_v39  ;;  %v577_v30 = vadd.f32 %v573_v27, %v571_v1  ;;  %v559_v52 = vmul.f32 %v557_v49, %v7314_v7  ;;  %v585_v27 = vld [vmem:[#allocation5 + $0x488] sm:$0xff] }
  0xac   :  { %v564_v33 = vmul.f32 %v562_v62, %v4491_v53  ;;  %v566_v5 = vadd.f32 %v534_v36, %v529_v58  ;;  %v568_v48 = vadd.f32 %v544_v13, %v539_v57  ;;  %v1069_v20 = vmul.f32 %v4436_v16, %v528_v4  ;;  %v595_v13 = vld [vmem:[#allocation5 + $0x4a8] sm:$0xff] }
  0xad   :  { %v570_v32 = vadd.f32 %v554_v9, %v549_v60  ;;  %v1073_v8 = vmul.f32 %v4439_v17, %v533_v51  ;;  %v5239_v38 = vadd.f32 %v577_v30, %v575_v11  ;;  %v1077_v2 = vmul.f32 %v4442_v18, %v538_v47  ;;  %v590_v11 = vld [vmem:[#allocation5 + $0x498] sm:$0xff]  ;;  %v605_v30 = vld [vmem:[#allocation5 + $0x4c8] sm:$0xff] }
  0xae   :  { %v572_v50 = vadd.f32 %v564_v33, %v559_v52  ;;  %v1081_v44 = vmul.f32 %v4445_v19, %v543_v43  ;;  %v574_v15 = vadd.f32 %v568_v48, %v566_v5  ;;  %v1085_v22 = vmul.f32 %v4448_v23, %v548_v59  ;;  %v615_v48 = vld [vmem:[#allocation5 + $0x4e8] sm:$0xff] }
  0xaf   :  { %7316 = vst [vmem:[#allocation20_spill] sm:$0xff] %v5239_v38  ;;  %v1089_v3 = vmul.f32 %v4451_v24, %v553_v63  ;;  %v1093_v54 = vmul.f32 %v4454_v25, %v558_v0  ;;  %1270 = vadd.xlane.f32.xlu1 %v5239_v38  ;;  %v1097_v4 = vmul.f32 %v4457_v26, %v563_v55 }
  0xb0   :  { %v576_v61 = vadd.f32 %v572_v50, %v570_v32  ;;  %v1099_v51 = vadd.f32 %v1073_v8, %v1069_v20  ;;  %v1101_v58 = vadd.f32 %v1081_v44, %v1077_v2  ;;  %v1068_v1 = vmul.f32 %v4436_v16, %v527_v41  ;;  %v620_v32 = vld [vmem:[#allocation5 + $0x4f8] sm:$0xff]  ;;  %v584_v8 = vld [vmem:[#allocation5 + $0x480] sm:$0xff] }
  0xb1   :  { %v1103_v36 = vadd.f32 %v1089_v3, %v1085_v22  ;;  %v1072_v47 = vmul.f32 %v4439_v17, %v532_v37  ;;  %v1076_v43 = vmul.f32 %v4442_v18, %v537_v14  ;;  %v1105_v63 = vadd.f32 %v1097_v4, %v1093_v54  ;;  %v600_v37 = vld [vmem:[#allocation5 + $0x4b8] sm:$0xff]  ;;  %v594_v22 = vld [vmem:[#allocation5 + $0x4a0] sm:$0xff] }
  0xb2   :  { %v5251_v59 = vadd.f32 %v576_v61, %v574_v15  ;;  %v1107_v57 = vadd.f32 %v1101_v58, %v1099_v51  ;;  %v1080_v0 = vmul.f32 %v4445_v19, %v542_v12  ;;  %v1084_v55 = vmul.f32 %v4448_v23, %v547_v29  ;;  %v610_v12 = vld [vmem:[#allocation5 + $0x4d8] sm:$0xff]  ;;  %v599_v51 = vld [vmem:[#allocation5 + $0x4b0] sm:$0xff]  ;;  %v604_v58 = vld [vmem:[#allocation5 + $0x4c0] sm:$0xff] }
  0xb3   :  { %v1088_v60 = vmul.f32 %v4451_v24, %v552_v34  ;;  %v1092_v9 = vmul.f32 %v4454_v25, %v557_v49  ;;  %v1096_v41 = vmul.f32 %v4457_v26, %v562_v62  ;;  %v1109_v14 = vadd.f32 %v1105_v63, %v1103_v36  ;;  %v589_v62 = vld [vmem:[#allocation5 + $0x490] sm:$0xff] }
  0xb4   :  { %7317 = vst [vmem:[#allocation21_spill] sm:$0xff] %v5251_v59  ;;  %1268 = vadd.xlane.f32.xlu0 %v5251_v59  ;;  %v1098_v52 = vadd.f32 %v1072_v47, %v1068_v1  ;;  %v1100_v33 = vadd.f32 %v1080_v0, %v1076_v43  ;;  %v587_v5 = vmul.f32 %v585_v27, %v4470_v42  ;;  %v609_v36 = vld [vmem:[#allocation5 + $0x4d0] sm:$0xff] }
  0xb5   :  { %v1102_v20 = vadd.f32 %v1088_v60, %v1084_v55  ;;  %v1104_v29 = vadd.f32 %v1096_v41, %v1092_v9  ;;  %v592_v34 = vmul.f32 %v590_v11, %v4473_v45  ;;  %v597_v49 = vmul.f32 %v595_v13, %v4476_v46  ;;  %v619_v0 = vld [vmem:[#allocation5 + $0x4f0] sm:$0xff] }
  0xb6   :  { %v5262_v50 = vadd.f32 %v1109_v14, %v1107_v57  ;;  %v1106_v2 = vadd.f32 %v1100_v33, %v1098_v52  ;;  %v602_v44 = vmul.f32 %v600_v37, %v7311_v56  ;;  %v607_v15 = vmul.f32 %v605_v30, %v7312_v35  ;;  %v614_v57 = vld [vmem:[#allocation5 + $0x4e0] sm:$0xff] }
  0xb7   :  { %v1108_v3 = vadd.f32 %v1104_v29, %v1102_v20  ;;  %v612_v54 = vmul.f32 %v610_v12, %v7313_v28  ;;  %v617_v61 = vmul.f32 %v615_v48, %v7314_v7  ;;  %v622_v4 = vmul.f32 %v620_v32, %v4491_v53 }
  0xb8   :  { %7318 = vst [vmem:[#allocation22_spill] sm:$0xff] %v5262_v50  ;;  %1274 = vadd.xlane.f32.xlu1 %v5262_v50  ;;  %v624_v1 = vadd.f32 %v592_v34, %v587_v5  ;;  %v626_v47 = vadd.f32 %v602_v44, %v597_v49  ;;  %v586_v43 = vmul.f32 %v584_v8, %v4470_v42 }
  0xb9   :  { %v591_v63 = vmul.f32 %v589_v62, %v4473_v45  ;;  %v5272_v55 = vadd.f32 %v1108_v3, %v1106_v2  ;;  %v628_v60 = vadd.f32 %v612_v54, %v607_v15  ;;  %v630_v9 = vadd.f32 %v622_v4, %v617_v61 }
  0xba   :  { %v596_v41 = vmul.f32 %v594_v22, %v4476_v46  ;;  %v632_v14 = vadd.f32 %v626_v47, %v624_v1  ;;  %v601_v52 = vmul.f32 %v599_v51, %v7311_v56  ;;  %v606_v33 = vmul.f32 %v604_v58, %v7312_v35 }
  0xbb   :  { %7319 = vst [vmem:[#allocation53_spill] sm:$0xff] %v5272_v55  ;;  %v611_v5 = vmul.f32 %v609_v36, %v7313_v28  ;;  %1272 = vadd.xlane.f32.xlu0 %v5272_v55  ;;  %v634_v42 = vadd.f32 %v630_v9, %v628_v60  ;;  %v616_v45 = vmul.f32 %v614_v57, %v7314_v7 }
  0xbc   :  { %v621_v20 = vmul.f32 %v619_v0, %v4491_v53  ;;  %v623_v29 = vadd.f32 %v591_v63, %v586_v43  ;;  %v625_v34 = vadd.f32 %v601_v52, %v596_v41  ;;  %v1118_v2 = vmul.f32 %v4436_v16, %v585_v27 }
  0xbd   :  { %v627_v49 = vadd.f32 %v611_v5, %v606_v33  ;;  %v1122_v46 = vmul.f32 %v4439_v17, %v590_v11  ;;  %v5283_v44 = vadd.f32 %v634_v42, %v632_v14  ;;  %v1126_v35 = vmul.f32 %v4442_v18, %v595_v13 }
  0xbe   :  { %v629_v56 = vadd.f32 %v621_v20, %v616_v45  ;;  %v1130_v28 = vmul.f32 %v4445_v19, %v600_v37  ;;  %v631_v15 = vadd.f32 %v625_v34, %v623_v29  ;;  %v1134_v3 = vmul.f32 %v4448_v23, %v605_v30 }
  0xbf   :  { %7320 = vst [vmem:[#allocation54_spill] sm:$0xff] %v5283_v44  ;;  %v1138_v7 = vmul.f32 %v4451_v24, %v610_v12  ;;  %v1142_v53 = vmul.f32 %v4454_v25, %v615_v48  ;;  %1278 = vadd.xlane.f32.xlu1 %v5283_v44  ;;  %v1146_v27 = vmul.f32 %v4457_v26, %v620_v32 }
  0xc0   :  { %v633_v54 = vadd.f32 %v629_v56, %v627_v49  ;;  %v1148_v11 = vadd.f32 %v1122_v46, %v1118_v2  ;;  %v1150_v61 = vadd.f32 %v1130_v28, %v1126_v35  ;;  %v1117_v1 = vmul.f32 %v4436_v16, %v584_v8 }
  0xc1   :  { %v1152_v4 = vadd.f32 %v1138_v7, %v1134_v3  ;;  %v1121_v13 = vmul.f32 %v4439_v17, %v589_v62  ;;  %v1125_v37 = vmul.f32 %v4442_v18, %v594_v22  ;;  %v1154_v30 = vadd.f32 %v1146_v27, %v1142_v53  ;;  %v1209_v18 = vpop.xlane.xlu1 %1208 }
  0xc2   :  { %v5295_v47 = vadd.f32 %v633_v54, %v631_v15  ;;  %v1156_v12 = vadd.f32 %v1150_v61, %v1148_v11  ;;  %v1129_v48 = vmul.f32 %v4445_v19, %v599_v51  ;;  %v1133_v43 = vmul.f32 %v4448_v23, %v604_v58  ;;  %v1205_v23 = vpop.xlane.xlu0 %1204 }
  0xc3   :  { %v1137_v63 = vmul.f32 %v4451_v24, %v609_v36  ;;  %v1141_v32 = vmul.f32 %v4454_v25, %v614_v57  ;;  %v1145_v60 = vmul.f32 %v4457_v26, %v619_v0  ;;  %v1158_v16 = vadd.f32 %v1154_v30, %v1152_v4 }
  0xc4   :  { %7321 = vst [vmem:[#allocation55_spill] sm:$0xff] %v5295_v47  ;;  %1276 = vadd.xlane.f32.xlu0 %v5295_v47  ;;  %v1147_v17 = vadd.f32 %v1121_v13, %v1117_v1  ;;  %v1149_v8 = vadd.f32 %v1129_v48, %v1125_v37  ;;  %v5305_v51 = vmul.f32 0.0078125, %v1209_v18  ;;  %v5315_v36 = vmul.f32 0.0078125, %v1205_v23 }
  0xc5   :  { %v1151_v62 = vadd.f32 %v1137_v63, %v1133_v43  ;;  %v1153_v22 = vadd.f32 %v1145_v60, %v1141_v32  ;;  %v5303_v9 = vadd.f32 %v1158_v16, %v1156_v12  ;;  %v1211_v25 = vpop.xlane.xlu1 %1210 }
  0xc6   :  { %v1155_v41 = vadd.f32 %v1149_v8, %v1147_v17  ;;  %v1326_v26 = vmul.f32 %v5305_v51, %v5305_v51  ;;  %v5313_v58 = vmul.f32 0.0078125, %v1211_v25  ;;  %v1207_v0 = vpop.xlane.xlu0 %1206  ;;  %v1324_v33 = vmul.f32 %v5315_v36, %v5315_v36 }
  0xc7   :  { %7322 = vst [vmem:[#allocation56_spill] sm:$0xff] %v5303_v9  ;;  %v1157_v19 = vadd.f32 %v1153_v22, %v1151_v62  ;;  %1282 = vadd.xlane.f32.xlu1 %v5303_v9  ;;  %v5319_v14 = vmul.f32 0.0078125, %v1207_v0 }
  0xc8   :  { %v1327_v57 = vmul.f32 %v5313_v58, %v5313_v58 }
  0xc9   :  { %v5308_v24 = vadd.f32 %v1157_v19, %v1155_v41  ;;  %v1325_v5 = vmul.f32 %v5319_v14, %v5319_v14  ;;  %v1239_v45 = vpop.xlane.xlu1 %1238 }
  0xca   :  { %v1371_v52 = vadd.f32 %v1327_v57, %v1326_v26  ;;  %v5325_v29 = vmul.f32 0.0078125, %v1239_v45 }
  0xcb   :  { %7323 = vst [vmem:[#allocation57_spill] sm:$0xff] %v5308_v24  ;;  %1280 = vadd.xlane.f32.xlu0 %v5308_v24  ;;  %v1364_v20 = vadd.f32 %v1325_v5, %v1324_v33 }
  0xcc   :  { %v1372_v42 = vrot.slane %v1371_v52, 4  ;;  %v1341_v35 = vmul.f32 %v5325_v29, %v5325_v29 }
  0xcd   :  { %v1365_v49 = vrot.slane %v1364_v20, 4  ;;  %v1237_v46 = vpop.xlane.xlu0 %1236 }
  0xce   :  { %v1373_v34 = vadd.f32 %v1372_v42, %v1371_v52  ;;  %v5329_v28 = vmul.f32 0.0078125, %v1237_v46 }
  0xcf   :  { %v1366_v56 = vadd.f32 %v1365_v49, %v1364_v20 }
  0xd0   :  { %v1374_v2 = vrot.slane %v1373_v34, 2  ;;  %v1340_v7 = vmul.f32 %v5329_v28, %v5329_v28 }
  0xd1   :  { %v1367_v3 = vrot.slane %v1366_v56, 2  ;;  %v1243_v54 = vpop.xlane.xlu1 %1242 }
  0xd2   :  { %v1375_v15 = vadd.f32 %v1374_v2, %v1373_v34  ;;  %v1420_v11 = vadd.f32 %v1341_v35, %v1340_v7  ;;  %v5333_v4 = vmul.f32 0.0078125, %v1243_v54 }
  0xd3   :  { %v1368_v27 = vadd.f32 %v1367_v3, %v1366_v56 }
  0xd4   :  { %v1376_v53 = vrot.slane %v1375_v15, 1  ;;  %v1421_v13 = vrot.slane %v1420_v11, 4  ;;  %v1241_v37 = vpop.xlane.xlu0 %1240  ;;  %v1343_v63 = vmul.f32 %v5333_v4, %v5333_v4 }
  0xd5   :  { %v1369_v1 = vrot.slane %v1368_v27, 1  ;;  %v5335_v43 = vmul.f32 0.0078125, %v1241_v37 }
  0xd6   :  { %v1377_v61 = vadd.f32 %v1376_v53, %v1375_v15  ;;  %v1422_v48 = vadd.f32 %v1421_v13, %v1420_v11 }
  0xd7   :  { %v1370_v12 = vadd.f32 %v1369_v1, %v1368_v27  ;;  %v1342_v17 = vmul.f32 %v5335_v43, %v5335_v43 }
  0xd8   :  { %4015 = vrsqrt.f32 %v1377_v61  ;;  %v1645_v30 = vadd.f32 1.0, %v1377_v61  ;;  %v1423_v16 = vrot.slane %v1422_v48, 2  ;;  %vm1513_vm0 = vcmp.eq.f32.partialorder %v1377_v61, inf }
  0xd9   :  { %v1215_v32 = vpop.xlane.xlu1 %1214  ;;  %v1644_v60 = vadd.f32 1.0, %v1370_v12  ;;  %v1427_v62 = vadd.f32 %v1343_v63, %v1342_v17  ;;  %vm1515_vm1 = vcmp.eq.f32.partialorder %v1377_v61, 0.0  ;;  %v1516_v2 = vand.u32 2147483648, %v1377_v61 }
  0xda   :  { %4017 = vrcp.f32 %v1645_v30  ;;  %v5341_v8 = vmul.f32 0.0078125, %v1215_v32  ;;  %v1424_v18 = vadd.f32 %v1423_v16, %v1422_v48  ;;  %vm1506_vm2 = vcmp.eq.f32.partialorder %v1370_v12, inf }
  0xdb   :  { %4019 = vrsqrt.f32 %v1370_v12  ;;  %v1428_v19 = vrot.slane %v1427_v62, 4  ;;  %vm1508_vm3 = vcmp.eq.f32.partialorder %v1370_v12, 0.0  ;;  %v1509_v48 = vand.u32 2147483648, %v1370_v12 }
  0xdc   :  { %4021 = vrcp.f32 %v1644_v60  ;;  %v1425_v41 = vrot.slane %v1424_v18, 1  ;;  %v1329_v25 = vmul.f32 %v5341_v8, %v5341_v8 }
  0xdd   :  { %v1213_v22 = vpop.xlane.xlu0 %1212  ;;  %v1429_v57 = vadd.f32 %v1428_v19, %v1427_v62 }
  0xde   :  { %v5343_v23 = vmul.f32 0.0078125, %v1213_v22  ;;  %v5347_v26 = vadd.f32 %v1425_v41, %v1424_v18  ;;  %v7324_v41 = vld [vmem:[#allocation23_spill] sm:$0xff] }
  0xdf   :  { %v1430_v42 = vrot.slane %v1429_v57, 2 }
  0xe0   :  { %v1328_v0 = vmul.f32 %v5343_v23, %v5343_v23  ;;  %4023 = vrsqrt.f32 %v5347_v26  ;;  %v1652_v5 = vadd.f32 1.0, %v5347_v26  ;;  %vm1562_vm4 = vcmp.eq.f32.partialorder %v5347_v26, inf }
  0xe1   :  { %v1247_v52 = vpop.xlane.xlu1 %1246  ;;  %v1431_v46 = vadd.f32 %v1430_v42, %v1429_v57  ;;  %vm1564_vm5 = vcmp.eq.f32.partialorder %v5347_v26, 0.0 }
  0xe2   :  { %v1378_v45 = vadd.f32 %v1329_v25, %v1328_v0  ;;  %v5353_v20 = vmul.f32 0.0078125, %v1247_v52  ;;  %4025 = vrcp.f32 %v1652_v5  ;;  %v7325_v25 = vld [vmem:[#allocation25_spill] sm:$0xff] }
  0xe3   :  { %v1432_v27 = vrot.slane %v1431_v46, 1 }
  0xe4   :  { %v1245_v49 = vpop.xlane.xlu0 %1244  ;;  %v1379_v56 = vrot.slane %v1378_v45, 4  ;;  %v1345_v3 = vmul.f32 %v5353_v20, %v5353_v20 }
  0xe5   :  { %v4016_v33 = vpop.eup %4015  ;;  %v5357_v7 = vmul.f32 0.0078125, %v1245_v49 }
  0xe6   :  { %v1512_v34 = vmul.f32 %v4016_v33, %v1377_v61  ;;  %v1380_v11 = vadd.f32 %v1379_v56, %v1378_v45 }
  0xe7   :  { %v4018_v35 = vpop.eup %4017  ;;  %v1344_v37 = vmul.f32 %v5357_v7, %v5357_v7 }
  0xe8   :  { %v1514_v15 = vsel %vm1513_vm0, %v1377_v61, %v1512_v34  ;;  %v4020_v53 = vpop.eup %4019  ;;  %v5361_v61 = vadd.f32 %v1432_v27, %v1431_v46  ;;  %v1381_v63 = vrot.slane %v1380_v11, 2 }
  0xe9   :  { %v1517_v54 = vsel %vm1515_vm1, %v1516_v2, %v1514_v15  ;;  %v1505_v13 = vmul.f32 %v4020_v53, %v1370_v12  ;;  %v1219_v30 = vpop.xlane.xlu1 %1218  ;;  %v1434_v17 = vadd.f32 %v1345_v3, %v1344_v37  ;;  %v4022_v18 = vpop.eup %4021  ;;  %v7326_v15 = vld [vmem:[#allocation24_spill] sm:$0xff]  ;;  %v7327_v53 = vld [vmem:[#allocation26_spill] sm:$0xff] }
  0xea   :  { %v1667_v1 = vmul.f32 %v4018_v35, %v1517_v54  ;;  %4027 = vrsqrt.f32 %v5361_v61  ;;  %v5366_v22 = vmul.f32 0.0078125, %v1219_v30  ;;  %vm1569_vm6 = vcmp.eq.f32.partialorder %v5361_v61, inf }
  0xeb   :  { %v1507_v16 = vsel %vm1506_vm2, %v1370_v12, %v1505_v13  ;;  %v1382_v12 = vadd.f32 %v1381_v63, %v1380_v11  ;;  %v1435_v33 = vrot.slane %v1434_v17, 4  ;;  %vm1571_vm7 = vcmp.eq.f32.partialorder %v5361_v61, 0.0 }
  0xec   :  { %v1706_v32 = vmul.f32 %v1667_v1, %v5305_v51  ;;  %v1707_v60 = vmul.f32 %v1667_v1, %v5313_v58  ;;  %v1510_v62 = vsel %vm1508_vm3, %v1509_v48, %v1507_v16  ;;  %v1565_v51 = vand.u32 2147483648, %v5347_v26 }
  0xed   :  { %v1665_v0 = vmul.f32 %v4022_v18, %v1510_v62  ;;  %v1217_v52 = vpop.xlane.xlu0 %1216  ;;  %v1653_v58 = vadd.f32 1.0, %v5361_v61  ;;  %v4024_v49 = vpop.eup %4023  ;;  %v1383_v2 = vrot.slane %v1382_v12, 1  ;;  %v1436_v46 = vadd.f32 %v1435_v33, %v1434_v17 }
  0xee   :  { %v1746_v19 = vmul.f32 %v1706_v32, %v7324_v41  ;;  %v1747_v57 = vmul.f32 %v1707_v60, %v7325_v25  ;;  %v5375_v34 = vmul.f32 0.0078125, %v1217_v52  ;;  %v1331_v56 = vmul.f32 %v5366_v22, %v5366_v22 }
  0xef   :  { %v1704_v42 = vmul.f32 %v1665_v0, %v5315_v36  ;;  %v1705_v45 = vmul.f32 %v1665_v0, %v5319_v14  ;;  %4029 = vrcp.f32 %v1653_v58  ;;  %v1561_v27 = vmul.f32 %v4024_v49, %v5347_v26  ;;  %v4026_v63 = vpop.eup %4025  ;;  %v7328_v49 = vld [vmem:[#allocation28_spill] sm:$0xff] }
  0xf0   :  { %v1791_v5 = vadd.f32 %v1747_v57, %v1746_v19  ;;  %v5382_v36 = vadd.f32 %v1383_v2, %v1382_v12  ;;  %v1437_v14 = vrot.slane %v1436_v46, 2  ;;  %v1330_v1 = vmul.f32 %v5375_v34, %v5375_v34 }
  0xf1   :  { %v1744_v3 = vmul.f32 %v1704_v42, %v7326_v15  ;;  %v1745_v54 = vmul.f32 %v1705_v45, %v7327_v53  ;;  %v1251_v11 = vpop.xlane.xlu1 %1250  ;;  %v1563_v30 = vsel %vm1562_vm4, %v5347_v26, %v1561_v27  ;;  %v7349_v15 = vld [vmem:[#allocation46_spill] sm:$0xff] }
  0xf2   :  { %v1792_v35 = vrot.slane %v1791_v5, 4  ;;  %v5386_v13 = vmul.f32 0.0078125, %v1251_v11  ;;  %v1566_v32 = vsel %vm1564_vm5, %v1565_v51, %v1563_v30  ;;  %4031 = vrsqrt.f32 %v5382_v36 }
  0xf3   :  { %v1784_v37 = vadd.f32 %v1745_v54, %v1744_v3  ;;  %v1681_v17 = vmul.f32 %v4026_v63, %v1566_v32  ;;  %v1646_v18 = vadd.f32 1.0, %v5382_v36  ;;  %v1438_v62 = vadd.f32 %v1437_v14, %v1436_v46  ;;  %v7329_v46 = vld [vmem:[#allocation27_spill] sm:$0xff] }
  0xf4   :  { %v1793_v48 = vadd.f32 %v1792_v35, %v1791_v5  ;;  %v1249_v60 = vpop.xlane.xlu0 %1248  ;;  %v1385_v19 = vadd.f32 %v1331_v56, %v1330_v1  ;;  %v1347_v57 = vmul.f32 %v5386_v13, %v5386_v13  ;;  %v1572_v14 = vand.u32 2147483648, %v5361_v61 }
  0xf5   :  { %v1785_v16 = vrot.slane %v1784_v37, 4  ;;  %v5397_v0 = vmul.f32 0.0078125, %v1249_v60  ;;  %v1720_v26 = vmul.f32 %v1681_v17, %v5329_v28  ;;  %v1721_v52 = vmul.f32 %v1681_v17, %v5325_v29 }
  0xf6   :  { %4033 = vrcp.f32 %v1646_v18  ;;  %v1794_v51 = vrot.slane %v1793_v48, 2  ;;  %v1439_v58 = vrot.slane %v1438_v62, 1  ;;  %v1386_v12 = vrot.slane %v1385_v19, 4 }
  0xf7   :  { %v1346_v33 = vmul.f32 %v5397_v0, %v5397_v0  ;;  %v1786_v42 = vadd.f32 %v1785_v16, %v1784_v37  ;;  %v4028_v45 = vpop.eup %4027  ;;  %v1760_v2 = vmul.f32 %v1720_v26, %v7328_v49  ;;  %v1761_v56 = vmul.f32 %v1721_v52, %v7329_v46  ;;  %v7338_v49 = vld [vmem:[#allocation38_spill] sm:$0xff] }
  0xf8   :  { %v1795_v3 = vadd.f32 %v1794_v51, %v1793_v48  ;;  %v1568_v28 = vmul.f32 %v4028_v45, %v5361_v61  ;;  %v5408_v29 = vadd.f32 %v1439_v58, %v1438_v62  ;;  %v1387_v54 = vadd.f32 %v1386_v12, %v1385_v19 }
  0xf9   :  { %v1223_v5 = vpop.xlane.xlu1 %1222  ;;  %v1441_v27 = vadd.f32 %v1347_v57, %v1346_v33  ;;  %v1840_v11 = vadd.f32 %v1761_v56, %v1760_v2  ;;  %v1787_v30 = vrot.slane %v1786_v42, 2  ;;  %vm1520_vm8 = vcmp.eq.f32.partialorder %v5382_v36, inf }
  0xfa   :  { %v5405_v35 = vmul.f32 0.0078125, %v1223_v5  ;;  %v1796_v1 = vrot.slane %v1795_v3, 1  ;;  %v1570_v37 = vsel %vm1569_vm6, %v5361_v61, %v1568_v28  ;;  %4035 = vrsqrt.f32 %v5408_v29 }
  0xfb   :  { %v1841_v32 = vrot.slane %v1840_v11, 4  ;;  %v1573_v60 = vsel %vm1571_vm7, %v1572_v14, %v1570_v37  ;;  %v1654_v16 = vadd.f32 1.0, %v5408_v29  ;;  %v1388_v62 = vrot.slane %v1387_v54, 2 }
  0xfc   :  { %v4030_v63 = vpop.eup %4029  ;;  %v1333_v17 = vmul.f32 %v5405_v35, %v5405_v35  ;;  %v1442_v19 = vrot.slane %v1441_v27, 4  ;;  %v5421_v26 = vadd.f32 %v1796_v1, %v1795_v3  ;;  %v1788_v61 = vadd.f32 %v1787_v30, %v1786_v42  ;;  %v7330_v42 = vld [vmem:[#allocation30_spill] sm:$0xff] }
  0xfd   :  { %v1221_v48 = vpop.xlane.xlu0 %1220  ;;  %v1683_v18 = vmul.f32 %v4030_v63, %v1573_v60  ;;  %4037 = vrcp.f32 %v1654_v16  ;;  %v1842_v52 = vadd.f32 %v1841_v32, %v1840_v11  ;;  %v1389_v12 = vadd.f32 %v1388_v62, %v1387_v54  ;;  %v7331_v54 = vld [vmem:[#allocation29_spill] sm:$0xff] }
  0xfe   :  { %v5419_v57 = vmul.f32 0.0078125, %v1221_v48  ;;  %v1443_v33 = vadd.f32 %v1442_v19, %v1441_v27  ;;  %v1523_v45 = vand.u32 2147483648, %v5382_v36  ;;  %1946 = vmax.xlane.f32.xlu1 %v5421_v26  ;;  %v1789_v3 = vrot.slane %v1788_v61, 1 }
  0xff   :  { %v1722_v51 = vmul.f32 %v1683_v18, %v5335_v43  ;;  %v1723_v58 = vmul.f32 %v1683_v18, %v5333_v4  ;;  %v4032_v5 = vpop.eup %4031  ;;  %v1390_v11 = vrot.slane %v1389_v12, 1  ;;  %v1843_v4 = vrot.slane %v1842_v52, 2 }
 0x100   :  { %v1332_v2 = vmul.f32 %v5419_v57, %v5419_v57  ;;  %v1519_v43 = vmul.f32 %v4032_v5, %v5382_v36  ;;  %v1444_v14 = vrot.slane %v1443_v33, 2  ;;  %v5433_v37 = vadd.f32 %v1789_v3, %v1788_v61 }
 0x101   :  { %v1255_v56 = vpop.xlane.xlu1 %1254  ;;  %v1762_v28 = vmul.f32 %v1722_v51, %v7330_v42  ;;  %v1763_v27 = vmul.f32 %v1723_v58, %v7331_v54  ;;  %vm1522_vm9 = vcmp.eq.f32.partialorder %v5382_v36, 0.0  ;;  %v5439_v32 = vadd.f32 %v1390_v11, %v1389_v12  ;;  %v7332_v11 = vld [vmem:[#allocation34_spill] sm:$0xff] }
 0x102   :  { %v1392_v1 = vadd.f32 %v1333_v17, %v1332_v2  ;;  %v1521_v63 = vsel %vm1520_vm8, %v5382_v36, %v1519_v43  ;;  %v5441_v60 = vmul.f32 0.0078125, %v1255_v56  ;;  %v1445_v18 = vadd.f32 %v1444_v14, %v1443_v33  ;;  %1944 = vmax.xlane.f32.xlu0 %v5433_v37 }
 0x103   :  { %v4034_v48 = vpop.eup %4033  ;;  %v1524_v16 = vsel %vm1522_vm9, %v1523_v45, %v1521_v63  ;;  %vm1576_vm10 = vcmp.eq.f32.partialorder %v5408_v29, inf  ;;  %vm1578_vm11 = vcmp.eq.f32.partialorder %v5408_v29, 0.0  ;;  %4039 = vrsqrt.f32 %v5439_v32 }
 0x104   :  { %v1253_v30 = vpop.xlane.xlu0 %1252  ;;  %v1393_v62 = vrot.slane %v1392_v1, 4  ;;  %v1669_v17 = vmul.f32 %v4034_v48, %v1524_v16  ;;  %v1847_v61 = vadd.f32 %v1763_v27, %v1762_v28  ;;  %v1647_v36 = vadd.f32 1.0, %v5439_v32 }
 0x105   :  { %v5443_v19 = vmul.f32 0.0078125, %v1253_v30  ;;  %v1446_v51 = vrot.slane %v1445_v18, 1  ;;  %v1844_v12 = vadd.f32 %v1843_v4, %v1842_v52  ;;  %v1349_v2 = vmul.f32 %v5441_v60, %v5441_v60  ;;  %v7333_v52 = vld [vmem:[#allocation33_spill] sm:$0xff] }
 0x106   :  { %v1708_v33 = vmul.f32 %v1669_v17, %v5343_v23  ;;  %v1709_v5 = vmul.f32 %v1669_v17, %v5341_v8  ;;  %v1394_v45 = vadd.f32 %v1393_v62, %v1392_v1  ;;  %4041 = vrcp.f32 %v1647_v36 }
 0x107   :  { %v4036_v56 = vpop.eup %4035  ;;  %v5454_v3 = vadd.f32 %v1446_v51, %v1445_v18  ;;  %v1348_v28 = vmul.f32 %v5443_v19, %v5443_v19  ;;  %v1848_v14 = vrot.slane %v1847_v61, 4  ;;  %v1579_v1 = vand.u32 2147483648, %v5408_v29 }
 0x108   :  { %v1748_v27 = vmul.f32 %v1708_v33, %v7332_v11  ;;  %v1749_v4 = vmul.f32 %v1709_v5, %v7333_v52  ;;  %v1575_v23 = vmul.f32 %v4036_v56, %v5408_v29  ;;  %v1395_v8 = vrot.slane %v1394_v45, 2  ;;  %v7335_v52 = vld [vmem:[#allocation35_spill] sm:$0xff] }
 0x109   :  { %v1227_v58 = vpop.xlane.xlu1 %1226  ;;  %4043 = vrsqrt.f32 %v5454_v3  ;;  %v1845_v48 = vrot.slane %v1844_v12, 1  ;;  %v1655_v62 = vadd.f32 1.0, %v5454_v3  ;;  %v1448_v51 = vadd.f32 %v1349_v2, %v1348_v28 }
 0x10a   :  { %v5458_v43 = vmul.f32 0.0078125, %v1227_v58  ;;  %v4038_v63 = vpop.eup %4037  ;;  %v1798_v16 = vadd.f32 %v1749_v4, %v1748_v27  ;;  %v1577_v18 = vsel %vm1576_vm10, %v5408_v29, %v1575_v23  ;;  %v1396_v17 = vadd.f32 %v1395_v8, %v1394_v45 }
 0x10b   :  { %v1580_v36 = vsel %vm1578_vm11, %v1579_v1, %v1577_v18  ;;  %4045 = vrcp.f32 %v1655_v62  ;;  %v1449_v27 = vrot.slane %v1448_v51, 4  ;;  %v5477_v11 = vadd.f32 %v1845_v48, %v1844_v12 }
 0x10c   :  { %v1335_v58 = vmul.f32 %v5458_v43, %v5458_v43  ;;  %v1685_v5 = vmul.f32 %v4038_v63, %v1580_v36  ;;  %v1397_v56 = vrot.slane %v1396_v17, 1  ;;  %v1849_v45 = vadd.f32 %v1848_v14, %v1847_v61 }
 0x10d   :  { %v1225_v30 = vpop.xlane.xlu0 %1224  ;;  %v1799_v8 = vrot.slane %v1798_v16, 4  ;;  %vm1527_vm12 = vcmp.eq.f32.partialorder %v5439_v32, inf  ;;  %v1450_v28 = vadd.f32 %v1449_v27, %v1448_v51  ;;  %1960 = vmax.xlane.f32.xlu0 %v5477_v11  ;;  %vm1529_vm13 = vcmp.eq.f32.partialorder %v5439_v32, 0.0 }
 0x10e   :  { %v5473_v33 = vmul.f32 0.0078125, %v1225_v30  ;;  %v5479_v29 = vadd.f32 %v1397_v56, %v1396_v17  ;;  %v1850_v30 = vrot.slane %v1849_v45, 2  ;;  %v1724_v63 = vmul.f32 %v1685_v5, %v5357_v7 }
 0x10f   :  { %v1530_v12 = vand.u32 2147483648, %v5439_v32  ;;  %v1725_v48 = vmul.f32 %v1685_v5, %v5353_v20  ;;  %vm1583_vm14 = vcmp.eq.f32.partialorder %v5454_v3, inf  ;;  %v1451_v62 = vrot.slane %v1450_v28, 2 }
 0x110   :  { %v1334_v4 = vmul.f32 %v5473_v33, %v5473_v33  ;;  %4047 = vrsqrt.f32 %v5479_v29  ;;  %v4040_v14 = vpop.eup %4039  ;;  %v1648_v18 = vadd.f32 1.0, %v5479_v29  ;;  %v1800_v51 = vadd.f32 %v1799_v8, %v1798_v16 }
 0x111   :  { %v1259_v23 = vpop.xlane.xlu1 %1258  ;;  %v1526_v17 = vmul.f32 %v4040_v14, %v5439_v32  ;;  %v1851_v27 = vadd.f32 %v1850_v30, %v1849_v45  ;;  %vm1585_vm15 = vcmp.eq.f32.partialorder %v5454_v3, 0.0  ;;  %v1765_v42 = vmul.f32 %v1725_v48, %v7335_v52 }
 0x112   :  { %v5481_v2 = vmul.f32 0.0078125, %v1259_v23  ;;  %v1399_v1 = vadd.f32 %v1335_v58, %v1334_v4  ;;  %4049 = vrcp.f32 %v1648_v18  ;;  %v1452_v58 = vadd.f32 %v1451_v62, %v1450_v28  ;;  %v7334_v23 = vld [vmem:[#allocation36_spill] sm:$0xff] }
 0x113   :  { %v4042_v4 = vpop.eup %4041  ;;  %v1764_v20 = vmul.f32 %v1724_v63, %v7334_v23  ;;  %v1528_v5 = vsel %vm1527_vm12, %v5439_v32, %v1526_v17  ;;  %v1852_v18 = vrot.slane %v1851_v27, 1  ;;  %v1801_v62 = vrot.slane %v1800_v51, 2 }
 0x114   :  { %v1257_v61 = vpop.xlane.xlu0 %1256  ;;  %v1400_v36 = vrot.slane %v1399_v1, 4  ;;  %v1351_v7 = vmul.f32 %v5481_v2, %v5481_v2  ;;  %v1531_v16 = vsel %vm1529_vm13, %v1530_v12, %v1528_v5  ;;  %v1453_v8 = vrot.slane %v1452_v58, 1 }
 0x115   :  { %v5495_v56 = vmul.f32 0.0078125, %v1257_v61  ;;  %v1671_v30 = vmul.f32 %v4042_v4, %v1531_v16  ;;  %v1586_v23 = vand.u32 2147483648, %v5454_v3  ;;  %v5513_v5 = vadd.f32 %v1852_v18, %v1851_v27  ;;  %v7337_v27 = vld [vmem:[#allocation37_spill] sm:$0xff] }
 0x116   :  { %v1401_v14 = vadd.f32 %v1400_v36, %v1399_v1  ;;  %v4044_v45 = vpop.eup %4043  ;;  %v5509_v1 = vadd.f32 %v1453_v8, %v1452_v58  ;;  %v1854_v4 = vadd.f32 %v1765_v42, %v1764_v20  ;;  %v7336_v8 = vld [vmem:[#allocation31_spill] sm:$0xff]  ;;  %vm1534_vm0 = vcmp.eq.f32.partialorder %v5479_v29, inf }
 0x117   :  { %v1350_v28 = vmul.f32 %v5495_v56, %v5495_v56  ;;  %v1582_v17 = vmul.f32 %v4044_v45, %v5454_v3  ;;  %v1710_v32 = vmul.f32 %v1671_v30, %v5375_v34  ;;  %v1711_v12 = vmul.f32 %v1671_v30, %v5366_v22  ;;  %1962 = vmax.xlane.f32.xlu1 %v5513_v5 }
 0x118   :  { %v1402_v61 = vrot.slane %v1401_v14, 2  ;;  %v4046_v52 = vpop.eup %4045  ;;  %4051 = vrsqrt.f32 %v5509_v1  ;;  %v1802_v22 = vadd.f32 %v1801_v62, %v1800_v51  ;;  %v1656_v42 = vadd.f32 1.0, %v5509_v1 }
 0x119   :  { %v1231_v63 = vpop.xlane.xlu1 %1230  ;;  %v1455_v48 = vadd.f32 %v1351_v7, %v1350_v28  ;;  %v1584_v16 = vsel %vm1583_vm14, %v5454_v3, %v1582_v17  ;;  %v1750_v7 = vmul.f32 %v1710_v32, %v7336_v8  ;;  %v1855_v18 = vrot.slane %v1854_v4, 4 }
 0x11a   :  { %v1403_v36 = vadd.f32 %v1402_v61, %v1401_v14  ;;  %v5519_v45 = vmul.f32 0.0078125, %v1231_v63  ;;  %v1587_v34 = vsel %vm1585_vm15, %v1586_v23, %v1584_v16  ;;  %v1751_v14 = vmul.f32 %v1711_v12, %v7337_v27 }
 0x11b   :  { %v1456_v28 = vrot.slane %v1455_v48, 4  ;;  %v1687_v30 = vmul.f32 %v4046_v52, %v1587_v34  ;;  %4053 = vrcp.f32 %v1656_v42  ;;  %vm1536_vm1 = vcmp.eq.f32.partialorder %v5479_v29, 0.0 }
 0x11c   :  { %v1404_v20 = vrot.slane %v1403_v36, 1  ;;  %v1337_v3 = vmul.f32 %v5519_v45, %v5519_v45  ;;  %v5538_v32 = vadd.f32 %v1751_v14, %v1750_v7  ;;  %v1537_v12 = vand.u32 2147483648, %v5479_v29 }
 0x11d   :  { %v1229_v58 = vpop.xlane.xlu0 %1228  ;;  %v4048_v63 = vpop.eup %4047  ;;  %v1457_v62 = vadd.f32 %v1456_v28, %v1455_v48  ;;  %v1803_v16 = vrot.slane %v1802_v22, 1  ;;  %v1726_v34 = vmul.f32 %v1687_v30, %v5397_v0  ;;  %v1727_v42 = vmul.f32 %v1687_v30, %v5386_v13 }
 0x11e   :  { %v5528_v61 = vmul.f32 0.0078125, %v1229_v58  ;;  %v5530_v17 = vadd.f32 %v1404_v20, %v1403_v36  ;;  %v1533_v23 = vmul.f32 %v4048_v63, %v5479_v29  ;;  %vm1590_vm2 = vcmp.eq.f32.partialorder %v5509_v1, inf }
 0x11f   :  { %v4050_v58 = vpop.eup %4049  ;;  %vm1592_vm3 = vcmp.eq.f32.partialorder %v5509_v1, 0.0  ;;  %v1458_v20 = vrot.slane %v1457_v62, 2  ;;  %v1856_v63 = vadd.f32 %v1855_v18, %v1854_v4  ;;  %v1593_v13 = vand.u32 2147483648, %v5509_v1 }
 0x120   :  { %v1336_v52 = vmul.f32 %v5528_v61, %v5528_v61  ;;  %4055 = vrsqrt.f32 %v5530_v17  ;;  %v1535_v48 = vsel %vm1534_vm0, %v5479_v29, %v1533_v23  ;;  %v1649_v7 = vadd.f32 1.0, %v5530_v17 }
 0x121   :  { %v1263_v51 = vpop.xlane.xlu1 %1262  ;;  %v1538_v14 = vsel %vm1536_vm1, %v1537_v12, %v1535_v48  ;;  %v1459_v30 = vadd.f32 %v1458_v20, %v1457_v62  ;;  %v5555_v54 = vadd.f32 %v1803_v16, %v1802_v22  ;;  %v1766_v12 = vmul.f32 %v1726_v34, %v7338_v49  ;;  %v7339_v48 = vld [vmem:[#allocation32_spill] sm:$0xff] }
 0x122   :  { %v1406_v28 = vadd.f32 %v1337_v3, %v1336_v52  ;;  %v1673_v8 = vmul.f32 %v4050_v58, %v1538_v14  ;;  %4057 = vrcp.f32 %v1649_v7  ;;  %v5550_v27 = vmul.f32 0.0078125, %v1263_v51 }
 0x123   :  { %v1767_v46 = vmul.f32 %v1727_v42, %v7339_v48  ;;  %v1460_v51 = vrot.slane %v1459_v30, 1  ;;  %1948 = vmax.xlane.f32.xlu0 %v5555_v54  ;;  %v1857_v62 = vrot.slane %v1856_v63, 2  ;;  %v1806_v22 = vrot.slane %v5538_v32, 4  ;;  %v7340_v48 = vld [vmem:[#allocation42_spill] sm:$0xff] }
 0x124   :  { %v1261_v36 = vpop.xlane.xlu0 %1260  ;;  %v1407_v29 = vrot.slane %v1406_v28, 4  ;;  %v1353_v4 = vmul.f32 %v5550_v27, %v5550_v27  ;;  %v1712_v3 = vmul.f32 %v1673_v8, %v5419_v57  ;;  %v1713_v16 = vmul.f32 %v1673_v8, %v5405_v35 }
 0x125   :  { %v5552_v0 = vmul.f32 0.0078125, %v1261_v36  ;;  %v4052_v36 = vpop.eup %4051  ;;  %vm1541_vm4 = vcmp.eq.f32.partialorder %v5530_v17, inf  ;;  %v5571_v7 = vadd.f32 %v1460_v51, %v1459_v30  ;;  %v5573_v20 = vadd.f32 %v1767_v46, %v1766_v12  ;;  %v7341_v30 = vld [vmem:[#allocation41_spill] sm:$0xff] }
 0x126   :  { %v1408_v52 = vadd.f32 %v1407_v29, %v1406_v28  ;;  %v1589_v42 = vmul.f32 %v4052_v36, %v5509_v1  ;;  %v1858_v49 = vadd.f32 %v1857_v62, %v1856_v63  ;;  %v1752_v41 = vmul.f32 %v1712_v3, %v7340_v48 }
 0x127   :  { %v1352_v18 = vmul.f32 %v5552_v0, %v5552_v0  ;;  %vm1543_vm5 = vcmp.eq.f32.partialorder %v5530_v17, 0.0  ;;  %4059 = vrsqrt.f32 %v5571_v7  ;;  %v1657_v12 = vadd.f32 1.0, %v5571_v7 }
 0x128   :  { %v1409_v57 = vrot.slane %v1408_v52, 2  ;;  %v1591_v35 = vsel %vm1590_vm2, %v5509_v1, %v1589_v42  ;;  %v4054_v8 = vpop.eup %4053  ;;  %v1859_v1 = vrot.slane %v1858_v49, 1  ;;  %vm1597_vm6 = vcmp.eq.f32.partialorder %v5571_v7, inf }
 0x129   :  { %v1235_v23 = vpop.xlane.xlu1 %1234  ;;  %v1462_v58 = vadd.f32 %v1353_v4, %v1352_v18  ;;  %v1594_v46 = vsel %vm1592_vm3, %v1593_v13, %v1591_v35  ;;  %4061 = vrcp.f32 %v1657_v12  ;;  %vm1599_vm7 = vcmp.eq.f32.partialorder %v5571_v7, 0.0 }
 0x12a   :  { %v5567_v34 = vmul.f32 0.0078125, %v1235_v23  ;;  %v1753_v23 = vmul.f32 %v1713_v16, %v7341_v30  ;;  %v1689_v4 = vmul.f32 %v4054_v8, %v1594_v46  ;;  %v1410_v18 = vadd.f32 %v1409_v57, %v1408_v52 }
 0x12b   :  { %v1463_v28 = vrot.slane %v1462_v58, 4  ;;  %v1544_v16 = vand.u32 2147483648, %v5530_v17  ;;  %v1807_v8 = vadd.f32 %v1806_v22, %v5538_v32  ;;  %v5598_v46 = vadd.f32 %v1859_v1, %v1858_v49 }
 0x12c   :  { %v1339_v63 = vmul.f32 %v5567_v34, %v5567_v34  ;;  %v1728_v52 = vmul.f32 %v1689_v4, %v5443_v19  ;;  %v5600_v42 = vadd.f32 %v1753_v23, %v1752_v41  ;;  %v1729_v12 = vmul.f32 %v1689_v4, %v5441_v60  ;;  %v7343_v60 = vld [vmem:[#allocation44_spill] sm:$0xff] }
 0x12d   :  { %v1233_v14 = vpop.xlane.xlu0 %1232  ;;  %v1464_v3 = vadd.f32 %v1463_v28, %v1462_v58  ;;  %v4056_v36 = vpop.eup %4055  ;;  %7342 = vst [vmem:[#allocation58_spill] sm:$0xff] %v5598_v46  ;;  %1964 = vmax.xlane.f32.xlu1 %v5598_v46  ;;  %v1808_v41 = vrot.slane %v1807_v8, 2 }
 0x12e   :  { %v5575_v29 = vmul.f32 0.0078125, %v1233_v14  ;;  %v1540_v13 = vmul.f32 %v4056_v36, %v5530_v17  ;;  %v1411_v14 = vrot.slane %v1410_v18, 1  ;;  %v1768_v23 = vmul.f32 %v1728_v52, %v7343_v60 }
 0x12f   :  { %v1465_v58 = vrot.slane %v1464_v3, 2  ;;  %v4058_v48 = vpop.eup %4057  ;;  %v1809_v25 = vadd.f32 %v1808_v41, %v1807_v8 }
 0x130   :  { %v1338_v51 = vmul.f32 %v5575_v29, %v5575_v29  ;;  %v1542_v36 = vsel %vm1541_vm4, %v5530_v17, %v1540_v13 }
 0x131   :  { %v1267_v62 = vpop.xlane.xlu1 %1266  ;;  %v1545_v32 = vsel %vm1543_vm5, %v1544_v16, %v1542_v36  ;;  %v1466_v19 = vadd.f32 %v1465_v58, %v1464_v3 }
 0x132   :  { %v5594_v35 = vmul.f32 0.0078125, %v1267_v62  ;;  %v1413_v57 = vadd.f32 %v1339_v63, %v1338_v51  ;;  %v5606_v62 = vadd.f32 %v1411_v14, %v1410_v18  ;;  %v1675_v49 = vmul.f32 %v4058_v48, %v1545_v32  ;;  %v7344_v51 = vld [vmem:[#allocation43_spill] sm:$0xff]  ;;  %v7346_v32 = vld [vmem:[#allocation45_spill] sm:$0xff] }
 0x133   :  { %v1467_v18 = vrot.slane %v1466_v19, 1  ;;  %v1769_v16 = vmul.f32 %v1729_v12, %v7344_v51 }
 0x134   :  { %v1265_v28 = vpop.xlane.xlu0 %1264  ;;  %v1414_v22 = vrot.slane %v1413_v57, 4  ;;  %4063 = vrsqrt.f32 %v5606_v62  ;;  %v1650_v4 = vadd.f32 1.0, %v5606_v62  ;;  %v1355_v17 = vmul.f32 %v5594_v35, %v5594_v35  ;;  %v4060_v12 = vpop.eup %4059 }
 0x135   :  { %v5610_v63 = vmul.f32 0.0078125, %v1265_v28  ;;  %v1714_v1 = vmul.f32 %v1675_v49, %v5473_v33  ;;  %v1715_v48 = vmul.f32 %v1675_v49, %v5458_v43  ;;  %v5622_v14 = vadd.f32 %v1467_v18, %v1466_v19  ;;  %v7345_v28 = vld [vmem:[#allocation39_spill] sm:$0xff] }
 0x136   :  { %v1415_v13 = vadd.f32 %v1414_v22, %v1413_v57  ;;  %4065 = vrcp.f32 %v1650_v4  ;;  %v1813_v33 = vrot.slane %v5600_v42, 4  ;;  %v1600_v43 = vand.u32 2147483648, %v5571_v7 }
 0x137   :  { %v1354_v52 = vmul.f32 %v5610_v63, %v5610_v63  ;;  %v1754_v36 = vmul.f32 %v1714_v1, %v7345_v28  ;;  %v1755_v60 = vmul.f32 %v1715_v48, %v7346_v32  ;;  %4067 = vrsqrt.f32 %v5622_v14  ;;  %v4062_v1 = vpop.eup %4061 }
 0x138   :  { %v1271_v3 = vpop.xlane.xlu1 %1270  ;;  %v1416_v30 = vrot.slane %v1415_v13, 2  ;;  %v1868_v19 = vadd.f32 %v1769_v16, %v1768_v23  ;;  %v1596_v22 = vmul.f32 %v4060_v12, %v5571_v7  ;;  %v1658_v49 = vadd.f32 1.0, %v5622_v14 }
 0x139   :  { %v5626_v58 = vmul.f32 0.0078125, %v1271_v3  ;;  %vm1548_vm8 = vcmp.eq.f32.partialorder %v5606_v62, inf  ;;  %v1469_v18 = vadd.f32 %v1355_v17, %v1354_v52  ;;  %v1810_v3 = vrot.slane %v1809_v25, 1 }
 0x13a   :  { %v1417_v4 = vadd.f32 %v1416_v30, %v1415_v13  ;;  %v5641_v48 = vadd.f32 %v1755_v60, %v1754_v36  ;;  %v1598_v23 = vsel %vm1597_vm6, %v5571_v7, %v1596_v22  ;;  %4069 = vrcp.f32 %v1658_v49 }
 0x13b   :  { %v1357_v8 = vmul.f32 %v5626_v58, %v5626_v58  ;;  %v1601_v30 = vsel %vm1599_vm7, %v1600_v43, %v1598_v23  ;;  %v1470_v13 = vrot.slane %v1469_v18, 4  ;;  %v5650_v12 = vadd.f32 %v1810_v3, %v1809_v25 }
 0x13c   :  { %v1418_v16 = vrot.slane %v1417_v4, 1  ;;  %vm1550_vm9 = vcmp.eq.f32.partialorder %v5606_v62, 0.0  ;;  %v1551_v60 = vand.u32 2147483648, %v5606_v62  ;;  %v1869_v22 = vrot.slane %v1868_v19, 4 }
 0x13d   :  { %v1269_v57 = vpop.xlane.xlu0 %1268  ;;  %7347 = vst [vmem:[#allocation59_spill] sm:$0xff] %v5650_v12  ;;  %v1471_v49 = vadd.f32 %v1470_v13, %v1469_v18  ;;  %1950 = vmax.xlane.f32.xlu0 %v5650_v12  ;;  %vm1604_vm10 = vcmp.eq.f32.partialorder %v5622_v14, inf  ;;  %v1607_v7 = vand.u32 2147483648, %v5622_v14  ;;  %v7348_v43 = vrot.slane %v5573_v20, 4 }
 0x13e   :  { %v5639_v41 = vmul.f32 0.0078125, %v1269_v57  ;;  %v1691_v57 = vmul.f32 %v4062_v1, %v1601_v30  ;;  %v5654_v36 = vadd.f32 %v1418_v16, %v1417_v4  ;;  %vm1606_vm11 = vcmp.eq.f32.partialorder %v5622_v14, 0.0 }
 0x13f   :  { %v1863_v3 = vadd.f32 %v7348_v43, %v5573_v20  ;;  %v1472_v23 = vrot.slane %v1471_v49, 2 }
 0x140   :  { %v1356_v17 = vmul.f32 %v5639_v41, %v5639_v41  ;;  %4071 = vrsqrt.f32 %v5654_v36  ;;  %v1730_v18 = vmul.f32 %v1691_v57, %v5495_v56  ;;  %v1731_v16 = vmul.f32 %v1691_v57, %v5481_v2 }
 0x141   :  { %v1275_v52 = vpop.xlane.xlu1 %1274  ;;  %v4064_v4 = vpop.eup %4063  ;;  %v1473_v20 = vadd.f32 %v1472_v23, %v1471_v49  ;;  %v1864_v57 = vrot.slane %v1863_v3, 2  ;;  %v7350_v23 = vld [vmem:[#allocation40_spill] sm:$0xff]  ;;  %vm1555_vm12 = vcmp.eq.f32.partialorder %v5654_v36, inf  ;;  %vm1557_vm13 = vcmp.eq.f32.partialorder %v5654_v36, 0.0 }
 0x142   :  { %v1476_v28 = vadd.f32 %v1357_v8, %v1356_v17  ;;  %v5656_v32 = vmul.f32 0.0078125, %v1275_v52  ;;  %v1651_v8 = vadd.f32 1.0, %v5654_v36  ;;  %v1547_v30 = vmul.f32 %v4064_v4, %v5606_v62 }
 0x143   :  { %v5672_v17 = vadd.f32 %v1813_v33, %v5600_v42  ;;  %v4066_v56 = vpop.eup %4065  ;;  %v5681_v4 = vadd.f32 %v1869_v22, %v1868_v19  ;;  %v1770_v42 = vmul.f32 %v1730_v18, %v7349_v15  ;;  %v1474_v49 = vrot.slane %v1473_v20, 1 }
 0x144   :  { %v1273_v25 = vpop.xlane.xlu0 %1272  ;;  %v1477_v13 = vrot.slane %v1476_v28, 4  ;;  %4073 = vrcp.f32 %v1651_v8  ;;  %v1359_v52 = vmul.f32 %v5656_v32, %v5656_v32  ;;  %v1549_v1 = vsel %vm1548_vm8, %v5606_v62, %v1547_v30  ;;  %v4068_v8 = vpop.eup %4067 }
 0x145   :  { %v5676_v43 = vmul.f32 0.0078125, %v1273_v25  ;;  %v1552_v33 = vsel %vm1550_vm9, %v1551_v60, %v1549_v1  ;;  %v1771_v53 = vmul.f32 %v1731_v16, %v7350_v23  ;;  %v1865_v30 = vadd.f32 %v1864_v57, %v1863_v3 }
 0x146   :  { %v1478_v51 = vadd.f32 %v1477_v13, %v1476_v28  ;;  %v1677_v12 = vmul.f32 %v4066_v56, %v1552_v33  ;;  %v1603_v28 = vmul.f32 %v4068_v8, %v5622_v14  ;;  %v5691_v19 = vadd.f32 %v1474_v49, %v1473_v20  ;;  %v7351_v56 = vld [vmem:[#allocation50_spill] sm:$0xff] }
 0x147   :  { %v1358_v25 = vmul.f32 %v5676_v43, %v5676_v43  ;;  %v1866_v13 = vrot.slane %v1865_v30, 1  ;;  %v4070_v15 = vpop.eup %4069  ;;  %v1558_v16 = vand.u32 2147483648, %v5654_v36 }
 0x148   :  { %v1279_v2 = vpop.xlane.xlu1 %1278  ;;  %v1479_v46 = vrot.slane %v1478_v51, 2  ;;  %v1716_v62 = vmul.f32 %v1677_v12, %v5528_v61  ;;  %v1717_v60 = vmul.f32 %v1677_v12, %v5519_v45  ;;  %v1605_v3 = vsel %vm1604_vm10, %v5622_v14, %v1603_v28 }
 0x149   :  { %v1483_v22 = vadd.f32 %v1359_v52, %v1358_v25  ;;  %v5693_v18 = vmul.f32 0.0078125, %v1279_v2  ;;  %4075 = vrsqrt.f32 %v5691_v19  ;;  %v5703_v52 = vadd.f32 %v1771_v53, %v1770_v42  ;;  %v7352_v2 = vld [vmem:[#allocation49_spill] sm:$0xff] }
 0x14a   :  { %v1480_v1 = vadd.f32 %v1479_v46, %v1478_v51  ;;  %v1756_v61 = vmul.f32 %v1716_v62, %v7351_v56  ;;  %v1757_v45 = vmul.f32 %v1717_v60, %v7352_v2  ;;  %v1608_v46 = vsel %vm1606_vm11, %v1607_v7, %v1605_v3 }
 0x14b   :  { %v1693_v51 = vmul.f32 %v4070_v15, %v1608_v46  ;;  %v1659_v12 = vadd.f32 1.0, %v5691_v19  ;;  %v1484_v33 = vrot.slane %v1483_v22, 4  ;;  %v1361_v25 = vmul.f32 %v5693_v18, %v5693_v18 }
 0x14c   :  { %v1481_v57 = vrot.slane %v1480_v1, 1  ;;  %v5710_v49 = vadd.f32 %v1757_v45, %v1756_v61  ;;  %v5716_v53 = vadd.f32 %v1866_v13, %v1865_v30  ;;  %vm1611_vm14 = vcmp.eq.f32.partialorder %v5691_v19, inf }
 0x14d   :  { %v1277_v20 = vpop.xlane.xlu0 %1276  ;;  %v4072_v42 = vpop.eup %4071  ;;  %v1732_v28 = vmul.f32 %v1693_v51, %v5552_v0  ;;  %v1733_v14 = vmul.f32 %v1693_v51, %v5550_v27  ;;  %4077 = vrcp.f32 %v1659_v12  ;;  %v1485_v60 = vadd.f32 %v1484_v33, %v1483_v22 }
 0x14e   :  { %v5714_v8 = vmul.f32 0.0078125, %v1277_v20  ;;  %7353 = vst [vmem:[#allocation60_spill] sm:$0xff] %v5716_v53  ;;  %v5720_v15 = vadd.f32 %v1481_v57, %v1480_v1  ;;  %v1554_v62 = vmul.f32 %v4072_v42, %v5654_v36  ;;  %1966 = vmax.xlane.f32.xlu1 %v5716_v53  ;;  %v1815_v1 = vrot.slane %v5672_v17, 2 }
 0x14f   :  { %v1772_v30 = vmul.f32 %v1732_v28, %v5162_v40  ;;  %v1773_v13 = vmul.f32 %v1733_v14, %v5145_v31  ;;  %v1614_v61 = vand.u32 2147483648, %v5691_v19  ;;  %v1827_v46 = vrot.slane %v5710_v49, 4 }
 0x150   :  { %v1360_v3 = vmul.f32 %v5714_v8, %v5714_v8  ;;  %4079 = vrsqrt.f32 %v5720_v15  ;;  %v1283_v27 = vpop.xlane.xlu1 %1282  ;;  %v1556_v22 = vsel %vm1555_vm12, %v5654_v36, %v1554_v62  ;;  %v1660_v45 = vadd.f32 1.0, %v5720_v15 }
 0x151   :  { %v4074_v20 = vpop.eup %4073  ;;  %v1559_v51 = vsel %vm1557_vm13, %v1558_v16, %v1556_v22  ;;  %vm1613_vm15 = vcmp.eq.f32.partialorder %v5691_v19, 0.0  ;;  %v1486_v12 = vrot.slane %v1485_v60, 2  ;;  %v5741_v42 = vmul.f32 0.0078125, %v1283_v27 }
 0x152   :  { %v1490_v57 = vadd.f32 %v1361_v25, %v1360_v3  ;;  %v1679_v33 = vmul.f32 %v4074_v20, %v1559_v51  ;;  %4081 = vrcp.f32 %v1660_v45  ;;  %v5745_v14 = vadd.f32 %v1773_v13, %v1772_v30 }
 0x153   :  { %v1487_v62 = vadd.f32 %v1486_v12, %v1485_v60  ;;  %v1816_v40 = vadd.f32 %v1815_v1, %v5672_v17  ;;  %v1363_v16 = vmul.f32 %v5741_v42, %v5741_v42  ;;  %v1871_v30 = vrot.slane %v5681_v4, 2 }
 0x154   :  { %v1281_v0 = vpop.xlane.xlu0 %1280  ;;  %v1491_v7 = vrot.slane %v1490_v57, 4  ;;  %v1718_v31 = vmul.f32 %v1679_v33, %v5575_v29  ;;  %v1719_v36 = vmul.f32 %v1679_v33, %v5567_v34  ;;  %v7354_v34 = vrot.slane %v5641_v48, 4 }
 0x155   :  { %v5743_v28 = vmul.f32 0.0078125, %v1281_v0  ;;  %v1488_v3 = vrot.slane %v1487_v62, 1  ;;  %v1817_v0 = vrot.slane %v1816_v40, 1  ;;  %vm1618_vm0 = vcmp.eq.f32.partialorder %v5720_v15, inf }
 0x156   :  { %v1492_v27 = vadd.f32 %v1491_v7, %v1490_v57  ;;  %v4076_v13 = vpop.eup %4075  ;;  %v1758_v60 = vmul.f32 %v1718_v31, %v5202_v10  ;;  %v1759_v17 = vmul.f32 %v1719_v36, %v5181_v21  ;;  %v1821_v29 = vadd.f32 %v7354_v34, %v5641_v48 }
 0x157   :  { %v1362_v25 = vmul.f32 %v5743_v28, %v5743_v28  ;;  %v1610_v20 = vmul.f32 %v4076_v13, %v5691_v19  ;;  %v5761_v22 = vadd.f32 %v1488_v3, %v1487_v62  ;;  %v5763_v51 = vadd.f32 %v1817_v0, %v1816_v40 }
 0x158   :  { %v1493_v45 = vrot.slane %v1492_v27, 2  ;;  %v1872_v12 = vadd.f32 %v1871_v30, %v5681_v4  ;;  %v1822_v31 = vrot.slane %v1821_v29, 2  ;;  %vm1620_vm1 = vcmp.eq.f32.partialorder %v5720_v15, 0.0 }
 0x159   :  { %v1497_v1 = vadd.f32 %v1363_v16, %v1362_v25  ;;  %7355 = vst [vmem:[#allocation61_spill] sm:$0xff] %v5763_v51  ;;  %v1612_v57 = vsel %vm1611_vm14, %v5691_v19, %v1610_v20  ;;  %v1621_v48 = vand.u32 2147483648, %v5720_v15  ;;  %4083 = vrsqrt.f32 %v5761_v22  ;;  %1952 = vmax.xlane.f32.xlu0 %v5763_v51 }
 0x15a   :  { %v4078_v40 = vpop.eup %4077  ;;  %v1883_v33 = vrot.slane %v5745_v14, 4  ;;  %v1833_v62 = vadd.f32 %v1759_v17, %v1758_v60  ;;  %v1615_v4 = vsel %vm1613_vm15, %v1614_v61, %v1612_v57  ;;  %v1661_v36 = vadd.f32 1.0, %v5761_v22 }
 0x15b   :  { %v1498_v7 = vrot.slane %v1497_v1, 4  ;;  %v1695_v16 = vmul.f32 %v4078_v40, %v1615_v4  ;;  %v1494_v25 = vadd.f32 %v1493_v45, %v1492_v27  ;;  %v1873_v0 = vrot.slane %v1872_v12, 1 }
 0x15c   :  { %4085 = vrcp.f32 %v1661_v36  ;;  %v1823_v13 = vadd.f32 %v1822_v31, %v1821_v29  ;;  %v7356_v34 = vrot.slane %v5703_v52, 4  ;;  %v1828_v10 = vadd.f32 %v1827_v46, %v5710_v49 }
 0x15d   :  { %v1499_v3 = vadd.f32 %v1498_v7, %v1497_v1  ;;  %v4080_v30 = vpop.eup %4079  ;;  %v1734_v60 = vmul.f32 %v1695_v16, %v5610_v63  ;;  %v1735_v19 = vmul.f32 %v1695_v16, %v5594_v35  ;;  %v1495_v17 = vrot.slane %v1494_v25, 1 }
 0x15e   :  { %v1877_v20 = vadd.f32 %v7356_v34, %v5703_v52  ;;  %v1617_v61 = vmul.f32 %v4080_v30, %v5720_v15  ;;  %v5785_v27 = vadd.f32 %v1873_v0, %v1872_v12  ;;  %v1824_v1 = vrot.slane %v1823_v13, 1 }
 0x15f   :  { %v1500_v57 = vrot.slane %v1499_v3, 2  ;;  %v4082_v7 = vpop.eup %4081  ;;  %v1774_v29 = vmul.f32 %v1734_v60, %v5228_v39  ;;  %v1775_v31 = vmul.f32 %v1735_v19, %v5218_v6  ;;  %v5792_v63 = vadd.f32 %v1495_v17, %v1494_v25 }
 0x160   :  { %7357 = vst [vmem:[#allocation62_spill] sm:$0xff] %v5785_v27  ;;  %v1878_v45 = vrot.slane %v1877_v20, 2  ;;  %v1619_v52 = vsel %vm1618_vm0, %v5720_v15, %v1617_v61  ;;  %1968 = vmax.xlane.f32.xlu1 %v5785_v27  ;;  %v5797_v46 = vadd.f32 %v1824_v1, %v1823_v13  ;;  %v1834_v40 = vrot.slane %v1833_v62, 4 }
 0x161   :  { %v1622_v35 = vsel %vm1620_vm1, %v1621_v48, %v1619_v52  ;;  %v1501_v49 = vadd.f32 %v1500_v57, %v1499_v3  ;;  %v1889_v4 = vadd.f32 %v1775_v31, %v1774_v29  ;;  %4087 = vrsqrt.f32 %v5792_v63 }
 0x162   :  { %7358 = vst [vmem:[#allocation63_spill] sm:$0xff] %v5797_v46  ;;  %v1879_v12 = vadd.f32 %v1878_v45, %v1877_v20  ;;  %v1697_v36 = vmul.f32 %v4082_v7, %v1622_v35  ;;  %v1662_v16 = vadd.f32 1.0, %v5792_v63  ;;  %1954 = vmax.xlane.f32.xlu0 %v5797_v46  ;;  %v1829_v13 = vrot.slane %v1828_v10, 2 }
 0x163   :  { %v1502_v0 = vrot.slane %v1501_v49, 1  ;;  %v1890_v25 = vrot.slane %v1889_v4, 4  ;;  %v1884_v34 = vadd.f32 %v1883_v33, %v5745_v14  ;;  %v1835_v61 = vadd.f32 %v1834_v40, %v1833_v62 }
 0x164   :  { %v1736_v15 = vmul.f32 %v1697_v36, %v5639_v41  ;;  %v1737_v48 = vmul.f32 %v1697_v36, %v5626_v58  ;;  %v1880_v3 = vrot.slane %v1879_v12, 1  ;;  %4089 = vrcp.f32 %v1662_v16 }
 0x165   :  { %v5804_v30 = vadd.f32 %v1502_v0, %v1501_v49  ;;  %vm1625_vm2 = vcmp.eq.f32.partialorder %v5761_v22, inf  ;;  %vm1627_vm3 = vcmp.eq.f32.partialorder %v5761_v22, 0.0  ;;  %v1830_v14 = vadd.f32 %v1829_v13, %v1828_v10 }
 0x166   :  { %v1776_v20 = vmul.f32 %v1736_v15, %v5251_v59  ;;  %v1777_v60 = vmul.f32 %v1737_v48, %v5239_v38  ;;  %v5809_v19 = vadd.f32 %v1880_v3, %v1879_v12  ;;  %v4084_v17 = vpop.eup %4083  ;;  %v1628_v33 = vand.u32 2147483648, %v5761_v22 }
 0x167   :  { %4091 = vrsqrt.f32 %v5804_v30  ;;  %v1624_v41 = vmul.f32 %v4084_v17, %v5761_v22  ;;  %v1663_v57 = vadd.f32 1.0, %v5804_v30  ;;  %v1885_v1 = vrot.slane %v1884_v34, 2 }
 0x168   :  { %7359 = vst [vmem:[#allocation64_spill] sm:$0xff] %v5809_v19  ;;  %v1896_v58 = vadd.f32 %v1777_v60, %v1776_v20  ;;  %1970 = vmax.xlane.f32.xlu1 %v5809_v19  ;;  %v1836_v45 = vrot.slane %v1835_v61, 2  ;;  %v1891_v62 = vadd.f32 %v1890_v25, %v1889_v4  ;;  %v1831_v52 = vrot.slane %v1830_v14, 1 }
 0x169   :  { %v4086_v7 = vpop.eup %4085  ;;  %v1626_v31 = vsel %vm1625_vm2, %v5761_v22, %v1624_v41  ;;  %4093 = vrcp.f32 %v1663_v57  ;;  %v1886_v49 = vadd.f32 %v1885_v1, %v1884_v34  ;;  %vm1632_vm4 = vcmp.eq.f32.partialorder %v5792_v63, inf }
 0x16a   :  { %v1897_v29 = vrot.slane %v1896_v58, 4  ;;  %v1629_v35 = vsel %vm1627_vm3, %v1628_v33, %v1626_v31  ;;  %v1837_v12 = vadd.f32 %v1836_v45, %v1835_v61  ;;  %v1892_v40 = vrot.slane %v1891_v62, 2 }
 0x16b   :  { %v1699_v36 = vmul.f32 %v4086_v7, %v1629_v35  ;;  %v5821_v16 = vadd.f32 %v1831_v52, %v1830_v14  ;;  %v1887_v0 = vrot.slane %v1886_v49, 1  ;;  %vm1634_vm5 = vcmp.eq.f32.partialorder %v5792_v63, 0.0 }
 0x16c   :  { %v1898_v10 = vadd.f32 %v1897_v29, %v1896_v58  ;;  %v1838_v15 = vrot.slane %v1837_v12, 1  ;;  %v1893_v48 = vadd.f32 %v1892_v40, %v1891_v62  ;;  %vm1639_vm6 = vcmp.eq.f32.partialorder %v5804_v30, inf }
 0x16d   :  { %7360 = vst [vmem:[#allocation65_spill] sm:$0xff] %v5821_v16  ;;  %v1738_v4 = vmul.f32 %v1699_v36, %v5676_v43  ;;  %v1739_v25 = vmul.f32 %v1699_v36, %v5656_v32  ;;  %1956 = vmax.xlane.f32.xlu0 %v5821_v16  ;;  %v5826_v22 = vadd.f32 %v1887_v0, %v1886_v49  ;;  %v1635_v32 = vand.u32 2147483648, %v5792_v63 }
 0x16e   :  { %v1899_v3 = vrot.slane %v1898_v10, 2  ;;  %v4088_v13 = vpop.eup %4087  ;;  %v5828_v34 = vadd.f32 %v1838_v15, %v1837_v12  ;;  %v1894_v20 = vrot.slane %v1893_v48, 1  ;;  %vm1641_vm7 = vcmp.eq.f32.partialorder %v5804_v30, 0.0 }
 0x16f   :  { %7361 = vst [vmem:[#allocation66_spill] sm:$0xff] %v5826_v22  ;;  %v1778_v60 = vmul.f32 %v1738_v4, %v5272_v55  ;;  %v1779_v61 = vmul.f32 %v1739_v25, %v5262_v50  ;;  %v1631_v17 = vmul.f32 %v4088_v13, %v5792_v63  ;;  %1972 = vmax.xlane.f32.xlu1 %v5826_v22 }
 0x170   :  { %7362 = vst [vmem:[#allocation67_spill] sm:$0xff] %v5828_v34  ;;  %v1900_v58 = vadd.f32 %v1899_v3, %v1898_v10  ;;  %v5836_v43 = vadd.f32 %v1894_v20, %v1893_v48 }
 0x171   :  { %v4090_v41 = vpop.eup %4089  ;;  %v1903_v57 = vadd.f32 %v1779_v61, %v1778_v60  ;;  %v1633_v14 = vsel %vm1632_vm4, %v5792_v63, %v1631_v17  ;;  %1958 = vmax.xlane.f32.xlu0 %v5828_v34  ;;  %v1642_v63 = vand.u32 2147483648, %v5804_v30 }
 0x172   :  { %7363 = vst [vmem:[#allocation68_spill] sm:$0xff] %v5836_v43  ;;  %v1901_v33 = vrot.slane %v1900_v58, 1  ;;  %v1636_v1 = vsel %vm1634_vm5, %v1635_v32, %v1633_v14 }
 0x173   :  { %v1904_v62 = vrot.slane %v1903_v57, 4  ;;  %v1701_v7 = vmul.f32 %v4090_v41, %v1636_v1  ;;  %1974 = vmax.xlane.f32.xlu1 %v5836_v43 }
 0x174   :  { %v4092_v45 = vpop.eup %4091  ;;  %v5841_v29 = vadd.f32 %v1901_v33, %v1900_v58 }
 0x175   :  { %v1638_v31 = vmul.f32 %v4092_v45, %v5804_v30  ;;  %v1740_v52 = vmul.f32 %v1701_v7, %v5714_v8  ;;  %v1741_v35 = vmul.f32 %v1701_v7, %v5693_v18  ;;  %v1905_v49 = vadd.f32 %v1904_v62, %v1903_v57 }
 0x176   :  { %7364 = vst [vmem:[#allocation69_spill] sm:$0xff] %v5841_v29  ;;  %1976 = vmax.xlane.f32.xlu0 %v5841_v29  ;;  %v4094_v12 = vpop.eup %4093 }
 0x177   :  { %v1640_v40 = vsel %vm1639_vm6, %v5804_v30, %v1638_v31  ;;  %v1780_v36 = vmul.f32 %v1740_v52, %v5295_v47  ;;  %v1781_v10 = vmul.f32 %v1741_v35, %v5283_v44  ;;  %v1906_v15 = vrot.slane %v1905_v49, 2 }
 0x178   :  { %v1643_v0 = vsel %vm1641_vm7, %v1642_v63, %v1640_v40 }
 0x179   :  { %v1703_v48 = vmul.f32 %v4094_v12, %v1643_v0  ;;  %v1910_v8 = vadd.f32 %v1781_v10, %v1780_v36  ;;  %v1907_v4 = vadd.f32 %v1906_v15, %v1905_v49 }
 0x17b   :  { %v1742_v18 = vmul.f32 %v1703_v48, %v5743_v28  ;;  %v1743_v25 = vmul.f32 %v1703_v48, %v5741_v42  ;;  %v1911_v3 = vrot.slane %v1910_v8, 4  ;;  %v1908_v13 = vrot.slane %v1907_v4, 1 }
 0x17d   :  { %v1782_v20 = vmul.f32 %v1742_v18, %v5308_v24  ;;  %v1783_v60 = vmul.f32 %v1743_v25, %v5303_v9  ;;  %v5858_v30 = vadd.f32 %v1908_v13, %v1907_v4  ;;  %v1912_v61 = vadd.f32 %v1911_v3, %v1910_v8 }
 0x17f   :  { %7365 = vst [vmem:[#allocation70_spill] sm:$0xff] %v5858_v30  ;;  %v1917_v17 = vadd.f32 %v1783_v60, %v1782_v20  ;;  %1978 = vmax.xlane.f32.xlu1 %v5858_v30  ;;  %v1913_v58 = vrot.slane %v1912_v61, 2  ;;  %v7368_v20 = vld [vmem:[#allocation58_spill] sm:$0xff] }
 0x181   :  { %v1918_v32 = vrot.slane %v1917_v17, 4  ;;  %v1914_v41 = vadd.f32 %v1913_v58, %v1912_v61 }
 0x183   :  { %v1919_v57 = vadd.f32 %v1918_v32, %v1917_v17  ;;  %v1915_v14 = vrot.slane %v1914_v41, 1  ;;  %v7369_v32 = vld [vmem:[#allocation59_spill] sm:$0xff] }
 0x185   :  { %v1920_v28 = vrot.slane %v1919_v57, 2  ;;  %v5861_v33 = vadd.f32 %v1915_v14, %v1914_v41 }
 0x187   :  { %7366 = vst [vmem:[#allocation71_spill] sm:$0xff] %v5861_v33  ;;  %v1921_v42 = vadd.f32 %v1920_v28, %v1919_v57  ;;  %1980 = vmax.xlane.f32.xlu0 %v5861_v33  ;;  %v1947_v62 = vpop.xlane.xlu1 %1946 }
 0x188   :  { %v1985_v7 = vsub.f32 %v5421_v26, %v1947_v62 }
 0x189   :  { %v1922_v1 = vrot.slane %v1921_v42, 1 }
 0x18a   :  { %v2006_v31 = vmul.f32 1.442695, %v1985_v7 }
 0x18b   :  { %v5864_v45 = vadd.f32 %v1922_v1, %v1921_v42  ;;  %v1945_v52 = vpop.xlane.xlu0 %1944 }
 0x18c   :  { %4095 = vpow2.f32 %v2006_v31  ;;  %v1984_v35 = vsub.f32 %v5433_v37, %v1945_v52 }
 0x18d   :  { %7367 = vst [vmem:[#allocation72_spill] sm:$0xff] %v5864_v45  ;;  %1982 = vmax.xlane.f32.xlu1 %v5864_v45 }
 0x18e   :  { %v2004_v63 = vmul.f32 1.442695, %v1984_v35 }
 0x190   :  { %4097 = vpow2.f32 %v2004_v63 }
 0x196   :  { %v1961_v49 = vpop.xlane.xlu0 %1960 }
 0x197   :  { %v1992_v12 = vsub.f32 %v5477_v11, %v1961_v49 }
 0x199   :  { %v5870_v40 = vpop.eup %4095  ;;  %v2020_v36 = vmul.f32 1.442695, %v1992_v12 }
 0x19a   :  { %2046 = vadd.xlane.f32.xlu1 %v5870_v40 }
 0x19b   :  { %4099 = vpow2.f32 %v2020_v36 }
 0x19d   :  { %v5873_v10 = vpop.eup %4097 }
 0x19e   :  { %2044 = vadd.xlane.f32.xlu0 %v5873_v10 }
 0x1a0   :  { %v1963_v0 = vpop.xlane.xlu1 %1962 }
 0x1a1   :  { %v1993_v15 = vsub.f32 %v5513_v5, %v1963_v0 }
 0x1a3   :  { %v2022_v48 = vmul.f32 1.442695, %v1993_v15 }
 0x1a5   :  { %4101 = vpow2.f32 %v2022_v48 }
 0x1a8   :  { %v5877_v8 = vpop.eup %4099 }
 0x1a9   :  { %2060 = vadd.xlane.f32.xlu0 %v5877_v8 }
 0x1ac   :  { %v1949_v4 = vpop.xlane.xlu0 %1948 }
 0x1ad   :  { %v1986_v18 = vsub.f32 %v5555_v54, %v1949_v4 }
 0x1af   :  { %v2008_v25 = vmul.f32 1.442695, %v1986_v18 }
 0x1b1   :  { %4103 = vpow2.f32 %v2008_v25 }
 0x1b2   :  { %v5881_v3 = vpop.eup %4101 }
 0x1b3   :  { %2062 = vadd.xlane.f32.xlu1 %v5881_v3 }
 0x1b6   :  { %v1965_v13 = vpop.xlane.xlu1 %1964 }
 0x1b7   :  { %v1994_v60 = vsub.f32 %v7368_v20, %v1965_v13 }
 0x1b9   :  { %v2024_v61 = vmul.f32 1.442695, %v1994_v60 }
 0x1bb   :  { %4105 = vpow2.f32 %v2024_v61 }
 0x1be   :  { %v5885_v17 = vpop.eup %4103 }
 0x1bf   :  { %2048 = vadd.xlane.f32.xlu0 %v5885_v17 }
 0x1c6   :  { %v1951_v58 = vpop.xlane.xlu0 %1950 }
 0x1c7   :  { %v1987_v41 = vsub.f32 %v7369_v32, %v1951_v58 }
 0x1c8   :  { %v5889_v14 = vpop.eup %4105 }
 0x1c9   :  { %v2010_v57 = vmul.f32 1.442695, %v1987_v41  ;;  %2064 = vadd.xlane.f32.xlu1 %v5889_v14 }
 0x1cb   :  { %4107 = vpow2.f32 %v2010_v57 }
 0x1d7   :  { %v1967_v28 = vpop.xlane.xlu1 %1966 }
 0x1d8   :  { %v1995_v42 = vsub.f32 %v5716_v53, %v1967_v28  ;;  %v5893_v1 = vpop.eup %4107 }
 0x1d9   :  { %2050 = vadd.xlane.f32.xlu0 %v5893_v1 }
 0x1da   :  { %v2026_v62 = vmul.f32 1.442695, %v1995_v42 }
 0x1dc   :  { %4109 = vpow2.f32 %v2026_v62 }
 0x1e2   :  { %v1953_v7 = vpop.xlane.xlu0 %1952 }
 0x1e3   :  { %v1988_v31 = vsub.f32 %v5763_v51, %v1953_v7 }
 0x1e5   :  { %v2012_v52 = vmul.f32 1.442695, %v1988_v31 }
 0x1e7   :  { %4111 = vpow2.f32 %v2012_v52 }
 0x1e9   :  { %v5897_v35 = vpop.eup %4109  ;;  %v1969_v63 = vpop.xlane.xlu1 %1968 }
 0x1ea   :  { %v1996_v49 = vsub.f32 %v5785_v27, %v1969_v63  ;;  %2066 = vadd.xlane.f32.xlu1 %v5897_v35 }
 0x1eb   :  { %v1955_v12 = vpop.xlane.xlu0 %1954 }
 0x1ec   :  { %v2028_v36 = vmul.f32 1.442695, %v1996_v49  ;;  %v1989_v0 = vsub.f32 %v5797_v46, %v1955_v12  ;;  %v7384_v46 = vld [vmem:[#allocation32_spill] sm:$0xff] }
 0x1ee   :  { %4113 = vpow2.f32 %v2028_v36  ;;  %v2014_v15 = vmul.f32 1.442695, %v1989_v0 }
 0x1f0   :  { %4115 = vpow2.f32 %v2014_v15 }
 0x1f1   :  { %v1971_v48 = vpop.xlane.xlu1 %1970 }
 0x1f2   :  { %v1997_v4 = vsub.f32 %v5809_v19, %v1971_v48 }
 0x1f4   :  { %v2030_v18 = vmul.f32 1.442695, %v1997_v4  ;;  %v5903_v25 = vpop.eup %4111 }
 0x1f5   :  { %2052 = vadd.xlane.f32.xlu0 %v5903_v25 }
 0x1f6   :  { %4117 = vpow2.f32 %v2030_v18  ;;  %v1957_v13 = vpop.xlane.xlu0 %1956 }
 0x1f7   :  { %v1990_v60 = vsub.f32 %v5821_v16, %v1957_v13  ;;  %v7380_v16 = vld [vmem:[#allocation35_spill] sm:$0xff] }
 0x1f8   :  { %v1973_v58 = vpop.xlane.xlu1 %1972 }
 0x1f9   :  { %v2016_v61 = vmul.f32 1.442695, %v1990_v60  ;;  %v1998_v41 = vsub.f32 %v5826_v22, %v1973_v58 }
 0x1fa   :  { %v1959_v57 = vpop.xlane.xlu0 %1958 }
 0x1fb   :  { %v5908_v28 = vpop.eup %4113  ;;  %4119 = vpow2.f32 %v2016_v61  ;;  %v1991_v42 = vsub.f32 %v5828_v34, %v1959_v57  ;;  %v2032_v62 = vmul.f32 1.442695, %v1998_v41  ;;  %v7375_v34 = vld [vmem:[#allocation28_spill] sm:$0xff] }
 0x1fc   :  { %2068 = vadd.xlane.f32.xlu1 %v5908_v28  ;;  %v1975_v52 = vpop.xlane.xlu1 %1974 }
 0x1fd   :  { %v5912_v7 = vpop.eup %4115  ;;  %v2018_v31 = vmul.f32 1.442695, %v1991_v42  ;;  %4121 = vpow2.f32 %v2032_v62  ;;  %v1999_v63 = vsub.f32 %v5836_v43, %v1975_v52 }
 0x1fe   :  { %2054 = vadd.xlane.f32.xlu0 %v5912_v7 }
 0x1ff   :  { %v1977_v49 = vpop.xlane.xlu0 %1976  ;;  %4123 = vpow2.f32 %v2018_v31  ;;  %v2034_v36 = vmul.f32 1.442695, %v1999_v63 }
 0x200   :  { %v2000_v12 = vsub.f32 %v5841_v29, %v1977_v49  ;;  %v7373_v29 = vld [vmem:[#allocation23_spill] sm:$0xff] }
 0x201   :  { %4125 = vpow2.f32 %v2034_v36 }
 0x202   :  { %v2036_v0 = vmul.f32 1.442695, %v2000_v12 }
 0x203   :  { %v5917_v15 = vpop.eup %4117 }
 0x204   :  { %2070 = vadd.xlane.f32.xlu1 %v5917_v15  ;;  %4127 = vpow2.f32 %v2036_v0 }
 0x208   :  { %v5920_v48 = vpop.eup %4119  ;;  %v1979_v4 = vpop.xlane.xlu1 %1978 }
 0x209   :  { %2056 = vadd.xlane.f32.xlu0 %v5920_v48  ;;  %v2001_v18 = vsub.f32 %v5858_v30, %v1979_v4 }
 0x20a   :  { %v5924_v13 = vpop.eup %4121 }
 0x20b   :  { %v2038_v60 = vmul.f32 1.442695, %v2001_v18  ;;  %2072 = vadd.xlane.f32.xlu1 %v5924_v13 }
 0x20c   :  { %v5926_v61 = vpop.eup %4123 }
 0x20d   :  { %4129 = vpow2.f32 %v2038_v60  ;;  %2058 = vadd.xlane.f32.xlu0 %v5926_v61 }
 0x20e   :  { %v5930_v58 = vpop.eup %4125 }
 0x20f   :  { %2074 = vadd.xlane.f32.xlu1 %v5930_v58 }
 0x210   :  { %v1981_v57 = vpop.xlane.xlu0 %1980 }
 0x211   :  { %v5932_v41 = vpop.eup %4127  ;;  %v2002_v42 = vsub.f32 %v5861_v33, %v1981_v57  ;;  %v7372_v33 = vld [vmem:[#allocation25_spill] sm:$0xff] }
 0x212   :  { %2076 = vadd.xlane.f32.xlu0 %v5932_v41 }
 0x213   :  { %v2040_v62 = vmul.f32 1.442695, %v2002_v42 }
 0x215   :  { %4131 = vpow2.f32 %v2040_v62  ;;  %v7370_v62 = vld [vmem:[#allocation26_spill] sm:$0xff] }
 0x216   :  { %v1983_v31 = vpop.xlane.xlu1 %1982 }
 0x217   :  { %v2003_v52 = vsub.f32 %v5864_v45, %v1983_v31 }
 0x219   :  { %v2042_v63 = vmul.f32 1.442695, %v2003_v52  ;;  %v7371_v52 = vld [vmem:[#allocation24_spill] sm:$0xff] }
 0x21a   :  { %v5938_v49 = vpop.eup %4129 }
 0x21b   :  { %4133 = vpow2.f32 %v2042_v63  ;;  %2078 = vadd.xlane.f32.xlu1 %v5938_v49 }
 0x222   :  { %v5941_v12 = vpop.eup %4131 }
 0x223   :  { %2080 = vadd.xlane.f32.xlu0 %v5941_v12  ;;  %v2047_v0 = vpop.xlane.xlu1 %2046 }
 0x224   :  { %4135 = vrcp.f32 %v2047_v0 }
 0x227   :  { %v2045_v4 = vpop.xlane.xlu0 %2044 }
 0x228   :  { %v5944_v36 = vpop.eup %4133  ;;  %4137 = vrcp.f32 %v2045_v4 }
 0x229   :  { %2082 = vadd.xlane.f32.xlu1 %v5944_v36 }
 0x231   :  { %v4136_v60 = vpop.eup %4135 }
 0x232   :  { %v2061_v18 = vpop.xlane.xlu0 %2060  ;;  %v2087_v45 = vmul.f32 %v4136_v60, %v5870_v40 }
 0x233   :  { %4139 = vrcp.f32 %v2061_v18 }
 0x234   :  { %v2127_v30 = vmul.f32 %v2087_v45, %v7372_v33  ;;  %v2126_v0 = vmul.f32 %v2087_v45, %v7373_v29 }
 0x235   :  { %v4138_v57 = vpop.eup %4137 }
 0x236   :  { %v2085_v42 = vmul.f32 %v4138_v57, %v5873_v10  ;;  %v7374_v10 = vld [vmem:[#allocation27_spill] sm:$0xff] }
 0x238   :  { %v2125_v31 = vmul.f32 %v2085_v42, %v7370_v62  ;;  %v2124_v63 = vmul.f32 %v2085_v42, %v7371_v52 }
 0x23a   :  { %2166 = vadd.xlane.f32.xlu1 %v2125_v31  ;;  %2164 = vadd.xlane.f32.xlu0 %v2124_v63  ;;  %v7376_v31 = vld [vmem:[#allocation29_spill] sm:$0xff]  ;;  %v7377_v63 = vld [vmem:[#allocation30_spill] sm:$0xff] }
 0x23c   :  { %v2063_v43 = vpop.xlane.xlu1 %2062 }
 0x23d   :  { %4141 = vrcp.f32 %v2063_v43 }
 0x23e   :  { %2170 = vadd.xlane.f32.xlu1 %v2127_v30  ;;  %2168 = vadd.xlane.f32.xlu0 %v2126_v0 }
 0x240   :  { %v4140_v4 = vpop.eup %4139 }
 0x241   :  { %v2101_v18 = vmul.f32 %v4140_v4, %v5877_v8  ;;  %v7378_v4 = vld [vmem:[#allocation33_spill] sm:$0xff] }
 0x243   :  { %v2141_v57 = vmul.f32 %v2101_v18, %v7374_v10  ;;  %v2140_v22 = vmul.f32 %v2101_v18, %v7375_v34 }
 0x245   :  { %2198 = vadd.xlane.f32.xlu1 %v2141_v57  ;;  %2196 = vadd.xlane.f32.xlu0 %v2140_v22  ;;  %v7379_v57 = vld [vmem:[#allocation34_spill] sm:$0xff] }
 0x248   :  { %v2049_v40 = vpop.xlane.xlu0 %2048 }
 0x249   :  { %4143 = vrcp.f32 %v2049_v40 }
 0x24a   :  { %v4142_v60 = vpop.eup %4141 }
 0x24b   :  { %v2103_v42 = vmul.f32 %v4142_v60, %v5881_v3 }
 0x24d   :  { %v2143_v45 = vmul.f32 %v2103_v42, %v7376_v31  ;;  %v2142_v30 = vmul.f32 %v2103_v42, %v7377_v63 }
 0x24f   :  { %2202 = vadd.xlane.f32.xlu1 %v2143_v45  ;;  %2200 = vadd.xlane.f32.xlu0 %v2142_v30  ;;  %v7381_v45 = vld [vmem:[#allocation36_spill] sm:$0xff] }
 0x252   :  { %v2065_v43 = vpop.xlane.xlu1 %2064 }
 0x253   :  { %4145 = vrcp.f32 %v2065_v43 }
 0x256   :  { %v4144_v8 = vpop.eup %4143 }
 0x257   :  { %v2089_v0 = vmul.f32 %v4144_v8, %v5885_v17  ;;  %v7382_v8 = vld [vmem:[#allocation37_spill] sm:$0xff] }
 0x259   :  { %v2129_v18 = vmul.f32 %v2089_v0, %v7378_v4  ;;  %v2128_v22 = vmul.f32 %v2089_v0, %v7379_v57 }
 0x25b   :  { %2174 = vadd.xlane.f32.xlu1 %v2129_v18  ;;  %2172 = vadd.xlane.f32.xlu0 %v2128_v22  ;;  %v7383_v18 = vld [vmem:[#allocation31_spill] sm:$0xff] }
 0x260   :  { %v4146_v3 = vpop.eup %4145 }
 0x261   :  { %v2105_v60 = vmul.f32 %v4146_v3, %v5889_v14 }
 0x262   :  { %v2051_v40 = vpop.xlane.xlu0 %2050 }
 0x263   :  { %4147 = vrcp.f32 %v2051_v40  ;;  %v2145_v42 = vmul.f32 %v2105_v60, %v7380_v16  ;;  %v2144_v30 = vmul.f32 %v2105_v60, %v7381_v45 }
 0x265   :  { %2206 = vadd.xlane.f32.xlu1 %v2145_v42  ;;  %2204 = vadd.xlane.f32.xlu0 %v2144_v30  ;;  %v7385_v42 = vld [vmem:[#allocation38_spill] sm:$0xff] }
 0x270   :  { %v4148_v43 = vpop.eup %4147 }
 0x271   :  { %v2091_v17 = vmul.f32 %v4148_v43, %v5893_v1 }
 0x273   :  { %v2067_v19 = vpop.xlane.xlu1 %2066  ;;  %v2131_v0 = vmul.f32 %v2091_v17, %v7382_v8  ;;  %v2130_v22 = vmul.f32 %v2091_v17, %v7383_v18 }
 0x274   :  { %4149 = vrcp.f32 %v2067_v19 }
 0x275   :  { %2178 = vadd.xlane.f32.xlu1 %v2131_v0  ;;  %2176 = vadd.xlane.f32.xlu0 %v2130_v22  ;;  %v7386_v0 = vld [vmem:[#allocation41_spill] sm:$0xff] }
 0x27e   :  { %v2053_v40 = vpop.xlane.xlu0 %2052 }
 0x27f   :  { %4151 = vrcp.f32 %v2053_v40  ;;  %v7387_v40 = vld [vmem:[#allocation42_spill] sm:$0xff] }
 0x281   :  { %v4150_v14 = vpop.eup %4149 }
 0x282   :  { %v2107_v3 = vmul.f32 %v4150_v14, %v5897_v35 }
 0x284   :  { %v2147_v60 = vmul.f32 %v2107_v3, %v7384_v46  ;;  %v2146_v30 = vmul.f32 %v2107_v3, %v7385_v42 }
 0x285   :  { %v2069_v27 = vpop.xlane.xlu1 %2068 }
 0x286   :  { %4153 = vrcp.f32 %v2069_v27  ;;  %2210 = vadd.xlane.f32.xlu1 %v2147_v60  ;;  %2208 = vadd.xlane.f32.xlu0 %v2146_v30 }
 0x287   :  { %v2055_v19 = vpop.xlane.xlu0 %2054 }
 0x288   :  { %4155 = vrcp.f32 %v2055_v19  ;;  %v7388_v19 = vld [vmem:[#allocation43_spill] sm:$0xff] }
 0x28c   :  { %v4152_v1 = vpop.eup %4151 }
 0x28d   :  { %v2071_v43 = vpop.xlane.xlu1 %2070  ;;  %v2093_v17 = vmul.f32 %v4152_v1, %v5903_v25 }
 0x28e   :  { %4157 = vrcp.f32 %v2071_v43  ;;  %v7389_v43 = vld [vmem:[#allocation44_spill] sm:$0xff] }
 0x28f   :  { %v2133_v22 = vmul.f32 %v2093_v17, %v7386_v0  ;;  %v2132_v51 = vmul.f32 %v2093_v17, %v7387_v40  ;;  %v7390_v17 = vld [vmem:[#allocation45_spill] sm:$0xff] }
 0x291   :  { %2182 = vadd.xlane.f32.xlu1 %v2133_v22  ;;  %2180 = vadd.xlane.f32.xlu0 %v2132_v51 }
 0x292   :  { %v2057_v35 = vpop.xlane.xlu0 %2056 }
 0x293   :  { %v4154_v14 = vpop.eup %4153  ;;  %4159 = vrcp.f32 %v2057_v35  ;;  %v7391_v35 = vld [vmem:[#allocation39_spill] sm:$0xff] }
 0x294   :  { %v2109_v27 = vmul.f32 %v4154_v14, %v5908_v28  ;;  %v2073_v60 = vpop.xlane.xlu1 %2072 }
 0x295   :  { %v4156_v3 = vpop.eup %4155  ;;  %4161 = vrcp.f32 %v2073_v60 }
 0x296   :  { %v2059_v30 = vpop.xlane.xlu0 %2058  ;;  %v2149_v53 = vmul.f32 %v2109_v27, %v7388_v19  ;;  %v2148_v32 = vmul.f32 %v2109_v27, %v7389_v43  ;;  %v2095_v25 = vmul.f32 %v4156_v3, %v5912_v7  ;;  %v7392_v27 = vld [vmem:[#allocation46_spill] sm:$0xff] }
 0x297   :  { %4163 = vrcp.f32 %v2059_v30 }
 0x298   :  { %2214 = vadd.xlane.f32.xlu1 %v2149_v53  ;;  %2212 = vadd.xlane.f32.xlu0 %v2148_v32  ;;  %v2075_v1 = vpop.xlane.xlu1 %2074  ;;  %v2135_v22 = vmul.f32 %v2095_v25, %v7390_v17  ;;  %v2134_v0 = vmul.f32 %v2095_v25, %v7391_v35 }
 0x299   :  { %4165 = vrcp.f32 %v2075_v1  ;;  %v7393_v1 = vld [vmem:[#allocation51_spill] sm:$0xff] }
 0x29b   :  { %v4158_v51 = vpop.eup %4157  ;;  %v2077_v14 = vpop.xlane.xlu0 %2076 }
 0x29c   :  { %v2111_v28 = vmul.f32 %v4158_v51, %v5917_v15  ;;  %2186 = vadd.xlane.f32.xlu1 %v2135_v22  ;;  %2184 = vadd.xlane.f32.xlu0 %v2134_v0  ;;  %4167 = vrcp.f32 %v2077_v14  ;;  %v7394_v22 = vld [vmem:[#allocation52_spill] sm:$0xff] }
 0x29e   :  { %v2151_v60 = vmul.f32 %v2111_v28, %v7350_v23  ;;  %v2150_v19 = vmul.f32 %v2111_v28, %v7392_v27 }
 0x2a0   :  { %v4160_v7 = vpop.eup %4159  ;;  %2218 = vadd.xlane.f32.xlu1 %v2151_v60  ;;  %2216 = vadd.xlane.f32.xlu0 %v2150_v19  ;;  %v7395_v60 = vld [vmem:[#allocation47_spill] sm:$0xff] }
 0x2a1   :  { %v2097_v53 = vmul.f32 %v4160_v7, %v5920_v48 }
 0x2a2   :  { %v4162_v32 = vpop.eup %4161 }
 0x2a3   :  { %v2137_v3 = vmul.f32 %v2097_v53, %v7352_v2  ;;  %v2136_v30 = vmul.f32 %v2097_v53, %v7351_v56  ;;  %v2113_v0 = vmul.f32 %v4162_v32, %v5924_v13 }
 0x2a4   :  { %v4164_v25 = vpop.eup %4163  ;;  %v2079_v15 = vpop.xlane.xlu1 %2078 }
 0x2a5   :  { %4169 = vrcp.f32 %v2079_v15  ;;  %2190 = vadd.xlane.f32.xlu1 %v2137_v3  ;;  %2188 = vadd.xlane.f32.xlu0 %v2136_v30  ;;  %v2153_v51 = vmul.f32 %v2113_v0, %v7393_v1  ;;  %v2152_v28 = vmul.f32 %v2113_v0, %v7394_v22  ;;  %v2099_v19 = vmul.f32 %v4164_v25, %v5926_v61 }
 0x2a6   :  { %v4166_v14 = vpop.eup %4165 }
 0x2a7   :  { %v2139_v48 = vmul.f32 %v2099_v19, %v5181_v21  ;;  %v2138_v7 = vmul.f32 %v2099_v19, %v7395_v60  ;;  %v2115_v53 = vmul.f32 %v4166_v14, %v5930_v58 }
 0x2a9   :  { %2222 = vadd.xlane.f32.xlu1 %v2153_v51  ;;  %2220 = vadd.xlane.f32.xlu0 %v2152_v28  ;;  %v4168_v2 = vpop.eup %4167  ;;  %v2155_v32 = vmul.f32 %v2115_v53, %v5218_v6  ;;  %v2154_v3 = vmul.f32 %v2115_v53, %v5228_v39 }
 0x2aa   :  { %v2117_v61 = vmul.f32 %v4168_v2, %v5932_v41 }
 0x2ac   :  { %v2081_v13 = vpop.xlane.xlu0 %2080  ;;  %v2157_v15 = vmul.f32 %v2117_v61, %v5239_v38  ;;  %v2156_v58 = vmul.f32 %v2117_v61, %v5251_v59 }
 0x2ad   :  { %4171 = vrcp.f32 %v2081_v13  ;;  %2194 = vadd.xlane.f32.xlu1 %v2139_v48  ;;  %2192 = vadd.xlane.f32.xlu0 %v2138_v7 }
 0x2b1   :  { %2226 = vadd.xlane.f32.xlu1 %v2155_v32  ;;  %2224 = vadd.xlane.f32.xlu0 %v2154_v3 }
 0x2b2   :  { %v2083_v30 = vpop.xlane.xlu1 %2082  ;;  %v4170_v25 = vpop.eup %4169 }
 0x2b3   :  { %4173 = vrcp.f32 %v2083_v30  ;;  %v2119_v0 = vmul.f32 %v4170_v25, %v5938_v49 }
 0x2b5   :  { %2230 = vadd.xlane.f32.xlu1 %v2157_v15  ;;  %2228 = vadd.xlane.f32.xlu0 %v2156_v58  ;;  %v2159_v51 = vmul.f32 %v2119_v0, %v5262_v50  ;;  %v2158_v28 = vmul.f32 %v2119_v0, %v5272_v55 }
 0x2b9   :  { %2234 = vadd.xlane.f32.xlu1 %v2159_v51  ;;  %2232 = vadd.xlane.f32.xlu0 %v2158_v28 }
 0x2ba   :  { %v4172_v2 = vpop.eup %4171 }
 0x2bb   :  { %v2121_v41 = vmul.f32 %v4172_v2, %v5941_v12 }
 0x2bd   :  { %v2161_v19 = vmul.f32 %v2121_v41, %v5283_v44  ;;  %v2160_v14 = vmul.f32 %v2121_v41, %v5295_v47 }
 0x2bf   :  { %2238 = vadd.xlane.f32.xlu1 %v2161_v19  ;;  %2236 = vadd.xlane.f32.xlu0 %v2160_v14 }
 0x2c0   :  { %v4174_v48 = vpop.eup %4173 }
 0x2c1   :  { %v2123_v49 = vmul.f32 %v4174_v48, %v5944_v36 }
 0x2c3   :  { %v2163_v7 = vmul.f32 %v2123_v49, %v5303_v9  ;;  %v2162_v53 = vmul.f32 %v2123_v49, %v5308_v24  ;;  %v6007_v13 = vpop.xlane.xlu1 %2166  ;;  %v6009_v32 = vpop.xlane.xlu0 %2164 }
 0x2c4   :  { %v2245_v12 = vmul.f32 %v6007_v13, %v6007_v13  ;;  %v2244_v3 = vmul.f32 %v6009_v32, %v6009_v32 }
 0x2c5   :  { %2242 = vadd.xlane.f32.xlu1 %v2163_v7  ;;  %2240 = vadd.xlane.f32.xlu0 %v2162_v53 }
 0x2c6   :  { %v2284_v61 = vadd.f32 %v2245_v12, %v2244_v3 }
 0x2c7   :  { %v6015_v30 = vpop.xlane.xlu1 %2170  ;;  %v6017_v36 = vpop.xlane.xlu0 %2168 }
 0x2c8   :  { %v2285_v25 = vrot.slane %v2284_v61, 4  ;;  %v2247_v15 = vmul.f32 %v6015_v30, %v6015_v30  ;;  %v2246_v58 = vmul.f32 %v6017_v36, %v6017_v36 }
 0x2ca   :  { %v2286_v0 = vadd.f32 %v2285_v25, %v2284_v61  ;;  %v2291_v51 = vadd.f32 %v2247_v15, %v2246_v58 }
 0x2cc   :  { %v2287_v28 = vrot.slane %v2286_v0, 2  ;;  %v2292_v2 = vrot.slane %v2291_v51, 4 }
 0x2ce   :  { %v2288_v41 = vadd.f32 %v2287_v28, %v2286_v0  ;;  %v2293_v19 = vadd.f32 %v2292_v2, %v2291_v51  ;;  %v6023_v14 = vpop.xlane.xlu1 %2198  ;;  %v6025_v48 = vpop.xlane.xlu0 %2196 }
 0x2cf   :  { %v2261_v53 = vmul.f32 %v6023_v14, %v6023_v14  ;;  %v2260_v12 = vmul.f32 %v6025_v48, %v6025_v48 }
 0x2d0   :  { %v2289_v49 = vrot.slane %v2288_v41, 1  ;;  %v2294_v7 = vrot.slane %v2293_v19, 2 }
 0x2d1   :  { %v2340_v61 = vadd.f32 %v2261_v53, %v2260_v12 }
 0x2d2   :  { %v2290_v3 = vadd.f32 %v2289_v49, %v2288_v41  ;;  %v2295_v9 = vadd.f32 %v2294_v7, %v2293_v19 }
 0x2d3   :  { %v2341_v58 = vrot.slane %v2340_v61, 4 }
 0x2d4   :  { %4175 = vrsqrt.f32 %v2290_v3  ;;  %v2564_v25 = vadd.f32 1.0, %v2290_v3  ;;  %v2296_v15 = vrot.slane %v2295_v9, 1  ;;  %vm2426_vm8 = vcmp.eq.f32.partialorder %v2290_v3, inf }
 0x2d5   :  { %v2342_v51 = vadd.f32 %v2341_v58, %v2340_v61  ;;  %vm2428_vm9 = vcmp.eq.f32.partialorder %v2290_v3, 0.0 }
 0x2d6   :  { %v2297_v0 = vadd.f32 %v2296_v15, %v2295_v9  ;;  %4177 = vrcp.f32 %v2564_v25  ;;  %v2429_v15 = vand.u32 2147483648, %v2290_v3 }
 0x2d7   :  { %v2343_v2 = vrot.slane %v2342_v51, 2 }
 0x2d8   :  { %4179 = vrsqrt.f32 %v2297_v0  ;;  %v2565_v28 = vadd.f32 1.0, %v2297_v0  ;;  %v6031_v24 = vpop.xlane.xlu1 %2202  ;;  %v6033_v44 = vpop.xlane.xlu0 %2200  ;;  %vm2433_vm10 = vcmp.eq.f32.partialorder %v2297_v0, inf  ;;  %vm2435_vm11 = vcmp.eq.f32.partialorder %v2297_v0, 0.0 }
 0x2d9   :  { %v2263_v47 = vmul.f32 %v6031_v24, %v6031_v24  ;;  %v2262_v41 = vmul.f32 %v6033_v44, %v6033_v44  ;;  %v2344_v19 = vadd.f32 %v2343_v2, %v2342_v51 }
 0x2da   :  { %4181 = vrcp.f32 %v2565_v28 }
 0x2db   :  { %v2347_v49 = vadd.f32 %v2263_v47, %v2262_v41  ;;  %v2345_v7 = vrot.slane %v2344_v19, 1 }
 0x2dd   :  { %v2348_v9 = vrot.slane %v2347_v49, 4  ;;  %v6039_v53 = vadd.f32 %v2345_v7, %v2344_v19 }
 0x2df   :  { %v2349_v61 = vadd.f32 %v2348_v9, %v2347_v49  ;;  %4183 = vrsqrt.f32 %v6039_v53  ;;  %v2572_v58 = vadd.f32 1.0, %v6039_v53  ;;  %vm2482_vm12 = vcmp.eq.f32.partialorder %v6039_v53, inf }
 0x2e0   :  { %vm2484_vm13 = vcmp.eq.f32.partialorder %v6039_v53, 0.0 }
 0x2e1   :  { %v4176_v12 = vpop.eup %4175  ;;  %v2350_v50 = vrot.slane %v2349_v61, 2  ;;  %4185 = vrcp.f32 %v2572_v58 }
 0x2e2   :  { %v2425_v25 = vmul.f32 %v4176_v12, %v2290_v3 }
 0x2e3   :  { %v4178_v38 = vpop.eup %4177  ;;  %v2351_v28 = vadd.f32 %v2350_v50, %v2349_v61 }
 0x2e4   :  { %v2427_v55 = vsel %vm2426_vm8, %v2290_v3, %v2425_v25  ;;  %v6043_v47 = vpop.xlane.xlu1 %2174  ;;  %v6045_v2 = vpop.xlane.xlu0 %2172 }
 0x2e5   :  { %v2430_v51 = vsel %vm2428_vm9, %v2429_v15, %v2427_v55  ;;  %v4180_v41 = vpop.eup %4179  ;;  %v2249_v49 = vmul.f32 %v6043_v47, %v6043_v47  ;;  %v2248_v7 = vmul.f32 %v6045_v2, %v6045_v2  ;;  %v2352_v12 = vrot.slane %v2351_v28, 1 }
 0x2e6   :  { %v2585_v19 = vmul.f32 %v4178_v38, %v2430_v51  ;;  %v2432_v9 = vmul.f32 %v4180_v41, %v2297_v0  ;;  %v2436_v55 = vand.u32 2147483648, %v2297_v0 }
 0x2e7   :  { %v2298_v61 = vadd.f32 %v2249_v49, %v2248_v7  ;;  %v6053_v15 = vadd.f32 %v2352_v12, %v2351_v28  ;;  %v4182_v38 = vpop.eup %4181 }
 0x2e8   :  { %v2624_v3 = vmul.f32 %v2585_v19, %v6009_v32  ;;  %v2625_v50 = vmul.f32 %v2585_v19, %v6007_v13  ;;  %v2434_v25 = vsel %vm2433_vm10, %v2297_v0, %v2432_v9 }
 0x2e9   :  { %v2437_v59 = vsel %vm2435_vm11, %v2436_v55, %v2434_v25  ;;  %v2299_v6 = vrot.slane %v2298_v61, 4  ;;  %4187 = vrsqrt.f32 %v6053_v15  ;;  %v2573_v32 = vadd.f32 1.0, %v6053_v15 }
 0x2ea   :  { %v2664_v58 = vmul.f32 %v2624_v3, %v7371_v52  ;;  %v2665_v51 = vmul.f32 %v2625_v50, %v7370_v62  ;;  %v2587_v41 = vmul.f32 %v4182_v38, %v2437_v59  ;;  %vm2489_vm14 = vcmp.eq.f32.partialorder %v6053_v15, inf }
 0x2eb   :  { %v2300_v13 = vadd.f32 %v2299_v6, %v2298_v61  ;;  %4189 = vrcp.f32 %v2573_v32  ;;  %vm2491_vm15 = vcmp.eq.f32.partialorder %v6053_v15, 0.0 }
 0x2ec   :  { %v2704_v39 = vadd.f32 %v2665_v51, %v2664_v58  ;;  %v2626_v19 = vmul.f32 %v2587_v41, %v6017_v36  ;;  %v2627_v0 = vmul.f32 %v2587_v41, %v6015_v30  ;;  %v4184_v7 = vpop.eup %4183  ;;  %v2485_v30 = vand.u32 2147483648, %v6039_v53 }
 0x2ed   :  { %v2301_v49 = vrot.slane %v2300_v13, 2  ;;  %v2481_v59 = vmul.f32 %v4184_v7, %v6039_v53 }
 0x2ee   :  { %v2705_v28 = vrot.slane %v2704_v39, 4  ;;  %v2666_v9 = vmul.f32 %v2626_v19, %v7373_v29  ;;  %v2667_v12 = vmul.f32 %v2627_v0, %v7372_v33  ;;  %v6065_v55 = vpop.xlane.xlu1 %2206  ;;  %v6067_v6 = vpop.xlane.xlu0 %2204 }
 0x2ef   :  { %v2302_v50 = vadd.f32 %v2301_v49, %v2300_v13  ;;  %v2265_v61 = vmul.f32 %v6065_v55, %v6065_v55  ;;  %v2264_v25 = vmul.f32 %v6067_v6, %v6067_v6  ;;  %v4186_v51 = vpop.eup %4185 }
 0x2f0   :  { %v2706_v3 = vadd.f32 %v2705_v28, %v2704_v39  ;;  %v2711_v36 = vadd.f32 %v2667_v12, %v2666_v9  ;;  %v2483_v39 = vsel %vm2482_vm12, %v6039_v53, %v2481_v59 }
 0x2f1   :  { %v2303_v38 = vrot.slane %v2302_v50, 1  ;;  %v2486_v32 = vsel %vm2484_vm13, %v2485_v30, %v2483_v39  ;;  %v2354_v13 = vadd.f32 %v2265_v61, %v2264_v25 }
 0x2f2   :  { %v2707_v58 = vrot.slane %v2706_v3, 2  ;;  %v2712_v41 = vrot.slane %v2711_v36, 4  ;;  %v2601_v19 = vmul.f32 %v4186_v51, %v2486_v32 }
 0x2f3   :  { %v6076_v0 = vadd.f32 %v2303_v38, %v2302_v50  ;;  %v2355_v7 = vrot.slane %v2354_v13, 4 }
 0x2f4   :  { %v2708_v28 = vadd.f32 %v2707_v58, %v2706_v3  ;;  %v2713_v49 = vadd.f32 %v2712_v41, %v2711_v36  ;;  %v2640_v9 = vmul.f32 %v2601_v19, %v6025_v48  ;;  %v2641_v12 = vmul.f32 %v2601_v19, %v6023_v14 }
 0x2f5   :  { %4191 = vrsqrt.f32 %v6076_v0  ;;  %v2566_v53 = vadd.f32 1.0, %v6076_v0  ;;  %v2356_v59 = vadd.f32 %v2355_v7, %v2354_v13  ;;  %v2492_v48 = vand.u32 2147483648, %v6053_v15 }
 0x2f6   :  { %v4188_v29 = vpop.eup %4187  ;;  %v2680_v33 = vmul.f32 %v2640_v9, %v7375_v34  ;;  %v2681_v30 = vmul.f32 %v2641_v12, %v7374_v10  ;;  %v2709_v61 = vrot.slane %v2708_v28, 1  ;;  %v2714_v50 = vrot.slane %v2713_v49, 2 }
 0x2f7   :  { %v2488_v3 = vmul.f32 %v4188_v29, %v6053_v15  ;;  %v2357_v36 = vrot.slane %v2356_v59, 2  ;;  %4193 = vrcp.f32 %v2566_v53  ;;  %vm2440_vm0 = vcmp.eq.f32.partialorder %v6076_v0, inf }
 0x2f8   :  { %v2760_v14 = vadd.f32 %v2681_v30, %v2680_v33  ;;  %v2710_v25 = vadd.f32 %v2709_v61, %v2708_v28  ;;  %v2715_v39 = vadd.f32 %v2714_v50, %v2713_v49  ;;  %v4190_v51 = vpop.eup %4189  ;;  %vm2442_vm1 = vcmp.eq.f32.partialorder %v6076_v0, 0.0 }
 0x2f9   :  { %v2490_v38 = vsel %vm2489_vm14, %v6053_v15, %v2488_v3  ;;  %v2358_v58 = vadd.f32 %v2357_v36, %v2356_v59 }
 0x2fa   :  { %v2761_v41 = vrot.slane %v2760_v14, 4  ;;  %v2493_v32 = vsel %vm2491_vm15, %v2492_v48, %v2490_v38  ;;  %v6094_v19 = vadd.f32 %v2710_v25, %v5433_v37  ;;  %v2716_v7 = vrot.slane %v2715_v39, 1 }
 0x2fb   :  { %v2603_v33 = vmul.f32 %v4190_v51, %v2493_v32  ;;  %v2359_v9 = vrot.slane %v2358_v58, 1 }
 0x2fc   :  { %v2762_v49 = vadd.f32 %v2761_v41, %v2760_v14  ;;  %2864 = vmax.xlane.f32.xlu0 %v6094_v19  ;;  %v2717_v12 = vadd.f32 %v2716_v7, %v2715_v39 }
 0x2fd   :  { %v2642_v53 = vmul.f32 %v2603_v33, %v6033_v44  ;;  %v2643_v59 = vmul.f32 %v2603_v33, %v6031_v24  ;;  %v2360_v30 = vadd.f32 %v2359_v9, %v2358_v58  ;;  %v2443_v58 = vand.u32 2147483648, %v6076_v0 }
 0x2fe   :  { %v6089_v13 = vpop.xlane.xlu1 %2178  ;;  %v6091_v29 = vpop.xlane.xlu0 %2176  ;;  %v6104_v61 = vadd.f32 %v2717_v12, %v5421_v26  ;;  %v2763_v50 = vrot.slane %v2762_v49, 2 }
 0x2ff   :  { %v2251_v28 = vmul.f32 %v6089_v13, %v6089_v13  ;;  %v2250_v15 = vmul.f32 %v6091_v29, %v6091_v29  ;;  %v2682_v3 = vmul.f32 %v2642_v53, %v7377_v63  ;;  %v2683_v48 = vmul.f32 %v2643_v59, %v7376_v31 }
 0x300   :  { %4195 = vrsqrt.f32 %v2360_v30  ;;  %v2574_v36 = vadd.f32 1.0, %v2360_v30  ;;  %2866 = vmax.xlane.f32.xlu1 %v6104_v61  ;;  %v2764_v44 = vadd.f32 %v2763_v50, %v2762_v49  ;;  %vm2496_vm2 = vcmp.eq.f32.partialorder %v2360_v30, inf }
 0x301   :  { %v2305_v37 = vadd.f32 %v2251_v28, %v2250_v15  ;;  %v2767_v39 = vadd.f32 %v2683_v48, %v2682_v3  ;;  %vm2498_vm3 = vcmp.eq.f32.partialorder %v2360_v30, 0.0 }
 0x302   :  { %v4192_v25 = vpop.eup %4191  ;;  %4197 = vrcp.f32 %v2574_v36  ;;  %v2765_v51 = vrot.slane %v2764_v44, 1 }
 0x303   :  { %v2306_v14 = vrot.slane %v2305_v37, 4  ;;  %v2439_v24 = vmul.f32 %v4192_v25, %v6076_v0  ;;  %v2768_v26 = vrot.slane %v2767_v39, 4 }
 0x304   :  { %v4194_v7 = vpop.eup %4193  ;;  %v2766_v28 = vadd.f32 %v2765_v51, %v2764_v44  ;;  %v2499_v51 = vand.u32 2147483648, %v2360_v30 }
 0x305   :  { %v2307_v38 = vadd.f32 %v2306_v14, %v2305_v37  ;;  %v2441_v41 = vsel %vm2440_vm0, %v6076_v0, %v2439_v24  ;;  %v2769_v33 = vadd.f32 %v2768_v26, %v2767_v39 }
 0x306   :  { %v2444_v9 = vsel %vm2442_vm1, %v2443_v58, %v2441_v41  ;;  %v6115_v12 = vadd.f32 %v2766_v28, %v5477_v11 }
 0x307   :  { %v2308_v32 = vrot.slane %v2307_v38, 2  ;;  %v2589_v15 = vmul.f32 %v4194_v7, %v2444_v9  ;;  %v2770_v53 = vrot.slane %v2769_v33, 2 }
 0x308   :  { %2880 = vmax.xlane.f32.xlu0 %v6115_v12 }
 0x309   :  { %v2309_v49 = vadd.f32 %v2308_v32, %v2307_v38  ;;  %v2628_v59 = vmul.f32 %v2589_v15, %v6045_v2  ;;  %v2629_v37 = vmul.f32 %v2589_v15, %v6043_v47  ;;  %v2771_v0 = vadd.f32 %v2770_v53, %v2769_v33 }
 0x30b   :  { %v2310_v50 = vrot.slane %v2309_v49, 1  ;;  %v2668_v36 = vmul.f32 %v2628_v59, %v7379_v57  ;;  %v2669_v14 = vmul.f32 %v2629_v37, %v7378_v4  ;;  %v2772_v47 = vrot.slane %v2771_v0, 1 }
 0x30d   :  { %v2311_v25 = vadd.f32 %v2310_v50, %v2309_v49  ;;  %v4196_v39 = vpop.eup %4195  ;;  %v2718_v44 = vadd.f32 %v2669_v14, %v2668_v36  ;;  %v2773_v41 = vadd.f32 %v2772_v47, %v2771_v0 }
 0x30e   :  { %v2495_v24 = vmul.f32 %v4196_v39, %v2360_v30 }
 0x30f   :  { %v6119_v3 = vpop.xlane.xlu1 %2210  ;;  %v6121_v48 = vpop.xlane.xlu0 %2208  ;;  %4199 = vrsqrt.f32 %v2311_v25  ;;  %v2567_v38 = vadd.f32 1.0, %v2311_v25  ;;  %v2719_v58 = vrot.slane %v2718_v44, 4  ;;  %v6131_v15 = vadd.f32 %v2773_v41, %v5513_v5 }
 0x310   :  { %v2267_v11 = vmul.f32 %v6119_v3, %v6119_v3  ;;  %v2266_v2 = vmul.f32 %v6121_v48, %v6121_v48  ;;  %v2497_v32 = vsel %vm2496_vm2, %v2360_v30, %v2495_v24  ;;  %v4198_v33 = vpop.eup %4197  ;;  %vm2447_vm4 = vcmp.eq.f32.partialorder %v2311_v25, inf }
 0x311   :  { %v2720_v9 = vadd.f32 %v2719_v58, %v2718_v44  ;;  %v2500_v28 = vsel %vm2498_vm3, %v2499_v51, %v2497_v32  ;;  %4201 = vrcp.f32 %v2567_v38  ;;  %2882 = vmax.xlane.f32.xlu1 %v6131_v15  ;;  %vm2449_vm5 = vcmp.eq.f32.partialorder %v2311_v25, 0.0 }
 0x312   :  { %v2361_v26 = vadd.f32 %v2267_v11, %v2266_v2  ;;  %v2605_v49 = vmul.f32 %v4198_v33, %v2500_v28 }
 0x313   :  { %v2721_v59 = vrot.slane %v2720_v9, 2 }
 0x314   :  { %v2362_v7 = vrot.slane %v2361_v26, 4  ;;  %v2644_v37 = vmul.f32 %v2605_v49, %v6067_v6  ;;  %v2645_v50 = vmul.f32 %v2605_v49, %v6065_v55 }
 0x315   :  { %v2722_v14 = vadd.f32 %v2721_v59, %v2720_v9  ;;  %v2450_v9 = vand.u32 2147483648, %v2311_v25 }
 0x316   :  { %v2363_v53 = vadd.f32 %v2362_v7, %v2361_v26  ;;  %v2684_v11 = vmul.f32 %v2644_v37, %v7381_v45  ;;  %v2685_v5 = vmul.f32 %v2645_v50, %v7380_v16 }
 0x317   :  { %v2723_v6 = vrot.slane %v2722_v14, 1 }
 0x318   :  { %v2364_v0 = vrot.slane %v2363_v53, 2  ;;  %v2774_v44 = vadd.f32 %v2685_v5, %v2684_v11 }
 0x319   :  { %v2724_v38 = vadd.f32 %v2723_v6, %v2722_v14 }
 0x31a   :  { %v6136_v36 = vpop.xlane.xlu1 %2182  ;;  %v6138_v30 = vpop.xlane.xlu0 %2180  ;;  %v2365_v2 = vadd.f32 %v2364_v0, %v2363_v53  ;;  %v2775_v58 = vrot.slane %v2774_v44, 4 }
 0x31b   :  { %v2253_v47 = vmul.f32 %v6136_v36, %v6136_v36  ;;  %v2252_v39 = vmul.f32 %v6138_v30, %v6138_v30  ;;  %v6149_v7 = vadd.f32 %v2724_v38, %v5555_v54 }
 0x31c   :  { %v2366_v55 = vrot.slane %v2365_v2, 1  ;;  %v4200_v26 = vpop.eup %4199  ;;  %v2776_v33 = vadd.f32 %v2775_v58, %v2774_v44 }
 0x31d   :  { %v2312_v24 = vadd.f32 %v2253_v47, %v2252_v39  ;;  %v2446_v41 = vmul.f32 %v4200_v26, %v2311_v25  ;;  %2868 = vmax.xlane.f32.xlu0 %v6149_v7 }
 0x31e   :  { %v6146_v51 = vadd.f32 %v2366_v55, %v2365_v2  ;;  %v4202_v50 = vpop.eup %4201  ;;  %v2777_v11 = vrot.slane %v2776_v33, 2 }
 0x31f   :  { %v2313_v32 = vrot.slane %v2312_v24, 4  ;;  %v2448_v53 = vsel %vm2447_vm4, %v2311_v25, %v2446_v41 }
 0x320   :  { %4203 = vrsqrt.f32 %v6146_v51  ;;  %v2575_v59 = vadd.f32 1.0, %v6146_v51  ;;  %v2451_v0 = vsel %vm2449_vm5, %v2450_v9, %v2448_v53  ;;  %v2778_v6 = vadd.f32 %v2777_v11, %v2776_v33 }
 0x321   :  { %v6152_v28 = vpop.xlane.xlu1 %2214  ;;  %v6154_v49 = vpop.xlane.xlu0 %2212  ;;  %v2314_v37 = vadd.f32 %v2313_v32, %v2312_v24  ;;  %v2591_v5 = vmul.f32 %v4202_v50, %v2451_v0  ;;  %vm2503_vm6 = vcmp.eq.f32.partialorder %v6146_v51, inf  ;;  %vm2505_vm7 = vcmp.eq.f32.partialorder %v6146_v51, 0.0 }
 0x322   :  { %v2269_v54 = vmul.f32 %v6152_v28, %v6152_v28  ;;  %v2268_v14 = vmul.f32 %v6154_v49, %v6154_v49  ;;  %4205 = vrcp.f32 %v2575_v59  ;;  %v2779_v41 = vrot.slane %v2778_v6, 1 }
 0x323   :  { %v2315_v2 = vrot.slane %v2314_v37, 2  ;;  %v2630_v44 = vmul.f32 %v2591_v5, %v6091_v29  ;;  %v2631_v55 = vmul.f32 %v2591_v5, %v6089_v13 }
 0x324   :  { %v2368_v47 = vadd.f32 %v2269_v54, %v2268_v14  ;;  %v2780_v13 = vadd.f32 %v2779_v41, %v2778_v6  ;;  %v2506_v41 = vand.u32 2147483648, %v6146_v51 }
 0x325   :  { %v6162_v39 = vpop.xlane.xlu1 %2186  ;;  %v6164_v25 = vpop.xlane.xlu0 %2184  ;;  %v2316_v24 = vadd.f32 %v2315_v2, %v2314_v37  ;;  %v2670_v32 = vmul.f32 %v2630_v44, %v7383_v18  ;;  %v2671_v9 = vmul.f32 %v2631_v55, %v7382_v8 }
 0x326   :  { %v2255_v38 = vmul.f32 %v6162_v39, %v6162_v39  ;;  %v2369_v26 = vrot.slane %v2368_v47, 4  ;;  %v2254_v58 = vmul.f32 %v6164_v25, %v6164_v25  ;;  %v6185_v2 = vadd.f32 %v2780_v13, %v7368_v20 }
 0x327   :  { %v2317_v53 = vrot.slane %v2316_v24, 1  ;;  %v2725_v37 = vadd.f32 %v2671_v9, %v2670_v32 }
 0x328   :  { %v2370_v59 = vadd.f32 %v2369_v26, %v2368_v47  ;;  %v2319_v33 = vadd.f32 %v2255_v38, %v2254_v58  ;;  %7396 = vst [vmem:[#allocation58_spill] sm:$0xff] %v6185_v2  ;;  %2884 = vmax.xlane.f32.xlu1 %v6185_v2 }
 0x329   :  { %v6174_v50 = vpop.xlane.xlu1 %2218  ;;  %v6176_v29 = vpop.xlane.xlu0 %2216  ;;  %v6178_v0 = vadd.f32 %v2317_v53, %v2316_v24  ;;  %v2726_v47 = vrot.slane %v2725_v37, 4 }
 0x32a   :  { %v2271_v54 = vmul.f32 %v6174_v50, %v6174_v50  ;;  %v2270_v14 = vmul.f32 %v6176_v29, %v6176_v29  ;;  %v2371_v11 = vrot.slane %v2370_v59, 2  ;;  %v2320_v5 = vrot.slane %v2319_v33, 4 }
 0x32b   :  { %4207 = vrsqrt.f32 %v6178_v0  ;;  %v2568_v44 = vadd.f32 1.0, %v6178_v0  ;;  %v2727_v13 = vadd.f32 %v2726_v47, %v2725_v37  ;;  %vm2454_vm8 = vcmp.eq.f32.partialorder %v6178_v0, inf }
 0x32c   :  { %v2372_v6 = vadd.f32 %v2371_v11, %v2370_v59  ;;  %v2321_v55 = vadd.f32 %v2320_v5, %v2319_v33  ;;  %v2375_v38 = vadd.f32 %v2271_v54, %v2270_v14  ;;  %vm2456_vm9 = vcmp.eq.f32.partialorder %v6178_v0, 0.0 }
 0x32d   :  { %v4204_v24 = vpop.eup %4203  ;;  %4209 = vrcp.f32 %v2568_v44 }
 0x32e   :  { %v6192_v26 = vpop.xlane.xlu1 %2190  ;;  %v6194_v58 = vpop.xlane.xlu0 %2188  ;;  %v2502_v20 = vmul.f32 %v4204_v24, %v6146_v51  ;;  %v2373_v32 = vrot.slane %v2372_v6, 1  ;;  %v2322_v9 = vrot.slane %v2321_v55, 2  ;;  %v2376_v53 = vrot.slane %v2375_v38, 4 }
 0x32f   :  { %v2257_v59 = vmul.f32 %v6192_v26, %v6192_v26  ;;  %v2256_v33 = vmul.f32 %v6194_v58, %v6194_v58  ;;  %v4206_v5 = vpop.eup %4205 }
 0x330   :  { %v2504_v54 = vsel %vm2503_vm6, %v6146_v51, %v2502_v20  ;;  %v6203_v14 = vadd.f32 %v2373_v32, %v2372_v6  ;;  %v2323_v11 = vadd.f32 %v2322_v9, %v2321_v55  ;;  %v2377_v16 = vadd.f32 %v2376_v53, %v2375_v38 }
 0x331   :  { %v2507_v24 = vsel %vm2505_vm7, %v2506_v41, %v2504_v54  ;;  %v2326_v31 = vadd.f32 %v2257_v59, %v2256_v33  ;;  %v2728_v32 = vrot.slane %v2727_v13, 2 }
 0x332   :  { %v6207_v44 = vpop.xlane.xlu1 %2222  ;;  %v6209_v10 = vpop.xlane.xlu0 %2220  ;;  %v2607_v8 = vmul.f32 %v4206_v5, %v2507_v24  ;;  %4211 = vrsqrt.f32 %v6203_v14  ;;  %v2576_v37 = vadd.f32 1.0, %v6203_v14  ;;  %v2324_v47 = vrot.slane %v2323_v11, 1 }
 0x333   :  { %v2378_v20 = vrot.slane %v2377_v16, 2  ;;  %v2327_v6 = vrot.slane %v2326_v31, 4  ;;  %v2273_v51 = vmul.f32 %v6207_v44, %v6207_v44  ;;  %v2272_v38 = vmul.f32 %v6209_v10, %v6209_v10 }
 0x334   :  { %v6213_v55 = vadd.f32 %v2324_v47, %v2323_v11  ;;  %v2646_v59 = vmul.f32 %v2607_v8, %v6121_v48  ;;  %v2647_v33 = vmul.f32 %v2607_v8, %v6119_v3  ;;  %4213 = vrcp.f32 %v2576_v37 }
 0x335   :  { %v2379_v9 = vadd.f32 %v2378_v20, %v2377_v16  ;;  %v2328_v54 = vadd.f32 %v2327_v6, %v2326_v31  ;;  %v2457_v5 = vand.u32 2147483648, %v6178_v0  ;;  %v2382_v3 = vadd.f32 %v2273_v51, %v2272_v38 }
 0x336   :  { %v6219_v41 = vpop.xlane.xlu1 %2194  ;;  %v6221_v53 = vpop.xlane.xlu0 %2192  ;;  %4215 = vrsqrt.f32 %v6213_v55  ;;  %v2569_v24 = vadd.f32 1.0, %v6213_v55  ;;  %v6239_v6 = vadd.f32 %v2728_v32, %v2727_v13  ;;  %v2686_v18 = vmul.f32 %v2646_v59, %v7385_v42 }
 0x337   :  { %v2259_v16 = vmul.f32 %v6219_v41, %v6219_v41  ;;  %v2380_v47 = vrot.slane %v2379_v9, 1  ;;  %v2329_v48 = vrot.slane %v2328_v54, 2  ;;  %v2258_v31 = vmul.f32 %v6221_v53, %v6221_v53 }
 0x338   :  { %v4208_v11 = vpop.eup %4207  ;;  %v2687_v45 = vmul.f32 %v2647_v33, %v7384_v46  ;;  %4217 = vrcp.f32 %v2569_v24  ;;  %v2383_v38 = vrot.slane %v2382_v3, 4  ;;  %vm2510_vm10 = vcmp.eq.f32.partialorder %v6203_v14, inf }
 0x339   :  { %v2453_v8 = vmul.f32 %v4208_v11, %v6178_v0  ;;  %v6243_v63 = vadd.f32 %v2380_v47, %v2379_v9  ;;  %v2330_v34 = vadd.f32 %v2329_v48, %v2328_v54  ;;  %v2333_v11 = vadd.f32 %v2259_v16, %v2258_v31 }
 0x33a   :  { %v6235_v37 = vpop.xlane.xlu1 %2226  ;;  %v6237_v20 = vpop.xlane.xlu0 %2224  ;;  %vm2512_vm11 = vcmp.eq.f32.partialorder %v6203_v14, 0.0  ;;  %v2513_v32 = vand.u32 2147483648, %v6203_v14  ;;  %v2384_v54 = vadd.f32 %v2383_v38, %v2382_v3  ;;  %v6263_v48 = vadd.f32 %v2687_v45, %v2686_v18 }
 0x33b   :  { %v2455_v51 = vsel %vm2454_vm8, %v6178_v0, %v2453_v8  ;;  %v4210_v57 = vpop.eup %4209  ;;  %4219 = vrsqrt.f32 %v6243_v63  ;;  %v2577_v9 = vadd.f32 1.0, %v6243_v63  ;;  %v2275_v59 = vmul.f32 %v6235_v37, %v6235_v37 }
 0x33c   :  { %v2458_v4 = vsel %vm2456_vm9, %v2457_v5, %v2455_v51  ;;  %v2331_v33 = vrot.slane %v2330_v34, 1  ;;  %v2334_v16 = vrot.slane %v2333_v11, 4  ;;  %v2274_v0 = vmul.f32 %v6237_v20, %v6237_v20 }
 0x33d   :  { %v2593_v13 = vmul.f32 %v4210_v57, %v2458_v4  ;;  %vm2461_vm12 = vcmp.eq.f32.partialorder %v6213_v55, inf  ;;  %vm2463_vm13 = vcmp.eq.f32.partialorder %v6213_v55, 0.0  ;;  %4221 = vrcp.f32 %v2577_v9 }
 0x33e   :  { %v6259_v5 = vpop.xlane.xlu1 %2230  ;;  %v6261_v24 = vpop.xlane.xlu0 %2228  ;;  %v6268_v57 = vadd.f32 %v2331_v33, %v2330_v34  ;;  %v2385_v8 = vrot.slane %v2384_v54, 2  ;;  %v2335_v3 = vadd.f32 %v2334_v16, %v2333_v11  ;;  %v2389_v51 = vadd.f32 %v2275_v59, %v2274_v0 }
 0x33f   :  { %v4212_v47 = vpop.eup %4211  ;;  %v2632_v31 = vmul.f32 %v2593_v13, %v6138_v30  ;;  %v2277_v38 = vmul.f32 %v6259_v5, %v6259_v5  ;;  %v2276_v45 = vmul.f32 %v6261_v24, %v6261_v24  ;;  %v2464_v9 = vand.u32 2147483648, %v6213_v55 }
 0x340   :  { %v2509_v4 = vmul.f32 %v4212_v47, %v6203_v14  ;;  %4223 = vrsqrt.f32 %v6268_v57  ;;  %v2782_v30 = vrot.slane %v6263_v48, 4  ;;  %v2633_v59 = vmul.f32 %v2593_v13, %v6136_v36 }
 0x341   :  { %v4214_v11 = vpop.eup %4213  ;;  %v2570_v16 = vadd.f32 1.0, %v6268_v57  ;;  %v2386_v42 = vadd.f32 %v2385_v8, %v2384_v54  ;;  %v2390_v46 = vrot.slane %v2389_v51, 4  ;;  %v2672_v52 = vmul.f32 %v2632_v31, %v7387_v40 }
 0x342   :  { %v2511_v18 = vsel %vm2510_vm10, %v6203_v14, %v2509_v4  ;;  %v2336_v4 = vrot.slane %v2335_v3, 2  ;;  %v2396_v34 = vadd.f32 %v2277_v38, %v2276_v45  ;;  %vm2517_vm14 = vcmp.eq.f32.partialorder %v6243_v63, inf }
 0x343   :  { %v2514_v33 = vsel %vm2512_vm11, %v2513_v32, %v2511_v18  ;;  %v4216_v0 = vpop.eup %4215  ;;  %4225 = vrcp.f32 %v2570_v16  ;;  %v2387_v13 = vrot.slane %v2386_v42, 1  ;;  %v7397_v32 = vld [vmem:[#allocation41_spill] sm:$0xff]  ;;  %v2391_v8 = vadd.f32 %v2390_v46, %v2389_v51 }
 0x344   :  { %v2609_v47 = vmul.f32 %v4214_v11, %v2514_v33  ;;  %v2460_v62 = vmul.f32 %v4216_v0, %v6213_v55  ;;  %v2337_v14 = vadd.f32 %v2336_v4, %v2335_v3  ;;  %v2673_v18 = vmul.f32 %v2633_v59, %v7397_v32  ;;  %v7398_v0 = vld [vmem:[#allocation43_spill] sm:$0xff] }
 0x345   :  { %v2397_v11 = vrot.slane %v2396_v34, 4  ;;  %v4218_v33 = vpop.eup %4217  ;;  %v6298_v38 = vadd.f32 %v2387_v13, %v2386_v42  ;;  %v2392_v59 = vrot.slane %v2391_v8, 2  ;;  %vm2519_vm15 = vcmp.eq.f32.partialorder %v6243_v63, 0.0 }
 0x346   :  { %v2648_v2 = vmul.f32 %v2609_v47, %v6154_v49  ;;  %v2649_v36 = vmul.f32 %v2609_v47, %v6152_v28  ;;  %v2462_v54 = vsel %vm2461_vm12, %v6213_v55, %v2460_v62  ;;  %v2338_v45 = vrot.slane %v2337_v14, 1  ;;  %v6301_v47 = vpop.xlane.xlu1 %2234 }
 0x347   :  { %v2465_v49 = vsel %vm2463_vm13, %v2464_v9, %v2462_v54  ;;  %v2520_v62 = vand.u32 2147483648, %v6243_v63  ;;  %4227 = vrsqrt.f32 %v6298_v38  ;;  %v2398_v51 = vadd.f32 %v2397_v11, %v2396_v34  ;;  %v6309_v9 = vpop.xlane.xlu0 %2232 }
 0x348   :  { %v2688_v31 = vmul.f32 %v2648_v2, %v7389_v43  ;;  %v2689_v16 = vmul.f32 %v2649_v36, %v7398_v0  ;;  %v4220_v28 = vpop.eup %4219  ;;  %v2595_v3 = vmul.f32 %v4218_v33, %v2465_v49  ;;  %v2732_v2 = vadd.f32 %v2673_v18, %v2672_v52 }
 0x349   :  { %v2516_v46 = vmul.f32 %v4220_v28, %v6243_v63  ;;  %v2578_v54 = vadd.f32 1.0, %v6298_v38  ;;  %v6313_v33 = vadd.f32 %v2338_v45, %v2337_v14  ;;  %v2393_v18 = vadd.f32 %v2392_v59, %v2391_v8 }
 0x34a   :  { %v2634_v42 = vmul.f32 %v2595_v3, %v6164_v25  ;;  %v2635_v55 = vmul.f32 %v2595_v3, %v6162_v39  ;;  %v4222_v4 = vpop.eup %4221  ;;  %v2788_v36 = vadd.f32 %v2689_v16, %v2688_v31  ;;  %v6318_v25 = vadd.f32 %v2782_v30, %v6263_v48  ;;  %v6324_v14 = vpop.xlane.xlu1 %2238 }
 0x34b   :  { %v2518_v13 = vsel %vm2517_vm14, %v6243_v63, %v2516_v46  ;;  %vm2468_vm0 = vcmp.eq.f32.partialorder %v6268_v57, inf  ;;  %4229 = vrcp.f32 %v2578_v54  ;;  %v2733_v11 = vrot.slane %v2732_v2, 4  ;;  %v6330_v46 = vpop.xlane.xlu0 %2236 }
 0x34c   :  { %v2674_v49 = vmul.f32 %v2634_v42, %v7391_v35  ;;  %v2675_v28 = vmul.f32 %v2635_v55, %v7390_v17  ;;  %v2521_v52 = vsel %vm2519_vm15, %v2520_v62, %v2518_v13  ;;  %vm2470_vm1 = vcmp.eq.f32.partialorder %v6268_v57, 0.0 }
 0x34d   :  { %v2611_v39 = vmul.f32 %v4222_v4, %v2521_v52  ;;  %v4224_v34 = vpop.eup %4223  ;;  %v2471_v63 = vand.u32 2147483648, %v6268_v57  ;;  %4231 = vrsqrt.f32 %v6313_v33  ;;  %v2571_v30 = vadd.f32 1.0, %v6313_v33 }
 0x34e   :  { %v2467_v48 = vmul.f32 %v4224_v34, %v6268_v57  ;;  %v2789_v16 = vrot.slane %v2788_v36, 4  ;;  %v2739_v3 = vadd.f32 %v2675_v28, %v2674_v49  ;;  %v2394_v45 = vrot.slane %v2393_v18, 1 }
 0x34f   :  { %v2650_v31 = vmul.f32 %v2611_v39, %v6176_v29  ;;  %v2651_v8 = vmul.f32 %v2611_v39, %v6174_v50  ;;  %v2399_v59 = vrot.slane %v2398_v51, 2  ;;  %v2279_v50 = vmul.f32 %v6301_v47, %v6301_v47 }
 0x350   :  { %v4226_v62 = vpop.eup %4225  ;;  %v2469_v29 = vsel %vm2468_vm0, %v6268_v57, %v2467_v48  ;;  %4233 = vrcp.f32 %v2571_v30  ;;  %v6341_v13 = vadd.f32 %v2394_v45, %v2393_v18  ;;  %v6343_v49 = vadd.f32 %v2733_v11, %v2732_v2  ;;  %v6353_v18 = vpop.xlane.xlu1 %2242 }
 0x351   :  { %v2690_v42 = vmul.f32 %v2650_v31, %v7392_v27  ;;  %v2691_v55 = vmul.f32 %v2651_v8, %v7350_v23  ;;  %v2472_v4 = vsel %vm2470_vm1, %v2471_v63, %v2469_v29  ;;  %v2400_v54 = vadd.f32 %v2399_v59, %v2398_v51  ;;  %v6362_v30 = vpop.xlane.xlu0 %2240 }
 0x352   :  { %v2597_v28 = vmul.f32 %v4226_v62, %v2472_v4  ;;  %vm2524_vm2 = vcmp.eq.f32.partialorder %v6298_v38, inf  ;;  %v2278_v52 = vmul.f32 %v6309_v9, %v6309_v9  ;;  %vm2526_vm3 = vcmp.eq.f32.partialorder %v6298_v38, 0.0 }
 0x353   :  { %v2527_v39 = vand.u32 2147483648, %v6298_v38  ;;  %4235 = vrsqrt.f32 %v6341_v13  ;;  %v2281_v57 = vmul.f32 %v6324_v14, %v6324_v14  ;;  %v6355_v51 = vadd.f32 %v2789_v16, %v2788_v36 }
 0x354   :  { %v2740_v2 = vrot.slane %v2739_v3, 4  ;;  %vm2475_vm4 = vcmp.eq.f32.partialorder %v6313_v33, inf  ;;  %v2579_v34 = vadd.f32 1.0, %v6341_v13  ;;  %v4228_v11 = vpop.eup %4227  ;;  %v2795_v63 = vadd.f32 %v2691_v55, %v2690_v42 }
 0x355   :  { %vm2477_vm5 = vcmp.eq.f32.partialorder %v6313_v33, 0.0  ;;  %v2401_v31 = vrot.slane %v2400_v54, 1  ;;  %v2403_v8 = vadd.f32 %v2279_v50, %v2278_v52  ;;  %v2280_v48 = vmul.f32 %v6330_v46, %v6330_v46 }
 0x356   :  { %v2636_v45 = vmul.f32 %v2597_v28, %v6194_v58  ;;  %v2523_v36 = vmul.f32 %v4228_v11, %v6298_v38  ;;  %v2478_v16 = vand.u32 2147483648, %v6313_v33  ;;  %v2283_v59 = vmul.f32 %v6353_v18, %v6353_v18 }
 0x357   :  { %4237 = vrcp.f32 %v2579_v34  ;;  %v6369_v62 = vadd.f32 %v2401_v31, %v2400_v54  ;;  %v2404_v42 = vrot.slane %v2403_v8, 4  ;;  %v2410_v55 = vadd.f32 %v2281_v57, %v2280_v48 }
 0x358   :  { %v6371_v29 = vadd.f32 %v2740_v2, %v2739_v3  ;;  %v2637_v50 = vmul.f32 %v2597_v28, %v6192_v26  ;;  %v2525_v58 = vsel %vm2524_vm2, %v6298_v38, %v2523_v36  ;;  %v2282_v4 = vmul.f32 %v6362_v30, %v6362_v30  ;;  %v4230_v52 = vpop.eup %4229 }
 0x359   :  { %v2796_v11 = vrot.slane %v2795_v63, 4  ;;  %v2528_v34 = vsel %vm2526_vm3, %v2527_v39, %v2525_v58  ;;  %v2534_v54 = vand.u32 2147483648, %v6341_v13  ;;  %4239 = vrsqrt.f32 %v6369_v62  ;;  %v7400_v58 = vld [vmem:[#allocation49_spill] sm:$0xff] }
 0x35a   :  { %v4232_v3 = vpop.eup %4231  ;;  %v2676_v57 = vmul.f32 %v2636_v45, %v7351_v56  ;;  %v2613_v26 = vmul.f32 %v4230_v52, %v2528_v34  ;;  %vm2531_vm6 = vcmp.eq.f32.partialorder %v6341_v13, inf  ;;  %v2580_v28 = vadd.f32 1.0, %v6369_v62 }
 0x35b   :  { %v7399_v2 = vrot.slane %v6239_v6, 1  ;;  %v2474_v48 = vmul.f32 %v4232_v3, %v6313_v33  ;;  %vm2533_vm7 = vcmp.eq.f32.partialorder %v6341_v13, 0.0  ;;  %v2405_v38 = vadd.f32 %v2404_v42, %v2403_v8  ;;  %v7401_v42 = vld [vmem:[#allocation59_spill] sm:$0xff] }
 0x35c   :  { %v2411_v39 = vrot.slane %v2410_v55, 4  ;;  %v2417_v36 = vadd.f32 %v2283_v59, %v2282_v4  ;;  %v2677_v27 = vmul.f32 %v2637_v50, %v7400_v58  ;;  %v2652_v45 = vmul.f32 %v2613_v26, %v6209_v10 }
 0x35d   :  { %v2731_v31 = vadd.f32 %v7399_v2, %v6239_v6  ;;  %v2653_v52 = vmul.f32 %v2613_v26, %v6207_v44  ;;  %4241 = vrcp.f32 %v2580_v28  ;;  %v2476_v34 = vsel %vm2475_vm4, %v6313_v33, %v2474_v48  ;;  %v4234_v3 = vpop.eup %4233 }
 0x35e   :  { %v2406_v56 = vrot.slane %v2405_v38, 2  ;;  %v2412_v6 = vadd.f32 %v2411_v39, %v2410_v55  ;;  %v2418_v2 = vrot.slane %v2417_v36, 4  ;;  %v2692_v23 = vmul.f32 %v2652_v45, %v7394_v22 }
 0x35f   :  { %v2693_v8 = vmul.f32 %v2653_v52, %v7393_v1  ;;  %v2479_v59 = vsel %vm2477_vm5, %v2478_v16, %v2476_v34  ;;  %v6402_v10 = vadd.f32 %v2731_v31, %v7401_v42  ;;  %v6404_v48 = vadd.f32 %v2796_v11, %v2795_v63 }
 0x360   :  { %v2599_v44 = vmul.f32 %v4234_v3, %v2479_v59  ;;  %v2407_v50 = vadd.f32 %v2406_v56, %v2405_v38  ;;  %v2413_v4 = vrot.slane %v2412_v6, 2  ;;  %v2419_v26 = vadd.f32 %v2418_v2, %v2417_v36  ;;  %v4236_v28 = vpop.eup %4235 }
 0x361   :  { %v2746_v55 = vadd.f32 %v2677_v27, %v2676_v57  ;;  %v2802_v39 = vadd.f32 %v2693_v8, %v2692_v23  ;;  %vm2538_vm8 = vcmp.eq.f32.partialorder %v6369_v62, inf  ;;  %2870 = vmax.xlane.f32.xlu0 %v6402_v10  ;;  %v2530_v16 = vmul.f32 %v4236_v28, %v6341_v13 }
 0x362   :  { %v2638_v45 = vmul.f32 %v2599_v44, %v6221_v53  ;;  %v2639_v33 = vmul.f32 %v2599_v44, %v6219_v41  ;;  %v2408_v31 = vrot.slane %v2407_v50, 1  ;;  %vm2540_vm9 = vcmp.eq.f32.partialorder %v6369_v62, 0.0 }
 0x363   :  { %v2414_v56 = vadd.f32 %v2413_v4, %v2412_v6  ;;  %v2420_v38 = vrot.slane %v2419_v26, 2  ;;  %v2784_v63 = vrot.slane %v6318_v25, 2  ;;  %v2532_v11 = vsel %vm2531_vm6, %v6341_v13, %v2530_v16 }
 0x364   :  { %v2678_v27 = vmul.f32 %v2638_v45, %v7395_v60  ;;  %v2679_v23 = vmul.f32 %v2639_v33, %v5181_v21  ;;  %v6418_v53 = vadd.f32 %v2408_v31, %v2407_v50  ;;  %v4238_v41 = vpop.eup %4237  ;;  %v2747_v57 = vrot.slane %v2746_v55, 4 }
 0x365   :  { %v2803_v36 = vrot.slane %v2802_v39, 4  ;;  %v2535_v52 = vsel %vm2533_vm7, %v2534_v54, %v2532_v11  ;;  %v2415_v34 = vrot.slane %v2414_v56, 1  ;;  %v2541_v3 = vand.u32 2147483648, %v6369_v62  ;;  %v7403_v11 = vld [vmem:[#allocation48_spill] sm:$0xff] }
 0x366   :  { %v2753_v6 = vadd.f32 %v2679_v23, %v2678_v27  ;;  %v2615_v2 = vmul.f32 %v4238_v41, %v2535_v52  ;;  %4243 = vrsqrt.f32 %v6418_v53  ;;  %v4240_v8 = vpop.eup %4239  ;;  %v2581_v59 = vadd.f32 1.0, %v6418_v53  ;;  %v7402_v23 = vld [vmem:[#allocation19_spill] sm:$0xff] }
 0x367   :  { %v6425_v42 = vadd.f32 %v2415_v34, %v2414_v56  ;;  %v2421_v44 = vadd.f32 %v2420_v38, %v2419_v26  ;;  %v2735_v50 = vrot.slane %v6343_v49, 2  ;;  %v2537_v54 = vmul.f32 %v4240_v8, %v6369_v62 }
 0x368   :  { %v2654_v4 = vmul.f32 %v2615_v2, %v6237_v20  ;;  %v2655_v13 = vmul.f32 %v2615_v2, %v6235_v37  ;;  %v2785_v28 = vadd.f32 %v2784_v63, %v6318_v25  ;;  %v2748_v45 = vadd.f32 %v2747_v57, %v2746_v55 }
 0x369   :  { %v2804_v33 = vadd.f32 %v2803_v36, %v2802_v39  ;;  %v2754_v16 = vrot.slane %v2753_v6, 4  ;;  %v2791_v31 = vrot.slane %v6355_v51, 2  ;;  %v2539_v20 = vsel %vm2538_vm8, %v6369_v62, %v2537_v54 }
 0x36a   :  { %v4242_v27 = vpop.eup %4241  ;;  %v2694_v56 = vmul.f32 %v2654_v4, %v7402_v23  ;;  %v2695_v26 = vmul.f32 %v2655_v13, %v7403_v11  ;;  %4245 = vrcp.f32 %v2581_v59  ;;  %v2542_v37 = vsel %vm2540_vm9, %v2541_v3, %v2539_v20  ;;  %v7405_v4 = vld [vmem:[#allocation20_spill] sm:$0xff] }
 0x36b   :  { %4247 = vrsqrt.f32 %v6425_v42  ;;  %v2582_v25 = vadd.f32 1.0, %v6425_v42  ;;  %v2422_v55 = vrot.slane %v2421_v44, 1  ;;  %v2617_v38 = vmul.f32 %v4242_v27, %v2542_v37 }
 0x36c   :  { %v2809_v39 = vadd.f32 %v2695_v26, %v2694_v56  ;;  %v2786_v63 = vrot.slane %v2785_v28, 1  ;;  %v2736_v41 = vadd.f32 %v2735_v50, %v6343_v49  ;;  %vm2545_vm10 = vcmp.eq.f32.partialorder %v6418_v53, inf  ;;  %v7404_v50 = vld [vmem:[#allocation21_spill] sm:$0xff] }
 0x36d   :  { %4249 = vrcp.f32 %v2582_v25  ;;  %v6444_v57 = vadd.f32 %v2422_v55, %v2421_v44  ;;  %v2792_v36 = vadd.f32 %v2791_v31, %v6355_v51  ;;  %v2742_v62 = vrot.slane %v6371_v29, 2 }
 0x36e   :  { %v2810_v52 = vrot.slane %v2809_v39, 4  ;;  %v2656_v34 = vmul.f32 %v2617_v38, %v6261_v24  ;;  %v2657_v2 = vmul.f32 %v2617_v38, %v6259_v5  ;;  %vm2547_vm11 = vcmp.eq.f32.partialorder %v6418_v53, 0.0  ;;  %v7406_v24 = vld [vmem:[#allocation60_spill] sm:$0xff] }
 0x36f   :  { %v2787_v3 = vadd.f32 %v2786_v63, %v2785_v28  ;;  %v2755_v8 = vadd.f32 %v2754_v16, %v2753_v6  ;;  %v2548_v49 = vand.u32 2147483648, %v6418_v53  ;;  %v2555_v59 = vand.u32 2147483648, %v6425_v42 }
 0x370   :  { %4251 = vrsqrt.f32 %v6444_v57  ;;  %v2811_v44 = vadd.f32 %v2810_v52, %v2809_v39  ;;  %v2696_v51 = vmul.f32 %v2656_v34, %v7404_v50  ;;  %v2697_v13 = vmul.f32 %v2657_v2, %v7405_v4  ;;  %v7408_v34 = vld [vmem:[#allocation62_spill] sm:$0xff] }
 0x371   :  { %v2583_v54 = vadd.f32 1.0, %v6444_v57  ;;  %v6458_v31 = vadd.f32 %v2787_v3, %v7406_v24  ;;  %v2737_v5 = vrot.slane %v2736_v41, 1  ;;  %v2793_v27 = vrot.slane %v2792_v36, 1 }
 0x372   :  { %v2743_v6 = vadd.f32 %v2742_v62, %v6371_v29  ;;  %v2816_v28 = vadd.f32 %v2697_v13, %v2696_v51  ;;  %vm2552_vm12 = vcmp.eq.f32.partialorder %v6425_v42, inf  ;;  %v2798_v16 = vrot.slane %v6404_v48, 2  ;;  %v7407_v62 = vld [vmem:[#allocation61_spill] sm:$0xff] }
 0x373   :  { %4253 = vrcp.f32 %v2583_v54  ;;  %v2749_v56 = vrot.slane %v2748_v45, 2  ;;  %v4244_v26 = vpop.eup %4243  ;;  %vm2554_vm13 = vcmp.eq.f32.partialorder %v6425_v42, 0.0  ;;  %2886 = vmax.xlane.f32.xlu1 %v6458_v31  ;;  %v2738_v20 = vadd.f32 %v2737_v5, %v2736_v41 }
 0x374   :  { %v2794_v37 = vadd.f32 %v2793_v27, %v2792_v36  ;;  %v2744_v25 = vrot.slane %v2743_v6, 1  ;;  %v2805_v55 = vrot.slane %v2804_v33, 2  ;;  %v2817_v39 = vrot.slane %v2816_v28, 4 }
 0x375   :  { %v2544_v38 = vmul.f32 %v4244_v26, %v6418_v53  ;;  %v2799_v29 = vadd.f32 %v2798_v16, %v6404_v48  ;;  %v2750_v63 = vadd.f32 %v2749_v56, %v2748_v45  ;;  %v6468_v52 = vadd.f32 %v2738_v20, %v7407_v62  ;;  %v7409_v45 = vld [vmem:[#allocation63_spill] sm:$0xff] }
 0x376   :  { %v6471_v2 = vadd.f32 %v2794_v37, %v7408_v34  ;;  %v2745_v3 = vadd.f32 %v2744_v25, %v2743_v6  ;;  %v2806_v51 = vadd.f32 %v2805_v55, %v2804_v33  ;;  %v2818_v13 = vadd.f32 %v2817_v39, %v2816_v28  ;;  %v7411_v34 = vld [vmem:[#allocation65_spill] sm:$0xff] }
 0x377   :  { %v2546_v41 = vsel %vm2545_vm10, %v6418_v53, %v2544_v38  ;;  %vm2559_vm14 = vcmp.eq.f32.partialorder %v6444_v57, inf  ;;  %v2800_v36 = vrot.slane %v2799_v29, 1  ;;  %v2751_v54 = vrot.slane %v2750_v63, 1  ;;  %v4246_v24 = vpop.eup %4245  ;;  %2872 = vmax.xlane.f32.xlu0 %v6468_v52  ;;  %v7410_v38 = vld [vmem:[#allocation64_spill] sm:$0xff] }
 0x378   :  { %v2549_v48 = vsel %vm2547_vm11, %v2548_v49, %v2546_v41  ;;  %2888 = vmax.xlane.f32.xlu1 %v6471_v2  ;;  %v6482_v5 = vadd.f32 %v2745_v3, %v7409_v45  ;;  %v2807_v33 = vrot.slane %v2806_v51, 1  ;;  %v2756_v27 = vrot.slane %v2755_v8, 2  ;;  %v4248_v6 = vpop.eup %4247 }
 0x379   :  { %v2619_v28 = vmul.f32 %v4246_v24, %v2549_v48  ;;  %v2801_v16 = vadd.f32 %v2800_v36, %v2799_v29  ;;  %v2752_v56 = vadd.f32 %v2751_v54, %v2750_v63  ;;  %v2812_v26 = vrot.slane %v2811_v44, 2  ;;  %v7412_v63 = vld [vmem:[#allocation66_spill] sm:$0xff]  ;;  %v7413_v36 = vld [vmem:[#allocation53_spill] sm:$0xff] }
 0x37a   :  { %v2551_v20 = vmul.f32 %v4248_v6, %v6425_v42  ;;  %v2808_v37 = vadd.f32 %v2807_v33, %v2806_v51  ;;  %v2757_v25 = vadd.f32 %v2756_v27, %v2755_v8  ;;  %v2819_v53 = vrot.slane %v2818_v13, 2  ;;  %v4250_v49 = vpop.eup %4249  ;;  %v7414_v54 = vld [vmem:[#allocation22_spill] sm:$0xff] }
 0x37b   :  { %v2658_v55 = vmul.f32 %v2619_v28, %v6309_v9  ;;  %v2659_v39 = vmul.f32 %v2619_v28, %v6301_v47  ;;  %v6488_v62 = vadd.f32 %v2801_v16, %v7410_v38  ;;  %v6491_v3 = vadd.f32 %v2752_v56, %v7411_v34  ;;  %2874 = vmax.xlane.f32.xlu0 %v6482_v5 }
 0x37c   :  { %v2553_v29 = vsel %vm2552_vm12, %v6425_v42, %v2551_v20  ;;  %v6498_v8 = vadd.f32 %v2808_v37, %v7412_v63  ;;  %v2758_v51 = vrot.slane %v2757_v25, 1  ;;  %v2813_v41 = vadd.f32 %v2812_v26, %v2811_v44  ;;  %v7418_v63 = vld [vmem:[#allocation68_spill] sm:$0xff] }
 0x37d   :  { %v4252_v9 = vpop.eup %4251  ;;  %v2698_v47 = vmul.f32 %v2658_v55, %v7413_v36  ;;  %v2699_v24 = vmul.f32 %v2659_v39, %v7414_v54  ;;  %v2556_v48 = vsel %vm2554_vm13, %v2555_v59, %v2553_v29  ;;  %2890 = vmax.xlane.f32.xlu1 %v6488_v62  ;;  %v2820_v45 = vadd.f32 %v2819_v53, %v2818_v13  ;;  %v7415_v13 = vld [vmem:[#allocation67_spill] sm:$0xff] }
 0x37e   :  { %v2621_v33 = vmul.f32 %v4250_v49, %v2556_v48  ;;  %v2558_v27 = vmul.f32 %v4252_v9, %v6444_v57  ;;  %v2759_v6 = vadd.f32 %v2758_v51, %v2757_v25  ;;  %v2814_v28 = vrot.slane %v2813_v41, 1  ;;  %v7416_v39 = vld [vmem:[#allocation55_spill] sm:$0xff] }
 0x37f   :  { %v2823_v16 = vadd.f32 %v2699_v24, %v2698_v47  ;;  %vm2561_vm15 = vcmp.eq.f32.partialorder %v6444_v57, 0.0  ;;  %v2562_v44 = vand.u32 2147483648, %v6444_v57  ;;  %v2821_v56 = vrot.slane %v2820_v45, 1  ;;  %2876 = vmax.xlane.f32.xlu0 %v6491_v3  ;;  %v7419_v24 = vld [vmem:[#allocation69_spill] sm:$0xff] }
 0x380   :  { %v4254_v26 = vpop.eup %4253  ;;  %v2660_v20 = vmul.f32 %v2621_v33, %v6330_v46  ;;  %v2661_v42 = vmul.f32 %v2621_v33, %v6324_v14  ;;  %v2560_v59 = vsel %vm2559_vm14, %v6444_v57, %v2558_v27  ;;  %v6517_v37 = vadd.f32 %v2759_v6, %v7415_v13  ;;  %v7417_v46 = vld [vmem:[#allocation54_spill] sm:$0xff]  ;;  %v7420_v33 = vld [vmem:[#allocation57_spill] sm:$0xff]  ;;  %v7421_v6 = vld [vmem:[#allocation56_spill] sm:$0xff] }
 0x381   :  { %v2824_v25 = vrot.slane %v2823_v16, 4  ;;  %v2563_v53 = vsel %vm2561_vm15, %v2562_v44, %v2560_v59  ;;  %2892 = vmax.xlane.f32.xlu1 %v6498_v8  ;;  %v2815_v49 = vadd.f32 %v2814_v28, %v2813_v41  ;;  %v2822_v55 = vadd.f32 %v2821_v56, %v2820_v45 }
 0x382   :  { %v2700_v38 = vmul.f32 %v2660_v20, %v7416_v39  ;;  %v2701_v34 = vmul.f32 %v2661_v42, %v7417_v46  ;;  %v2623_v14 = vmul.f32 %v4254_v26, %v2563_v53  ;;  %v7422_v53 = vld [vmem:[#allocation70_spill] sm:$0xff]  ;;  %vm3255_vm0 = vcmask 130112  }
 0x383   :  { %v2825_v29 = vadd.f32 %v2824_v25, %v2823_v16  ;;  %v6523_v51 = vadd.f32 %v2815_v49, %v7418_v63  ;;  %2878 = vmax.xlane.f32.xlu0 %v6517_v37  ;;  %v6529_v48 = vadd.f32 %v2822_v55, %v7419_v24  ;;  %vm3428_vm1 = vcmask 1041409  }
 0x384   :  { %v2830_v57 = vadd.f32 %v2701_v34, %v2700_v38  ;;  %v2662_v9 = vmul.f32 %v2623_v14, %v6362_v30  ;;  %v2663_v47 = vmul.f32 %v2623_v14, %v6353_v18  ;;  %vm3430_vm2 = vcmask 1042434  }
 0x385   :  { %2894 = vmax.xlane.f32.xlu1 %v6523_v51  ;;  %v2826_v41 = vrot.slane %v2825_v29, 2  ;;  %v2865_v20 = vpop.xlane.xlu0 %2864  ;;  %vm3432_vm3 = vcmask 1043459   ;;  %vm3434_vm4 = vcmask 1044484   ;;  %vm3436_vm5 = vcmask 1045509  }
 0x386   :  { %v2831_v45 = vrot.slane %v2830_v57, 4  ;;  %v2702_v27 = vmul.f32 %v2662_v9, %v7420_v33  ;;  %v2703_v28 = vmul.f32 %v2663_v47, %v7421_v6  ;;  %v2904_v59 = vsub.f32 %v6094_v19, %v2865_v20  ;;  %v7423_v47 = vld [vmem:[#allocation71_spill] sm:$0xff] }
 0x387   :  { %v2827_v16 = vadd.f32 %v2826_v41, %v2825_v29  ;;  %2896 = vmax.xlane.f32.xlu0 %v6529_v48  ;;  %vm3438_vm6 = vcmask 1046534   ;;  %vm3440_vm7 = vcmask 1047559   ;;  %vm3455_vm8 = vcmask 130048  }
 0x388   :  { %v2832_v44 = vadd.f32 %v2831_v45, %v2830_v57  ;;  %v2837_v56 = vadd.f32 %v2703_v28, %v2702_v27  ;;  %v2924_v55 = vmul.f32 1.442695, %v2904_v59  ;;  %v7424_v45 = vld [vmem:[#allocation72_spill] sm:$0xff]  ;;  %vm3462_vm9 = vcmask 125952  }
 0x389   :  { %v2828_v30 = vrot.slane %v2827_v16, 1  ;;  %v2867_v14 = vpop.xlane.xlu1 %2866 }
 0x38a   :  { %v2838_v18 = vrot.slane %v2837_v56, 4  ;;  %v2833_v26 = vrot.slane %v2832_v44, 2  ;;  %4255 = vpow2.f32 %v2924_v55  ;;  %v2905_v29 = vsub.f32 %v6104_v61, %v2867_v14 }
 0x38b   :  { %v2829_v42 = vadd.f32 %v2828_v30, %v2827_v16 }
 0x38c   :  { %v2839_v13 = vadd.f32 %v2838_v18, %v2837_v56  ;;  %v2834_v25 = vadd.f32 %v2833_v26, %v2832_v44  ;;  %v2926_v9 = vmul.f32 1.442695, %v2905_v29 }
 0x38d   :  { %v6537_v49 = vadd.f32 %v2829_v42, %v7422_v53  ;;  %v7425_v53 = vld [vmem:[#allocation58_spill] sm:$0xff] }
 0x38e   :  { %v2835_v38 = vrot.slane %v2834_v25, 1  ;;  %v2840_v34 = vrot.slane %v2839_v13, 2  ;;  %4257 = vpow2.f32 %v2926_v9 }
 0x38f   :  { %2898 = vmax.xlane.f32.xlu1 %v6537_v49 }
 0x390   :  { %v2836_v63 = vadd.f32 %v2835_v38, %v2834_v25  ;;  %v2841_v57 = vadd.f32 %v2840_v34, %v2839_v13 }
 0x391   :  { %v2881_v28 = vpop.xlane.xlu0 %2880 }
 0x392   :  { %v6542_v24 = vadd.f32 %v2836_v63, %v7423_v47  ;;  %v2842_v19 = vrot.slane %v2841_v57, 1  ;;  %v2912_v16 = vsub.f32 %v6115_v12, %v2881_v28 }
 0x394   :  { %2900 = vmax.xlane.f32.xlu0 %v6542_v24  ;;  %v2843_v41 = vadd.f32 %v2842_v19, %v2841_v57  ;;  %v2940_v61 = vmul.f32 1.442695, %v2912_v16 }
 0x396   :  { %v6546_v27 = vadd.f32 %v2843_v41, %v7424_v45  ;;  %4259 = vpow2.f32 %v2940_v61 }
 0x397   :  { %v6550_v44 = vpop.eup %4255 }
 0x398   :  { %2902 = vmax.xlane.f32.xlu1 %v6546_v27  ;;  %2964 = vadd.xlane.f32.xlu0 %v6550_v44 }
 0x39a   :  { %v2883_v30 = vpop.xlane.xlu1 %2882 }
 0x39b   :  { %v6553_v56 = vpop.eup %4257  ;;  %v2913_v18 = vsub.f32 %v6131_v15, %v2883_v30 }
 0x39c   :  { %2966 = vadd.xlane.f32.xlu1 %v6553_v56 }
 0x39d   :  { %v2942_v26 = vmul.f32 1.442695, %v2913_v18 }
 0x39f   :  { %4261 = vpow2.f32 %v2942_v26 }
 0x3a3   :  { %v6557_v20 = vpop.eup %4259 }
 0x3a4   :  { %2980 = vadd.xlane.f32.xlu0 %v6557_v20 }
 0x3a6   :  { %v2869_v42 = vpop.xlane.xlu0 %2868 }
 0x3a7   :  { %v2906_v12 = vsub.f32 %v6149_v7, %v2869_v42 }
 0x3a9   :  { %v2928_v59 = vmul.f32 1.442695, %v2906_v12 }
 0x3ab   :  { %4263 = vpow2.f32 %v2928_v59 }
 0x3ac   :  { %v6561_v13 = vpop.eup %4261 }
 0x3ad   :  { %2982 = vadd.xlane.f32.xlu1 %v6561_v13 }
 0x3b1   :  { %v2885_v25 = vpop.xlane.xlu1 %2884 }
 0x3b2   :  { %v2914_v15 = vsub.f32 %v7425_v53, %v2885_v25 }
 0x3b4   :  { %v2944_v55 = vmul.f32 1.442695, %v2914_v15 }
 0x3b6   :  { %4265 = vpow2.f32 %v2944_v55 }
 0x3b8   :  { %v6565_v38 = vpop.eup %4263 }
 0x3b9   :  { %2968 = vadd.xlane.f32.xlu0 %v6565_v38 }
 0x3c3   :  { %v6568_v34 = vpop.eup %4265 }
 0x3c4   :  { %2984 = vadd.xlane.f32.xlu1 %v6568_v34 }
 0x3ea   :  { %v2871_v7 = vpop.xlane.xlu0 %2870 }
 0x3eb   :  { %v2907_v14 = vsub.f32 %v6402_v10, %v2871_v7 }
 0x3ed   :  { %v2930_v29 = vmul.f32 1.442695, %v2907_v14 }
 0x3ef   :  { %4267 = vpow2.f32 %v2930_v29 }
 0x3fc   :  { %v6572_v63 = vpop.eup %4267  ;;  %v2887_v57 = vpop.xlane.xlu1 %2886 }
 0x3fd   :  { %v2915_v9 = vsub.f32 %v6458_v31, %v2887_v57  ;;  %2970 = vadd.xlane.f32.xlu0 %v6572_v63 }
 0x3ff   :  { %v2946_v47 = vmul.f32 1.442695, %v2915_v9 }
 0x400   :  { %v2873_v19 = vpop.xlane.xlu0 %2872 }
 0x401   :  { %v2889_v41 = vpop.xlane.xlu1 %2888  ;;  %4269 = vpow2.f32 %v2946_v47  ;;  %v2908_v45 = vsub.f32 %v6468_v52, %v2873_v19 }
 0x402   :  { %v2916_v28 = vsub.f32 %v6471_v2, %v2889_v41 }
 0x403   :  { %v2932_v16 = vmul.f32 1.442695, %v2908_v45 }
 0x404   :  { %v2948_v61 = vmul.f32 1.442695, %v2916_v28  ;;  %v2875_v10 = vpop.xlane.xlu0 %2874 }
 0x405   :  { %4271 = vpow2.f32 %v2932_v16  ;;  %v2909_v30 = vsub.f32 %v6482_v5, %v2875_v10 }
 0x406   :  { %v2891_v18 = vpop.xlane.xlu1 %2890  ;;  %4273 = vpow2.f32 %v2948_v61 }
 0x407   :  { %v2917_v31 = vsub.f32 %v6488_v62, %v2891_v18  ;;  %v2934_v26 = vmul.f32 1.442695, %v2909_v30 }
 0x408   :  { %v2877_v12 = vpop.xlane.xlu0 %2876 }
 0x409   :  { %v2950_v42 = vmul.f32 1.442695, %v2917_v31  ;;  %4275 = vpow2.f32 %v2934_v26  ;;  %v2910_v59 = vsub.f32 %v6491_v3, %v2877_v12 }
 0x40a   :  { %v2893_v25 = vpop.xlane.xlu1 %2892 }
 0x40b   :  { %4277 = vpow2.f32 %v2950_v42  ;;  %v2918_v52 = vsub.f32 %v6498_v8, %v2893_v25  ;;  %v2936_v2 = vmul.f32 1.442695, %v2910_v59 }
 0x40c   :  { %v2879_v15 = vpop.xlane.xlu0 %2878 }
 0x40d   :  { %v2952_v53 = vmul.f32 1.442695, %v2918_v52  ;;  %4279 = vpow2.f32 %v2936_v2  ;;  %v2911_v5 = vsub.f32 %v6517_v37, %v2879_v15 }
 0x40e   :  { %v2895_v55 = vpop.xlane.xlu1 %2894  ;;  %v6583_v7 = vpop.eup %4269 }
 0x40f   :  { %4281 = vpow2.f32 %v2952_v53  ;;  %v2919_v62 = vsub.f32 %v6523_v51, %v2895_v55  ;;  %2986 = vadd.xlane.f32.xlu1 %v6583_v7  ;;  %v2938_v14 = vmul.f32 1.442695, %v2911_v5  ;;  %v7426_v53 = vld [vmem:[#allocation26_spill] sm:$0xff]  ;;  %v7427_v5 = vld [vmem:[#allocation24_spill] sm:$0xff] }
 0x410   :  { %v2897_v29 = vpop.xlane.xlu0 %2896 }
 0x411   :  { %v2954_v3 = vmul.f32 1.442695, %v2919_v62  ;;  %4283 = vpow2.f32 %v2938_v14  ;;  %v2920_v8 = vsub.f32 %v6529_v48, %v2897_v29 }
 0x412   :  { %v6588_v57 = vpop.eup %4271 }
 0x413   :  { %4285 = vpow2.f32 %v2954_v3  ;;  %v6590_v9 = vpop.eup %4273  ;;  %2972 = vadd.xlane.f32.xlu0 %v6588_v57  ;;  %v2956_v37 = vmul.f32 1.442695, %v2920_v8  ;;  %v7428_v3 = vld [vmem:[#allocation25_spill] sm:$0xff]  ;;  %v7429_v8 = vld [vmem:[#allocation23_spill] sm:$0xff] }
 0x414   :  { %2988 = vadd.xlane.f32.xlu1 %v6590_v9 }
 0x415   :  { %4287 = vpow2.f32 %v2956_v37 }
 0x416   :  { %v6594_v51 = vpop.eup %4275 }
 0x417   :  { %2974 = vadd.xlane.f32.xlu0 %v6594_v51 }
 0x418   :  { %v6596_v47 = vpop.eup %4277  ;;  %v2899_v19 = vpop.xlane.xlu1 %2898 }
 0x419   :  { %2990 = vadd.xlane.f32.xlu1 %v6596_v47  ;;  %v2921_v48 = vsub.f32 %v6537_v49, %v2899_v19 }
 0x41a   :  { %v6601_v41 = vpop.eup %4279 }
 0x41b   :  { %v2958_v45 = vmul.f32 1.442695, %v2921_v48  ;;  %2976 = vadd.xlane.f32.xlu0 %v6601_v41 }
 0x41c   :  { %v6603_v28 = vpop.eup %4281 }
 0x41d   :  { %4289 = vpow2.f32 %v2958_v45  ;;  %2992 = vadd.xlane.f32.xlu1 %v6603_v28  ;;  %v2901_v16 = vpop.xlane.xlu0 %2900 }
 0x41e   :  { %v2922_v61 = vsub.f32 %v6542_v24, %v2901_v16  ;;  %v6608_v10 = vpop.eup %4283 }
 0x41f   :  { %2978 = vadd.xlane.f32.xlu0 %v6608_v10 }
 0x420   :  { %v6610_v30 = vpop.eup %4285  ;;  %v2960_v18 = vmul.f32 1.442695, %v2922_v61 }
 0x421   :  { %v2903_v49 = vpop.xlane.xlu1 %2902  ;;  %2994 = vadd.xlane.f32.xlu1 %v6610_v30  ;;  %v2965_v24 = vpop.xlane.xlu0 %2964 }
 0x422   :  { %4291 = vpow2.f32 %v2960_v18  ;;  %v2923_v31 = vsub.f32 %v6546_v27, %v2903_v49  ;;  %v6615_v26 = vpop.eup %4287  ;;  %v7430_v49 = vld [vmem:[#allocation33_spill] sm:$0xff] }
 0x423   :  { %2996 = vadd.xlane.f32.xlu0 %v6615_v26 }
 0x424   :  { %v2962_v42 = vmul.f32 1.442695, %v2923_v31  ;;  %v7431_v31 = vld [vmem:[#allocation34_spill] sm:$0xff] }
 0x425   :  { %v2967_v59 = vpop.xlane.xlu1 %2966 }
 0x426   :  { %4293 = vpow2.f32 %v2962_v42 }
 0x427   :  { %4295 = vrcp.f32 %v2965_v24 }
 0x428   :  { %4297 = vrcp.f32 %v2967_v59 }
 0x42a   :  { %v6618_v12 = vpop.eup %4289 }
 0x42b   :  { %2998 = vadd.xlane.f32.xlu1 %v6618_v12 }
 0x42d   :  { %v2981_v19 = vpop.xlane.xlu0 %2980 }
 0x42e   :  { %4299 = vrcp.f32 %v2981_v19  ;;  %v7436_v19 = vld [vmem:[#allocation37_spill] sm:$0xff] }
 0x42f   :  { %v6621_v25 = vpop.eup %4291 }
 0x430   :  { %3000 = vadd.xlane.f32.xlu0 %v6621_v25 }
 0x433   :  { %v6624_v52 = vpop.eup %4293 }
 0x434   :  { %v4296_v27 = vpop.eup %4295  ;;  %3002 = vadd.xlane.f32.xlu1 %v6624_v52 }
 0x435   :  { %v3005_v2 = vmul.f32 %v4296_v27, %v6550_v44  ;;  %v4298_v62 = vpop.eup %4297  ;;  %v7432_v27 = vld [vmem:[#allocation28_spill] sm:$0xff] }
 0x436   :  { %v3007_v14 = vmul.f32 %v4298_v62, %v6553_v56  ;;  %v2983_v44 = vpop.xlane.xlu1 %2982 }
 0x437   :  { %v3045_v15 = vmul.f32 %v3005_v2, %v7426_v53  ;;  %v3044_v55 = vmul.f32 %v3005_v2, %v7427_v5  ;;  %v7433_v5 = vld [vmem:[#allocation30_spill] sm:$0xff] }
 0x438   :  { %v3047_v29 = vmul.f32 %v3007_v14, %v7428_v3  ;;  %v3046_v37 = vmul.f32 %v3007_v14, %v7429_v8  ;;  %v7435_v8 = vld [vmem:[#allocation31_spill] sm:$0xff] }
 0x439   :  { %3086 = vadd.xlane.f32.xlu1 %v3045_v15  ;;  %3084 = vadd.xlane.f32.xlu0 %v3044_v55 }
 0x43b   :  { %v4300_v16 = vpop.eup %4299 }
 0x43c   :  { %v3021_v24 = vmul.f32 %v4300_v16, %v6557_v20 }
 0x43d   :  { %3090 = vadd.xlane.f32.xlu1 %v3047_v29  ;;  %3088 = vadd.xlane.f32.xlu0 %v3046_v37 }
 0x43e   :  { %v3060_v2 = vmul.f32 %v3021_v24, %v7432_v27 }
 0x442   :  { %v2969_v48 = vpop.xlane.xlu0 %2968 }
 0x443   :  { %4301 = vrcp.f32 %v2969_v48 }
 0x444   :  { %4303 = vrcp.f32 %v2983_v44  ;;  %v7437_v44 = vld [vmem:[#allocation27_spill] sm:$0xff] }
 0x44d   :  { %v2985_v45 = vpop.xlane.xlu1 %2984 }
 0x44e   :  { %4305 = vrcp.f32 %v2985_v45  ;;  %v3061_v45 = vmul.f32 %v3021_v24, %v7437_v44  ;;  %v7440_v24 = vld [vmem:[#allocation32_spill] sm:$0xff] }
 0x450   :  { %v4302_v61 = vpop.eup %4301 }
 0x451   :  { %v3009_v18 = vmul.f32 %v4302_v61, %v6565_v38  ;;  %v4304_v59 = vpop.eup %4303  ;;  %v7434_v38 = vld [vmem:[#allocation36_spill] sm:$0xff]  ;;  %v7438_v61 = vld [vmem:[#allocation29_spill] sm:$0xff] }
 0x452   :  { %v3023_v53 = vmul.f32 %v4304_v59, %v6561_v13 }
 0x453   :  { %v3049_v56 = vmul.f32 %v3009_v18, %v7430_v49  ;;  %v3048_v42 = vmul.f32 %v3009_v18, %v7431_v31 }
 0x454   :  { %v3062_v55 = vmul.f32 %v3023_v53, %v7433_v5  ;;  %v3063_v18 = vmul.f32 %v3023_v53, %v7438_v61 }
 0x455   :  { %3094 = vadd.xlane.f32.xlu1 %v3049_v56  ;;  %3092 = vadd.xlane.f32.xlu0 %v3048_v42  ;;  %v7439_v56 = vld [vmem:[#allocation35_spill] sm:$0xff] }
 0x459   :  { %3116 = vadd.xlane.f32.xlu1 %v3060_v2 }
 0x45b   :  { %v4306_v15 = vpop.eup %4305 }
 0x45c   :  { %v3025_v62 = vmul.f32 %v4306_v15, %v6568_v34  ;;  %v7441_v15 = vld [vmem:[#allocation38_spill] sm:$0xff] }
 0x45d   :  { %3120 = vadd.xlane.f32.xlu1 %v3062_v55 }
 0x45e   :  { %v3064_v14 = vmul.f32 %v3025_v62, %v7434_v38  ;;  %v3065_v31 = vmul.f32 %v3025_v62, %v7439_v56 }
 0x461   :  { %3124 = vadd.xlane.f32.xlu1 %v3064_v14 }
 0x486   :  { %v2971_v3 = vpop.xlane.xlu0 %2970 }
 0x487   :  { %4307 = vrcp.f32 %v2971_v3 }
 0x494   :  { %v4308_v20 = vpop.eup %4307 }
 0x495   :  { %v3011_v29 = vmul.f32 %v4308_v20, %v6572_v63 }
 0x497   :  { %v3050_v37 = vmul.f32 %v3011_v29, %v7435_v8  ;;  %v3051_v48 = vmul.f32 %v3011_v29, %v7436_v19 }
 0x498   :  { %v2987_v13 = vpop.xlane.xlu1 %2986 }
 0x499   :  { %4309 = vrcp.f32 %v2987_v13  ;;  %3096 = vadd.xlane.f32.xlu0 %v3050_v37  ;;  %3098 = vadd.xlane.f32.xlu1 %v3051_v48 }
 0x49c   :  { %v2973_v34 = vpop.xlane.xlu0 %2972 }
 0x49d   :  { %4311 = vrcp.f32 %v2973_v34  ;;  %v2989_v16 = vpop.xlane.xlu1 %2988  ;;  %3118 = vadd.xlane.f32.xlu0 %v3061_v45  ;;  %v7443_v45 = vld [vmem:[#allocation46_spill] sm:$0xff] }
 0x49e   :  { %4313 = vrcp.f32 %v2989_v16 }
 0x4a0   :  { %v2975_v49 = vpop.xlane.xlu0 %2974 }
 0x4a1   :  { %4315 = vrcp.f32 %v2975_v49  ;;  %3122 = vadd.xlane.f32.xlu0 %v3063_v18 }
 0x4a2   :  { %v2991_v63 = vpop.xlane.xlu1 %2990 }
 0x4a3   :  { %4317 = vrcp.f32 %v2991_v63 }
 0x4a4   :  { %v2977_v59 = vpop.xlane.xlu0 %2976 }
 0x4a5   :  { %3126 = vadd.xlane.f32.xlu0 %v3065_v31  ;;  %4319 = vrcp.f32 %v2977_v59 }
 0x4a6   :  { %v4310_v42 = vpop.eup %4309  ;;  %v2993_v38 = vpop.xlane.xlu1 %2992 }
 0x4a7   :  { %v3027_v27 = vmul.f32 %v4310_v42, %v6583_v7  ;;  %4321 = vrcp.f32 %v2993_v38 }
 0x4a8   :  { %v2979_v29 = vpop.xlane.xlu0 %2978 }
 0x4a9   :  { %v3067_v2 = vmul.f32 %v3027_v27, %v7440_v24  ;;  %v3066_v5 = vmul.f32 %v3027_v27, %v7441_v15  ;;  %4323 = vrcp.f32 %v2979_v29 }
 0x4aa   :  { %v4312_v55 = vpop.eup %4311 }
 0x4ab   :  { %v4314_v53 = vpop.eup %4313  ;;  %3130 = vadd.xlane.f32.xlu1 %v3067_v2  ;;  %3128 = vadd.xlane.f32.xlu0 %v3066_v5  ;;  %v3013_v14 = vmul.f32 %v4312_v55, %v6588_v57  ;;  %v2995_v57 = vpop.xlane.xlu1 %2994 }
 0x4ac   :  { %v3029_v3 = vmul.f32 %v4314_v53, %v6590_v9  ;;  %4325 = vrcp.f32 %v2995_v57  ;;  %v2997_v44 = vpop.xlane.xlu0 %2996 }
 0x4ad   :  { %v3053_v62 = vmul.f32 %v3013_v14, %v7397_v32  ;;  %v3052_v20 = vmul.f32 %v3013_v14, %v7387_v40  ;;  %4327 = vrcp.f32 %v2997_v44 }
 0x4ae   :  { %v4316_v7 = vpop.eup %4315  ;;  %v3069_v8 = vmul.f32 %v3029_v3, %v7398_v0  ;;  %v3068_v37 = vmul.f32 %v3029_v3, %v7389_v43  ;;  %v7442_v0 = vld [vmem:[#allocation40_spill] sm:$0xff] }
 0x4af   :  { %3102 = vadd.xlane.f32.xlu1 %v3053_v62  ;;  %3100 = vadd.xlane.f32.xlu0 %v3052_v20  ;;  %v3015_v19 = vmul.f32 %v4316_v7, %v6594_v51 }
 0x4b0   :  { %v4318_v48 = vpop.eup %4317 }
 0x4b1   :  { %v3055_v32 = vmul.f32 %v3015_v19, %v7390_v17  ;;  %v3031_v40 = vmul.f32 %v4318_v48, %v6596_v47  ;;  %v3054_v9 = vmul.f32 %v3015_v19, %v7391_v35  ;;  %v7444_v47 = vld [vmem:[#allocation50_spill] sm:$0xff] }
 0x4b2   :  { %v4320_v13 = vpop.eup %4319 }
 0x4b3   :  { %3134 = vadd.xlane.f32.xlu1 %v3069_v8  ;;  %3132 = vadd.xlane.f32.xlu0 %v3068_v37  ;;  %v3071_v43 = vmul.f32 %v3031_v40, %v7442_v0  ;;  %v3070_v51 = vmul.f32 %v3031_v40, %v7443_v45  ;;  %v3017_v34 = vmul.f32 %v4320_v13, %v6601_v41 }
 0x4b4   :  { %v4322_v16 = vpop.eup %4321  ;;  %v2999_v61 = vpop.xlane.xlu1 %2998 }
 0x4b5   :  { %4329 = vrcp.f32 %v2999_v61  ;;  %v3057_v17 = vmul.f32 %v3017_v34, %v7400_v58  ;;  %v3033_v35 = vmul.f32 %v4322_v16, %v6603_v28  ;;  %v3056_v18 = vmul.f32 %v3017_v34, %v7444_v47  ;;  %v7445_v34 = vld [vmem:[#allocation18_spill] sm:$0xff]  ;;  %v7446_v61 = vld [vmem:[#allocation17_spill] sm:$0xff] }
 0x4b6   :  { %v4324_v49 = vpop.eup %4323 }
 0x4b7   :  { %3106 = vadd.xlane.f32.xlu1 %v3055_v32  ;;  %3104 = vadd.xlane.f32.xlu0 %v3054_v9  ;;  %v3073_v56 = vmul.f32 %v3033_v35, %v7393_v1  ;;  %v3072_v41 = vmul.f32 %v3033_v35, %v7394_v22  ;;  %v3019_v31 = vmul.f32 %v4324_v49, %v6608_v10 }
 0x4b9   :  { %v3001_v63 = vpop.xlane.xlu0 %3000  ;;  %v4326_v42 = vpop.eup %4325  ;;  %v3059_v58 = vmul.f32 %v3019_v31, %v5181_v21  ;;  %v3058_v27 = vmul.f32 %v3019_v31, %v7395_v60 }
 0x4ba   :  { %4331 = vrcp.f32 %v3001_v63  ;;  %v3035_v28 = vmul.f32 %v4326_v42, %v6610_v30  ;;  %v4328_v24 = vpop.eup %4327 }
 0x4bb   :  { %3138 = vadd.xlane.f32.xlu1 %v3071_v43  ;;  %3136 = vadd.xlane.f32.xlu0 %v3070_v51  ;;  %v3037_v10 = vmul.f32 %v4328_v24, %v6615_v26 }
 0x4bc   :  { %v3075_v1 = vmul.f32 %v3035_v28, %v7403_v11  ;;  %v3074_v22 = vmul.f32 %v3035_v28, %v7402_v23 }
 0x4bd   :  { %v3003_v59 = vpop.xlane.xlu1 %3002  ;;  %v3077_v15 = vmul.f32 %v3037_v10, %v7405_v4  ;;  %v3076_v30 = vmul.f32 %v3037_v10, %v7404_v50 }
 0x4be   :  { %4333 = vrcp.f32 %v3003_v59 }
 0x4bf   :  { %3110 = vadd.xlane.f32.xlu1 %v3057_v17  ;;  %3108 = vadd.xlane.f32.xlu0 %v3056_v18 }
 0x4c2   :  { %v4330_v2 = vpop.eup %4329 }
 0x4c3   :  { %3142 = vadd.xlane.f32.xlu1 %v3073_v56  ;;  %3140 = vadd.xlane.f32.xlu0 %v3072_v41  ;;  %v3039_v21 = vmul.f32 %v4330_v2, %v6618_v12 }
 0x4c5   :  { %v3079_v60 = vmul.f32 %v3039_v21, %v7414_v54  ;;  %v3078_v11 = vmul.f32 %v3039_v21, %v7413_v36  ;;  %v6687_v36 = vpop.xlane.xlu1 %3086 }
 0x4c6   :  { %v3165_v44 = vmul.f32 %v6687_v36, %v6687_v36 }
 0x4c7   :  { %3114 = vadd.xlane.f32.xlu1 %v3059_v58  ;;  %3112 = vadd.xlane.f32.xlu0 %v3058_v27  ;;  %v4332_v5 = vpop.eup %4331 }
 0x4c8   :  { %v3041_v23 = vmul.f32 %v4332_v5, %v6621_v25  ;;  %v6691_v25 = vpop.xlane.xlu0 %3084  ;;  %v3254_v63 = vrot.slane %v3165_v44, %v7445_v34 }
 0x4c9   :  { %v6689_v54 = vpop.xlane.xlu1 %3090  ;;  %v3164_v0 = vmul.f32 %v6691_v25, %v6691_v25 }
 0x4ca   :  { %v3081_v26 = vmul.f32 %v3041_v23, %v7417_v46  ;;  %v3080_v12 = vmul.f32 %v3041_v23, %v7416_v39  ;;  %v3167_v32 = vmul.f32 %v6689_v54, %v6689_v54 }
 0x4cb   :  { %3146 = vadd.xlane.f32.xlu1 %v3075_v1  ;;  %3144 = vadd.xlane.f32.xlu0 %v3074_v22  ;;  %v4334_v55 = vpop.eup %4333  ;;  %v3249_v56 = vrot.slane %v3164_v0, %v7446_v61 }
 0x4cc   :  { %v3043_v4 = vmul.f32 %v4334_v55, %v6624_v52  ;;  %v6695_v46 = vpop.xlane.xlu0 %3088  ;;  %v3264_v16 = vrot.slane %v3167_v32, %v7445_v34 }
 0x4cd   :  { %v3166_v40 = vmul.f32 %v6695_v46, %v6695_v46 }
 0x4ce   :  { %v3083_v50 = vmul.f32 %v3043_v4, %v7421_v6  ;;  %v3082_v38 = vmul.f32 %v3043_v4, %v7420_v33 }
 0x4cf   :  { %3150 = vadd.xlane.f32.xlu1 %v3077_v15  ;;  %3148 = vadd.xlane.f32.xlu0 %v3076_v30  ;;  %v3260_v17 = vrot.slane %v3166_v40, %v7446_v61  ;;  %v3256_v15 = vsel %vm3255_vm0, %v3254_v63, %v3249_v56 }
 0x4d1   :  { %v3265_v27 = vsel %vm3255_vm0, %v3264_v16, %v3260_v17 }
 0x4d3   :  { %3154 = vadd.xlane.f32.xlu1 %v3079_v60  ;;  %3152 = vadd.xlane.f32.xlu0 %v3078_v11  ;;  %v3429_v60 = vsel %vm3428_vm1, %v3265_v27, %v3256_v15 }
 0x4d7   :  { %3158 = vadd.xlane.f32.xlu1 %v3081_v26  ;;  %3156 = vadd.xlane.f32.xlu0 %v3080_v12 }
 0x4db   :  { %3162 = vadd.xlane.f32.xlu1 %v3083_v50  ;;  %3160 = vadd.xlane.f32.xlu0 %v3082_v38 }
 0x4de   :  { %v6693_v53 = vpop.xlane.xlu1 %3094  ;;  %v6699_v39 = vpop.xlane.xlu0 %3092 }
 0x4df   :  { %v3169_v9 = vmul.f32 %v6693_v53, %v6693_v53  ;;  %v3168_v13 = vmul.f32 %v6699_v39, %v6699_v39 }
 0x4e1   :  { %v3273_v47 = vrot.slane %v3169_v9, %v7445_v34  ;;  %v3269_v18 = vrot.slane %v3168_v13, %v7446_v61 }
 0x4e2   :  { %v6697_v52 = vpop.xlane.xlu1 %3116 }
 0x4e3   :  { %v3180_v24 = vmul.f32 %v6697_v52, %v6697_v52  ;;  %v3274_v22 = vsel %vm3255_vm0, %v3273_v47, %v3269_v18 }
 0x4e4   :  { %v3431_v4 = vsel %vm3430_vm2, %v3274_v22, %v3429_v60 }
 0x4e5   :  { %v3323_v12 = vrot.slane %v3180_v24, %v7446_v61 }
 0x4e6   :  { %v6701_v14 = vpop.xlane.xlu1 %3120 }
 0x4e7   :  { %v3182_v42 = vmul.f32 %v6701_v14, %v6701_v14 }
 0x4e9   :  { %v3332_v11 = vrot.slane %v3182_v42, %v7446_v61 }
 0x4ea   :  { %v6707_v62 = vpop.xlane.xlu1 %3124 }
 0x4eb   :  { %v3184_v10 = vmul.f32 %v6707_v62, %v6707_v62 }
 0x4ed   :  { %v3341_v32 = vrot.slane %v3184_v10, %v7446_v61 }
 0x522   :  { %v6703_v6 = vpop.xlane.xlu0 %3096  ;;  %v6711_v20 = vpop.xlane.xlu1 %3098 }
 0x523   :  { %v3171_v43 = vmul.f32 %v6711_v20, %v6711_v20  ;;  %v3170_v35 = vmul.f32 %v6703_v6, %v6703_v6 }
 0x525   :  { %v3282_v31 = vrot.slane %v3171_v43, %v7445_v34  ;;  %v3278_v1 = vrot.slane %v3170_v35, %v7446_v61 }
 0x526   :  { %v6705_v33 = vpop.xlane.xlu0 %3118 }
 0x527   :  { %v3181_v41 = vmul.f32 %v6705_v33, %v6705_v33  ;;  %v3283_v30 = vsel %vm3255_vm0, %v3282_v31, %v3278_v1 }
 0x528   :  { %v3433_v40 = vsel %vm3432_vm3, %v3283_v30, %v3431_v4 }
 0x529   :  { %v3327_v21 = vrot.slane %v3181_v41, %v7445_v34 }
 0x52a   :  { %v6709_v3 = vpop.xlane.xlu0 %3122 }
 0x52b   :  { %v3183_v49 = vmul.f32 %v6709_v3, %v6709_v3  ;;  %v3328_v44 = vsel %vm3255_vm0, %v3327_v21, %v3323_v12 }
 0x52d   :  { %v3336_v2 = vrot.slane %v3183_v49, %v7445_v34 }
 0x52e   :  { %v6713_v7 = vpop.xlane.xlu0 %3126 }
 0x52f   :  { %v3185_v59 = vmul.f32 %v6713_v7, %v6713_v7  ;;  %v3337_v9 = vsel %vm3255_vm0, %v3336_v2, %v3332_v11 }
 0x530   :  { %v3442_v56 = vsel %vm3428_vm1, %v3337_v9, %v3328_v44 }
 0x531   :  { %v3345_v23 = vrot.slane %v3185_v59, %v7445_v34 }
 0x533   :  { %v3346_v17 = vsel %vm3255_vm0, %v3345_v23, %v3341_v32 }
 0x534   :  { %v6715_v29 = vpop.xlane.xlu1 %3130  ;;  %v6717_v8 = vpop.xlane.xlu0 %3128  ;;  %v3443_v22 = vsel %vm3430_vm2, %v3346_v17, %v3442_v56 }
 0x535   :  { %v3186_v0 = vmul.f32 %v6717_v8, %v6717_v8  ;;  %v3187_v41 = vmul.f32 %v6715_v29, %v6715_v29 }
 0x537   :  { %v3350_v10 = vrot.slane %v3186_v0, %v7446_v61  ;;  %v3354_v4 = vrot.slane %v3187_v41, %v7445_v34 }
 0x538   :  { %v6719_v37 = vpop.xlane.xlu1 %3102  ;;  %v6721_v19 = vpop.xlane.xlu0 %3100 }
 0x539   :  { %v3172_v5 = vmul.f32 %v6721_v19, %v6721_v19  ;;  %v3173_v50 = vmul.f32 %v6719_v37, %v6719_v37  ;;  %v3355_v0 = vsel %vm3255_vm0, %v3354_v4, %v3350_v10 }
 0x53b   :  { %v3287_v43 = vrot.slane %v3172_v5, %v7446_v61  ;;  %v3291_v31 = vrot.slane %v3173_v50, %v7445_v34 }
 0x53c   :  { %v6723_v48 = vpop.xlane.xlu1 %3134  ;;  %v6725_v57 = vpop.xlane.xlu0 %3132 }
 0x53d   :  { %v3188_v35 = vmul.f32 %v6725_v57, %v6725_v57  ;;  %v3189_v59 = vmul.f32 %v6723_v48, %v6723_v48  ;;  %v3292_v2 = vsel %vm3255_vm0, %v3291_v31, %v3287_v43 }
 0x53e   :  { %v3435_v17 = vsel %vm3434_vm4, %v3292_v2, %v3433_v40 }
 0x53f   :  { %v3359_v21 = vrot.slane %v3188_v35, %v7446_v61  ;;  %v3363_v32 = vrot.slane %v3189_v59, %v7445_v34 }
 0x540   :  { %v6741_v45 = vpop.xlane.xlu1 %3106  ;;  %v6743_v51 = vpop.xlane.xlu0 %3104 }
 0x541   :  { %v3174_v38 = vmul.f32 %v6743_v51, %v6743_v51  ;;  %v3175_v16 = vmul.f32 %v6741_v45, %v6741_v45  ;;  %v3364_v35 = vsel %vm3255_vm0, %v3363_v32, %v3359_v21 }
 0x543   :  { %v3296_v42 = vrot.slane %v3174_v38, %v7446_v61  ;;  %v3300_v15 = vrot.slane %v3175_v16, %v7445_v34 }
 0x544   :  { %v6762_v58 = vpop.xlane.xlu1 %3138  ;;  %v6764_v28 = vpop.xlane.xlu0 %3136 }
 0x545   :  { %v3190_v18 = vmul.f32 %v6764_v28, %v6764_v28  ;;  %v3191_v27 = vmul.f32 %v6762_v58, %v6762_v58  ;;  %v3301_v12 = vsel %vm3255_vm0, %v3300_v15, %v3296_v42 }
 0x546   :  { %v3437_v31 = vsel %vm3436_vm5, %v3301_v12, %v3435_v17 }
 0x547   :  { %v3368_v5 = vrot.slane %v3190_v18, %v7446_v61  ;;  %v3372_v9 = vrot.slane %v3191_v27, %v7445_v34 }
 0x548   :  { %v6782_v55 = vpop.xlane.xlu1 %3110  ;;  %v6784_v26 = vpop.xlane.xlu0 %3108 }
 0x549   :  { %v3176_v13 = vmul.f32 %v6784_v26, %v6784_v26  ;;  %v3177_v47 = vmul.f32 %v6782_v55, %v6782_v55 }
 0x54b   :  { %v3305_v24 = vrot.slane %v3176_v13, %v7446_v61  ;;  %v3309_v30 = vrot.slane %v3177_v47, %v7445_v34  ;;  %v3373_v47 = vsel %vm3255_vm0, %v3372_v9, %v3368_v5 }
 0x54c   :  { %v6810_v49 = vpop.xlane.xlu1 %3142  ;;  %v6812_v63 = vpop.xlane.xlu0 %3140 }
 0x54d   :  { %v3192_v1 = vmul.f32 %v6812_v63, %v6812_v63  ;;  %v3193_v60 = vmul.f32 %v6810_v49, %v6810_v49  ;;  %v3310_v44 = vsel %vm3255_vm0, %v3309_v30, %v3305_v24  ;;  %v3444_v24 = vsel %vm3432_vm3, %v3355_v0, %v3443_v22 }
 0x54e   :  { %v3439_v27 = vsel %vm3438_vm6, %v3310_v44, %v3437_v31  ;;  %v3445_v30 = vsel %vm3434_vm4, %v3364_v35, %v3444_v24 }
 0x54f   :  { %v3377_v13 = vrot.slane %v3192_v1, %v7446_v61  ;;  %v3381_v18 = vrot.slane %v3193_v60, %v7445_v34  ;;  %v3446_v4 = vsel %vm3436_vm5, %v3373_v47, %v3445_v30 }
 0x550   :  { %v6835_v11 = vpop.xlane.xlu1 %3114  ;;  %v6837_v23 = vpop.xlane.xlu0 %3112 }
 0x551   :  { %v3179_v50 = vmul.f32 %v6835_v11, %v6835_v11  ;;  %v3178_v38 = vmul.f32 %v6837_v23, %v6837_v23  ;;  %v3382_v10 = vsel %vm3255_vm0, %v3381_v18, %v3377_v13 }
 0x552   :  { %v3447_v12 = vsel %vm3438_vm6, %v3382_v10, %v3446_v4 }
 0x553   :  { %v3318_v43 = vrot.slane %v3179_v50, %v7445_v34  ;;  %v3314_v16 = vrot.slane %v3178_v38, %v7446_v61 }
 0x554   :  { %v6856_v56 = vpop.xlane.xlu1 %3146  ;;  %v6858_v41 = vpop.xlane.xlu0 %3144 }
 0x555   :  { %v3195_v42 = vmul.f32 %v6856_v56, %v6856_v56  ;;  %v3194_v59 = vmul.f32 %v6858_v41, %v6858_v41  ;;  %v3319_v40 = vsel %vm3255_vm0, %v3318_v43, %v3314_v16 }
 0x556   :  { %v3441_v1 = vsel %vm3440_vm7, %v3319_v40, %v3439_v27 }
 0x557   :  { %v3390_v2 = vrot.slane %v3195_v42, %v7445_v34  ;;  %v3386_v15 = vrot.slane %v3194_v59, %v7446_v61  ;;  %v3456_v21 = vsel %vm3455_vm8, %v3441_v1, 0.0 }
 0x558   :  { %v6874_v5 = vpop.xlane.xlu1 %3150  ;;  %3457 = vadd.xlane.f32.xlu0 %v3456_v21  ;;  %v6876_v60 = vpop.xlane.xlu0 %3148 }
 0x559   :  { %v3391_v22 = vsel %vm3255_vm0, %v3390_v2, %v3386_v15  ;;  %v3196_v0 = vmul.f32 %v6876_v60, %v6876_v60  ;;  %v3197_v17 = vmul.f32 %v6874_v5, %v6874_v5 }
 0x55a   :  { %v3448_v50 = vsel %vm3440_vm7, %v3391_v22, %v3447_v12 }
 0x55b   :  { %v3459_v38 = vsel %vm3455_vm8, %v3448_v50, 0.0  ;;  %v3395_v42 = vrot.slane %v3196_v0, %v7446_v61  ;;  %v3399_v1 = vrot.slane %v3197_v17, %v7445_v34  ;;  %v4395_v0 = vmov 0  }
 0x55c   :  { %v6883_v32 = vpop.xlane.xlu1 %3154  ;;  %3460 = vadd.xlane.f32.xlu1 %v3459_v38  ;;  %v6885_v9 = vpop.xlane.xlu0 %3152  ;;  %4013 = vset.pattern.permute.xlu0 %v4395_v0 }
 0x55d   :  { %v3198_v13 = vmul.f32 %v6885_v9, %v6885_v9  ;;  %v3199_v44 = vmul.f32 %v6883_v32, %v6883_v32  ;;  %v3400_v30 = vsel %vm3255_vm0, %v3399_v1, %v3395_v42  ;;  %4014 = vset.pattern.permute.xlu1 %v4395_v0 }
 0x55f   :  { %v3404_v47 = vrot.slane %v3198_v13, %v7446_v61  ;;  %v3408_v31 = vrot.slane %v3199_v44, %v7445_v34 }
 0x560   :  { %v6893_v43 = vpop.xlane.xlu1 %3158  ;;  %v6895_v16 = vpop.xlane.xlu0 %3156 }
 0x561   :  { %v3201_v35 = vmul.f32 %v6893_v43, %v6893_v43  ;;  %v3200_v18 = vmul.f32 %v6895_v16, %v6895_v16  ;;  %v3409_v10 = vsel %vm3255_vm0, %v3408_v31, %v3404_v47 }
 0x562   :  { %v3449_v12 = vsel %vm3428_vm1, %v3409_v10, %v3400_v30 }
 0x563   :  { %v3413_v59 = vrot.slane %v3200_v18, %v7446_v61  ;;  %v3417_v40 = vrot.slane %v3201_v35, %v7445_v34 }
 0x564   :  { %v6908_v27 = vpop.xlane.xlu1 %3162  ;;  %v6910_v24 = vpop.xlane.xlu0 %3160 }
 0x565   :  { %v3203_v2 = vmul.f32 %v6908_v27, %v6908_v27  ;;  %v3202_v15 = vmul.f32 %v6910_v24, %v6910_v24  ;;  %v3418_v21 = vsel %vm3255_vm0, %v3417_v40, %v3413_v59 }
 0x566   :  { %v3450_v38 = vsel %vm3430_vm2, %v3418_v21, %v3449_v12 }
 0x567   :  { %v3426_v4 = vrot.slane %v3203_v2, %v7445_v34  ;;  %v3422_v22 = vrot.slane %v3202_v15, %v7446_v61 }
 0x569   :  { %v3427_v50 = vsel %vm3255_vm0, %v3426_v4, %v3422_v22  ;;  %v7447_v22 = vld [vmem:[#allocation9_spill] sm:$0xff] }
 0x56a   :  { %v3451_v13 = vsel %vm3432_vm3, %v3427_v50, %v3450_v38 }
 0x56b   :  { %v3463_v44 = vsel %vm3462_vm9, %v3451_v13, 0.0 }
 0x56c   :  { %3464 = vadd.xlane.f32.xlu0 %v3463_v44  ;;  %v7448_v44 = vld [vmem:[#allocation10_spill] sm:$0xff] }
 0x5e1   :  { %v3458_v17 = vpop.xlane.xlu0 %3457 }
 0x5e2   :  { %4335 = vrsqrt.f32 %v3458_v17  ;;  %v3487_v18 = vadd.f32 1.0, %v3458_v17  ;;  %vm3468_vm12 = vcmp.eq.f32.partialorder %v3458_v17, inf  ;;  %v3471_v50 = vand.u32 2147483648, %v3458_v17 }
 0x5e3   :  { %vm3470_vm13 = vcmp.eq.f32.partialorder %v3458_v17, 0.0 }
 0x5e5   :  { %v3461_v42 = vpop.xlane.xlu1 %3460 }
 0x5e6   :  { %vm3475_vm14 = vcmp.eq.f32.partialorder %v3461_v42, inf  ;;  %vm3477_vm15 = vcmp.eq.f32.partialorder %v3461_v42, 0.0 }
 0x5ef   :  { %v4336_v31 = vpop.eup %4335 }
 0x5f0   :  { %v3467_v10 = vmul.f32 %v4336_v31, %v3458_v17 }
 0x5f2   :  { %v3469_v4 = vsel %vm3468_vm12, %v3458_v17, %v3467_v10 }
 0x5f5   :  { %v3465_v35 = vpop.xlane.xlu0 %3464 }
 0x5f6   :  { %4337 = vrsqrt.f32 %v3465_v35  ;;  %v3489_v47 = vadd.f32 1.0, %v3465_v35  ;;  %vm3482_vm10 = vcmp.eq.f32.partialorder %v3465_v35, inf  ;;  %v3485_v1 = vand.u32 2147483648, %v3465_v35 }
 0x5f7   :  { %vm3484_vm11 = vcmp.eq.f32.partialorder %v3465_v35, 0.0 }
 0x5f8   :  { %4339 = vrcp.f32 %v3489_v47  ;;  %v3472_v47 = vsel %vm3470_vm13, %v3471_v50, %v3469_v4  ;;  %v7450_v4 = vld [vmem:[#allocation14_spill] sm:$0xff] }
 0x5f9   :  { %4341 = vrcp.f32 %v3487_v18 }
 0x5fa   :  { %4343 = vrsqrt.f32 %v3461_v42 }
 0x603   :  { %v4338_v59 = vpop.eup %4337 }
 0x604   :  { %v3481_v40 = vmul.f32 %v4338_v59, %v3465_v35 }
 0x605   :  { %v4340_v15 = vpop.eup %4339 }
 0x606   :  { %v3483_v2 = vsel %vm3482_vm10, %v3465_v35, %v3481_v40  ;;  %v3488_v35 = vadd.f32 1.0, %v3461_v42  ;;  %v4342_v18 = vpop.eup %4341 }
 0x607   :  { %v3486_v21 = vsel %vm3484_vm11, %v3485_v1, %v3483_v2  ;;  %v3491_v31 = vmul.f32 %v4342_v18, %v3472_v47  ;;  %v7449_v1 = vld [vmem:[#allocation11_spill] sm:$0xff] }
 0x608   :  { %v6927_v30 = vmul.f32 %v4340_v15, %v3486_v21  ;;  %4345 = vrcp.f32 %v3488_v35 }
 0x609   :  { %v3502_v2 = vrot.slane %v3491_v31, %v7447_v22  ;;  %v3506_v21 = vrot.slane %v3491_v31, %v7448_v44 }
 0x60a   :  { %v3566_v12 = vrot.slane %v6927_v30, %v7447_v22  ;;  %v3570_v0 = vrot.slane %v6927_v30, %v7448_v44  ;;  %v3574_v17 = vrot.slane %v6927_v30, %v7449_v1 }
 0x60c   :  { %v3632_v38 = vmul.f32 %v3566_v12, %v6874_v5  ;;  %v3631_v13 = vmul.f32 %v3566_v12, %v6876_v60  ;;  %v3634_v59 = vmul.f32 %v3570_v0, %v6883_v32  ;;  %v3633_v40 = vmul.f32 %v3570_v0, %v6885_v9  ;;  %v4344_v5 = vpop.eup %4343  ;;  %v7451_v0 = vld [vmem:[#allocation15_spill] sm:$0xff] }
 0x60d   :  { %v3636_v60 = vmul.f32 %v3574_v17, %v6893_v43  ;;  %v3635_v10 = vmul.f32 %v3574_v17, %v6895_v16  ;;  %v3474_v15 = vmul.f32 %v4344_v5, %v3461_v42  ;;  %v3599_v32 = vmul.f32 %v3502_v2, %v6691_v25 }
 0x60e   :  { %3779 = vperm.xlu1 %4014, %v3632_v38   ;;  %3776 = vperm.xlu0 %4013, %v3631_v13   ;;  %v3600_v9 = vmul.f32 %v3502_v2, %v6687_v36  ;;  %v3522_v12 = vrot.slane %v3491_v31, %v7450_v4  ;;  %v3478_v38 = vand.u32 2147483648, %v3461_v42  ;;  %v3601_v16 = vmul.f32 %v3506_v21, %v6695_v46 }
 0x60f   :  { %v3476_v50 = vsel %vm3475_vm14, %v3461_v42, %v3474_v15  ;;  %v3526_v47 = vrot.slane %v3491_v31, %v7451_v0  ;;  %v3602_v25 = vmul.f32 %v3506_v21, %v6689_v54  ;;  %v7454_v15 = vld [vmem:[#allocation13_spill] sm:$0xff] }
 0x610   :  { %v3479_v43 = vsel %vm3477_vm15, %v3478_v38, %v3476_v50  ;;  %v3609_v13 = vmul.f32 %v3522_v12, %v6743_v51 }
 0x611   :  { %v3611_v18 = vmul.f32 %v3526_v47, %v6784_v26 }
 0x612   :  { %3785 = vperm.xlu1 %4014, %v3634_v59   ;;  %3782 = vperm.xlu0 %4013, %v3633_v40   ;;  %v3510_v59 = vrot.slane %v3491_v31, %v7449_v1  ;;  %v7452_v40 = vld [vmem:[#allocation16_spill] sm:$0xff] }
 0x613   :  { %v3530_v17 = vrot.slane %v3491_v31, %v7452_v40 }
 0x614   :  { %v3603_v46 = vmul.f32 %v3510_v59, %v6699_v39  ;;  %v3604_v5 = vmul.f32 %v3510_v59, %v6693_v53 }
 0x615   :  { %v4346_v35 = vpop.eup %4345  ;;  %v3613_v51 = vmul.f32 %v3530_v17, %v6837_v23 }
 0x616   :  { %3791 = vperm.xlu1 %4014, %v3636_v60   ;;  %3788 = vperm.xlu0 %4013, %v3635_v10   ;;  %v3493_v36 = vmul.f32 %v4346_v35, %v3479_v43  ;;  %v7453_v60 = vld [vmem:[#allocation12_spill] sm:$0xff] }
 0x617   :  { %v3514_v26 = vrot.slane %v3491_v31, %v7453_v60 }
 0x618   :  { %v3534_v42 = vrot.slane %v3493_v36, %v7447_v22  ;;  %v3538_v10 = vrot.slane %v3493_v36, %v7448_v44  ;;  %v3542_v23 = vrot.slane %v3493_v36, %v7449_v1 }
 0x619   :  { %v3605_v2 = vmul.f32 %v3514_v26, %v6703_v6  ;;  %v3606_v22 = vmul.f32 %v3514_v26, %v6711_v20 }
 0x61a   :  { %3680 = vperm.xlu1 %4014, %v3599_v32   ;;  %3683 = vperm.xlu0 %4013, %v3600_v9   ;;  %v3615_v54 = vmul.f32 %v3534_v42, %v6697_v52  ;;  %v3617_v39 = vmul.f32 %v3538_v10, %v6701_v14  ;;  %v3619_v53 = vmul.f32 %v3542_v23, %v6707_v62 }
 0x61b   :  { %v3518_v52 = vrot.slane %v3491_v31, %v7454_v15  ;;  %v3546_v32 = vrot.slane %v3493_v36, %v7453_v60  ;;  %v3550_v14 = vrot.slane %v3493_v36, %v7454_v15  ;;  %v3554_v62 = vrot.slane %v3493_v36, %v7450_v4 }
 0x61c   :  { %v3610_v31 = vmul.f32 %v3522_v12, %v6741_v45  ;;  %v3578_v45 = vrot.slane %v6927_v30, %v7453_v60 }
 0x61d   :  { %v3607_v44 = vmul.f32 %v3518_v52, %v6721_v19  ;;  %v3621_v6 = vmul.f32 %v3546_v32, %v6717_v8  ;;  %v3608_v1 = vmul.f32 %v3518_v52, %v6719_v37  ;;  %v3623_v20 = vmul.f32 %v3550_v14, %v6725_v57 }
 0x61e   :  { %3686 = vperm.xlu1 %4014, %v3601_v16   ;;  %3710 = vperm.xlu0 %4013, %v3609_v13   ;;  %v3625_v9 = vmul.f32 %v3554_v62, %v6764_v28  ;;  %v3558_v19 = vrot.slane %v3493_v36, %v7451_v0  ;;  %v3612_v8 = vmul.f32 %v3526_v47, %v6782_v55 }
 0x61f   :  { %v3562_v37 = vrot.slane %v3493_v36, %v7452_v40  ;;  %v3614_v57 = vmul.f32 %v3530_v17, %v6835_v11  ;;  %v3616_v28 = vmul.f32 %v3534_v42, %v6705_v33  ;;  %v3637_v12 = vmul.f32 %v3578_v45, %v6910_v24 }
 0x620   :  { %v3627_v21 = vmul.f32 %v3558_v19, %v6812_v63  ;;  %v3618_v55 = vmul.f32 %v3538_v10, %v6709_v3  ;;  %v3620_v63 = vmul.f32 %v3542_v23, %v6713_v7  ;;  %v3622_v11 = vmul.f32 %v3546_v32, %v6715_v29 }
 0x621   :  { %v3629_v4 = vmul.f32 %v3562_v37, %v6858_v41  ;;  %v3624_v41 = vmul.f32 %v3550_v14, %v6723_v48  ;;  %v3626_v30 = vmul.f32 %v3554_v62, %v6762_v58  ;;  %v3628_v33 = vmul.f32 %v3558_v19, %v6810_v49 }
 0x622   :  { %3689 = vperm.xlu1 %4014, %v3602_v25   ;;  %3716 = vperm.xlu0 %4013, %v3611_v18   ;;  %v3630_v24 = vmul.f32 %v3562_v37, %v6856_v56  ;;  %v3638_v3 = vmul.f32 %v3578_v45, %v6908_v27 }
 0x626   :  { %3692 = vperm.xlu1 %4014, %v3603_v46   ;;  %3722 = vperm.xlu0 %4013, %v3613_v51  }
 0x62a   :  { %3695 = vperm.xlu1 %4014, %v3604_v5   ;;  %3728 = vperm.xlu0 %4013, %v3615_v54  }
 0x62e   :  { %3698 = vperm.xlu1 %4014, %v3605_v2   ;;  %3734 = vperm.xlu0 %4013, %v3617_v39  }
 0x632   :  { %3701 = vperm.xlu1 %4014, %v3606_v22   ;;  %3740 = vperm.xlu0 %4013, %v3619_v53  }
 0x636   :  { %3704 = vperm.xlu1 %4014, %v3607_v44   ;;  %3746 = vperm.xlu0 %4013, %v3621_v6  }
 0x63a   :  { %3707 = vperm.xlu1 %4014, %v3608_v1   ;;  %3752 = vperm.xlu0 %4013, %v3623_v20  }
 0x63e   :  { %3713 = vperm.xlu1 %4014, %v3610_v31   ;;  %3758 = vperm.xlu0 %4013, %v3625_v9  }
 0x642   :  { %3719 = vperm.xlu1 %4014, %v3612_v8   ;;  %3764 = vperm.xlu0 %4013, %v3627_v21  }
 0x646   :  { %3725 = vperm.xlu1 %4014, %v3614_v57   ;;  %3770 = vperm.xlu0 %4013, %v3629_v4  }
 0x64a   :  { %3731 = vperm.xlu1 %4014, %v3616_v28   ;;  %3794 = vperm.xlu0 %4013, %v3637_v12  }
 0x64e   :  { %3737 = vperm.xlu1 %4014, %v3618_v55  }
 0x652   :  { %3743 = vperm.xlu1 %4014, %v3620_v63  }
 0x656   :  { %3749 = vperm.xlu1 %4014, %v3622_v11  }
 0x65a   :  { %3755 = vperm.xlu1 %4014, %v3624_v41  }
 0x65e   :  { %3761 = vperm.xlu1 %4014, %v3626_v30  }
 0x662   :  { %3767 = vperm.xlu1 %4014, %v3628_v33  }
 0x666   :  { %3773 = vperm.xlu1 %4014, %v3630_v24  }
 0x66a   :  { %3797 = vperm.xlu1 %4014, %v3638_v3  }
 0x689   :  { %v3780_v7 = vpop.permute.xlu1 %3779  ;;  %v3777_v50 = vpop.permute.xlu0 %3776 }
 0x68a   :  { %v3950_v29 = vrot.slane %v3780_v7, %v7445_v34  ;;  %v3946_v38 = vrot.slane %v3777_v50, %v7446_v61 }
 0x68c   :  { %v3951_v49 = vsel %vm3255_vm0, %v3950_v29, %v3946_v38 }
 0x68d   :  { %v3786_v48 = vpop.permute.xlu1 %3785  ;;  %v3783_v43 = vpop.permute.xlu0 %3782 }
 0x68e   :  { %v3959_v58 = vrot.slane %v3786_v48, %v7445_v34  ;;  %v3955_v16 = vrot.slane %v3783_v43, %v7446_v61 }
 0x690   :  { %v3960_v56 = vsel %vm3255_vm0, %v3959_v58, %v3955_v16 }
 0x691   :  { %v3993_v13 = vsel %vm3428_vm1, %v3960_v56, %v3951_v49  ;;  %v3792_v27 = vpop.permute.xlu1 %3791  ;;  %v3789_v0 = vpop.permute.xlu0 %3788 }
 0x692   :  { %v3968_v47 = vrot.slane %v3792_v27, %v7445_v34  ;;  %v3964_v35 = vrot.slane %v3789_v0, %v7446_v61 }
 0x694   :  { %v3969_v36 = vsel %vm3255_vm0, %v3968_v47, %v3964_v35 }
 0x695   :  { %v7004_v25 = vsel %vm3430_vm2, %v3969_v36, %v3993_v13  ;;  %v3681_v18 = vpop.permute.xlu1 %3680  ;;  %v3684_v40 = vpop.permute.xlu0 %3683 }
 0x696   :  { %v3802_v52 = vrot.slane %v3681_v18, %v7446_v61  ;;  %v3806_v32 = vrot.slane %v3684_v40, %v7445_v34 }
 0x698   :  { %v3807_v21 = vsel %vm3255_vm0, %v3806_v32, %v3802_v52 }
 0x699   :  { %v3687_v59 = vpop.permute.xlu1 %3686  ;;  %v3711_v46 = vpop.permute.xlu0 %3710 }
 0x69a   :  { %v3811_v44 = vrot.slane %v3687_v59, %v7446_v61  ;;  %v3847_v37 = vrot.slane %v3711_v46, %v7446_v61 }
 0x69d   :  { %v3690_v17 = vpop.permute.xlu1 %3689  ;;  %v3717_v5 = vpop.permute.xlu0 %3716 }
 0x69e   :  { %v3815_v23 = vrot.slane %v3690_v17, %v7445_v34  ;;  %v3856_v28 = vrot.slane %v3717_v5, %v7446_v61 }
 0x6a0   :  { %v3816_v20 = vsel %vm3255_vm0, %v3815_v23, %v3811_v44 }
 0x6a1   :  { %v3693_v51 = vpop.permute.xlu1 %3692  ;;  %v3723_v60 = vpop.permute.xlu0 %3722  ;;  %v3979_v45 = vsel %vm3428_vm1, %v3816_v20, %v3807_v21 }
 0x6a2   :  { %v3820_v14 = vrot.slane %v3693_v51, %v7446_v61  ;;  %v3865_v24 = vrot.slane %v3723_v60, %v7446_v61 }
 0x6a5   :  { %v3696_v42 = vpop.permute.xlu1 %3695  ;;  %v7006_v2 = vpop.permute.xlu0 %3728 }
 0x6a6   :  { %v3824_v22 = vrot.slane %v3696_v42, %v7445_v34  ;;  %v3874_v42 = vrot.slane %v7006_v2, %v7446_v61 }
 0x6a8   :  { %v3825_v9 = vsel %vm3255_vm0, %v3824_v22, %v3820_v14 }
 0x6a9   :  { %v3699_v54 = vpop.permute.xlu1 %3698  ;;  %v3735_v53 = vpop.permute.xlu0 %3734  ;;  %v3980_v63 = vsel %vm3430_vm2, %v3825_v9, %v3979_v45 }
 0x6aa   :  { %v3829_v62 = vrot.slane %v3699_v54, %v7446_v61  ;;  %v3883_v59 = vrot.slane %v3735_v53, %v7446_v61 }
 0x6ad   :  { %v3702_v26 = vpop.permute.xlu1 %3701  ;;  %v3741_v12 = vpop.permute.xlu0 %3740 }
 0x6ae   :  { %v3833_v6 = vrot.slane %v3702_v26, %v7445_v34  ;;  %v3892_v46 = vrot.slane %v3741_v12, %v7446_v61 }
 0x6b0   :  { %v3834_v57 = vsel %vm3255_vm0, %v3833_v6, %v3829_v62 }
 0x6b1   :  { %v3705_v10 = vpop.permute.xlu1 %3704  ;;  %v3981_v41 = vsel %vm3432_vm3, %v3834_v57, %v3980_v63  ;;  %v3747_v48 = vpop.permute.xlu0 %3746 }
 0x6b2   :  { %v3838_v19 = vrot.slane %v3705_v10, %v7446_v61  ;;  %v3901_v5 = vrot.slane %v3747_v48, %v7446_v61 }
 0x6b5   :  { %v3708_v39 = vpop.permute.xlu1 %3707  ;;  %v3753_v49 = vpop.permute.xlu0 %3752 }
 0x6b6   :  { %v3842_v1 = vrot.slane %v3708_v39, %v7445_v34  ;;  %v3910_v26 = vrot.slane %v3753_v49, %v7446_v61 }
 0x6b8   :  { %v3843_v55 = vsel %vm3255_vm0, %v3842_v1, %v3838_v19 }
 0x6b9   :  { %v3714_v15 = vpop.permute.xlu1 %3713  ;;  %v3982_v3 = vsel %vm3434_vm4, %v3843_v55, %v3981_v41  ;;  %v3759_v13 = vpop.permute.xlu0 %3758 }
 0x6ba   :  { %v3851_v31 = vrot.slane %v3714_v15, %v7445_v34  ;;  %v3919_v22 = vrot.slane %v3759_v13, %v7446_v61 }
 0x6bc   :  { %v3852_v11 = vsel %vm3255_vm0, %v3851_v31, %v3847_v37 }
 0x6bd   :  { %v3720_v8 = vpop.permute.xlu1 %3719  ;;  %v3983_v50 = vsel %vm3436_vm5, %v3852_v11, %v3982_v3  ;;  %v3765_v47 = vpop.permute.xlu0 %3764 }
 0x6be   :  { %v3860_v4 = vrot.slane %v3720_v8, %v7445_v34  ;;  %v3928_v52 = vrot.slane %v3765_v47, %v7446_v61 }
 0x6c0   :  { %v3861_v30 = vsel %vm3255_vm0, %v3860_v4, %v3856_v28 }
 0x6c1   :  { %v3726_v33 = vpop.permute.xlu1 %3725  ;;  %v3984_v29 = vsel %vm3438_vm6, %v3861_v30, %v3983_v50  ;;  %v3771_v10 = vpop.permute.xlu0 %3770 }
 0x6c2   :  { %v3869_v7 = vrot.slane %v3726_v33, %v7445_v34  ;;  %v3937_v31 = vrot.slane %v3771_v10, %v7446_v61 }
 0x6c4   :  { %v3870_v38 = vsel %vm3255_vm0, %v3869_v7, %v3865_v24 }
 0x6c5   :  { %v3985_v43 = vsel %vm3440_vm7, %v3870_v38, %v3984_v29  ;;  %v3732_v58 = vpop.permute.xlu1 %3731  ;;  %v3795_v8 = vpop.permute.xlu0 %3794 }
 0x6c6   :  { %3999 = vst.msk [vmem:[%s7090_s2] sm:$0xff] %vm3455_vm8, %v3985_v43  ;;  %v3878_v40 = vrot.slane %v3732_v58, %v7445_v34  ;;  %v3973_v28 = vrot.slane %v3795_v8, %v7446_v61 }
 0x6c8   :  { %v3879_v53 = vsel %vm3255_vm0, %v3878_v40, %v3874_v42 }
 0x6c9   :  { %v3738_v16 = vpop.permute.xlu1 %3737 }
 0x6ca   :  { %v3887_v35 = vrot.slane %v3738_v16, %v7445_v34 }
 0x6cc   :  { %v3888_v54 = vsel %vm3255_vm0, %v3887_v35, %v3883_v59 }
 0x6cd   :  { %v3744_v56 = vpop.permute.xlu1 %3743  ;;  %v3986_v32 = vsel %vm3428_vm1, %v3888_v54, %v3879_v53 }
 0x6ce   :  { %v3896_v36 = vrot.slane %v3744_v56, %v7445_v34 }
 0x6d0   :  { %v3897_v39 = vsel %vm3255_vm0, %v3896_v36, %v3892_v46 }
 0x6d1   :  { %v3750_v27 = vpop.permute.xlu1 %3749  ;;  %v3987_v6 = vsel %vm3430_vm2, %v3897_v39, %v3986_v32 }
 0x6d2   :  { %v3905_v17 = vrot.slane %v3750_v27, %v7445_v34 }
 0x6d4   :  { %v3906_v15 = vsel %vm3255_vm0, %v3905_v17, %v3901_v5 }
 0x6d5   :  { %v3756_v0 = vpop.permute.xlu1 %3755  ;;  %v3988_v1 = vsel %vm3432_vm3, %v3906_v15, %v3987_v6 }
 0x6d6   :  { %v3914_v51 = vrot.slane %v3756_v0, %v7445_v34 }
 0x6d8   :  { %v3915_v44 = vsel %vm3255_vm0, %v3914_v51, %v3910_v26 }
 0x6d9   :  { %v3762_v18 = vpop.permute.xlu1 %3761  ;;  %v3989_v9 = vsel %vm3434_vm4, %v3915_v44, %v3988_v1 }
 0x6da   :  { %v3923_v60 = vrot.slane %v3762_v18, %v7445_v34 }
 0x6dc   :  { %v3924_v14 = vsel %vm3255_vm0, %v3923_v60, %v3919_v22 }
 0x6dd   :  { %v3768_v23 = vpop.permute.xlu1 %3767  ;;  %v3990_v21 = vsel %vm3436_vm5, %v3924_v14, %v3989_v9 }
 0x6de   :  { %v3932_v2 = vrot.slane %v3768_v23, %v7445_v34 }
 0x6e0   :  { %v3933_v20 = vsel %vm3255_vm0, %v3932_v2, %v3928_v52 }
 0x6e1   :  { %v3774_v62 = vpop.permute.xlu1 %3773  ;;  %v3991_v37 = vsel %vm3438_vm6, %v3933_v20, %v3990_v21 }
 0x6e2   :  { %v3941_v19 = vrot.slane %v3774_v62, %v7445_v34 }
 0x6e4   :  { %v3942_v57 = vsel %vm3255_vm0, %v3941_v19, %v3937_v31 }
 0x6e5   :  { %v3992_v4 = vsel %vm3440_vm7, %v3942_v57, %v3991_v37  ;;  %v3798_v45 = vpop.permute.xlu1 %3797 }
 0x6e6   :  { %4000 = vst.msk [vmem:[%s7090_s2 + $0x8] sm:$0xff] %vm3455_vm8, %v3992_v4  ;;  %v3977_v12 = vrot.slane %v3798_v45, %v7445_v34 }
 0x6e8   :  { %v3978_v55 = vsel %vm3255_vm0, %v3977_v12, %v3973_v28 }
 0x6e9   :  { %v3995_v63 = vsel %vm3432_vm3, %v3978_v55, %v7004_v25 }
 0x6ea   :  { %4001 = vst.msk [vmem:[%s7090_s2 + $0x10] sm:$0xf] %vm3462_vm9, %v3995_v63 }
 0x6eb   :  { %4006 = vsyncpa [#allocation4], 1 }
 0x6ec   :  { %4007 = vsyncpa [#allocation6], 1 }

</bundles_post_ra>
